<compile_context>
chip_gen: v6e
topology: v6e:2x2x1
jax: 0.10.0
libtpu: 0.0.40
codegen_flags: <defaults>
</compile_context>

<pallas_src>
import functools

import jax
import jax.numpy as jnp
from jax.experimental import pallas as pl
from jax.experimental.pallas import tpu as pltpu

HIDDEN = 768
HEADS = 12
HEAD_DIM = HIDDEN // HEADS          # 64
INTERMEDIATE = 3072
LAYERS = 2                          # bert-base has 12; 2 kept for a small demo
WORD_VOCAB = 1000
MAX_POS = 512
VOCAB_SIZE = 512                    # tag vocabulary for the final fc
LN_EPS = 1e-12


def _pick_tile(dim, target, align=16):
    """Largest tile <= target that divides dim and is a multiple of `align`
    (or the full dim if dim is small / no divisor found)."""
    if dim <= target:
        return dim
    for t in range(target, align - 1, -align):
        if dim % t == 0:
            return t
    return dim


# ------------------------------------------------------------ tiled linear --
def _linear_kernel(x_ref, w_ref, b_ref, o_ref, *, act):
    y = jnp.dot(x_ref[...], w_ref[...], preferred_element_type=jnp.float32)
    y = y + b_ref[...]
    if act == "gelu":
        # tanh-approximate GELU done in f32 on the VPU/EUP.
        # TODO(synk): switch to erf-based GELU for exact HF-BERT parity.
        y = 0.5 * y * (1.0 + jnp.tanh(0.7978845608028654 * (y + 0.044715 * y * y * y)))
    o_ref[...] = y.astype(o_ref.dtype)


def linear(x, w, b, act="none"):
    M, K = x.shape
    N = w.shape[1]
    tm = _pick_tile(M, 256)
    tn = _pick_tile(N, 256, align=128)
    return pl.pallas_call(
        functools.partial(_linear_kernel, act=act),
        out_shape=jax.ShapeDtypeStruct((M, N), jnp.bfloat16),
        grid=(M // tm, N // tn),
        in_specs=[
            pl.BlockSpec((tm, K), lambda i, j: (i, 0)),
            pl.BlockSpec((K, tn), lambda i, j: (0, j)),
            pl.BlockSpec((1, tn), lambda i, j: (0, j)),
        ],
        out_specs=pl.BlockSpec((tm, tn), lambda i, j: (i, j)),
        compiler_params=pltpu.CompilerParams(
            dimension_semantics=("parallel", "parallel")),
    )(x, w, b.reshape(1, N))


# ------------------------------------------------ residual + layernorm fused --
def _ln_res_kernel(x_ref, d_ref, g_ref, b_ref, o_ref):
    x = x_ref[...].astype(jnp.float32) + d_ref[...].astype(jnp.float32)
    mean = jnp.mean(x, axis=-1, keepdims=True)
    xc = x - mean
    var = jnp.mean(xc * xc, axis=-1, keepdims=True)
    inv = jax.lax.rsqrt(var + LN_EPS)
    o_ref[...] = (xc * inv * g_ref[...] + b_ref[...]).astype(o_ref.dtype)


def layernorm_residual(x, delta, gamma, beta):
    M, H = x.shape
    tm = _pick_tile(M, 512)
    return pl.pallas_call(
        _ln_res_kernel,
        out_shape=jax.ShapeDtypeStruct((M, H), jnp.bfloat16),
        grid=(M // tm,),
        in_specs=[
            pl.BlockSpec((tm, H), lambda i: (i, 0)),
            pl.BlockSpec((tm, H), lambda i: (i, 0)),
            pl.BlockSpec((1, H), lambda i: (0, 0)),
            pl.BlockSpec((1, H), lambda i: (0, 0)),
        ],
        out_specs=pl.BlockSpec((tm, H), lambda i: (i, 0)),
        compiler_params=pltpu.CompilerParams(dimension_semantics=("parallel",)),
    )(x, delta, gamma.reshape(1, H), beta.reshape(1, H))


# ------------------------------------------- fused QKV projection (head-major) --
def _qkv_head_kernel(x_ref, wq_ref, wk_ref, wv_ref, bq_ref, bk_ref, bv_ref,
                     q_ref, k_ref, v_ref):
    x = x_ref[0]                                           # (T, HIDDEN) bf16
    for w_ref, b_ref, o_ref in ((wq_ref, bq_ref, q_ref),
                                (wk_ref, bk_ref, k_ref),
                                (wv_ref, bv_ref, v_ref)):
        y = jnp.dot(x, w_ref[0], preferred_element_type=jnp.float32) + b_ref[0]
        o_ref[0] = y.astype(o_ref.dtype)


def qkv_head_proj(h2d, wq, wk, wv, bq, bk, bv, n, t):
    """h (N*T, HIDDEN) -> q, k, v each (N*HEADS, T, HEAD_DIM), no transposes."""
    x3 = h2d.reshape(n, t, HIDDEN)                         # free row-major reshape
    bh = n * HEADS
    w_spec = pl.BlockSpec((1, HIDDEN, HEAD_DIM), lambda i, hh: (hh, 0, 0))
    b_spec = pl.BlockSpec((1, 1, HEAD_DIM), lambda i, hh: (hh, 0, 0))
    o_spec = pl.BlockSpec((1, t, HEAD_DIM), lambda i, hh: (i * HEADS + hh, 0, 0))
    return pl.pallas_call(
        _qkv_head_kernel,
        out_shape=tuple(jax.ShapeDtypeStruct((bh, t, HEAD_DIM), jnp.bfloat16)
                        for _ in range(3)),
        grid=(n, HEADS),
        in_specs=[
            pl.BlockSpec((1, t, HIDDEN), lambda i, hh: (i, 0, 0)),
            w_spec, w_spec, w_spec, b_spec, b_spec, b_spec,
        ],
        out_specs=(o_spec, o_spec, o_spec),
        compiler_params=pltpu.CompilerParams(
            dimension_semantics=("parallel", "parallel")),
    )(x3, wq, wk, wv, bq, bk, bv)


# -------------------------------------------- attention (all heads per step) --
def _attn_kernel(q_ref, k_ref, v_ref, o_ref, *, scale):
    # TODO(synk): no attention_mask (matches the reference call self.bert(x)).
    q = q_ref[...]                                         # (HEADS, T, D) bf16
    k = k_ref[...]
    v = v_ref[...]
    s = jnp.einsum("htd,hsd->hts", q, k,
                   preferred_element_type=jnp.float32) * scale
    s = s - jnp.max(s, axis=-1, keepdims=True)
    p = jnp.exp(s)
    denom = jnp.sum(p, axis=-1, keepdims=True)
    p = p * pl.reciprocal(denom, approx=True)
    ctx = jnp.einsum("hts,hsd->htd", p.astype(v.dtype), v,
                     preferred_element_type=jnp.float32)
    o_ref[...] = ctx.astype(o_ref.dtype)


def attention(q, k, v, n):
    bh, t, d = q.shape
    scale = 1.0 / (d ** 0.5)
    spec = pl.BlockSpec((HEADS, t, d), lambda i: (i, 0, 0))
    return pl.pallas_call(
        functools.partial(_attn_kernel, scale=scale),
        out_shape=jax.ShapeDtypeStruct((bh, t, d), jnp.bfloat16),
        grid=(n,),
        in_specs=[spec, spec, spec],
        out_specs=spec,
        compiler_params=pltpu.CompilerParams(dimension_semantics=("parallel",)),
    )(q, k, v)


# --------------------------- attention output projection (reduce over heads) --
def _attn_out_kernel(ctx_ref, wo_ref, bo_ref, o_ref, acc_ref):
    @pl.when(pl.program_id(1) == 0)
    def _():
        acc_ref[...] = jnp.zeros_like(acc_ref)

    acc_ref[...] += jnp.dot(ctx_ref[0], wo_ref[0],
                            preferred_element_type=jnp.float32)

    @pl.when(pl.program_id(1) == pl.num_programs(1) - 1)
    def _():
        o_ref[0] = (acc_ref[...] + bo_ref[...]).astype(o_ref.dtype)


def attn_out_proj(ctx, wo_h, bo, n, t):
    """ctx (N*HEADS, T, D) x wo (HEADS, D, HIDDEN) -> (N*T, HIDDEN)."""
    out = pl.pallas_call(
        _attn_out_kernel,
        out_shape=jax.ShapeDtypeStruct((n, t, HIDDEN), jnp.bfloat16),
        grid=(n, HEADS),
        in_specs=[
            pl.BlockSpec((1, t, HEAD_DIM), lambda i, hh: (i * HEADS + hh, 0, 0)),
            pl.BlockSpec((1, HEAD_DIM, HIDDEN), lambda i, hh: (hh, 0, 0)),
            pl.BlockSpec((1, HIDDEN), lambda i, hh: (0, 0)),
        ],
        out_specs=pl.BlockSpec((1, t, HIDDEN), lambda i, hh: (i, 0, 0)),
        scratch_shapes=[pltpu.VMEM((t, HIDDEN), jnp.float32)],
        compiler_params=pltpu.CompilerParams(
            dimension_semantics=("parallel", "arbitrary")),
    )(ctx, wo_h, bo.reshape(1, HIDDEN))
    return out.reshape(n * t, HIDDEN)


# ------------------------------------------------------ final fc + argmax ----
def _fc_argmax_kernel(x_ref, w_ref, b_ref, logits_ref, yhat_ref):
    logits = jnp.dot(x_ref[...], w_ref[...],
                     preferred_element_type=jnp.float32) + b_ref[...]
    logits_ref[...] = logits
    V = logits.shape[-1]
    col = jax.lax.broadcasted_iota(jnp.int32, logits.shape, 1)
    maxval = jnp.max(logits, axis=-1, keepdims=True)
    cand = jnp.where(logits == maxval, col, V)              # first-max tie-break
    idx = jnp.min(cand, axis=-1, keepdims=True)
    # lane-dense store: broadcast argmax across 128 lanes (sliced outside)
    yhat_ref[...] = jnp.broadcast_to(idx, yhat_ref.shape)


def fc_argmax(x, w, b):
    M, H = x.shape
    V = w.shape[1]
    tm = _pick_tile(M, 256)
    return pl.pallas_call(
        _fc_argmax_kernel,
        out_shape=(jax.ShapeDtypeStruct((M, V), jnp.float32),
                   jax.ShapeDtypeStruct((M, 128), jnp.int32)),
        grid=(M // tm,),
        in_specs=[
            pl.BlockSpec((tm, H), lambda i: (i, 0)),
            pl.BlockSpec((H, V), lambda i: (0, 0)),
            pl.BlockSpec((1, V), lambda i: (0, 0)),
        ],
        out_specs=(pl.BlockSpec((tm, V), lambda i: (i, 0)),
                   pl.BlockSpec((tm, 128), lambda i: (i, 0))),
        compiler_params=pltpu.CompilerParams(dimension_semantics=("parallel",)),
    )(x, w, b.reshape(1, V))


# ----------------------------------------------------------------- model ----
def init_params(key):
    std = 0.02

    def nrm(k, shape, dtype=jnp.bfloat16):
        return (std * jax.random.normal(k, shape, jnp.float32)).astype(dtype)

    keys = iter(jax.random.split(key, 8 + LAYERS * 8))
    p = {
        "word_emb": nrm(next(keys), (WORD_VOCAB, HIDDEN), jnp.float32),
        "pos_emb": nrm(next(keys), (MAX_POS, HIDDEN), jnp.float32),
        "type_emb": nrm(next(keys), (2, HIDDEN), jnp.float32),
        "emb_ln_g": jnp.ones((HIDDEN,), jnp.float32),
        "emb_ln_b": jnp.zeros((HIDDEN,), jnp.float32),
        "fc_w": nrm(next(keys), (HIDDEN, VOCAB_SIZE)),
        "fc_b": jnp.zeros((VOCAB_SIZE,), jnp.float32),
        "layers": [],
    }
    for _ in range(LAYERS):
        lp = {
            # QKV / output weights stored head-major so kernels never transpose.
            "wq": nrm(next(keys), (HEADS, HIDDEN, HEAD_DIM)),
            "wk": nrm(next(keys), (HEADS, HIDDEN, HEAD_DIM)),
            "wv": nrm(next(keys), (HEADS, HIDDEN, HEAD_DIM)),
            "wo": nrm(next(keys), (HEADS, HEAD_DIM, HIDDEN)),
            "bq": jnp.zeros((HEADS, 1, HEAD_DIM), jnp.float32),
            "bk": jnp.zeros((HEADS, 1, HEAD_DIM), jnp.float32),
            "bv": jnp.zeros((HEADS, 1, HEAD_DIM), jnp.float32),
            "bo": jnp.zeros((HIDDEN,), jnp.float32),
            "w1": nrm(next(keys), (HIDDEN, INTERMEDIATE)),
            "b1": jnp.zeros((INTERMEDIATE,), jnp.float32),
            "w2": nrm(next(keys), (INTERMEDIATE, HIDDEN)),
            "b2": jnp.zeros((HIDDEN,), jnp.float32),
            "ln1_g": jnp.ones((HIDDEN,), jnp.float32),
            "ln1_b": jnp.zeros((HIDDEN,), jnp.float32),
            "ln2_g": jnp.ones((HIDDEN,), jnp.float32),
            "ln2_b": jnp.zeros((HIDDEN,), jnp.float32),
        }
        p["layers"].append(lp)
    return p


def encoder_layer(h, lp, n, t):
    q, k, v = qkv_head_proj(h, lp["wq"], lp["wk"], lp["wv"],
                            lp["bq"], lp["bk"], lp["bv"], n, t)
    ctx = attention(q, k, v, n)
    attn_out = attn_out_proj(ctx, lp["wo"], lp["bo"], n, t)
    h = layernorm_residual(h, attn_out, lp["ln1_g"], lp["ln1_b"])
    ff = linear(h, lp["w1"], lp["b1"], act="gelu")
    ff = linear(ff, lp["w2"], lp["b2"])
    h = layernorm_residual(h, ff, lp["ln2_g"], lp["ln2_b"])
    return h


def net_forward(params, x, y):
    """x, y: (N, T) int32 -> (logits (N,T,V) f32, y (N,T) i32, y_hat (N,T) i32)."""
    n, t = x.shape
    m = n * t
    # embedding lookup is glue; the add + layernorm run in the fused LN kernel
    word = jnp.take(params["word_emb"], x, axis=0).reshape(m, HIDDEN)
    posty = jnp.tile(params["pos_emb"][:t] + params["type_emb"][0], (n, 1))
    h = layernorm_residual(word, posty, params["emb_ln_g"], params["emb_ln_b"])
    for lp in params["layers"]:
        h = encoder_layer(h, lp, n, t)
    logits_flat, yhat_pad = fc_argmax(h, params["fc_w"], params["fc_b"])
    logits = logits_flat.reshape(n, t, VOCAB_SIZE)
    # TODO(synk): torch argmax returns int64; int32 here (x64 disabled in JAX).
    y_hat = yhat_pad[:, 0].reshape(n, t)
    return logits, y, y_hat


if __name__ == "__main__":
    N, T = 2, 8
    key = jax.random.PRNGKey(0)
    kx, ky, kp = jax.random.split(key, 3)
    x = jax.random.randint(kx, (N, T), 0, WORD_VOCAB, dtype=jnp.int32)
    y = jax.random.randint(ky, (N, T), 0, VOCAB_SIZE, dtype=jnp.int32)
    params = init_params(kp)

    fwd = jax.jit(net_forward)
    logits, y_out, y_hat = fwd(params, x, y)
    jax.block_until_ready((logits, y_out, y_hat))

    assert logits.shape == (N, T, VOCAB_SIZE) and logits.dtype == jnp.float32
    assert y_out.shape == (N, T)
    assert y_hat.shape == (N, T) and y_hat.dtype == jnp.int32
    print("KERNEL_OK")
</pallas_src>

<mosaic_0001>
module attributes {stable_mosaic.version = 11 : i64} {
  func.func @_ln_res_kernel(%arg0: i32, %arg1: memref<16x768xf32, #tpu.memory_space<vmem>>, %arg2: memref<16x768xf32, #tpu.memory_space<vmem>>, %arg3: memref<1x768xf32, #tpu.memory_space<vmem>>, %arg4: memref<1x768xf32, #tpu.memory_space<vmem>>, %arg5: memref<16x768xbf16, #tpu.memory_space<vmem>>) attributes {dimension_semantics = [#tpu.dimension_semantics<parallel>], iteration_bounds = array<i64: 1>, scalar_prefetch = 0 : i64, scratch_operands = 0 : i64, tpu.core_type = #tpu.core_type<tc>, window_params = [{transform_indices = @transform_0, window_bounds = array<i64: 16, 768>}, {transform_indices = @transform_1, window_bounds = array<i64: 16, 768>}, {pipeline_mode = #tpu.pipeline_mode<synchronous>, transform_indices = @transform_2, window_bounds = array<i64: 1, 768>}, {pipeline_mode = #tpu.pipeline_mode<synchronous>, transform_indices = @transform_3, window_bounds = array<i64: 1, 768>}, {transform_indices = @transform_4, window_bounds = array<i64: 16, 768>}]} {
    %c0 = arith.constant 0 : index
    %c0_0 = arith.constant 0 : index
    %0 = vector.load %arg1[%c0, %c0_0] : memref<16x768xf32, #tpu.memory_space<vmem>>, vector<16x768xf32>
    %c0_1 = arith.constant 0 : index
    %c0_2 = arith.constant 0 : index
    %1 = vector.load %arg2[%c0_1, %c0_2] : memref<16x768xf32, #tpu.memory_space<vmem>>, vector<16x768xf32>
    %2 = arith.addf %0, %1 : vector<16x768xf32>
    %cst = arith.constant dense<0.000000e+00> : vector<16xf32>
    %3 = vector.multi_reduction <add>, %2, %cst [1] : vector<16x768xf32> to vector<16xf32>
    %4 = vector.shape_cast %3 : vector<16xf32> to vector<16x1xf32>
    %cst_3 = arith.constant 7.680000e+02 : f32
    %5 = vector.broadcast %cst_3 : f32 to vector<16x1xf32>
    %6 = arith.divf %4, %5 : vector<16x1xf32>
    %7 = vector.broadcast %6 : vector<16x1xf32> to vector<16x768xf32>
    %8 = arith.subf %2, %7 : vector<16x768xf32>
    %9 = arith.mulf %8, %8 : vector<16x768xf32>
    %cst_4 = arith.constant dense<0.000000e+00> : vector<16xf32>
    %10 = vector.multi_reduction <add>, %9, %cst_4 [1] : vector<16x768xf32> to vector<16xf32>
    %11 = vector.shape_cast %10 : vector<16xf32> to vector<16x1xf32>
    %cst_5 = arith.constant 7.680000e+02 : f32
    %12 = vector.broadcast %cst_5 : f32 to vector<16x1xf32>
    %13 = arith.divf %11, %12 : vector<16x1xf32>
    %cst_6 = arith.constant 9.99999996E-13 : f32
    %14 = vector.broadcast %cst_6 : f32 to vector<16x1xf32>
    %15 = arith.addf %13, %14 : vector<16x1xf32>
    %16 = math.rsqrt %15 : vector<16x1xf32>
    %17 = vector.broadcast %16 : vector<16x1xf32> to vector<16x768xf32>
    %18 = arith.mulf %8, %17 : vector<16x768xf32>
    %c0_7 = arith.constant 0 : index
    %c0_8 = arith.constant 0 : index
    %19 = vector.load %arg3[%c0_7, %c0_8] : memref<1x768xf32, #tpu.memory_space<vmem>>, vector<1x768xf32>
    %20 = vector.broadcast %19 : vector<1x768xf32> to vector<16x768xf32>
    %21 = arith.mulf %18, %20 : vector<16x768xf32>
    %c0_9 = arith.constant 0 : index
    %c0_10 = arith.constant 0 : index
    %22 = vector.load %arg4[%c0_9, %c0_10] : memref<1x768xf32, #tpu.memory_space<vmem>>, vector<1x768xf32>
    %23 = vector.broadcast %22 : vector<1x768xf32> to vector<16x768xf32>
    %24 = arith.addf %21, %23 : vector<16x768xf32>
    %25 = arith.truncf %24 : vector<16x768xf32> to vector<16x768xbf16>
    %c0_11 = arith.constant 0 : index
    %c0_12 = arith.constant 0 : index
    %26 = vector.load %arg5[%c0_11, %c0_12] : memref<16x768xbf16, #tpu.memory_space<vmem>>, vector<16x768xbf16>
    tpu.vector_store %arg5[%c0_11, %c0_12], %25 {strides = array<i32>} : memref<16x768xbf16, #tpu.memory_space<vmem>>, vector<16x768xbf16>,
    return
  }
  func.func @transform_0(%arg0: i32) -> (i32, i32) {
    %c0_i32 = arith.constant 0 : i32
    %c0_i32_0 = arith.constant 0 : i32
    return %arg0, %c0_i32 : i32, i32
  }
  func.func @transform_1(%arg0: i32) -> (i32, i32) {
    %c0_i32 = arith.constant 0 : i32
    %c0_i32_0 = arith.constant 0 : i32
    return %arg0, %c0_i32 : i32, i32
  }
  func.func @transform_2(%arg0: i32) -> (i32, i32) {
    %c0_i32 = arith.constant 0 : i32
    %c0_i32_0 = arith.constant 0 : i32
    %c0_i32_1 = arith.constant 0 : i32
    return %c0_i32, %c0_i32_0 : i32, i32
  }
  func.func @transform_3(%arg0: i32) -> (i32, i32) {
    %c0_i32 = arith.constant 0 : i32
    %c0_i32_0 = arith.constant 0 : i32
    %c0_i32_1 = arith.constant 0 : i32
    return %c0_i32, %c0_i32_0 : i32, i32
  }
  func.func @transform_4(%arg0: i32) -> (i32, i32) {
    %c0_i32 = arith.constant 0 : i32
    %c0_i32_0 = arith.constant 0 : i32
    return %arg0, %c0_i32 : i32, i32
  }
}

module attributes {stable_mosaic.version = 11 : i64} {
  func.func @_qkv_head_kernel(%arg0: i32, %arg1: i32, %arg2: memref<1x8x768xbf16, #tpu.memory_space<vmem>>, %arg3: memref<1x768x64xbf16, #tpu.memory_space<vmem>>, %arg4: memref<1x768x64xbf16, #tpu.memory_space<vmem>>, %arg5: memref<1x768x64xbf16, #tpu.memory_space<vmem>>, %arg6: memref<1x1x64xf32, #tpu.memory_space<vmem>>, %arg7: memref<1x1x64xf32, #tpu.memory_space<vmem>>, %arg8: memref<1x1x64xf32, #tpu.memory_space<vmem>>, %arg9: memref<1x8x64xbf16, #tpu.memory_space<vmem>>, %arg10: memref<1x8x64xbf16, #tpu.memory_space<vmem>>, %arg11: memref<1x8x64xbf16, #tpu.memory_space<vmem>>) attributes {dimension_semantics = [#tpu.dimension_semantics<parallel>, #tpu.dimension_semantics<parallel>], iteration_bounds = array<i64: 2, 12>, scalar_prefetch = 0 : i64, scratch_operands = 0 : i64, tpu.core_type = #tpu.core_type<tc>, window_params = [{transform_indices = @transform_0, window_bounds = array<i64: 1, 8, 768>}, {transform_indices = @transform_1, window_bounds = array<i64: 1, 768, 64>}, {transform_indices = @transform_2, window_bounds = array<i64: 1, 768, 64>}, {transform_indices = @transform_3, window_bounds = array<i64: 1, 768, 64>}, {transform_indices = @transform_4, window_bounds = array<i64: 1, 1, 64>}, {transform_indices = @transform_5, window_bounds = array<i64: 1, 1, 64>}, {transform_indices = @transform_6, window_bounds = array<i64: 1, 1, 64>}, {transform_indices = @transform_7, window_bounds = array<i64: 1, 8, 64>}, {transform_indices = @transform_8, window_bounds = array<i64: 1, 8, 64>}, {transform_indices = @transform_9, window_bounds = array<i64: 1, 8, 64>}]} {
    %c0 = arith.constant 0 : index
    %c0_0 = arith.constant 0 : index
    %c0_1 = arith.constant 0 : index
    %0 = vector.load %arg2[%c0, %c0_0, %c0_1] : memref<1x8x768xbf16, #tpu.memory_space<vmem>>, vector<1x8x768xbf16>
    %1 = vector.shape_cast %0 : vector<1x8x768xbf16> to vector<8x768xbf16>
    %c0_2 = arith.constant 0 : index
    %c0_3 = arith.constant 0 : index
    %c0_4 = arith.constant 0 : index
    %2 = vector.load %arg3[%c0_2, %c0_3, %c0_4] : memref<1x768x64xbf16, #tpu.memory_space<vmem>>, vector<1x768x64xbf16>
    %3 = vector.shape_cast %2 : vector<1x768x64xbf16> to vector<768x64xbf16>
    %cst = arith.constant dense<0.000000e+00> : vector<8x64xf32>
    %4 = tpu.matmul %1, %3, %cst {dimension_numbers = #tpu.dot_dimension_numbers<[1], [0], [0], [1], [0, 0, 1, 1], [], []>} : vector<8x768xbf16>, vector<768x64xbf16>, vector<8x64xf32> -> vector<8x64xf32>
    %c0_5 = arith.constant 0 : index
    %c0_6 = arith.constant 0 : index
    %c0_7 = arith.constant 0 : index
    %5 = vector.load %arg6[%c0_5, %c0_6, %c0_7] : memref<1x1x64xf32, #tpu.memory_space<vmem>>, vector<1x1x64xf32>
    %6 = vector.shape_cast %5 : vector<1x1x64xf32> to vector<1x64xf32>
    %7 = vector.broadcast %6 : vector<1x64xf32> to vector<8x64xf32>
    %8 = arith.addf %4, %7 : vector<8x64xf32>
    %9 = arith.truncf %8 : vector<8x64xf32> to vector<8x64xbf16>
    %c0_8 = arith.constant 0 : index
    %c0_9 = arith.constant 0 : index
    %c0_10 = arith.constant 0 : index
    %10 = vector.load %arg9[%c0_8, %c0_9, %c0_10] : memref<1x8x64xbf16, #tpu.memory_space<vmem>>, vector<1x8x64xbf16>
    %11 = vector.shape_cast %10 : vector<1x8x64xbf16> to vector<8x64xbf16>
    %12 = vector.shape_cast %9 : vector<8x64xbf16> to vector<1x8x64xbf16>
    tpu.vector_store %arg9[%c0_8, %c0_9, %c0_10], %12 {strides = array<i32>} : memref<1x8x64xbf16, #tpu.memory_space<vmem>>, vector<1x8x64xbf16>,
    %c0_11 = arith.constant 0 : index
    %c0_12 = arith.constant 0 : index
    %c0_13 = arith.constant 0 : index
    %13 = vector.load %arg4[%c0_11, %c0_12, %c0_13] : memref<1x768x64xbf16, #tpu.memory_space<vmem>>, vector<1x768x64xbf16>
    %14 = vector.shape_cast %13 : vector<1x768x64xbf16> to vector<768x64xbf16>
    %cst_14 = arith.constant dense<0.000000e+00> : vector<8x64xf32>
    %15 = tpu.matmul %1, %14, %cst_14 {dimension_numbers = #tpu.dot_dimension_numbers<[1], [0], [0], [1], [0, 0, 1, 1], [], []>} : vector<8x768xbf16>, vector<768x64xbf16>, vector<8x64xf32> -> vector<8x64xf32>
    %c0_15 = arith.constant 0 : index
    %c0_16 = arith.constant 0 : index
    %c0_17 = arith.constant 0 : index
    %16 = vector.load %arg7[%c0_15, %c0_16, %c0_17] : memref<1x1x64xf32, #tpu.memory_space<vmem>>, vector<1x1x64xf32>
    %17 = vector.shape_cast %16 : vector<1x1x64xf32> to vector<1x64xf32>
    %18 = vector.broadcast %17 : vector<1x64xf32> to vector<8x64xf32>
    %19 = arith.addf %15, %18 : vector<8x64xf32>
    %20 = arith.truncf %19 : vector<8x64xf32> to vector<8x64xbf16>
    %c0_18 = arith.constant 0 : index
    %c0_19 = arith.constant 0 : index
    %c0_20 = arith.constant 0 : index
    %21 = vector.load %arg10[%c0_18, %c0_19, %c0_20] : memref<1x8x64xbf16, #tpu.memory_space<vmem>>, vector<1x8x64xbf16>
    %22 = vector.shape_cast %21 : vector<1x8x64xbf16> to vector<8x64xbf16>
    %23 = vector.shape_cast %20 : vector<8x64xbf16> to vector<1x8x64xbf16>
    tpu.vector_store %arg10[%c0_18, %c0_19, %c0_20], %23 {strides = array<i32>} : memref<1x8x64xbf16, #tpu.memory_space<vmem>>, vector<1x8x64xbf16>,
    %c0_21 = arith.constant 0 : index
    %c0_22 = arith.constant 0 : index
    %c0_23 = arith.constant 0 : index
    %24 = vector.load %arg5[%c0_21, %c0_22, %c0_23] : memref<1x768x64xbf16, #tpu.memory_space<vmem>>, vector<1x768x64xbf16>
    %25 = vector.shape_cast %24 : vector<1x768x64xbf16> to vector<768x64xbf16>
    %cst_24 = arith.constant dense<0.000000e+00> : vector<8x64xf32>
    %26 = tpu.matmul %1, %25, %cst_24 {dimension_numbers = #tpu.dot_dimension_numbers<[1], [0], [0], [1], [0, 0, 1, 1], [], []>} : vector<8x768xbf16>, vector<768x64xbf16>, vector<8x64xf32> -> vector<8x64xf32>
    %c0_25 = arith.constant 0 : index
    %c0_26 = arith.constant 0 : index
    %c0_27 = arith.constant 0 : index
    %27 = vector.load %arg8[%c0_25, %c0_26, %c0_27] : memref<1x1x64xf32, #tpu.memory_space<vmem>>, vector<1x1x64xf32>
    %28 = vector.shape_cast %27 : vector<1x1x64xf32> to vector<1x64xf32>
    %29 = vector.broadcast %28 : vector<1x64xf32> to vector<8x64xf32>
    %30 = arith.addf %26, %29 : vector<8x64xf32>
    %31 = arith.truncf %30 : vector<8x64xf32> to vector<8x64xbf16>
    %c0_28 = arith.constant 0 : index
    %c0_29 = arith.constant 0 : index
    %c0_30 = arith.constant 0 : index
    %32 = vector.load %arg11[%c0_28, %c0_29, %c0_30] : memref<1x8x64xbf16, #tpu.memory_space<vmem>>, vector<1x8x64xbf16>
    %33 = vector.shape_cast %32 : vector<1x8x64xbf16> to vector<8x64xbf16>
    %34 = vector.shape_cast %31 : vector<8x64xbf16> to vector<1x8x64xbf16>
    tpu.vector_store %arg11[%c0_28, %c0_29, %c0_30], %34 {strides = array<i32>} : memref<1x8x64xbf16, #tpu.memory_space<vmem>>, vector<1x8x64xbf16>,
    return
  }
  func.func @transform_0(%arg0: i32, %arg1: i32) -> (i32, i32, i32) {
    %c0_i32 = arith.constant 0 : i32
    %c0_i32_0 = arith.constant 0 : i32
    %c0_i32_1 = arith.constant 0 : i32
    return %arg0, %c0_i32, %c0_i32_0 : i32, i32, i32
  }
  func.func @transform_1(%arg0: i32, %arg1: i32) -> (i32, i32, i32) {
    %c0_i32 = arith.constant 0 : i32
    %c0_i32_0 = arith.constant 0 : i32
    %c0_i32_1 = arith.constant 0 : i32
    return %arg1, %c0_i32, %c0_i32_0 : i32, i32, i32
  }
  func.func @transform_2(%arg0: i32, %arg1: i32) -> (i32, i32, i32) {
    %c0_i32 = arith.constant 0 : i32
    %c0_i32_0 = arith.constant 0 : i32
    %c0_i32_1 = arith.constant 0 : i32
    return %arg1, %c0_i32, %c0_i32_0 : i32, i32, i32
  }
  func.func @transform_3(%arg0: i32, %arg1: i32) -> (i32, i32, i32) {
    %c0_i32 = arith.constant 0 : i32
    %c0_i32_0 = arith.constant 0 : i32
    %c0_i32_1 = arith.constant 0 : i32
    return %arg1, %c0_i32, %c0_i32_0 : i32, i32, i32
  }
  func.func @transform_4(%arg0: i32, %arg1: i32) -> (i32, i32, i32) {
    %c0_i32 = arith.constant 0 : i32
    %c0_i32_0 = arith.constant 0 : i32
    %c0_i32_1 = arith.constant 0 : i32
    return %arg1, %c0_i32, %c0_i32_0 : i32, i32, i32
  }
  func.func @transform_5(%arg0: i32, %arg1: i32) -> (i32, i32, i32) {
    %c0_i32 = arith.constant 0 : i32
    %c0_i32_0 = arith.constant 0 : i32
    %c0_i32_1 = arith.constant 0 : i32
    return %arg1, %c0_i32, %c0_i32_0 : i32, i32, i32
  }
  func.func @transform_6(%arg0: i32, %arg1: i32) -> (i32, i32, i32) {
    %c0_i32 = arith.constant 0 : i32
    %c0_i32_0 = arith.constant 0 : i32
    %c0_i32_1 = arith.constant 0 : i32
    return %arg1, %c0_i32, %c0_i32_0 : i32, i32, i32
  }
  func.func @transform_7(%arg0: i32, %arg1: i32) -> (i32, i32, i32) {
    %c12_i32 = arith.constant 12 : i32
    %0 = arith.muli %arg0, %c12_i32 : i32
    %1 = arith.addi %0, %arg1 : i32
    %c0_i32 = arith.constant 0 : i32
    %c0_i32_0 = arith.constant 0 : i32
    %c0_i32_1 = arith.constant 0 : i32
    return %1, %c0_i32, %c0_i32_0 : i32, i32, i32
  }
  func.func @transform_8(%arg0: i32, %arg1: i32) -> (i32, i32, i32) {
    %c12_i32 = arith.constant 12 : i32
    %0 = arith.muli %arg0, %c12_i32 : i32
    %1 = arith.addi %0, %arg1 : i32
    %c0_i32 = arith.constant 0 : i32
    %c0_i32_0 = arith.constant 0 : i32
    %c0_i32_1 = arith.constant 0 : i32
    return %1, %c0_i32, %c0_i32_0 : i32, i32, i32
  }
  func.func @transform_9(%arg0: i32, %arg1: i32) -> (i32, i32, i32) {
    %c12_i32 = arith.constant 12 : i32
    %0 = arith.muli %arg0, %c12_i32 : i32
    %1 = arith.addi %0, %arg1 : i32
    %c0_i32 = arith.constant 0 : i32
    %c0_i32_0 = arith.constant 0 : i32
    %c0_i32_1 = arith.constant 0 : i32
    return %1, %c0_i32, %c0_i32_0 : i32, i32, i32
  }
}

module attributes {stable_mosaic.version = 11 : i64} {
  func.func @_attn_kernel(%arg0: i32, %arg1: memref<12x8x64xbf16, #tpu.memory_space<vmem>>, %arg2: memref<12x8x64xbf16, #tpu.memory_space<vmem>>, %arg3: memref<12x8x64xbf16, #tpu.memory_space<vmem>>, %arg4: memref<12x8x64xbf16, #tpu.memory_space<vmem>>) attributes {dimension_semantics = [#tpu.dimension_semantics<parallel>], iteration_bounds = array<i64: 2>, scalar_prefetch = 0 : i64, scratch_operands = 0 : i64, tpu.core_type = #tpu.core_type<tc>, window_params = [{transform_indices = @transform_0, window_bounds = array<i64: 12, 8, 64>}, {transform_indices = @transform_1, window_bounds = array<i64: 12, 8, 64>}, {transform_indices = @transform_2, window_bounds = array<i64: 12, 8, 64>}, {transform_indices = @transform_3, window_bounds = array<i64: 12, 8, 64>}]} {
    %c0 = arith.constant 0 : index
    %c0_0 = arith.constant 0 : index
    %c0_1 = arith.constant 0 : index
    %0 = vector.load %arg1[%c0, %c0_0, %c0_1] : memref<12x8x64xbf16, #tpu.memory_space<vmem>>, vector<12x8x64xbf16>
    %c0_2 = arith.constant 0 : index
    %c0_3 = arith.constant 0 : index
    %c0_4 = arith.constant 0 : index
    %1 = vector.load %arg2[%c0_2, %c0_3, %c0_4] : memref<12x8x64xbf16, #tpu.memory_space<vmem>>, vector<12x8x64xbf16>
    %c0_5 = arith.constant 0 : index
    %c0_6 = arith.constant 0 : index
    %c0_7 = arith.constant 0 : index
    %2 = vector.load %arg3[%c0_5, %c0_6, %c0_7] : memref<12x8x64xbf16, #tpu.memory_space<vmem>>, vector<12x8x64xbf16>
    "tpu.trace_start"() <{level = 10 : i32, message = "htd,hsd->hts"}> : () -> ()
    %cst = arith.constant dense<0.000000e+00> : vector<12x8x8xf32>
    %3 = tpu.matmul %0, %1, %cst {dimension_numbers = #tpu.dot_dimension_numbers<[2], [2], [1], [1], [0, 0, 0, 1, 1, 1], [0], [0]>} : vector<12x8x64xbf16>, vector<12x8x64xbf16>, vector<12x8x8xf32> -> vector<12x8x8xf32>
    "tpu.trace_stop"() : () -> ()
    %cst_8 = arith.constant 1.250000e-01 : f32
    %4 = vector.broadcast %cst_8 : f32 to vector<12x8x8xf32>
    %5 = arith.mulf %3, %4 : vector<12x8x8xf32>
    %cst_9 = arith.constant dense<0xFF800000> : vector<12x8xf32>
    %6 = vector.multi_reduction <maximumf>, %5, %cst_9 [2] : vector<12x8x8xf32> to vector<12x8xf32>
    %7 = vector.shape_cast %6 : vector<12x8xf32> to vector<12x8x1xf32>
    %8 = vector.broadcast %7 : vector<12x8x1xf32> to vector<12x8x8xf32>
    %9 = arith.subf %5, %8 : vector<12x8x8xf32>
    %10 = math.exp %9 : vector<12x8x8xf32>
    %cst_10 = arith.constant dense<0.000000e+00> : vector<12x8xf32>
    %11 = vector.multi_reduction <add>, %10, %cst_10 [2] : vector<12x8x8xf32> to vector<12x8xf32>
    %12 = vector.shape_cast %11 : vector<12x8xf32> to vector<12x8x1xf32>
    %13 = tpu.reciprocal %12 {approx = true} : vector<12x8x1xf32> -> vector<12x8x1xf32>
    %14 = vector.broadcast %13 : vector<12x8x1xf32> to vector<12x8x8xf32>
    %15 = arith.mulf %10, %14 : vector<12x8x8xf32>
    %16 = arith.truncf %15 : vector<12x8x8xf32> to vector<12x8x8xbf16>
    "tpu.trace_start"() <{level = 10 : i32, message = "hts,hsd->htd"}> : () -> ()
    %cst_11 = arith.constant dense<0.000000e+00> : vector<12x8x64xf32>
    %17 = tpu.matmul %16, %2, %cst_11 {dimension_numbers = #tpu.dot_dimension_numbers<[2], [1], [1], [2], [0, 0, 0, 1, 1, 2], [0], [0]>} : vector<12x8x8xbf16>, vector<12x8x64xbf16>, vector<12x8x64xf32> -> vector<12x8x64xf32>
    "tpu.trace_stop"() : () -> ()
    %18 = arith.truncf %17 : vector<12x8x64xf32> to vector<12x8x64xbf16>
    %c0_12 = arith.constant 0 : index
    %c0_13 = arith.constant 0 : index
    %c0_14 = arith.constant 0 : index
    %19 = vector.load %arg4[%c0_12, %c0_13, %c0_14] : memref<12x8x64xbf16, #tpu.memory_space<vmem>>, vector<12x8x64xbf16>
    tpu.vector_store %arg4[%c0_12, %c0_13, %c0_14], %18 {strides = array<i32>} : memref<12x8x64xbf16, #tpu.memory_space<vmem>>, vector<12x8x64xbf16>,
    return
  }
  func.func @transform_0(%arg0: i32) -> (i32, i32, i32) {
    %c0_i32 = arith.constant 0 : i32
    %c0_i32_0 = arith.constant 0 : i32
    %c0_i32_1 = arith.constant 0 : i32
    return %arg0, %c0_i32, %c0_i32_0 : i32, i32, i32
  }
  func.func @transform_1(%arg0: i32) -> (i32, i32, i32) {
    %c0_i32 = arith.constant 0 : i32
    %c0_i32_0 = arith.constant 0 : i32
    %c0_i32_1 = arith.constant 0 : i32
    return %arg0, %c0_i32, %c0_i32_0 : i32, i32, i32
  }
  func.func @transform_2(%arg0: i32) -> (i32, i32, i32) {
    %c0_i32 = arith.constant 0 : i32
    %c0_i32_0 = arith.constant 0 : i32
    %c0_i32_1 = arith.constant 0 : i32
    return %arg0, %c0_i32, %c0_i32_0 : i32, i32, i32
  }
  func.func @transform_3(%arg0: i32) -> (i32, i32, i32) {
    %c0_i32 = arith.constant 0 : i32
    %c0_i32_0 = arith.constant 0 : i32
    %c0_i32_1 = arith.constant 0 : i32
    return %arg0, %c0_i32, %c0_i32_0 : i32, i32, i32
  }
}

module attributes {stable_mosaic.version = 11 : i64} {
  func.func @_attn_out_kernel(%arg0: i32, %arg1: i32, %arg2: memref<1x8x64xbf16, #tpu.memory_space<vmem>>, %arg3: memref<1x64x768xbf16, #tpu.memory_space<vmem>>, %arg4: memref<1x768xf32, #tpu.memory_space<vmem>>, %arg5: memref<1x8x768xbf16, #tpu.memory_space<vmem>>, %arg6: memref<8x768xf32, #tpu.memory_space<vmem>>) attributes {dimension_semantics = [#tpu.dimension_semantics<parallel>, #tpu.dimension_semantics<arbitrary>], iteration_bounds = array<i64: 2, 12>, scalar_prefetch = 0 : i64, scratch_operands = 1 : i64, tpu.core_type = #tpu.core_type<tc>, window_params = [{transform_indices = @transform_0, window_bounds = array<i64: 1, 8, 64>}, {transform_indices = @transform_1, window_bounds = array<i64: 1, 64, 768>}, {pipeline_mode = #tpu.pipeline_mode<synchronous>, transform_indices = @transform_2, window_bounds = array<i64: 1, 768>}, {transform_indices = @transform_3, window_bounds = array<i64: 1, 8, 768>}]} {
    %c0_i32 = arith.constant 0 : i32
    %0 = arith.cmpi eq, %arg1, %c0_i32 : i32
    %1 = arith.extui %0 : i1 to i32
    %c0_i32_0 = arith.constant 0 : i32
    %2 = arith.cmpi ne, %1, %c0_i32_0 : i32
    scf.if %2 {
      %cst_11 = arith.constant 0.000000e+00 : f32
      %14 = vector.broadcast %cst_11 : f32 to vector<8x768xf32>
      %c0_12 = arith.constant 0 : index
      %c0_13 = arith.constant 0 : index
      %15 = vector.load %arg6[%c0_12, %c0_13] : memref<8x768xf32, #tpu.memory_space<vmem>>, vector<8x768xf32>
      tpu.vector_store %arg6[%c0_12, %c0_13], %14 {strides = array<i32>} : memref<8x768xf32, #tpu.memory_space<vmem>>, vector<8x768xf32>,
    } else {
    }
    %c0 = arith.constant 0 : index
    %c0_1 = arith.constant 0 : index
    %3 = vector.load %arg6[%c0, %c0_1] : memref<8x768xf32, #tpu.memory_space<vmem>>, vector<8x768xf32>
    %c0_2 = arith.constant 0 : index
    %c0_3 = arith.constant 0 : index
    %c0_4 = arith.constant 0 : index
    %4 = vector.load %arg2[%c0_2, %c0_3, %c0_4] : memref<1x8x64xbf16, #tpu.memory_space<vmem>>, vector<1x8x64xbf16>
    %5 = vector.shape_cast %4 : vector<1x8x64xbf16> to vector<8x64xbf16>
    %c0_5 = arith.constant 0 : index
    %c0_6 = arith.constant 0 : index
    %c0_7 = arith.constant 0 : index
    %6 = vector.load %arg3[%c0_5, %c0_6, %c0_7] : memref<1x64x768xbf16, #tpu.memory_space<vmem>>, vector<1x64x768xbf16>
    %7 = vector.shape_cast %6 : vector<1x64x768xbf16> to vector<64x768xbf16>
    %cst = arith.constant dense<0.000000e+00> : vector<8x768xf32>
    %8 = tpu.matmul %5, %7, %cst {dimension_numbers = #tpu.dot_dimension_numbers<[1], [0], [0], [1], [0, 0, 1, 1], [], []>} : vector<8x64xbf16>, vector<64x768xbf16>, vector<8x768xf32> -> vector<8x768xf32>
    %9 = arith.addf %3, %8 : vector<8x768xf32>
    %c0_8 = arith.constant 0 : index
    %c0_9 = arith.constant 0 : index
    %10 = vector.load %arg6[%c0_8, %c0_9] : memref<8x768xf32, #tpu.memory_space<vmem>>, vector<8x768xf32>
    tpu.vector_store %arg6[%c0_8, %c0_9], %9 {strides = array<i32>} : memref<8x768xf32, #tpu.memory_space<vmem>>, vector<8x768xf32>,
    %c11_i32 = arith.constant 11 : i32
    %11 = arith.cmpi eq, %arg1, %c11_i32 : i32
    %12 = arith.extui %11 : i1 to i32
    %c0_i32_10 = arith.constant 0 : i32
    %13 = arith.cmpi ne, %12, %c0_i32_10 : i32
    scf.if %13 {
      %c0_11 = arith.constant 0 : index
      %c0_12 = arith.constant 0 : index
      %14 = vector.load %arg6[%c0_11, %c0_12] : memref<8x768xf32, #tpu.memory_space<vmem>>, vector<8x768xf32>
      %c0_13 = arith.constant 0 : index
      %c0_14 = arith.constant 0 : index
      %15 = vector.load %arg4[%c0_13, %c0_14] : memref<1x768xf32, #tpu.memory_space<vmem>>, vector<1x768xf32>
      %16 = vector.broadcast %15 : vector<1x768xf32> to vector<8x768xf32>
      %17 = arith.addf %14, %16 : vector<8x768xf32>
      %18 = arith.truncf %17 : vector<8x768xf32> to vector<8x768xbf16>
      %c0_15 = arith.constant 0 : index
      %c0_16 = arith.constant 0 : index
      %c0_17 = arith.constant 0 : index
      %19 = vector.load %arg5[%c0_15, %c0_16, %c0_17] : memref<1x8x768xbf16, #tpu.memory_space<vmem>>, vector<1x8x768xbf16>
      %20 = vector.shape_cast %19 : vector<1x8x768xbf16> to vector<8x768xbf16>
      %21 = vector.shape_cast %18 : vector<8x768xbf16> to vector<1x8x768xbf16>
      tpu.vector_store %arg5[%c0_15, %c0_16, %c0_17], %21 {strides = array<i32>} : memref<1x8x768xbf16, #tpu.memory_space<vmem>>, vector<1x8x768xbf16>,
    } else {
    }
    return
  }
  func.func @transform_0(%arg0: i32, %arg1: i32) -> (i32, i32, i32) {
    %c12_i32 = arith.constant 12 : i32
    %0 = arith.muli %arg0, %c12_i32 : i32
    %1 = arith.addi %0, %arg1 : i32
    %c0_i32 = arith.constant 0 : i32
    %c0_i32_0 = arith.constant 0 : i32
    %c0_i32_1 = arith.constant 0 : i32
    return %1, %c0_i32, %c0_i32_0 : i32, i32, i32
  }
  func.func @transform_1(%arg0: i32, %arg1: i32) -> (i32, i32, i32) {
    %c0_i32 = arith.constant 0 : i32
    %c0_i32_0 = arith.constant 0 : i32
    %c0_i32_1 = arith.constant 0 : i32
    return %arg1, %c0_i32, %c0_i32_0 : i32, i32, i32
  }
  func.func @transform_2(%arg0: i32, %arg1: i32) -> (i32, i32) {
    %c0_i32 = arith.constant 0 : i32
    %c0_i32_0 = arith.constant 0 : i32
    %c0_i32_1 = arith.constant 0 : i32
    return %c0_i32, %c0_i32_0 : i32, i32
  }
  func.func @transform_3(%arg0: i32, %arg1: i32) -> (i32, i32, i32) {
    %c0_i32 = arith.constant 0 : i32
    %c0_i32_0 = arith.constant 0 : i32
    %c0_i32_1 = arith.constant 0 : i32
    return %arg0, %c0_i32, %c0_i32_0 : i32, i32, i32
  }
}

module attributes {stable_mosaic.version = 11 : i64} {
  func.func @_ln_res_kernel(%arg0: i32, %arg1: memref<16x768xbf16, #tpu.memory_space<vmem>>, %arg2: memref<16x768xbf16, #tpu.memory_space<vmem>>, %arg3: memref<1x768xf32, #tpu.memory_space<vmem>>, %arg4: memref<1x768xf32, #tpu.memory_space<vmem>>, %arg5: memref<16x768xbf16, #tpu.memory_space<vmem>>) attributes {dimension_semantics = [#tpu.dimension_semantics<parallel>], iteration_bounds = array<i64: 1>, scalar_prefetch = 0 : i64, scratch_operands = 0 : i64, tpu.core_type = #tpu.core_type<tc>, window_params = [{transform_indices = @transform_0, window_bounds = array<i64: 16, 768>}, {transform_indices = @transform_1, window_bounds = array<i64: 16, 768>}, {pipeline_mode = #tpu.pipeline_mode<synchronous>, transform_indices = @transform_2, window_bounds = array<i64: 1, 768>}, {pipeline_mode = #tpu.pipeline_mode<synchronous>, transform_indices = @transform_3, window_bounds = array<i64: 1, 768>}, {transform_indices = @transform_4, window_bounds = array<i64: 16, 768>}]} {
    %c0 = arith.constant 0 : index
    %c0_0 = arith.constant 0 : index
    %0 = vector.load %arg1[%c0, %c0_0] : memref<16x768xbf16, #tpu.memory_space<vmem>>, vector<16x768xbf16>
    %1 = arith.extf %0 : vector<16x768xbf16> to vector<16x768xf32>
    %c0_1 = arith.constant 0 : index
    %c0_2 = arith.constant 0 : index
    %2 = vector.load %arg2[%c0_1, %c0_2] : memref<16x768xbf16, #tpu.memory_space<vmem>>, vector<16x768xbf16>
    %3 = arith.extf %2 : vector<16x768xbf16> to vector<16x768xf32>
    %4 = arith.addf %1, %3 : vector<16x768xf32>
    %cst = arith.constant dense<0.000000e+00> : vector<16xf32>
    %5 = vector.multi_reduction <add>, %4, %cst [1] : vector<16x768xf32> to vector<16xf32>
    %6 = vector.shape_cast %5 : vector<16xf32> to vector<16x1xf32>
    %cst_3 = arith.constant 7.680000e+02 : f32
    %7 = vector.broadcast %cst_3 : f32 to vector<16x1xf32>
    %8 = arith.divf %6, %7 : vector<16x1xf32>
    %9 = vector.broadcast %8 : vector<16x1xf32> to vector<16x768xf32>
    %10 = arith.subf %4, %9 : vector<16x768xf32>
    %11 = arith.mulf %10, %10 : vector<16x768xf32>
    %cst_4 = arith.constant dense<0.000000e+00> : vector<16xf32>
    %12 = vector.multi_reduction <add>, %11, %cst_4 [1] : vector<16x768xf32> to vector<16xf32>
    %13 = vector.shape_cast %12 : vector<16xf32> to vector<16x1xf32>
    %cst_5 = arith.constant 7.680000e+02 : f32
    %14 = vector.broadcast %cst_5 : f32 to vector<16x1xf32>
    %15 = arith.divf %13, %14 : vector<16x1xf32>
    %cst_6 = arith.constant 9.99999996E-13 : f32
    %16 = vector.broadcast %cst_6 : f32 to vector<16x1xf32>
    %17 = arith.addf %15, %16 : vector<16x1xf32>
    %18 = math.rsqrt %17 : vector<16x1xf32>
    %19 = vector.broadcast %18 : vector<16x1xf32> to vector<16x768xf32>
    %20 = arith.mulf %10, %19 : vector<16x768xf32>
    %c0_7 = arith.constant 0 : index
    %c0_8 = arith.constant 0 : index
    %21 = vector.load %arg3[%c0_7, %c0_8] : memref<1x768xf32, #tpu.memory_space<vmem>>, vector<1x768xf32>
    %22 = vector.broadcast %21 : vector<1x768xf32> to vector<16x768xf32>
    %23 = arith.mulf %20, %22 : vector<16x768xf32>
    %c0_9 = arith.constant 0 : index
    %c0_10 = arith.constant 0 : index
    %24 = vector.load %arg4[%c0_9, %c0_10] : memref<1x768xf32, #tpu.memory_space<vmem>>, vector<1x768xf32>
    %25 = vector.broadcast %24 : vector<1x768xf32> to vector<16x768xf32>
    %26 = arith.addf %23, %25 : vector<16x768xf32>
    %27 = arith.truncf %26 : vector<16x768xf32> to vector<16x768xbf16>
    %c0_11 = arith.constant 0 : index
    %c0_12 = arith.constant 0 : index
    %28 = vector.load %arg5[%c0_11, %c0_12] : memref<16x768xbf16, #tpu.memory_space<vmem>>, vector<16x768xbf16>
    tpu.vector_store %arg5[%c0_11, %c0_12], %27 {strides = array<i32>} : memref<16x768xbf16, #tpu.memory_space<vmem>>, vector<16x768xbf16>,
    return
  }
  func.func @transform_0(%arg0: i32) -> (i32, i32) {
    %c0_i32 = arith.constant 0 : i32
    %c0_i32_0 = arith.constant 0 : i32
    return %arg0, %c0_i32 : i32, i32
  }
  func.func @transform_1(%arg0: i32) -> (i32, i32) {
    %c0_i32 = arith.constant 0 : i32
    %c0_i32_0 = arith.constant 0 : i32
    return %arg0, %c0_i32 : i32, i32
  }
  func.func @transform_2(%arg0: i32) -> (i32, i32) {
    %c0_i32 = arith.constant 0 : i32
    %c0_i32_0 = arith.constant 0 : i32
    %c0_i32_1 = arith.constant 0 : i32
    return %c0_i32, %c0_i32_0 : i32, i32
  }
  func.func @transform_3(%arg0: i32) -> (i32, i32) {
    %c0_i32 = arith.constant 0 : i32
    %c0_i32_0 = arith.constant 0 : i32
    %c0_i32_1 = arith.constant 0 : i32
    return %c0_i32, %c0_i32_0 : i32, i32
  }
  func.func @transform_4(%arg0: i32) -> (i32, i32) {
    %c0_i32 = arith.constant 0 : i32
    %c0_i32_0 = arith.constant 0 : i32
    return %arg0, %c0_i32 : i32, i32
  }
}

module attributes {stable_mosaic.version = 11 : i64} {
  func.func @_linear_kernel(%arg0: i32, %arg1: i32, %arg2: memref<16x768xbf16, #tpu.memory_space<vmem>>, %arg3: memref<768x256xbf16, #tpu.memory_space<vmem>>, %arg4: memref<1x256xf32, #tpu.memory_space<vmem>>, %arg5: memref<16x256xbf16, #tpu.memory_space<vmem>>) attributes {dimension_semantics = [#tpu.dimension_semantics<parallel>, #tpu.dimension_semantics<parallel>], iteration_bounds = array<i64: 1, 12>, scalar_prefetch = 0 : i64, scratch_operands = 0 : i64, tpu.core_type = #tpu.core_type<tc>, window_params = [{transform_indices = @transform_0, window_bounds = array<i64: 16, 768>}, {transform_indices = @transform_1, window_bounds = array<i64: 768, 256>}, {transform_indices = @transform_2, window_bounds = array<i64: 1, 256>}, {transform_indices = @transform_3, window_bounds = array<i64: 16, 256>}]} {
    %c0 = arith.constant 0 : index
    %c0_0 = arith.constant 0 : index
    %0 = vector.load %arg2[%c0, %c0_0] : memref<16x768xbf16, #tpu.memory_space<vmem>>, vector<16x768xbf16>
    %c0_1 = arith.constant 0 : index
    %c0_2 = arith.constant 0 : index
    %1 = vector.load %arg3[%c0_1, %c0_2] : memref<768x256xbf16, #tpu.memory_space<vmem>>, vector<768x256xbf16>
    %cst = arith.constant dense<0.000000e+00> : vector<16x256xf32>
    %2 = tpu.matmul %0, %1, %cst {dimension_numbers = #tpu.dot_dimension_numbers<[1], [0], [0], [1], [0, 0, 1, 1], [], []>} : vector<16x768xbf16>, vector<768x256xbf16>, vector<16x256xf32> -> vector<16x256xf32>
    %c0_3 = arith.constant 0 : index
    %c0_4 = arith.constant 0 : index
    %3 = vector.load %arg4[%c0_3, %c0_4] : memref<1x256xf32, #tpu.memory_space<vmem>>, vector<1x256xf32>
    %4 = vector.broadcast %3 : vector<1x256xf32> to vector<16x256xf32>
    %5 = arith.addf %2, %4 : vector<16x256xf32>
    %cst_5 = arith.constant 5.000000e-01 : f32
    %6 = vector.broadcast %cst_5 : f32 to vector<16x256xf32>
    %7 = arith.mulf %6, %5 : vector<16x256xf32>
    %cst_6 = arith.constant 4.471500e-02 : f32
    %8 = vector.broadcast %cst_6 : f32 to vector<16x256xf32>
    %9 = arith.mulf %8, %5 : vector<16x256xf32>
    %10 = arith.mulf %9, %5 : vector<16x256xf32>
    %11 = arith.mulf %10, %5 : vector<16x256xf32>
    %12 = arith.addf %5, %11 : vector<16x256xf32>
    %cst_7 = arith.constant 0.797884583 : f32
    %13 = vector.broadcast %cst_7 : f32 to vector<16x256xf32>
    %14 = arith.mulf %13, %12 : vector<16x256xf32>
    %15 = math.tanh %14 : vector<16x256xf32>
    %cst_8 = arith.constant 1.000000e+00 : f32
    %16 = vector.broadcast %cst_8 : f32 to vector<16x256xf32>
    %17 = arith.addf %16, %15 : vector<16x256xf32>
    %18 = arith.mulf %7, %17 : vector<16x256xf32>
    %19 = arith.truncf %18 : vector<16x256xf32> to vector<16x256xbf16>
    %c0_9 = arith.constant 0 : index
    %c0_10 = arith.constant 0 : index
    %20 = vector.load %arg5[%c0_9, %c0_10] : memref<16x256xbf16, #tpu.memory_space<vmem>>, vector<16x256xbf16>
    tpu.vector_store %arg5[%c0_9, %c0_10], %19 {strides = array<i32>} : memref<16x256xbf16, #tpu.memory_space<vmem>>, vector<16x256xbf16>,
    return
  }
  func.func @transform_0(%arg0: i32, %arg1: i32) -> (i32, i32) {
    %c0_i32 = arith.constant 0 : i32
    %c0_i32_0 = arith.constant 0 : i32
    return %arg0, %c0_i32 : i32, i32
  }
  func.func @transform_1(%arg0: i32, %arg1: i32) -> (i32, i32) {
    %c0_i32 = arith.constant 0 : i32
    %c0_i32_0 = arith.constant 0 : i32
    return %c0_i32, %arg1 : i32, i32
  }
  func.func @transform_2(%arg0: i32, %arg1: i32) -> (i32, i32) {
    %c0_i32 = arith.constant 0 : i32
    %c0_i32_0 = arith.constant 0 : i32
    return %c0_i32, %arg1 : i32, i32
  }
  func.func @transform_3(%arg0: i32, %arg1: i32) -> (i32, i32) {
    %c0_i32 = arith.constant 0 : i32
    return %arg0, %arg1 : i32, i32
  }
}

module attributes {stable_mosaic.version = 11 : i64} {
  func.func @_linear_kernel(%arg0: i32, %arg1: i32, %arg2: memref<16x3072xbf16, #tpu.memory_space<vmem>>, %arg3: memref<3072x256xbf16, #tpu.memory_space<vmem>>, %arg4: memref<1x256xf32, #tpu.memory_space<vmem>>, %arg5: memref<16x256xbf16, #tpu.memory_space<vmem>>) attributes {dimension_semantics = [#tpu.dimension_semantics<parallel>, #tpu.dimension_semantics<parallel>], iteration_bounds = array<i64: 1, 3>, scalar_prefetch = 0 : i64, scratch_operands = 0 : i64, tpu.core_type = #tpu.core_type<tc>, window_params = [{transform_indices = @transform_0, window_bounds = array<i64: 16, 3072>}, {transform_indices = @transform_1, window_bounds = array<i64: 3072, 256>}, {transform_indices = @transform_2, window_bounds = array<i64: 1, 256>}, {transform_indices = @transform_3, window_bounds = array<i64: 16, 256>}]} {
    %c0 = arith.constant 0 : index
    %c0_0 = arith.constant 0 : index
    %0 = vector.load %arg2[%c0, %c0_0] : memref<16x3072xbf16, #tpu.memory_space<vmem>>, vector<16x3072xbf16>
    %c0_1 = arith.constant 0 : index
    %c0_2 = arith.constant 0 : index
    %1 = vector.load %arg3[%c0_1, %c0_2] : memref<3072x256xbf16, #tpu.memory_space<vmem>>, vector<3072x256xbf16>
    %cst = arith.constant dense<0.000000e+00> : vector<16x256xf32>
    %2 = tpu.matmul %0, %1, %cst {dimension_numbers = #tpu.dot_dimension_numbers<[1], [0], [0], [1], [0, 0, 1, 1], [], []>} : vector<16x3072xbf16>, vector<3072x256xbf16>, vector<16x256xf32> -> vector<16x256xf32>
    %c0_3 = arith.constant 0 : index
    %c0_4 = arith.constant 0 : index
    %3 = vector.load %arg4[%c0_3, %c0_4] : memref<1x256xf32, #tpu.memory_space<vmem>>, vector<1x256xf32>
    %4 = vector.broadcast %3 : vector<1x256xf32> to vector<16x256xf32>
    %5 = arith.addf %2, %4 : vector<16x256xf32>
    %6 = arith.truncf %5 : vector<16x256xf32> to vector<16x256xbf16>
    %c0_5 = arith.constant 0 : index
    %c0_6 = arith.constant 0 : index
    %7 = vector.load %arg5[%c0_5, %c0_6] : memref<16x256xbf16, #tpu.memory_space<vmem>>, vector<16x256xbf16>
    tpu.vector_store %arg5[%c0_5, %c0_6], %6 {strides = array<i32>} : memref<16x256xbf16, #tpu.memory_space<vmem>>, vector<16x256xbf16>,
    return
  }
  func.func @transform_0(%arg0: i32, %arg1: i32) -> (i32, i32) {
    %c0_i32 = arith.constant 0 : i32
    %c0_i32_0 = arith.constant 0 : i32
    return %arg0, %c0_i32 : i32, i32
  }
  func.func @transform_1(%arg0: i32, %arg1: i32) -> (i32, i32) {
    %c0_i32 = arith.constant 0 : i32
    %c0_i32_0 = arith.constant 0 : i32
    return %c0_i32, %arg1 : i32, i32
  }
  func.func @transform_2(%arg0: i32, %arg1: i32) -> (i32, i32) {
    %c0_i32 = arith.constant 0 : i32
    %c0_i32_0 = arith.constant 0 : i32
    return %c0_i32, %arg1 : i32, i32
  }
  func.func @transform_3(%arg0: i32, %arg1: i32) -> (i32, i32) {
    %c0_i32 = arith.constant 0 : i32
    return %arg0, %arg1 : i32, i32
  }
}

module attributes {stable_mosaic.version = 11 : i64} {
  func.func @_fc_argmax_kernel(%arg0: i32, %arg1: memref<16x768xbf16, #tpu.memory_space<vmem>>, %arg2: memref<768x512xbf16, #tpu.memory_space<vmem>>, %arg3: memref<1x512xf32, #tpu.memory_space<vmem>>, %arg4: memref<16x512xf32, #tpu.memory_space<vmem>>, %arg5: memref<16x128xi32, #tpu.memory_space<vmem>>) attributes {dimension_semantics = [#tpu.dimension_semantics<parallel>], iteration_bounds = array<i64: 1>, scalar_prefetch = 0 : i64, scratch_operands = 0 : i64, tpu.core_type = #tpu.core_type<tc>, window_params = [{transform_indices = @transform_0, window_bounds = array<i64: 16, 768>}, {pipeline_mode = #tpu.pipeline_mode<synchronous>, transform_indices = @transform_1, window_bounds = array<i64: 768, 512>}, {pipeline_mode = #tpu.pipeline_mode<synchronous>, transform_indices = @transform_2, window_bounds = array<i64: 1, 512>}, {transform_indices = @transform_3, window_bounds = array<i64: 16, 512>}, {transform_indices = @transform_4, window_bounds = array<i64: 16, 128>}]} {
    %c0 = arith.constant 0 : index
    %c0_0 = arith.constant 0 : index
    %0 = vector.load %arg1[%c0, %c0_0] : memref<16x768xbf16, #tpu.memory_space<vmem>>, vector<16x768xbf16>
    %c0_1 = arith.constant 0 : index
    %c0_2 = arith.constant 0 : index
    %1 = vector.load %arg2[%c0_1, %c0_2] : memref<768x512xbf16, #tpu.memory_space<vmem>>, vector<768x512xbf16>
    %cst = arith.constant dense<0.000000e+00> : vector<16x512xf32>
    %2 = tpu.matmul %0, %1, %cst {dimension_numbers = #tpu.dot_dimension_numbers<[1], [0], [0], [1], [0, 0, 1, 1], [], []>} : vector<16x768xbf16>, vector<768x512xbf16>, vector<16x512xf32> -> vector<16x512xf32>
    %c0_3 = arith.constant 0 : index
    %c0_4 = arith.constant 0 : index
    %3 = vector.load %arg3[%c0_3, %c0_4] : memref<1x512xf32, #tpu.memory_space<vmem>>, vector<1x512xf32>
    %4 = vector.broadcast %3 : vector<1x512xf32> to vector<16x512xf32>
    %5 = arith.addf %2, %4 : vector<16x512xf32>
    %c0_5 = arith.constant 0 : index
    %c0_6 = arith.constant 0 : index
    %6 = vector.load %arg4[%c0_5, %c0_6] : memref<16x512xf32, #tpu.memory_space<vmem>>, vector<16x512xf32>
    tpu.vector_store %arg4[%c0_5, %c0_6], %5 {strides = array<i32>} : memref<16x512xf32, #tpu.memory_space<vmem>>, vector<16x512xf32>,
    %7 = tpu.iota {dimensions = array<i32: 1>} : vector<16x512xi32>
    %cst_7 = arith.constant dense<0xFF800000> : vector<16xf32>
    %8 = vector.multi_reduction <maximumf>, %5, %cst_7 [1] : vector<16x512xf32> to vector<16xf32>
    %9 = vector.shape_cast %8 : vector<16xf32> to vector<16x1xf32>
    %10 = vector.broadcast %9 : vector<16x1xf32> to vector<16x512xf32>
    %11 = arith.cmpf oeq, %5, %10 : vector<16x512xf32>
    %c512_i32 = arith.constant 512 : i32
    %12 = vector.broadcast %c512_i32 : i32 to vector<16x512xi32>
    %13 = arith.select %11, %7, %12 : vector<16x512xi1>, vector<16x512xi32>
    %cst_8 = arith.constant dense<2147483647> : vector<16xi32>
    %14 = vector.multi_reduction <minsi>, %13, %cst_8 [1] : vector<16x512xi32> to vector<16xi32>
    %15 = vector.shape_cast %14 : vector<16xi32> to vector<16x1xi32>
    %16 = vector.shape_cast %15 : vector<16x1xi32> to vector<16x1xi32>
    %17 = vector.broadcast %16 : vector<16x1xi32> to vector<16x128xi32>
    %c0_9 = arith.constant 0 : index
    %c0_10 = arith.constant 0 : index
    %18 = vector.load %arg5[%c0_9, %c0_10] : memref<16x128xi32, #tpu.memory_space<vmem>>, vector<16x128xi32>
    tpu.vector_store %arg5[%c0_9, %c0_10], %17 {strides = array<i32>} : memref<16x128xi32, #tpu.memory_space<vmem>>, vector<16x128xi32>,
    return
  }
  func.func @transform_0(%arg0: i32) -> (i32, i32) {
    %c0_i32 = arith.constant 0 : i32
    %c0_i32_0 = arith.constant 0 : i32
    return %arg0, %c0_i32 : i32, i32
  }
  func.func @transform_1(%arg0: i32) -> (i32, i32) {
    %c0_i32 = arith.constant 0 : i32
    %c0_i32_0 = arith.constant 0 : i32
    %c0_i32_1 = arith.constant 0 : i32
    return %c0_i32, %c0_i32_0 : i32, i32
  }
  func.func @transform_2(%arg0: i32) -> (i32, i32) {
    %c0_i32 = arith.constant 0 : i32
    %c0_i32_0 = arith.constant 0 : i32
    %c0_i32_1 = arith.constant 0 : i32
    return %c0_i32, %c0_i32_0 : i32, i32
  }
  func.func @transform_3(%arg0: i32) -> (i32, i32) {
    %c0_i32 = arith.constant 0 : i32
    %c0_i32_0 = arith.constant 0 : i32
    return %arg0, %c0_i32 : i32, i32
  }
  func.func @transform_4(%arg0: i32) -> (i32, i32) {
    %c0_i32 = arith.constant 0 : i32
    %c0_i32_0 = arith.constant 0 : i32
    return %arg0, %c0_i32 : i32, i32
  }
}

</mosaic_0001>

<bundles_post_ra>
// kernel: net_forward.16
= control target key start
LH: loop header
LB: loop body
LE: loop exit
PB: predicated region body
PF: predicated region fallthrough
CT: control target
= control target key end

     0   :  { %s452_s0 = inlined_call_operand.vmem [shape: f32[16,768], index: 0, kind: input, shape index: {}]   ;;  %s453_s1 = inlined_call_operand.vmem [shape: f32[16,768], index: 1, kind: input, shape index: {}]   ;;  %s454_s2 = inlined_call_operand.vmem [shape: f32[1,768], index: 2, kind: input, shape index: {}]   ;;  %s455_s3 = inlined_call_operand.vmem [shape: f32[1,768], index: 3, kind: input, shape index: {}]   ;;  %s456_s4 = inlined_call_operand.vmem [shape: bf16[16,768], index: 4, kind: output, shape index: {}]  }
   0x1   :  { %v17_v0 = vld [vmem:[%s452_s0] sm:$0xff]  ;;  %v18_v1 = vld [vmem:[%s452_s0 + $0x8] sm:$0xff]  ;;  %v19_v2 = vld [vmem:[%s452_s0 + $0x10] sm:$0xff] }
   0x2   :  { %v20_v3 = vld [vmem:[%s452_s0 + $0x18] sm:$0xff]  ;;  %v29_v4 = vld [vmem:[%s453_s1] sm:$0xff]  ;;  %v30_v5 = vld [vmem:[%s453_s1 + $0x8] sm:$0xff] }
   0x3   :  { %v31_v6 = vld [vmem:[%s453_s1 + $0x10] sm:$0xff]  ;;  %v21_v7 = vld [vmem:[%s452_s0 + $0x20] sm:$0xff]  ;;  %v32_v8 = vld [vmem:[%s453_s1 + $0x18] sm:$0xff]  ;;  %v41_v10 = vadd.f32 %v29_v4, %v17_v0  ;;  %v42_v11 = vadd.f32 %v30_v5, %v18_v1 }
   0x4   :  { %v33_v9 = vld [vmem:[%s453_s1 + $0x20] sm:$0xff]  ;;  %v43_v12 = vadd.f32 %v31_v6, %v19_v2  ;;  %v23_v13 = vld [vmem:[%s452_s0 + $0x30] sm:$0xff]  ;;  %v24_v14 = vld [vmem:[%s452_s0 + $0x38] sm:$0xff]  ;;  %v44_v18 = vadd.f32 %v32_v8, %v20_v3 }
   0x5   :  { %v25_v15 = vld [vmem:[%s452_s0 + $0x40] sm:$0xff]  ;;  %v22_v16 = vld [vmem:[%s452_s0 + $0x28] sm:$0xff]  ;;  %v53_v19 = vadd.f32 %v42_v11, %v41_v10  ;;  %v45_v21 = vadd.f32 %v33_v9, %v21_v7  ;;  %v35_v22 = vld [vmem:[%s453_s1 + $0x30] sm:$0xff] }
   0x6   :  { %v34_v17 = vld [vmem:[%s453_s1 + $0x28] sm:$0xff]  ;;  %v36_v23 = vld [vmem:[%s453_s1 + $0x38] sm:$0xff]  ;;  %v37_v24 = vld [vmem:[%s453_s1 + $0x40] sm:$0xff]  ;;  %v47_v27 = vadd.f32 %v35_v22, %v23_v13 }
   0x7   :  { %v26_v20 = vld [vmem:[%s452_s0 + $0x48] sm:$0xff]  ;;  %v54_v25 = vadd.f32 %v53_v19, %v43_v12  ;;  %v48_v28 = vadd.f32 %v36_v23, %v24_v14  ;;  %v49_v29 = vadd.f32 %v37_v24, %v25_v15  ;;  %v27_v30 = vld [vmem:[%s452_s0 + $0x50] sm:$0xff]  ;;  %v46_v32 = vadd.f32 %v34_v17, %v22_v16  ;;  %v28_v36 = vld [vmem:[%s452_s0 + $0x58] sm:$0xff] }
   0x8   :  { %v38_v26 = vld [vmem:[%s453_s1 + $0x48] sm:$0xff]  ;;  %v39_v31 = vld [vmem:[%s453_s1 + $0x50] sm:$0xff]  ;;  %v40_v37 = vld [vmem:[%s453_s1 + $0x58] sm:$0xff]  ;;  %v128_v23 = vlaneseq }
   0x9   :  { %v55_v33 = vadd.f32 %v54_v25, %v44_v18  ;;  %v50_v34 = vadd.f32 %v38_v26, %v26_v20  ;;  %v60_v35 = vadd.f32 %v48_v28, %v47_v27  ;;  %v51_v39 = vadd.f32 %v39_v31, %v27_v30  ;;  %v126_v30 = vld [vmem:[%s454_s2] sm:$0x3f] }
   0xa   :  { %v52_v42 = vadd.f32 %v40_v37, %v28_v36 }
   0xb   :  { %v56_v38 = vadd.f32 %v55_v33, %v45_v21  ;;  %v61_v40 = vadd.f32 %v60_v35, %v49_v29  ;;  %v170_v35 = vld [vmem:[%s455_s3] sm:$0x3f] }
   0xd   :  { %v57_v41 = vadd.f32 %v56_v38, %v46_v32  ;;  %v62_v43 = vadd.f32 %v61_v40, %v50_v34 }
   0xf   :  { %58 = vadd.xlane.f32.xlu0 %v57_v41  ;;  %v63_v44 = vadd.f32 %v62_v43, %v51_v39 }
  0x11   :  { %v64_v45 = vadd.f32 %v63_v44, %v52_v42 }
  0x13   :  { %65 = vadd.xlane.f32.xlu0 %v64_v45 }
  0x98   :  { %v59_v46 = vpop.xlane.xlu0 %58 }
  0x99   :  { %v68_v47 = vmul.f32 0.0013020834, %v59_v46 }
  0x9b   :  { %v373_v48 = vsub.f32 %v41_v10, %v68_v47  ;;  %v375_v49 = vsub.f32 %v42_v11, %v68_v47  ;;  %v377_v50 = vsub.f32 %v43_v12, %v68_v47  ;;  %v379_v52 = vsub.f32 %v44_v18, %v68_v47 }
  0x9c   :  { %v66_v51 = vpop.xlane.xlu0 %65  ;;  %v385_v56 = vsub.f32 %v45_v21, %v68_v47  ;;  %v75_v62 = vsub.f32 %v46_v32, %v68_v47 }
  0x9d   :  { %v69_v53 = vmul.f32 0.0013020834, %v66_v51  ;;  %v82_v54 = vmul.f32 %v373_v48, %v373_v48  ;;  %v83_v55 = vmul.f32 %v375_v49, %v375_v49  ;;  %v84_v57 = vmul.f32 %v377_v50, %v377_v50 }
  0x9e   :  { %v85_v63 = vmul.f32 %v379_v52, %v379_v52  ;;  %v86_v4 = vmul.f32 %v385_v56, %v385_v56  ;;  %v87_v9 = vmul.f32 %v75_v62, %v75_v62 }
  0x9f   :  { %v94_v58 = vadd.f32 %v83_v55, %v82_v54  ;;  %v389_v59 = vsub.f32 %v47_v27, %v69_v53  ;;  %v391_v60 = vsub.f32 %v48_v28, %v69_v53  ;;  %v393_v61 = vsub.f32 %v49_v29, %v69_v53 }
  0xa0   :  { %v397_v1 = vsub.f32 %v50_v34, %v69_v53  ;;  %v405_v6 = vsub.f32 %v51_v39, %v69_v53  ;;  %v409_v11 = vsub.f32 %v52_v42, %v69_v53  ;;  %v129_v27 = vshrl.u32 %v128_v23, 7 }
  0xa1   :  { %v95_v0 = vadd.f32 %v94_v58, %v84_v57  ;;  %v88_v2 = vmul.f32 %v389_v59, %v389_v59  ;;  %v89_v3 = vmul.f32 %v391_v60, %v391_v60  ;;  %v90_v7 = vmul.f32 %v393_v61, %v393_v61 }
  0xa2   :  { %v91_v12 = vmul.f32 %v397_v1, %v397_v1  ;;  %v92_v15 = vmul.f32 %v405_v6, %v405_v6  ;;  %v93_v17 = vmul.f32 %v409_v11, %v409_v11  ;;  %v130_v28 = vsub.s32 0, %v129_v27 }
  0xa3   :  { %v96_v5 = vadd.f32 %v95_v0, %v85_v63  ;;  %v101_v8 = vadd.f32 %v89_v3, %v88_v2  ;;  %v134_v29 = vsub.s32 1, %v129_v27  ;;  %v138_v31 = vsub.s32 2, %v129_v27 }
  0xa4   :  { %v142_v32 = vsub.s32 3, %v129_v27  ;;  %v146_v33 = vsub.s32 4, %v129_v27  ;;  %v150_v34 = vsub.s32 5, %v129_v27  ;;  %v131_v36 = vrot.slane %v126_v30, %v130_v28 }
  0xa5   :  { %v97_v10 = vadd.f32 %v96_v5, %v86_v4  ;;  %v102_v13 = vadd.f32 %v101_v8, %v90_v7  ;;  %v135_v37 = vrot.slane %v126_v30, %v134_v29  ;;  %v139_v38 = vrot.slane %v126_v30, %v138_v31 }
  0xa6   :  { %v143_v39 = vrot.slane %v126_v30, %v142_v32  ;;  %v147_v40 = vrot.slane %v126_v30, %v146_v33  ;;  %v151_v41 = vrot.slane %v126_v30, %v150_v34  ;;  %v175_v43 = vrot.slane %v170_v35, %v130_v28 }
  0xa7   :  { %v98_v14 = vadd.f32 %v97_v10, %v87_v9  ;;  %v103_v16 = vadd.f32 %v102_v13, %v91_v12  ;;  %v179_v44 = vrot.slane %v170_v35, %v134_v29  ;;  %v183_v45 = vrot.slane %v170_v35, %v138_v31 }
  0xa8   :  { %v187_v46 = vrot.slane %v170_v35, %v142_v32  ;;  %v191_v55 = vrot.slane %v170_v35, %v146_v33  ;;  %v195_v57 = vrot.slane %v170_v35, %v150_v34 }
  0xa9   :  { %99 = vadd.xlane.f32.xlu1 %v98_v14  ;;  %v104_v18 = vadd.f32 %v103_v16, %v92_v15 }
  0xab   :  { %v105_v19 = vadd.f32 %v104_v18, %v93_v17 }
  0xad   :  { %106 = vadd.xlane.f32.xlu1 %v105_v19 }
 0x132   :  { %v100_v20 = vpop.xlane.xlu1 %99 }
 0x133   :  { %v108_v21 = vmul.f32 0.0013020834, %v100_v20 }
 0x135   :  { %v110_v22 = vadd.f32 1e-12, %v108_v21 }
 0x136   :  { %v107_v24 = vpop.xlane.xlu1 %106 }
 0x137   :  { %272 = vrsqrt.f32 %v110_v22  ;;  %v109_v25 = vmul.f32 0.0013020834, %v107_v24 }
 0x139   :  { %v111_v26 = vadd.f32 1e-12, %v109_v25 }
 0x13b   :  { %274 = vrsqrt.f32 %v111_v26 }
 0x144   :  { %v273_v42 = vpop.eup %272 }
 0x145   :  { %v114_v47 = vmul.f32 %v273_v42, %v373_v48  ;;  %v115_v51 = vmul.f32 %v273_v42, %v375_v49  ;;  %v116_v53 = vmul.f32 %v273_v42, %v377_v50  ;;  %v117_v54 = vmul.f32 %v273_v42, %v379_v52 }
 0x146   :  { %v118_v58 = vmul.f32 %v273_v42, %v385_v56  ;;  %v119_v63 = vmul.f32 %v273_v42, %v75_v62 }
 0x147   :  { %v158_v0 = vmul.f32 %v131_v36, %v114_v47  ;;  %v159_v2 = vmul.f32 %v135_v37, %v115_v51  ;;  %v160_v3 = vmul.f32 %v139_v38, %v116_v53  ;;  %v161_v4 = vmul.f32 %v143_v39, %v117_v54 }
 0x148   :  { %v275_v5 = vpop.eup %274  ;;  %v162_v7 = vmul.f32 %v147_v40, %v118_v58  ;;  %v163_v8 = vmul.f32 %v151_v41, %v119_v63 }
 0x149   :  { %v202_v9 = vadd.f32 %v175_v43, %v158_v0  ;;  %v203_v48 = vadd.f32 %v179_v44, %v159_v2  ;;  %v204_v10 = vadd.f32 %v183_v45, %v160_v3  ;;  %v205_v49 = vadd.f32 %v187_v46, %v161_v4 }
 0x14a   :  { %v206_v12 = vadd.f32 %v191_v55, %v162_v7  ;;  %v207_v50 = vadd.f32 %v195_v57, %v163_v8  ;;  %v120_v52 = vmul.f32 %v275_v5, %v389_v59  ;;  %v121_v13 = vmul.f32 %v275_v5, %v391_v60 }
 0x14b   :  { %v266_v14 = vpack.c.bf16 %v203_v48, %v202_v9  ;;  %v267_v56 = vpack.c.bf16 %v205_v49, %v204_v10  ;;  %v122_v62 = vmul.f32 %v275_v5, %v393_v61  ;;  %v123_v15 = vmul.f32 %v275_v5, %v397_v1 }
 0x14c   :  { %v268_v16 = vpack.c.bf16 %v207_v50, %v206_v12  ;;  %v124_v17 = vmul.f32 %v275_v5, %v405_v6  ;;  %v125_v18 = vmul.f32 %v275_v5, %v409_v11  ;;  %v164_v19 = vmul.f32 %v131_v36, %v120_v52 }
 0x14d   :  { %250 = vst [vmem:[%s456_s4] sm:$0xff] %v266_v14  ;;  %251 = vst [vmem:[%s456_s4 + $0x8] sm:$0xff] %v267_v56  ;;  %v165_v59 = vmul.f32 %v135_v37, %v121_v13  ;;  %v166_v60 = vmul.f32 %v139_v38, %v122_v62  ;;  %v167_v20 = vmul.f32 %v143_v39, %v123_v15 }
 0x14e   :  { %252 = vst [vmem:[%s456_s4 + $0x10] sm:$0xff] %v268_v16  ;;  %v168_v61 = vmul.f32 %v147_v40, %v124_v17  ;;  %v169_v1 = vmul.f32 %v151_v41, %v125_v18  ;;  %v208_v6 = vadd.f32 %v175_v43, %v164_v19 }
 0x14f   :  { %v209_v11 = vadd.f32 %v179_v44, %v165_v59  ;;  %v210_v21 = vadd.f32 %v183_v45, %v166_v60  ;;  %v211_v22 = vadd.f32 %v187_v46, %v167_v20 }
 0x150   :  { %v212_v23 = vadd.f32 %v191_v55, %v168_v61  ;;  %v213_v24 = vadd.f32 %v195_v57, %v169_v1 }
 0x151   :  { %v269_v25 = vpack.c.bf16 %v209_v11, %v208_v6  ;;  %v270_v26 = vpack.c.bf16 %v211_v22, %v210_v21 }
 0x152   :  { %v271_v27 = vpack.c.bf16 %v213_v24, %v212_v23 }
 0x153   :  { %253 = vst [vmem:[%s456_s4 + $0x18] sm:$0xff] %v269_v25  ;;  %254 = vst [vmem:[%s456_s4 + $0x20] sm:$0xff] %v270_v26 }
 0x154   :  { %255 = vst [vmem:[%s456_s4 + $0x28] sm:$0xff] %v271_v27 }

// kernel: net_forward.17
= control target key start
LH: loop header
LB: loop body
LE: loop exit
PB: predicated region body
PF: predicated region fallthrough
CT: control target
= control target key end

     0   :  { %s2916_s30 = smov 0   ;;  %s2918_s10 = smov 0   ;;  %s3205_s0 = inlined_call_operand.vmem [shape: bf16[2,8,768], index: 0, kind: input, shape index: {}]   ;;  %s3206_s1 = inlined_call_operand.vmem [shape: bf16[12,768,64], index: 1, kind: input, shape index: {}]   ;;  %s3207_s2 = inlined_call_operand.vmem [shape: bf16[12,768,64], index: 2, kind: input, shape index: {}]   ;;  %s3208_s3 = inlined_call_operand.vmem [shape: bf16[12,768,64], index: 3, kind: input, shape index: {}]   ;;  %s3209_s4 = inlined_call_operand.vmem [shape: f32[12,1,64], index: 4, kind: input, shape index: {}]   ;;  %s3210_s5 = inlined_call_operand.vmem [shape: f32[12,1,64], index: 5, kind: input, shape index: {}]   ;;  %s3211_s6 = inlined_call_operand.vmem [shape: f32[12,1,64], index: 6, kind: input, shape index: {}]   ;;  %s3212_s7 = inlined_call_operand.vmem [shape: bf16[24,8,64], index: 7, kind: output, shape index: {0}]   ;;  %s3213_s8 = inlined_call_operand.vmem [shape: bf16[24,8,64], index: 8, kind: output, shape index: {1}]   ;;  %s3214_s9 = inlined_call_operand.vmem [shape: bf16[24,8,64], index: 9, kind: output, shape index: {2}]  }
   0x1   :  { %s2920_s11 = smov 0   ;;  %s2922_s12 = smov 0  }
   0x2   :  { %s2924_s13 = smov 0  }
   0x3 LB: > { %s29_s14 = sadd.s32 1, %s2856_s11  ;;  %s32_s15 = sadd.s32 1, %s2860_s12  ;;  %s2864_s13 = sphi %s2924_s13, %s20_s13   ;;  %s2860_s12 = sphi %s2922_s12, %s3218_s12   ;;  %s2856_s11 = sphi %s2920_s11, %s3217_s11   ;;  %s2852_s10 = sphi %s2918_s10, %s3216_s10   ;;  %s2848_s30 = sphi %s2916_s30, %s3215_s30  }
   0x4   : > { %p30_p0 = scmp.ge.s32.totalorder %s29_s14, 12  ;;  %p2273_p1 = scmp.ge.s32.totalorder %s2864_s13, 1 }
   0x5   : > { %p370_p2 = scmp.lt.s32.totalorder %s2864_s13, 25 }
   0x6   : > { %s3220_s14 = smov (%p30_p0, %s29_s14), 0  ;;  %s3222_s15 = smov (!%p30_p0, %s32_s15), %s2860_s12 }
   0x7   : > { %p371_p3 = pnand %p2273_p1, %p370_p2  ;;  %p34_p4 = scmp.ge.s32.totalorder %s3222_s15, 2 }
   0x8   : > { %p448_p5 = scmp.lt.s32.totalorder (!%p371_p3), %s2848_s30, 11  ;;  %p443_p6 = scmp.lt.s32.totalorder (!%p371_p3), %s2852_s10, 1 }
   0x9   : > { %s3224_s15 = smov (%p34_p4, %s3222_s15), 0  ;;  %374 = sbr.rel (%p371_p3) target bundleno = 382 (0x17e), region = 48 }
   0xe   : > { %s2952_s16 = scalar_select %p448_p5, %s2848_s30, 11  ;;  %vm1033_vm0 = vcmask 519168  }
   0xf   : > { %s444_s21 = scalar_select %p443_p6, %s2852_s10, 1 }
  0x10   : > { %s2955_s17 = smul.u32 384, %s2952_s16  ;;  %s465_s23 = scalar_lea.vmem %s3209_s4, %s2952_s16 }
  0x11   : > { %s2634_s22 = smul.u32 24, %s444_s21  ;;  %s471_s21 = scalar_lea.vmem %s3211_s6, %s2952_s16 }
  0x12   : > { %s2961_s20 = scalar_lea.vmem %s3206_s1, %s2955_s17  ;;  %s3011_s28 = scalar_lea.vmem %s3207_s2, %s2955_s17 }
  0x13   : > { %v2676_v0 = vld [vmem:[%s2961_s20 + $0x78] sm:$0xff]   ;;  %v2680_v4 = vld [vmem:[%s2961_s20 + $0x70] sm:$0xff]   ;;  %v2684_v8 = vld [vmem:[%s2961_s20 + $0x68] sm:$0xff]   ;;  %s2997_s25 = scalar_lea.vmem %s3205_s0, %s2634_s22  ;;  %s3099_s19 = scalar_lea.vmem %s3208_s3, %s2955_s17 }
  0x14   : > { %v2677_v1 = vld [vmem:[%s2961_s20 + $0x38] sm:$0xff]   ;;  %2436 = vmatprep.subr.bf16.mxu0 %v2676_v0  ;;  %v2681_v5 = vld [vmem:[%s2961_s20 + $0x30] sm:$0xff]   ;;  %v2685_v9 = vld [vmem:[%s2961_s20 + $0x28] sm:$0xff]   ;;  %s472_s17 = smul.u32 12, %s2852_s10 }
  0x15   : > { %v2678_v2 = vld [vmem:[%s2961_s20 + $0xf8] sm:$0xff]   ;;  %2437 = vmatpush3.bf16.msra.mxu0 %v2677_v1  ;;  %v2682_v6 = vld [vmem:[%s2961_s20 + $0xf0] sm:$0xff]   ;;  %v2686_v10 = vld [vmem:[%s2961_s20 + $0xe8] sm:$0xff]  }
  0x16   : > { %v2679_v3 = vld [vmem:[%s2961_s20 + $0xb8] sm:$0xff]   ;;  %2458 = vmatprep.subr.bf16.mxu1 %v2678_v2  ;;  %2438 = vmatprep.subr.bf16.mxu0 %v2680_v4  ;;  %v2683_v7 = vld [vmem:[%s2961_s20 + $0xb0] sm:$0xff]   ;;  %v2687_v11 = vld [vmem:[%s2961_s20 + $0xa8] sm:$0xff]  }
  0x17   : > { %2459 = vmatpush3.bf16.msra.mxu1 %v2679_v3  ;;  %v2688_v12 = vld [vmem:[%s2961_s20 + $0x60] sm:$0xff]   ;;  %v2692_v16 = vld [vmem:[%s2961_s20 + $0x58] sm:$0xff]   ;;  %v2696_v20 = vld [vmem:[%s2961_s20 + $0x50] sm:$0xff]  }
  0x18   : > { %2460 = vmatprep.subr.bf16.mxu1 %v2682_v6  ;;  %v2689_v13 = vld [vmem:[%s2961_s20 + $0x20] sm:$0xff]   ;;  %v2693_v17 = vld [vmem:[%s2961_s20 + $0x18] sm:$0xff]   ;;  %v2697_v21 = vld [vmem:[%s2961_s20 + $0x10] sm:$0xff]  }
  0x19   : > { %2439 = vmatpush3.bf16.msra.mxu0 %v2681_v5  ;;  %v2690_v14 = vld [vmem:[%s2961_s20 + $0xe0] sm:$0xff]   ;;  %v2694_v18 = vld [vmem:[%s2961_s20 + $0xd8] sm:$0xff]   ;;  %v2698_v22 = vld [vmem:[%s2961_s20 + $0xd0] sm:$0xff]  }
  0x1a   : > { %2440 = vmatprep.subr.bf16.mxu0 %v2684_v8  ;;  %v2691_v15 = vld [vmem:[%s2961_s20 + $0xa0] sm:$0xff]   ;;  %v2695_v19 = vld [vmem:[%s2961_s20 + $0x98] sm:$0xff]   ;;  %v2699_v23 = vld [vmem:[%s2961_s20 + $0x90] sm:$0xff]  }
  0x1b   : > { %2461 = vmatpush3.bf16.msra.mxu1 %v2683_v7  ;;  %v2700_v24 = vld [vmem:[%s2961_s20 + $0x48] sm:$0xff]   ;;  %v2704_v28 = vld [vmem:[%s2961_s20 + $0x40] sm:$0xff]   ;;  %v2710_v35 = vld [vmem:[%s2961_s20 + $0x178] sm:$0xff]  }
  0x1c   : > { %2462 = vmatprep.subr.bf16.mxu1 %v2686_v10  ;;  %v2701_v25 = vld [vmem:[%s2961_s20 + $0x8] sm:$0xff]   ;;  %v2705_v29 = vld [vmem:[%s2961_s20] sm:$0xff]   ;;  %v2712_v38 = vld [vmem:[%s2961_s20 + $0x138] sm:$0xff]  }
  0x1d   : > { %2441 = vmatpush3.bf16.msra.mxu0 %v2685_v9  ;;  %v2702_v26 = vld [vmem:[%s2961_s20 + $0xc8] sm:$0xff]   ;;  %v2706_v30 = vld [vmem:[%s2961_s20 + $0xc0] sm:$0xff]   ;;  %v2714_v40 = vld [vmem:[%s3011_s28 + $0x78] sm:$0xff]  }
  0x1e   : > { %2442 = vmatprep.subr.bf16.mxu0 %v2688_v12  ;;  %v2703_v27 = vld [vmem:[%s2961_s20 + $0x88] sm:$0xff]   ;;  %v497_v31 = vld [vmem:[%s2997_s25] sm:$0xff]  ;;  %v2715_v41 = vld [vmem:[%s3011_s28 + $0x38] sm:$0xff]  }
  0x1f   : > { %2463 = vmatpush3.bf16.msra.mxu1 %v2687_v11  ;;  %v3002_v32 = vcombine.high %v497_v31, %v497_v31  ;;  %v2708_v33 = vld [vmem:[%s2961_s20 + $0x80] sm:$0xff]   ;;  %v3005_v34 = vcombine.low %v497_v31, %v497_v31  ;;  %v498_v36 = vld [vmem:[%s2997_s25 + $0x8] sm:$0xff]  ;;  %v2716_v42 = vld [vmem:[%s2961_s20 + $0x170] sm:$0xff]  }
  0x20   : > { %2464 = vmatprep.subr.bf16.mxu1 %v2690_v14  ;;  %v3016_v37 = vcombine.high %v498_v36, %v498_v36  ;;  %v3019_v39 = vcombine.low %v498_v36, %v498_v36  ;;  %v2717_v43 = vld [vmem:[%s2961_s20 + $0x130] sm:$0xff]   ;;  %v2720_v46 = vld [vmem:[%s2961_s20 + $0x168] sm:$0xff]   ;;  %v2724_v50 = vld [vmem:[%s2961_s20 + $0x160] sm:$0xff]  }
  0x21   : > { %2443 = vmatpush3.bf16.msra.mxu0 %v2689_v13  ;;  %944 = vmatprep.mubr.bf16.mxu0 %v3002_v32  ;;  %v2718_v44 = vld [vmem:[%s3011_s28 + $0x70] sm:$0xff]   ;;  %v2721_v47 = vld [vmem:[%s2961_s20 + $0x128] sm:$0xff]   ;;  %v2725_v51 = vld [vmem:[%s2961_s20 + $0x120] sm:$0xff]  }
  0x22   : > { %2444 = vmatprep.subr.bf16.mxu0 %v2692_v16  ;;  %984 = vmatprep.mubr.bf16.mxu1 %v3016_v37  ;;  %v2719_v45 = vld [vmem:[%s3011_s28 + $0x30] sm:$0xff]   ;;  %v2722_v48 = vld [vmem:[%s3011_s28 + $0x68] sm:$0xff]   ;;  %v2726_v52 = vld [vmem:[%s3011_s28 + $0x60] sm:$0xff]  }
  0x23   : > { %2465 = vmatpush3.bf16.msra.mxu1 %v2691_v15  ;;  %v2723_v49 = vld [vmem:[%s3011_s28 + $0x28] sm:$0xff]   ;;  %v2727_v53 = vld [vmem:[%s3011_s28 + $0x20] sm:$0xff]   ;;  %v2728_v54 = vld [vmem:[%s2961_s20 + $0x158] sm:$0xff]  }
  0x24   : > { %2466 = vmatprep.subr.bf16.mxu1 %v2694_v18  ;;  %v2729_v55 = vld [vmem:[%s2961_s20 + $0x118] sm:$0xff]   ;;  %v2732_v58 = vld [vmem:[%s2961_s20 + $0x150] sm:$0xff]   ;;  %v2736_v62 = vld [vmem:[%s2961_s20 + $0x148] sm:$0xff]  }
  0x25   : > { %2445 = vmatpush3.bf16.msra.mxu0 %v2693_v17  ;;  %v2730_v56 = vld [vmem:[%s3011_s28 + $0x58] sm:$0xff]   ;;  %v2733_v59 = vld [vmem:[%s2961_s20 + $0x110] sm:$0xff]   ;;  %v2737_v63 = vld [vmem:[%s2961_s20 + $0x108] sm:$0xff]  }
  0x26   : > { %2446 = vmatprep.subr.bf16.mxu0 %v2696_v20  ;;  %v2731_v57 = vld [vmem:[%s3011_s28 + $0x18] sm:$0xff]   ;;  %v2734_v60 = vld [vmem:[%s3011_s28 + $0x50] sm:$0xff]   ;;  %v2738_v0 = vld [vmem:[%s3011_s28 + $0x48] sm:$0xff]  }
  0x27   : > { %2467 = vmatpush3.bf16.msra.mxu1 %v2695_v19  ;;  %v2735_v61 = vld [vmem:[%s3011_s28 + $0x10] sm:$0xff]   ;;  %v2739_v1 = vld [vmem:[%s3011_s28 + $0x8] sm:$0xff]   ;;  %v2740_v2 = vld [vmem:[%s2961_s20 + $0x140] sm:$0xff]  }
  0x28   : > { %2468 = vmatprep.subr.bf16.mxu1 %v2698_v22  ;;  %v2741_v3 = vld [vmem:[%s2961_s20 + $0x100] sm:$0xff]   ;;  %v499_v5 = vld [vmem:[%s2997_s25 + $0x10] sm:$0xff]  ;;  %v2746_v9 = vld [vmem:[%s3011_s28 + $0xf8] sm:$0xff]   ;;  %s473_s20 = sadd.s32 %s2848_s30, %s472_s17 }
  0x29   : > { %2447 = vmatpush3.bf16.msra.mxu0 %v2697_v21  ;;  %v2742_v4 = vld [vmem:[%s3011_s28 + $0x40] sm:$0xff]   ;;  %v3055_v6 = vcombine.low %v499_v5, %v499_v5  ;;  %v3057_v7 = vcombine.high %v499_v5, %v499_v5  ;;  %v2747_v10 = vld [vmem:[%s3011_s28 + $0xb8] sm:$0xff]   ;;  %v2750_v13 = vld [vmem:[%s3011_s28 + $0xf0] sm:$0xff]   ;;  %p474_p7 = scmp.lt.s32.totalorder %s473_s20, 23 }
  0x2a   : > { %2448 = vmatprep.subr.bf16.mxu0 %v2700_v24  ;;  %v2745_v8 = vld [vmem:[%s3011_s28] sm:$0xff]   ;;  %v2748_v11 = vld [vmem:[%s3011_s28 + $0x178] sm:$0xff]   ;;  %v2751_v14 = vld [vmem:[%s3011_s28 + $0xb0] sm:$0xff]  }
  0x2b   : > { %2469 = vmatpush3.bf16.msra.mxu1 %v2699_v23  ;;  %v2749_v12 = vld [vmem:[%s3011_s28 + $0x138] sm:$0xff]   ;;  %v2752_v15 = vld [vmem:[%s3011_s28 + $0x170] sm:$0xff]   ;;  %v2754_v17 = vld [vmem:[%s3011_s28 + $0xe8] sm:$0xff]   ;;  %s3226_s20 = smov (!%p474_p7, %s473_s20), 23 }
  0x2c   : > { %2470 = vmatprep.subr.bf16.mxu1 %v2702_v26  ;;  %v2753_v16 = vld [vmem:[%s3011_s28 + $0x130] sm:$0xff]   ;;  %v2755_v18 = vld [vmem:[%s3011_s28 + $0xa8] sm:$0xff]   ;;  %v2758_v21 = vld [vmem:[%s3011_s28 + $0xe0] sm:$0xff]   ;;  %s3165_s24 = sshll.u32 %s3226_s20, 2 }
  0x2d   : > { %2449 = vmatpush3.bf16.msra.mxu0 %v2701_v25  ;;  %v2756_v19 = vld [vmem:[%s3011_s28 + $0x168] sm:$0xff]   ;;  %v2759_v22 = vld [vmem:[%s3011_s28 + $0xa0] sm:$0xff]   ;;  %v2762_v25 = vld [vmem:[%s3011_s28 + $0xd8] sm:$0xff]   ;;  %s477_s25 = scalar_lea.vmem %s3212_s7, %s3165_s24  ;;  %s493_s30 = scalar_lea.vmem %s3214_s9, %s3165_s24 }
  0x2e   : > { %2450 = vmatprep.subr.bf16.mxu0 %v2704_v28  ;;  %v2757_v20 = vld [vmem:[%s3011_s28 + $0x128] sm:$0xff]   ;;  %v2760_v23 = vld [vmem:[%s3011_s28 + $0x160] sm:$0xff]   ;;  %v2763_v26 = vld [vmem:[%s3011_s28 + $0x98] sm:$0xff]  }
  0x2f   : > { %2471 = vmatpush3.bf16.msra.mxu1 %v2703_v27  ;;  %v2761_v24 = vld [vmem:[%s3011_s28 + $0x120] sm:$0xff]   ;;  %v2764_v27 = vld [vmem:[%s3011_s28 + $0x158] sm:$0xff]   ;;  %v2768_v31 = vld [vmem:[%s3011_s28 + $0x150] sm:$0xff]  }
  0x30   : > { %2472 = vmatprep.subr.bf16.mxu1 %v2706_v30  ;;  %v2765_v28 = vld [vmem:[%s3011_s28 + $0x118] sm:$0xff]   ;;  %v2767_v30 = vld [vmem:[%s3011_s28 + $0x90] sm:$0xff]   ;;  %v2771_v36 = vld [vmem:[%s3011_s28 + $0x88] sm:$0xff]  }
  0x31   : > { %2451 = vmatpush3.bf16.msra.mxu0 %v2705_v29  ;;  %v2766_v29 = vld [vmem:[%s3011_s28 + $0xd0] sm:$0xff]   ;;  %v2804_v5 = vld [vmem:[%s3099_s19 + $0xc8] sm:$0xff]  }
  0x32   : > { %2480 = vmatprep.subr.bf16.mxu0 %v2710_v35  ;;  %v2770_v35 = vld [vmem:[%s3011_s28 + $0xc8] sm:$0xff]  }
  0x33   : > { %2473 = vmatpush3.bf16.msra.mxu1 %v2708_v33  ;;  %v2769_v33 = vld [vmem:[%s3011_s28 + $0x110] sm:$0xff]  }
  0x34   : > { %945 = vmatmul.mubr.bf16.vlgmr.msra.gmra.mxu0 %v3005_v34  ;;  %2502 = vmatprep.subr.bf16.mxu1 %v2714_v40  ;;  %v2773_v40 = vld [vmem:[%s3011_s28 + $0x108] sm:$0xff]  }
  0x35   : > { %2481 = vmatpush3.bf16.msra.mxu0 %v2712_v38  ;;  %1024 = vmatprep.mubr.bf16.mxu0 %v3057_v7  ;;  %v2772_v38 = vld [vmem:[%s3011_s28 + $0x148] sm:$0xff]  }
  0x36   : > { %985 = vmatmul.mubr.bf16.vlgmr.msra.gmra.mxu1 %v3019_v39  ;;  %2482 = vmatprep.subr.bf16.mxu0 %v2716_v42  ;;  %v2775_v42 = vld [vmem:[%s3011_s28 + $0x80] sm:$0xff]  }
  0x37   : > { %2503 = vmatpush3.bf16.msra.mxu1 %v2715_v41  ;;  %1458 = vmatprep.mubr.bf16.mxu1 %v3002_v32  ;;  %v2774_v41 = vld [vmem:[%s3011_s28 + $0xc0] sm:$0xff]  }
  0x38   : > { %2504 = vmatprep.subr.bf16.mxu1 %v2718_v44  ;;  %v2777_v44 = vld [vmem:[%s3011_s28 + $0x100] sm:$0xff]  }
  0x39   : > { %2483 = vmatpush3.bf16.msra.mxu0 %v2717_v43  ;;  %v2776_v43 = vld [vmem:[%s3011_s28 + $0x140] sm:$0xff]   ;;  %s468_s28 = scalar_lea.vmem %s3210_s5, %s2952_s16 }
  0x3a   : > { %2484 = vmatprep.subr.bf16.mxu0 %v2720_v46  ;;  %v2779_v46 = vld [vmem:[%s3099_s19 + $0x38] sm:$0xff]  }
  0x3b   : > { %2505 = vmatpush3.bf16.msra.mxu1 %v2719_v45  ;;  %v2778_v45 = vld [vmem:[%s3099_s19 + $0x78] sm:$0xff]  }
  0x3c   : > { %2506 = vmatprep.subr.bf16.mxu1 %v2722_v48  ;;  %v2781_v48 = vld [vmem:[%s3099_s19 + $0xb8] sm:$0xff]  }
  0x3d   : > { %2485 = vmatpush3.bf16.msra.mxu0 %v2721_v47  ;;  %v2780_v47 = vld [vmem:[%s3099_s19 + $0xf8] sm:$0xff]  }
  0x3e   : > { %2486 = vmatprep.subr.bf16.mxu0 %v2724_v50  ;;  %v2783_v50 = vld [vmem:[%s3099_s19 + $0x30] sm:$0xff]  }
  0x3f   : > { %2507 = vmatpush3.bf16.msra.mxu1 %v2723_v49  ;;  %v2782_v49 = vld [vmem:[%s3099_s19 + $0x70] sm:$0xff]  }
  0x40   : > { %2508 = vmatprep.subr.bf16.mxu1 %v2726_v52  ;;  %v2785_v52 = vld [vmem:[%s3099_s19 + $0xb0] sm:$0xff]  }
  0x41   : > { %2487 = vmatpush3.bf16.msra.mxu0 %v2725_v51  ;;  %v2784_v51 = vld [vmem:[%s3099_s19 + $0xf0] sm:$0xff]  }
  0x42   : > { %2488 = vmatprep.subr.bf16.mxu0 %v2728_v54  ;;  %v2788_v54 = vld [vmem:[%s3099_s19 + $0xe8] sm:$0xff]  }
  0x43   : > { %2509 = vmatpush3.bf16.msra.mxu1 %v2727_v53  ;;  %v2787_v53 = vld [vmem:[%s3099_s19 + $0x28] sm:$0xff]  }
  0x44   : > { %2510 = vmatprep.subr.bf16.mxu1 %v2730_v56  ;;  %v2791_v56 = vld [vmem:[%s3099_s19 + $0x20] sm:$0xff]  }
  0x45   : > { %2489 = vmatpush3.bf16.msra.mxu0 %v2729_v55  ;;  %v2789_v55 = vld [vmem:[%s3099_s19 + $0xa8] sm:$0xff]  }
  0x46   : > { %2490 = vmatprep.subr.bf16.mxu0 %v2732_v58  ;;  %v2793_v58 = vld [vmem:[%s3099_s19 + $0xa0] sm:$0xff]  }
  0x47   : > { %2511 = vmatpush3.bf16.msra.mxu1 %v2731_v57  ;;  %v2792_v57 = vld [vmem:[%s3099_s19 + $0xe0] sm:$0xff]  }
  0x48   : > { %2512 = vmatprep.subr.bf16.mxu1 %v2734_v60  ;;  %v2795_v60 = vld [vmem:[%s3099_s19 + $0x18] sm:$0xff]  }
  0x49   : > { %2491 = vmatpush3.bf16.msra.mxu0 %v2733_v59  ;;  %v2794_v59 = vld [vmem:[%s3099_s19 + $0x58] sm:$0xff]  }
  0x4a   : > { %2492 = vmatprep.subr.bf16.mxu0 %v2736_v62  ;;  %v2797_v62 = vld [vmem:[%s3099_s19 + $0x98] sm:$0xff]  }
  0x4b   : > { %2513 = vmatpush3.bf16.msra.mxu1 %v2735_v61  ;;  %v2796_v61 = vld [vmem:[%s3099_s19 + $0xd8] sm:$0xff]  }
  0x4c   : > { %2514 = vmatprep.subr.bf16.mxu1 %v2738_v0  ;;  %v2799_v0 = vld [vmem:[%s3099_s19 + $0x10] sm:$0xff]  }
  0x4d   : > { %2493 = vmatpush3.bf16.msra.mxu0 %v2737_v63  ;;  %v2798_v63 = vld [vmem:[%s3099_s19 + $0x50] sm:$0xff]  }
  0x4e   : > { %2494 = vmatprep.subr.bf16.mxu0 %v2740_v2  ;;  %v2801_v2 = vld [vmem:[%s3099_s19 + $0x90] sm:$0xff]  }
  0x4f   : > { %2515 = vmatpush3.bf16.msra.mxu1 %v2739_v1  ;;  %v2800_v1 = vld [vmem:[%s3099_s19 + $0xd0] sm:$0xff]  }
  0x50   : > { %2516 = vmatprep.subr.bf16.mxu1 %v2742_v4  ;;  %v2803_v4 = vld [vmem:[%s3099_s19 + $0x8] sm:$0xff]  }
  0x51   : > { %2495 = vmatpush3.bf16.msra.mxu0 %v2741_v3  ;;  %v2802_v3 = vld [vmem:[%s3099_s19 + $0x48] sm:$0xff]  }
  0x52   : > { %2524 = vmatprep.subr.bf16.mxu0 %v2746_v9  ;;  %v2806_v9 = vld [vmem:[%s3099_s19 + $0x40] sm:$0xff]  }
  0x53   : > { %2517 = vmatpush3.bf16.msra.mxu1 %v2745_v8  ;;  %v2805_v8 = vld [vmem:[%s3099_s19 + $0x88] sm:$0xff]  }
  0x54   : > { %1025 = vmatmul.mubr.bf16.vlgmr.msra.gmra.mxu0 %v3055_v6  ;;  %2546 = vmatprep.subr.bf16.mxu1 %v2748_v11  ;;  %v2808_v11 = vld [vmem:[%s3099_s19 + $0xc0] sm:$0xff]  }
  0x55   : > { %2525 = vmatpush3.bf16.msra.mxu0 %v2747_v10  ;;  %1498 = vmatprep.mubr.bf16.mxu0 %v3016_v37  ;;  %v2807_v10 = vld [vmem:[%s3099_s19] sm:$0xff]  }
  0x56   : > { %1459 = vmatmul.mubr.bf16.vlgmr.msra.gmra.mxu1 %v3005_v34  ;;  %2526 = vmatprep.subr.bf16.mxu0 %v2750_v13  ;;  %v2810_v13 = vld [vmem:[%s3099_s19 + $0x178] sm:$0xff]  }
  0x57   : > { %2547 = vmatpush3.bf16.msra.mxu1 %v2749_v12  ;;  %1538 = vmatprep.mubr.bf16.mxu1 %v3057_v7  ;;  %v2809_v12 = vld [vmem:[%s3099_s19 + $0x80] sm:$0xff]  }
  0x58   : > { %2548 = vmatprep.subr.bf16.mxu1 %v2752_v15  ;;  %v2812_v15 = vld [vmem:[%s3099_s19 + $0x170] sm:$0xff]  }
  0x59   : > { %2527 = vmatpush3.bf16.msra.mxu0 %v2751_v14  ;;  %v2811_v14 = vld [vmem:[%s3099_s19 + $0x138] sm:$0xff]  }
  0x5a   : > { %2528 = vmatprep.subr.bf16.mxu0 %v2754_v17  ;;  %v2814_v17 = vld [vmem:[%s3099_s19 + $0x168] sm:$0xff]  }
  0x5b   : > { %2549 = vmatpush3.bf16.msra.mxu1 %v2753_v16  ;;  %v2813_v16 = vld [vmem:[%s3099_s19 + $0x130] sm:$0xff]  }
  0x5c   : > { %2550 = vmatprep.subr.bf16.mxu1 %v2756_v19  ;;  %v2817_v19 = vld [vmem:[%s3099_s19 + $0x120] sm:$0xff]  }
  0x5d   : > { %2529 = vmatpush3.bf16.msra.mxu0 %v2755_v18  ;;  %v2815_v18 = vld [vmem:[%s3099_s19 + $0x128] sm:$0xff]  }
  0x5e   : > { %2530 = vmatprep.subr.bf16.mxu0 %v2758_v21  ;;  %v2819_v21 = vld [vmem:[%s3099_s19 + $0x118] sm:$0xff]  }
  0x5f   : > { %2551 = vmatpush3.bf16.msra.mxu1 %v2757_v20  ;;  %v2818_v20 = vld [vmem:[%s3099_s19 + $0x158] sm:$0xff]  }
  0x60   : > { %2552 = vmatprep.subr.bf16.mxu1 %v2760_v23  ;;  %v2823_v23 = vld [vmem:[%s3099_s19 + $0x108] sm:$0xff]  }
  0x61   : > { %2531 = vmatpush3.bf16.msra.mxu0 %v2759_v22  ;;  %v2822_v22 = vld [vmem:[%s3099_s19 + $0x148] sm:$0xff]  }
  0x62   : > { %2532 = vmatprep.subr.bf16.mxu0 %v2762_v25  ;;  %v2825_v25 = vld [vmem:[%s3099_s19 + $0x100] sm:$0xff]  }
  0x63   : > { %2553 = vmatpush3.bf16.msra.mxu1 %v2761_v24  ;;  %v2824_v24 = vld [vmem:[%s3099_s19 + $0x140] sm:$0xff]  }
  0x64   : > { %2554 = vmatprep.subr.bf16.mxu1 %v2764_v27 }
  0x65   : > { %2533 = vmatpush3.bf16.msra.mxu0 %v2763_v26 }
  0x66   : > { %2534 = vmatprep.subr.bf16.mxu0 %v2766_v29 }
  0x67   : > { %2555 = vmatpush3.bf16.msra.mxu1 %v2765_v28 }
  0x68   : > { %2556 = vmatprep.subr.bf16.mxu1 %v2768_v31 }
  0x69   : > { %2535 = vmatpush3.bf16.msra.mxu0 %v2767_v30 }
  0x6a   : > { %2536 = vmatprep.subr.bf16.mxu0 %v2770_v35 }
  0x6b   : > { %2557 = vmatpush3.bf16.msra.mxu1 %v2769_v33 }
  0x6c   : > { %2558 = vmatprep.subr.bf16.mxu1 %v2772_v38  ;;  %v2281_v38 = vld [vmem:[%s465_s23] ss:$0 sm:$0xff] }
  0x6d   : > { %2537 = vmatpush3.bf16.msra.mxu0 %v2771_v36 }
  0x6e   : > { %2538 = vmatprep.subr.bf16.mxu0 %v2774_v41 }
  0x6f   : > { %2559 = vmatpush3.bf16.msra.mxu1 %v2773_v40 }
  0x70   : > { %2560 = vmatprep.subr.bf16.mxu1 %v2776_v43 }
  0x71   : > { %2539 = vmatpush3.bf16.msra.mxu0 %v2775_v42 }
  0x72   : > { %2568 = vmatprep.subr.bf16.mxu0 %v2778_v45 }
  0x73   : > { %2561 = vmatpush3.bf16.msra.mxu1 %v2777_v44 }
  0x74   : > { %1499 = vmatmul.mubr.bf16.vlgmr.msra.gmra.mxu0 %v3019_v39  ;;  %2590 = vmatprep.subr.bf16.mxu1 %v2780_v47 }
  0x75   : > { %2569 = vmatpush3.bf16.msra.mxu0 %v2779_v46  ;;  %1971 = vmatprep.mubr.bf16.mxu0 %v3002_v32  ;;  %v2786_v32 = vld [vmem:[%s3099_s19 + $0x68] sm:$0xff]  }
  0x76   : > { %1539 = vmatmul.mubr.bf16.vlgmr.msra.gmra.mxu1 %v3055_v6  ;;  %2570 = vmatprep.subr.bf16.mxu0 %v2782_v49 }
  0x77   : > { %2591 = vmatpush3.bf16.msra.mxu1 %v2781_v48  ;;  %2011 = vmatprep.mubr.bf16.mxu1 %v3016_v37  ;;  %v2790_v37 = vld [vmem:[%s3099_s19 + $0x60] sm:$0xff]  }
  0x78   : > { %2592 = vmatprep.subr.bf16.mxu1 %v2784_v51 }
  0x79   : > { %2571 = vmatpush3.bf16.msra.mxu0 %v2783_v50 }
  0x7a   : > { %2572 = vmatprep.subr.bf16.mxu0 %v2786_v32 }
  0x7b   : > { %2593 = vmatpush3.bf16.msra.mxu1 %v2785_v52 }
  0x7c   : > { %2594 = vmatprep.subr.bf16.mxu1 %v2788_v54 }
  0x7d   : > { %2573 = vmatpush3.bf16.msra.mxu0 %v2787_v53  ;;  %v2336_v53 = vld [vmem:[%s468_s28] ss:$0 sm:$0xff] }
  0x7e   : > { %2574 = vmatprep.subr.bf16.mxu0 %v2790_v37 }
  0x7f   : > { %2595 = vmatpush3.bf16.msra.mxu1 %v2789_v55 }
  0x80   : > { %2596 = vmatprep.subr.bf16.mxu1 %v2792_v57 }
  0x81   : > { %2575 = vmatpush3.bf16.msra.mxu0 %v2791_v56 }
  0x82   : > { %2576 = vmatprep.subr.bf16.mxu0 %v2794_v59 }
  0x83   : > { %2597 = vmatpush3.bf16.msra.mxu1 %v2793_v58 }
  0x84   : > { %2598 = vmatprep.subr.bf16.mxu1 %v2796_v61 }
  0x85   : > { %2577 = vmatpush3.bf16.msra.mxu0 %v2795_v60 }
  0x86   : > { %2578 = vmatprep.subr.bf16.mxu0 %v2798_v63 }
  0x87   : > { %2599 = vmatpush3.bf16.msra.mxu1 %v2797_v62 }
  0x88   : > { %2600 = vmatprep.subr.bf16.mxu1 %v2800_v1 }
  0x89   : > { %2579 = vmatpush3.bf16.msra.mxu0 %v2799_v0 }
  0x8a   : > { %2580 = vmatprep.subr.bf16.mxu0 %v2802_v3 }
  0x8b   : > { %2601 = vmatpush3.bf16.msra.mxu1 %v2801_v2 }
  0x8c   : > { %2602 = vmatprep.subr.bf16.mxu1 %v2804_v5 }
  0x8d   : > { %2581 = vmatpush3.bf16.msra.mxu0 %v2803_v4 }
  0x8e   : > { %2582 = vmatprep.subr.bf16.mxu0 %v2806_v9 }
  0x8f   : > { %2603 = vmatpush3.bf16.msra.mxu1 %v2805_v8 }
  0x90   : > { %2604 = vmatprep.subr.bf16.mxu1 %v2808_v11 }
  0x91   : > { %2583 = vmatpush3.bf16.msra.mxu0 %v2807_v10 }
  0x92   : > { %2612 = vmatprep.subr.bf16.mxu0 %v2810_v13 }
  0x93   : > { %2605 = vmatpush3.bf16.msra.mxu1 %v2809_v12 }
  0x94   : > { %1972 = vmatmul.mubr.bf16.vlgmr.msra.gmra.mxu0 %v3005_v34  ;;  %v2816_v34 = vld [vmem:[%s3099_s19 + $0x160] sm:$0xff]  }
  0x95   : > { %2613 = vmatpush3.bf16.msra.mxu0 %v2811_v14  ;;  %2051 = vmatprep.mubr.bf16.mxu0 %v3057_v7  ;;  %v2820_v7 = vld [vmem:[%s3099_s19 + $0x150] sm:$0xff]   ;;  %v2385_v14 = vld [vmem:[%s471_s21] ss:$0 sm:$0xff] }
  0x96   : > { %2012 = vmatmul.mubr.bf16.vlgmr.msra.gmra.mxu1 %v3019_v39  ;;  %2614 = vmatprep.subr.bf16.mxu0 %v2812_v15  ;;  %v2821_v39 = vld [vmem:[%s3099_s19 + $0x110] sm:$0xff]   ;;  %s485_s19 = scalar_lea.vmem %s3213_s8, %s3165_s24 }
  0x99   : > { %2615 = vmatpush3.bf16.msra.mxu0 %v2813_v16 }
  0x9a   : > { %2616 = vmatprep.subr.bf16.mxu0 %v2814_v17 }
  0x9d   : > { %2617 = vmatpush3.bf16.msra.mxu0 %v2815_v18 }
  0x9e   : > { %2618 = vmatprep.subr.bf16.mxu0 %v2816_v34 }
  0xa1   : > { %2619 = vmatpush3.bf16.msra.mxu0 %v2817_v19 }
  0xa2   : > { %2620 = vmatprep.subr.bf16.mxu0 %v2818_v20 }
  0xa5   : > { %2621 = vmatpush3.bf16.msra.mxu0 %v2819_v21 }
  0xa6   : > { %2622 = vmatprep.subr.bf16.mxu0 %v2820_v7 }
  0xa9   : > { %2623 = vmatpush3.bf16.msra.mxu0 %v2821_v39 }
  0xaa   : > { %2624 = vmatprep.subr.bf16.mxu0 %v2822_v22 }
  0xad   : > { %2625 = vmatpush3.bf16.msra.mxu0 %v2823_v23 }
  0xae   : > { %2626 = vmatprep.subr.bf16.mxu0 %v2824_v24 }
  0xb1   : > { %2627 = vmatpush3.bf16.msra.mxu0 %v2825_v25 }
  0xb4   : > { %2052 = vmatmul.mubr.bf16.vlgmr.msra.gmra.mxu0 %v3055_v6 }
  0xf4   : > { %v2452_v26 = vpop.f32.mrf.mxu0 }
  0xf6   : > { %v2453_v27 = vpop.f32.mrf.mxu0  ;;  %v2474_v28 = vpop.f32.mrf.mxu1 }
  0xf7   : > { %v2454_v36 = vadd.f32 %v2453_v27, %v2452_v26 }
  0xf8   : > { %v2455_v29 = vpop.f32.mrf.mxu0  ;;  %v2475_v30 = vpop.f32.mrf.mxu1 }
  0xf9   : > { %v947_v40 = vadd.f32 %v2454_v36, %v2281_v38  ;;  %v2476_v41 = vadd.f32 %v2475_v30, %v2474_v28 }
  0xfa   : > { %v2456_v31 = vpop.f32.mrf.mxu0  ;;  %v2477_v33 = vpop.f32.mrf.mxu1 }
  0xfb   : > { %v987_v44 = vadd.f32 %v2476_v41, %v947_v40 }
  0xfc   : > { %v2478_v35 = vpop.f32.mrf.mxu1 }
 0x114   : > { %v2496_v6 = vpop.f32.mrf.mxu0 }
 0x116   : > { %v2497_v42 = vpop.f32.mrf.mxu0  ;;  %v2518_v43 = vpop.f32.mrf.mxu1 }
 0x117   : > { %v2498_v45 = vadd.f32 %v2497_v42, %v2496_v6 }
 0x118   : > { %v2499_v46 = vpop.f32.mrf.mxu0  ;;  %v2519_v47 = vpop.f32.mrf.mxu1 }
 0x119   : > { %v1027_v48 = vadd.f32 %v2498_v45, %v987_v44  ;;  %v2520_v32 = vadd.f32 %v2519_v47, %v2518_v43 }
 0x11a   : > { %v2500_v49 = vpop.f32.mrf.mxu0  ;;  %v2521_v50 = vpop.f32.mrf.mxu1 }
 0x11b   : > { %v1032_v51 = vpack.c.bf16 %v1027_v48, %v1027_v48  ;;  %v1461_v55 = vadd.f32 %v2520_v32, %v2336_v53 }
 0x11c   : > { %v2522_v52 = vpop.f32.mrf.mxu1 }
 0x11d   : > { %1034 = vst.msk [vmem:[%s477_s25] sm:$0xf] %vm1033_vm0, %v1032_v51 }
 0x134   : > { %v2540_v54 = vpop.f32.mrf.mxu0 }
 0x136   : > { %v2541_v37 = vpop.f32.mrf.mxu0  ;;  %v2562_v56 = vpop.f32.mrf.mxu1 }
 0x137   : > { %v2542_v57 = vadd.f32 %v2541_v37, %v2540_v54 }
 0x138   : > { %v2543_v58 = vpop.f32.mrf.mxu0  ;;  %v2563_v59 = vpop.f32.mrf.mxu1 }
 0x139   : > { %v1501_v60 = vadd.f32 %v2542_v57, %v1461_v55  ;;  %v2564_v61 = vadd.f32 %v2563_v59, %v2562_v56 }
 0x13a   : > { %v2544_v62 = vpop.f32.mrf.mxu0  ;;  %v2565_v63 = vpop.f32.mrf.mxu1 }
 0x13b   : > { %v1541_v0 = vadd.f32 %v2564_v61, %v1501_v60 }
 0x13c   : > { %v2566_v1 = vpop.f32.mrf.mxu1 }
 0x13d   : > { %v1546_v2 = vpack.c.bf16 %v1541_v0, %v1541_v0 }
 0x13f   : > { %1547 = vst.msk [vmem:[%s485_s19] sm:$0xf] %vm1033_vm0, %v1546_v2 }
 0x154   : > { %v2584_v3 = vpop.f32.mrf.mxu0 }
 0x156   : > { %v2585_v4 = vpop.f32.mrf.mxu0  ;;  %v2606_v5 = vpop.f32.mrf.mxu1 }
 0x157   : > { %v2586_v13 = vadd.f32 %v2585_v4, %v2584_v3 }
 0x158   : > { %v2587_v8 = vpop.f32.mrf.mxu0  ;;  %v2607_v9 = vpop.f32.mrf.mxu1 }
 0x159   : > { %v1974_v15 = vadd.f32 %v2586_v13, %v2385_v14  ;;  %v2608_v16 = vadd.f32 %v2607_v9, %v2606_v5 }
 0x15a   : > { %v2588_v10 = vpop.f32.mrf.mxu0  ;;  %v2609_v11 = vpop.f32.mrf.mxu1 }
 0x15b   : > { %v2014_v34 = vadd.f32 %v2608_v16, %v1974_v15 }
 0x15c   : > { %v2610_v12 = vpop.f32.mrf.mxu1 }
 0x174   : > { %v2628_v17 = vpop.f32.mrf.mxu0 }
 0x176   : > { %v2629_v18 = vpop.f32.mrf.mxu0 }
 0x177   : > { %v2630_v19 = vadd.f32 %v2629_v18, %v2628_v17 }
 0x178   : > { %v2631_v20 = vpop.f32.mrf.mxu0 }
 0x179   : > { %v2054_v21 = vadd.f32 %v2630_v19, %v2014_v34 }
 0x17a   : > { %v2632_v7 = vpop.f32.mrf.mxu0 }
 0x17b   : > { %v2059_v39 = vpack.c.bf16 %v2054_v21, %v2054_v21 }
 0x17d   : > { %2060 = vst.msk [vmem:[%s493_s30] sm:$0xf] %vm1033_vm0, %v2059_v39 }
 0x17e PF: > { %s20_s13 = sadd.s32 1, %s2864_s13   ;;  %s3215_s30 = smov %s2856_s11 }
 0x17f   : > { %p17_p8 = scmp.ge.s32.totalorder %s20_s13, 26   ;;  %s3216_s10 = smov %s2860_s12 }
 0x180   : > { %s3217_s11 = smov %s3220_s14  ;;  %s3218_s12 = smov %s3224_s15 }
 0x181   :  { %19 = sbr.rel (!%p17_p8) target bundleno = 3 (0x3), region = 120 }

// kernel: net_forward.18
= control target key start
LH: loop header
LB: loop body
LE: loop exit
PB: predicated region body
PF: predicated region fallthrough
CT: control target
= control target key end

     0   :  { %s1938_s12 = smov 0   ;;  %s2293_s0 = inlined_call_operand.vmem [shape: bf16[24,8,64], index: 0, kind: input, shape index: {}]   ;;  %s2294_s1 = inlined_call_operand.vmem [shape: bf16[24,8,64], index: 1, kind: input, shape index: {}]   ;;  %s2295_s2 = inlined_call_operand.vmem [shape: bf16[24,8,64], index: 2, kind: input, shape index: {}]   ;;  %s2296_s3 = inlined_call_operand.vmem [shape: bf16[24,8,64], index: 3, kind: output, shape index: {}]  }
   0x1 LB: > { %s1623_s13 = sadd.s32 4294967295, %s1914_s12   ;;  %p1627_p0 = scmp.ge.s32.totalorder %s1914_s12, 1  ;;  %s1914_s12 = sphi %s1938_s12, %s13_s12  }
   0x2   : > { %p160_p1 = scmp.lt.s32.totalorder %s1914_s12, 3 }
   0x4   : > { %p161_p2 = pnand %p1627_p0, %p160_p1 }
   0x5   : > { %s194_s14 = smul.u32 (!%p161_p2), 12, %s1623_s13 }
   0x6   : > { %164 = sbr.rel (%p161_p2) target bundleno = 775 (0x307), region = 32 }
   0x7   : > { %p195_p3 = scmp.lt.s32.totalorder (!%p161_p2), %s194_s14, 23 }
   0xb   : > { %v1916_v0 = vmov 0.0   ;;  %vm1917_vm0 = vmmov 0   ;;  %s2298_s14 = smov (!%p195_p3, %s194_s14), 23  ;;  %vm255_vm1 = vcmask 523264   ;;  %vm820_vm2 = vcmask 64512  }
   0xc   : > { %1706 = vmatprep.subr.bf16.mxu0 %v1916_v0  ;;  %1712 = vmatprep.subr.bf16.mxu1 %v1916_v0  ;;  %s1952_s15 = sshll.u32 %s2298_s14, 2  ;;  %vm968_vm3 = vcmask 1043456   ;;  %vm1530_vm4 = vcmask 519168  }
   0xd   : > { %1708 = vmatprep.mubr.msk.bf16.mxu0 %vm1917_vm0, %v1916_v0  ;;  %1714 = vmatprep.mubr.msk.bf16.mxu1 %vm1917_vm0, %v1916_v0  ;;  %s1958_s18 = scalar_lea.vmem %s2294_s1, %s1952_s15  ;;  %s1968_s21 = scalar_lea.vmem %s2293_s0, %s1952_s15 }
   0xe   : > { %v231_v1 = vld [vmem:[%s1958_s18] sm:$0xf]  ;;  %v232_v2 = vld [vmem:[%s1958_s18 + $0x4] sm:$0xf]  ;;  %v233_v5 = vld [vmem:[%s1958_s18 + $0x8] sm:$0xf]  ;;  %s2140_s24 = scalar_lea.vmem %s2295_s2, %s1952_s15  ;;  %s2264_s27 = scalar_lea.vmem %s2296_s3, %s1952_s15 }
   0xf   : > { %v260_v3 = vsel %vm255_vm1, %v231_v1, 0  ;;  %v306_v4 = vsel %vm255_vm1, %v232_v2, 0  ;;  %v234_v6 = vld [vmem:[%s1958_s18 + $0xc] sm:$0xf]  ;;  %v219_v7 = vld [vmem:[%s1968_s21] sm:$0xf] }
  0x10   : > { %1707 = vmatpush3.bf16.xpose.msra.mxu0 %v260_v3  ;;  %1713 = vmatpush3.bf16.xpose.msra.mxu1 %v306_v4  ;;  %v220_v8 = vld [vmem:[%s1968_s21 + $0x4] sm:$0xf]  ;;  %v352_v9 = vsel %vm255_vm1, %v233_v5, 0  ;;  %v398_v10 = vsel %vm255_vm1, %v234_v6, 0  ;;  %v235_v11 = vld [vmem:[%s1958_s18 + $0x10] sm:$0xf] }
  0x11   : > { %1718 = vmatprep.subr.bf16.mxu0 %v1916_v0  ;;  %1724 = vmatprep.subr.bf16.mxu1 %v1916_v0  ;;  %v236_v12 = vld [vmem:[%s1958_s18 + $0x14] sm:$0xf]  ;;  %v221_v13 = vld [vmem:[%s1968_s21 + $0x8] sm:$0xf]  ;;  %v222_v14 = vld [vmem:[%s1968_s21 + $0xc] sm:$0xf] }
  0x12   : > { %v444_v15 = vsel %vm255_vm1, %v235_v11, 0  ;;  %v490_v16 = vsel %vm255_vm1, %v236_v12, 0  ;;  %v237_v17 = vld [vmem:[%s1958_s18 + $0x18] sm:$0xf]  ;;  %v238_v18 = vld [vmem:[%s1958_s18 + $0x1c] sm:$0xf] }
  0x13   : > { %v223_v19 = vld [vmem:[%s1968_s21 + $0x10] sm:$0xf]  ;;  %v224_v20 = vld [vmem:[%s1968_s21 + $0x14] sm:$0xf]  ;;  %v536_v21 = vsel %vm255_vm1, %v237_v17, 0  ;;  %v582_v22 = vsel %vm255_vm1, %v238_v18, 0 }
  0x14   : > { %v239_v23 = vld [vmem:[%s1958_s18 + $0x20] sm:$0xf]  ;;  %v240_v24 = vld [vmem:[%s1958_s18 + $0x24] sm:$0xf]  ;;  %v225_v25 = vld [vmem:[%s1968_s21 + $0x18] sm:$0xf] }
  0x15   : > { %v226_v26 = vld [vmem:[%s1968_s21 + $0x1c] sm:$0xf]  ;;  %v628_v27 = vsel %vm255_vm1, %v239_v23, 0  ;;  %v674_v28 = vsel %vm255_vm1, %v240_v24, 0  ;;  %v241_v29 = vld [vmem:[%s1958_s18 + $0x28] sm:$0xf] }
  0x16   : > { %v242_v30 = vld [vmem:[%s1958_s18 + $0x2c] sm:$0xf]  ;;  %v227_v31 = vld [vmem:[%s1968_s21 + $0x20] sm:$0xf]  ;;  %v228_v32 = vld [vmem:[%s1968_s21 + $0x24] sm:$0xf] }
  0x17   : > { %1709 = vmatmul.mubr.msk.bf16.vlgmr.msra.gmra.mxu0 %vm255_vm1, %v219_v7  ;;  %1715 = vmatmul.mubr.msk.bf16.vlgmr.msra.gmra.mxu1 %vm255_vm1, %v220_v8  ;;  %v720_v33 = vsel %vm255_vm1, %v241_v29, 0  ;;  %v766_v34 = vsel %vm255_vm1, %v242_v30, 0  ;;  %v229_v35 = vld [vmem:[%s1968_s21 + $0x28] sm:$0xf]  ;;  %v230_v36 = vld [vmem:[%s1968_s21 + $0x2c] sm:$0xf] }
  0x18   : > { %1719 = vmatpush3.bf16.xpose.msra.mxu0 %v352_v9  ;;  %1725 = vmatpush3.bf16.xpose.msra.mxu1 %v398_v10 }
  0x19   : > { %1720 = vmatprep.mubr.msk.bf16.mxu0 %vm1917_vm0, %v1916_v0  ;;  %1726 = vmatprep.mubr.msk.bf16.mxu1 %vm1917_vm0, %v1916_v0 }
  0x1a   : > { %1730 = vmatprep.subr.bf16.mxu0 %v1916_v0  ;;  %1736 = vmatprep.subr.bf16.mxu1 %v1916_v0 }
  0x1f   : > { %1721 = vmatmul.mubr.msk.bf16.vlgmr.msra.gmra.mxu0 %vm255_vm1, %v221_v13  ;;  %1727 = vmatmul.mubr.msk.bf16.vlgmr.msra.gmra.mxu1 %vm255_vm1, %v222_v14 }
  0x20   : > { %1731 = vmatpush3.bf16.xpose.msra.mxu0 %v444_v15  ;;  %1737 = vmatpush3.bf16.xpose.msra.mxu1 %v490_v16 }
  0x21   : > { %1732 = vmatprep.mubr.msk.bf16.mxu0 %vm1917_vm0, %v1916_v0  ;;  %1738 = vmatprep.mubr.msk.bf16.mxu1 %vm1917_vm0, %v1916_v0 }
  0x22   : > { %1742 = vmatprep.subr.bf16.mxu0 %v1916_v0  ;;  %1748 = vmatprep.subr.bf16.mxu1 %v1916_v0 }
  0x27   : > { %1733 = vmatmul.mubr.msk.bf16.vlgmr.msra.gmra.mxu0 %vm255_vm1, %v223_v19  ;;  %1739 = vmatmul.mubr.msk.bf16.vlgmr.msra.gmra.mxu1 %vm255_vm1, %v224_v20 }
  0x28   : > { %1743 = vmatpush3.bf16.xpose.msra.mxu0 %v536_v21  ;;  %1749 = vmatpush3.bf16.xpose.msra.mxu1 %v582_v22 }
  0x29   : > { %1744 = vmatprep.mubr.msk.bf16.mxu0 %vm1917_vm0, %v1916_v0  ;;  %1750 = vmatprep.mubr.msk.bf16.mxu1 %vm1917_vm0, %v1916_v0 }
  0x2a   : > { %1754 = vmatprep.subr.bf16.mxu0 %v1916_v0  ;;  %1760 = vmatprep.subr.bf16.mxu1 %v1916_v0 }
  0x2f   : > { %1745 = vmatmul.mubr.msk.bf16.vlgmr.msra.gmra.mxu0 %vm255_vm1, %v225_v25  ;;  %1751 = vmatmul.mubr.msk.bf16.vlgmr.msra.gmra.mxu1 %vm255_vm1, %v226_v26 }
  0x30   : > { %1755 = vmatpush3.bf16.xpose.msra.mxu0 %v628_v27  ;;  %1761 = vmatpush3.bf16.xpose.msra.mxu1 %v674_v28 }
  0x31   : > { %1756 = vmatprep.mubr.msk.bf16.mxu0 %vm1917_vm0, %v1916_v0  ;;  %1762 = vmatprep.mubr.msk.bf16.mxu1 %vm1917_vm0, %v1916_v0 }
  0x32   : > { %1766 = vmatprep.subr.bf16.mxu0 %v1916_v0  ;;  %1772 = vmatprep.subr.bf16.mxu1 %v1916_v0 }
  0x37   : > { %1757 = vmatmul.mubr.msk.bf16.vlgmr.msra.gmra.mxu0 %vm255_vm1, %v227_v31  ;;  %1763 = vmatmul.mubr.msk.bf16.vlgmr.msra.gmra.mxu1 %vm255_vm1, %v228_v32 }
  0x38   : > { %1767 = vmatpush3.bf16.xpose.msra.mxu0 %v720_v33  ;;  %1773 = vmatpush3.bf16.xpose.msra.mxu1 %v766_v34 }
  0x39   : > { %1768 = vmatprep.mubr.msk.bf16.mxu0 %vm1917_vm0, %v1916_v0  ;;  %1774 = vmatprep.mubr.msk.bf16.mxu1 %vm1917_vm0, %v1916_v0 }
  0x3a   : > { %1778 = vmatprep.subr.bf16.mxu0 %v1916_v0  ;;  %1784 = vmatprep.subr.bf16.mxu1 %v1916_v0 }
  0x3f   : > { %1769 = vmatmul.mubr.msk.bf16.vlgmr.msra.gmra.mxu0 %vm255_vm1, %v229_v35  ;;  %1775 = vmatmul.mubr.msk.bf16.vlgmr.msra.gmra.mxu1 %vm255_vm1, %v230_v36 }
  0x40   : > { %1780 = vmatprep.mubr.msk.bf16.mxu0 %vm1917_vm0, %v1916_v0  ;;  %1786 = vmatprep.mubr.msk.bf16.mxu1 %vm1917_vm0, %v1916_v0 }
  0xd7   : > { %v296_v37 = vpop.f32.mrf.mxu0  ;;  %v342_v38 = vpop.f32.mrf.mxu1 }
  0xd8   : > { %v2050_v39 = vmul.f32 0.125, %v296_v37  ;;  %v2052_v40 = vmul.f32 0.125, %v342_v38 }
  0xd9   : > { %v1710_v41 = vpop.f32.mrf.mxu0  ;;  %v1716_v42 = vpop.f32.mrf.mxu1 }
  0xda   : > { %v821_v43 = vsel %vm820_vm2, %v2050_v39, -inf  ;;  %v824_v46 = vsel %vm820_vm2, %v2052_v40, -inf }
  0xdb   : > { %v345_v44 = vpop.f32.mrf.mxu1  ;;  %822 = vmax.xlane.f32.xlu0 %v821_v43  ;;  %v299_v45 = vpop.f32.mrf.mxu0 }
  0xdd   : > { %v1711_v47 = vpop.f32.mrf.mxu0  ;;  %v1717_v48 = vpop.f32.mrf.mxu1 }
  0xdf   : > { %v434_v49 = vpop.f32.mrf.mxu1  ;;  %825 = vmax.xlane.f32.xlu0 %v824_v46  ;;  %v388_v50 = vpop.f32.mrf.mxu0 }
  0xe0   : > { %v2058_v51 = vmul.f32 0.125, %v434_v49  ;;  %v2060_v52 = vmul.f32 0.125, %v388_v50 }
  0xe1   : > { %v1722_v53 = vpop.f32.mrf.mxu0  ;;  %v1728_v54 = vpop.f32.mrf.mxu1 }
  0xe2   : > { %v827_v55 = vsel %vm820_vm2, %v2060_v52, -inf  ;;  %v830_v58 = vsel %vm820_vm2, %v2058_v51, -inf }
  0xe3   : > { %v437_v56 = vpop.f32.mrf.mxu1  ;;  %828 = vmax.xlane.f32.xlu1 %v827_v55  ;;  %v391_v57 = vpop.f32.mrf.mxu0 }
  0xe5   : > { %v1723_v59 = vpop.f32.mrf.mxu0  ;;  %v1729_v60 = vpop.f32.mrf.mxu1 }
  0xe7   : > { %v526_v61 = vpop.f32.mrf.mxu1  ;;  %831 = vmax.xlane.f32.xlu1 %v830_v58  ;;  %v480_v62 = vpop.f32.mrf.mxu0 }
  0xe8   : > { %v2066_v63 = vmul.f32 0.125, %v526_v61  ;;  %v2068_v1 = vmul.f32 0.125, %v480_v62 }
  0xe9   : > { %v1734_v2 = vpop.f32.mrf.mxu0  ;;  %v1740_v3 = vpop.f32.mrf.mxu1 }
  0xea   : > { %v836_v4 = vsel %vm820_vm2, %v2066_v63, -inf  ;;  %v833_v5 = vsel %vm820_vm2, %v2068_v1, -inf }
  0xeb   : > { %v529_v6 = vpop.f32.mrf.mxu1  ;;  %837 = vmax.xlane.f32.xlu1 %v836_v4  ;;  %834 = vmax.xlane.f32.xlu0 %v833_v5  ;;  %v483_v7 = vpop.f32.mrf.mxu0 }
  0xed   : > { %v1735_v8 = vpop.f32.mrf.mxu0  ;;  %v1741_v9 = vpop.f32.mrf.mxu1 }
  0xef   : > { %v572_v10 = vpop.f32.mrf.mxu0  ;;  %v618_v11 = vpop.f32.mrf.mxu1 }
  0xf0   : > { %v2074_v12 = vmul.f32 0.125, %v572_v10  ;;  %v2076_v13 = vmul.f32 0.125, %v618_v11 }
  0xf1   : > { %v1746_v14 = vpop.f32.mrf.mxu0  ;;  %v1752_v15 = vpop.f32.mrf.mxu1 }
  0xf2   : > { %v842_v16 = vsel %vm820_vm2, %v2076_v13, -inf  ;;  %v839_v17 = vsel %vm820_vm2, %v2074_v12, -inf }
  0xf3   : > { %v621_v18 = vpop.f32.mrf.mxu1  ;;  %843 = vmax.xlane.f32.xlu1 %v842_v16  ;;  %840 = vmax.xlane.f32.xlu0 %v839_v17  ;;  %v575_v19 = vpop.f32.mrf.mxu0 }
  0xf5   : > { %v1747_v20 = vpop.f32.mrf.mxu0  ;;  %v1753_v21 = vpop.f32.mrf.mxu1 }
  0xf7   : > { %v664_v22 = vpop.f32.mrf.mxu0  ;;  %v710_v23 = vpop.f32.mrf.mxu1 }
  0xf8   : > { %v2082_v24 = vmul.f32 0.125, %v664_v22  ;;  %v2084_v25 = vmul.f32 0.125, %v710_v23 }
  0xf9   : > { %v1758_v26 = vpop.f32.mrf.mxu0  ;;  %v1764_v27 = vpop.f32.mrf.mxu1 }
  0xfa   : > { %v848_v28 = vsel %vm820_vm2, %v2084_v25, -inf  ;;  %v845_v29 = vsel %vm820_vm2, %v2082_v24, -inf }
  0xfb   : > { %v713_v30 = vpop.f32.mrf.mxu1  ;;  %849 = vmax.xlane.f32.xlu1 %v848_v28  ;;  %846 = vmax.xlane.f32.xlu0 %v845_v29  ;;  %v667_v31 = vpop.f32.mrf.mxu0 }
  0xfd   : > { %v1759_v32 = vpop.f32.mrf.mxu0  ;;  %v1765_v33 = vpop.f32.mrf.mxu1 }
  0xff   : > { %v756_v34 = vpop.f32.mrf.mxu0  ;;  %v802_v35 = vpop.f32.mrf.mxu1 }
 0x100   : > { %v2090_v36 = vmul.f32 0.125, %v756_v34  ;;  %v2092_v37 = vmul.f32 0.125, %v802_v35  ;;  %v243_v35 = vld [vmem:[%s2140_s24] sm:$0xf] }
 0x101   : > { %v1770_v38 = vpop.f32.mrf.mxu0  ;;  %v1776_v41 = vpop.f32.mrf.mxu1 }
 0x102   : > { %v854_v42 = vsel %vm820_vm2, %v2092_v37, -inf  ;;  %v851_v43 = vsel %vm820_vm2, %v2090_v36, -inf }
 0x103   : > { %v805_v44 = vpop.f32.mrf.mxu1  ;;  %855 = vmax.xlane.f32.xlu1 %v854_v42  ;;  %852 = vmax.xlane.f32.xlu0 %v851_v43  ;;  %v759_v45 = vpop.f32.mrf.mxu0 }
 0x104   : > { %v246_v45 = vld [vmem:[%s2140_s24 + $0xc] sm:$0xf] }
 0x105   : > { %v1771_v46 = vpop.f32.mrf.mxu0  ;;  %v1777_v47 = vpop.f32.mrf.mxu1 }
 0x106   : > { %v245_v46 = vld [vmem:[%s2140_s24 + $0x8] sm:$0xf]  ;;  %v1108_v47 = vsel %vm968_vm3, %v246_v45, 0 }
 0x164   : > { %v823_v48 = vpop.xlane.xlu0 %822 }
 0x165   : > { %v857_v49 = vsub.f32 %v2050_v39, %v823_v48  ;;  %v1062_v48 = vsel %vm968_vm3, %v245_v46, 0 }
 0x167   : > { %v869_v50 = vmul.f32 1.442695, %v857_v49 }
 0x168   : > { %v826_v53 = vpop.xlane.xlu0 %825 }
 0x169   : > { %1860 = vpow2.f32 %v869_v50  ;;  %v858_v54 = vsub.f32 %v2052_v40, %v826_v53 }
 0x16b   : > { %v871_v55 = vmul.f32 1.442695, %v858_v54 }
 0x16c   : > { %v829_v56 = vpop.xlane.xlu1 %828 }
 0x16d   : > { %1862 = vpow2.f32 %v871_v55  ;;  %v859_v57 = vsub.f32 %v2060_v52, %v829_v56  ;;  %v248_v55 = vld [vmem:[%s2140_s24 + $0x14] sm:$0xf]  ;;  %v247_v56 = vld [vmem:[%s2140_s24 + $0x10] sm:$0xf] }
 0x16f   : > { %v873_v58 = vmul.f32 1.442695, %v859_v57  ;;  %v1200_v57 = vsel %vm968_vm3, %v248_v55, 0 }
 0x170   : > { %v832_v59 = vpop.xlane.xlu1 %831 }
 0x171   : > { %1864 = vpow2.f32 %v873_v58  ;;  %v860_v60 = vsub.f32 %v2058_v51, %v832_v59  ;;  %v1154_v58 = vsel %vm968_vm3, %v247_v56, 0  ;;  %v250_v59 = vld [vmem:[%s2140_s24 + $0x1c] sm:$0xf] }
 0x173   : > { %v875_v61 = vmul.f32 1.442695, %v860_v60  ;;  %v249_v60 = vld [vmem:[%s2140_s24 + $0x18] sm:$0xf] }
 0x174   : > { %v838_v62 = vpop.xlane.xlu1 %837  ;;  %v835_v2 = vpop.xlane.xlu0 %834 }
 0x175   : > { %1866 = vpow2.f32 %v875_v61  ;;  %v862_v39 = vsub.f32 %v2066_v63, %v838_v62  ;;  %v861_v3 = vsub.f32 %v2068_v1, %v835_v2  ;;  %v2181_v61 = vsel %vm968_vm3, %v250_v59, 0  ;;  %v251_v2 = vld [vmem:[%s2140_s24 + $0x20] sm:$0xf] }
 0x176   : > { %v2104_v4 = vpop.eup %1860  ;;  %v2184_v62 = vsel %vm968_vm3, %v249_v60, 0 }
 0x177   : > { %v879_v40 = vmul.f32 1.442695, %v862_v39  ;;  %v877_v5 = vmul.f32 1.442695, %v861_v3  ;;  %v893_v52 = vsel %vm820_vm2, %v2104_v4, 0.0  ;;  %v2189_v3 = vsel %vm968_vm3, %v251_v2, 0 }
 0x178   : > { %894 = vadd.xlane.f32.xlu0 %v893_v52  ;;  %v252_v39 = vld [vmem:[%s2140_s24 + $0x24] sm:$0xf]  ;;  %v254_v52 = vld [vmem:[%s2140_s24 + $0x2c] sm:$0xf] }
 0x179   : > { %1868 = vpow2.f32 %v879_v40  ;;  %v2192_v40 = vsel %vm968_vm3, %v252_v39, 0 }
 0x17a   : > { %v2108_v6 = vpop.eup %1862  ;;  %1870 = vpow2.f32 %v877_v5  ;;  %v253_v5 = vld [vmem:[%s2140_s24 + $0x28] sm:$0xf] }
 0x17b   : > { %v896_v51 = vsel %vm820_vm2, %v2108_v6, 0.0 }
 0x17c   : > { %897 = vadd.xlane.f32.xlu1 %v896_v51  ;;  %v844_v7 = vpop.xlane.xlu1 %843  ;;  %v841_v63 = vpop.xlane.xlu0 %840  ;;  %v2197_v51 = vsel %vm968_vm3, %v253_v5, 0 }
 0x17d   : > { %v864_v1 = vsub.f32 %v2076_v13, %v844_v7  ;;  %v863_v8 = vsub.f32 %v2074_v12, %v841_v63  ;;  %v2200_v7 = vsel %vm968_vm3, %v254_v52, 0 }
 0x17e   : > { %v2114_v9 = vpop.eup %1864 }
 0x17f   : > { %v883_v10 = vmul.f32 1.442695, %v864_v1  ;;  %v881_v11 = vmul.f32 1.442695, %v863_v8  ;;  %v899_v14 = vsel %vm820_vm2, %v2114_v9, 0.0 }
 0x180   : > { %900 = vadd.xlane.f32.xlu0 %v899_v14 }
 0x181   : > { %1872 = vpow2.f32 %v883_v10 }
 0x182   : > { %v2118_v15 = vpop.eup %1866  ;;  %1874 = vpow2.f32 %v881_v11 }
 0x183   : > { %v902_v16 = vsel %vm820_vm2, %v2118_v15, 0.0 }
 0x184   : > { %903 = vadd.xlane.f32.xlu1 %v902_v16  ;;  %v850_v17 = vpop.xlane.xlu1 %849  ;;  %v847_v13 = vpop.xlane.xlu0 %846 }
 0x185   : > { %v866_v12 = vsub.f32 %v2084_v25, %v850_v17  ;;  %v865_v18 = vsub.f32 %v2082_v24, %v847_v13 }
 0x186   : > { %v2124_v19 = vpop.eup %1868 }
 0x187   : > { %v2126_v20 = vpop.eup %1870  ;;  %v887_v21 = vmul.f32 1.442695, %v866_v12  ;;  %v885_v22 = vmul.f32 1.442695, %v865_v18  ;;  %v908_v23 = vsel %vm820_vm2, %v2124_v19, 0.0 }
 0x188   : > { %909 = vadd.xlane.f32.xlu1 %v908_v23  ;;  %v905_v26 = vsel %vm820_vm2, %v2126_v20, 0.0 }
 0x189   : > { %1876 = vpow2.f32 %v887_v21  ;;  %906 = vadd.xlane.f32.xlu0 %v905_v26 }
 0x18a   : > { %1878 = vpow2.f32 %v885_v22 }
 0x18c   : > { %v856_v25 = vpop.xlane.xlu1 %855  ;;  %v853_v27 = vpop.xlane.xlu0 %852 }
 0x18d   : > { %v868_v24 = vsub.f32 %v2092_v37, %v856_v25  ;;  %v867_v28 = vsub.f32 %v2090_v36, %v853_v27  ;;  %v244_v36 = vld [vmem:[%s2140_s24 + $0x4] sm:$0xf]  ;;  %v970_v37 = vsel %vm968_vm3, %v243_v35, 0 }
 0x18e   : > { %v2134_v29 = vpop.eup %1872  ;;  %v1016_v38 = vsel %vm968_vm3, %v244_v36, 0  ;;  %1779 = vmatpush3.bf16.msra.mxu0 %v970_v37 }
 0x18f   : > { %v2142_v30 = vpop.eup %1874  ;;  %v891_v31 = vmul.f32 1.442695, %v868_v24  ;;  %v889_v32 = vmul.f32 1.442695, %v867_v28  ;;  %v914_v33 = vsel %vm820_vm2, %v2134_v29, 0.0  ;;  %1785 = vmatpush3.bf16.msra.mxu1 %v1016_v38  ;;  %1790 = vmatprep.subr.bf16.mxu0 %v1916_v0 }
 0x190   : > { %915 = vadd.xlane.f32.xlu1 %v914_v33  ;;  %v911_v34 = vsel %vm820_vm2, %v2142_v30, 0.0  ;;  %1796 = vmatprep.subr.bf16.mxu1 %v1916_v0 }
 0x191   : > { %1880 = vpow2.f32 %v891_v31  ;;  %912 = vadd.xlane.f32.xlu0 %v911_v34 }
 0x192   : > { %1882 = vpow2.f32 %v889_v32 }
 0x196   : > { %v2154_v41 = vpop.eup %1876 }
 0x197   : > { %v2156_v42 = vpop.eup %1878  ;;  %v920_v43 = vsel %vm820_vm2, %v2154_v41, 0.0 }
 0x198   : > { %921 = vadd.xlane.f32.xlu1 %v920_v43  ;;  %v917_v44 = vsel %vm820_vm2, %v2156_v42, 0.0 }
 0x199   : > { %918 = vadd.xlane.f32.xlu0 %v917_v44 }
 0x19e   : > { %v2166_v49 = vpop.eup %1880 }
 0x19f   : > { %v2168_v50 = vpop.eup %1882  ;;  %v926_v53 = vsel %vm820_vm2, %v2166_v49, 0.0 }
 0x1a0   : > { %927 = vadd.xlane.f32.xlu1 %v926_v53  ;;  %v923_v54 = vsel %vm820_vm2, %v2168_v50, 0.0 }
 0x1a1   : > { %924 = vadd.xlane.f32.xlu0 %v923_v54 }
 0x201   : > { %v895_v63 = vpop.xlane.xlu0 %894 }
 0x202   : > { %1884 = vrcp.f32 %v895_v63 }
 0x205   : > { %v898_v1 = vpop.xlane.xlu1 %897 }
 0x206   : > { %1886 = vrcp.f32 %v898_v1 }
 0x209   : > { %v901_v8 = vpop.xlane.xlu0 %900 }
 0x20a   : > { %1888 = vrcp.f32 %v901_v8 }
 0x20d   : > { %v904_v10 = vpop.xlane.xlu1 %903 }
 0x20e   : > { %1890 = vrcp.f32 %v904_v10 }
 0x20f   : > { %v1885_v11 = vpop.eup %1884 }
 0x210   : > { %v941_v14 = vmul.f32 %v1885_v11, %v2104_v4 }
 0x211   : > { %v910_v16 = vpop.xlane.xlu1 %909 }
 0x212   : > { %1892 = vrcp.f32 %v910_v16  ;;  %v907_v17 = vpop.xlane.xlu0 %906  ;;  %v953_v13 = vpack.c.bf16 %v941_v14, %v941_v14 }
 0x213   : > { %v1887_v12 = vpop.eup %1886  ;;  %1894 = vrcp.f32 %v907_v17 }
 0x214   : > { %1781 = vmatmul.mubr.msk.bf16.vlgmr.msra.gmra.mxu0 %vm820_vm2, %v953_v13  ;;  %v942_v18 = vmul.f32 %v1887_v12, %v2108_v6 }
 0x215   : > { %1791 = vmatpush3.bf16.msra.mxu0 %v1062_v48  ;;  %1792 = vmatprep.mubr.msk.bf16.mxu0 %vm1917_vm0, %v1916_v0 }
 0x216   : > { %v954_v21 = vpack.c.bf16 %v942_v18, %v942_v18  ;;  %1802 = vmatprep.subr.bf16.mxu0 %v1916_v0 }
 0x217   : > { %v1889_v22 = vpop.eup %1888 }
 0x218   : > { %1787 = vmatmul.mubr.msk.bf16.vlgmr.msra.gmra.mxu1 %vm820_vm2, %v954_v21  ;;  %v943_v4 = vmul.f32 %v1889_v22, %v2114_v9 }
 0x219   : > { %1797 = vmatpush3.bf16.msra.mxu1 %v1108_v47  ;;  %v916_v23 = vpop.xlane.xlu1 %915  ;;  %1798 = vmatprep.mubr.msk.bf16.mxu1 %vm1917_vm0, %v1916_v0 }
 0x21a   : > { %1896 = vrcp.f32 %v916_v23  ;;  %v913_v26 = vpop.xlane.xlu0 %912  ;;  %v955_v6 = vpack.c.bf16 %v943_v4, %v943_v4  ;;  %1808 = vmatprep.subr.bf16.mxu1 %v1916_v0 }
 0x21b   : > { %v1891_v25 = vpop.eup %1890  ;;  %1898 = vrcp.f32 %v913_v26 }
 0x21c   : > { %1793 = vmatmul.mubr.msk.bf16.vlgmr.msra.gmra.mxu0 %vm820_vm2, %v955_v6  ;;  %v944_v27 = vmul.f32 %v1891_v25, %v2118_v15 }
 0x21d   : > { %1803 = vmatpush3.bf16.msra.mxu0 %v1154_v58  ;;  %1804 = vmatprep.mubr.msk.bf16.mxu0 %vm1917_vm0, %v1916_v0 }
 0x21e   : > { %v956_v9 = vpack.c.bf16 %v944_v27, %v944_v27  ;;  %1814 = vmatprep.subr.bf16.mxu0 %v1916_v0 }
 0x21f   : > { %v1893_v24 = vpop.eup %1892 }
 0x220   : > { %v1895_v28 = vpop.eup %1894  ;;  %1799 = vmatmul.mubr.msk.bf16.vlgmr.msra.gmra.mxu1 %vm820_vm2, %v956_v9  ;;  %v946_v33 = vmul.f32 %v1893_v24, %v2124_v19 }
 0x221   : > { %1809 = vmatpush3.bf16.msra.mxu1 %v1200_v57  ;;  %v922_v31 = vpop.xlane.xlu1 %921  ;;  %v945_v32 = vmul.f32 %v1895_v28, %v2126_v20  ;;  %1810 = vmatprep.mubr.msk.bf16.mxu1 %vm1917_vm0, %v1916_v0 }
 0x222   : > { %1900 = vrcp.f32 %v922_v31  ;;  %v919_v15 = vpop.xlane.xlu0 %918  ;;  %1820 = vmatprep.subr.bf16.mxu1 %v1916_v0  ;;  %v958_v35 = vpack.c.bf16 %v946_v33, %v946_v33 }
 0x223   : > { %1902 = vrcp.f32 %v919_v15  ;;  %v957_v34 = vpack.c.bf16 %v945_v32, %v945_v32 }
 0x225   : > { %1805 = vmatmul.mubr.msk.bf16.vlgmr.msra.gmra.mxu0 %vm820_vm2, %v957_v34 }
 0x226   : > { %1815 = vmatpush3.bf16.msra.mxu0 %v2184_v62  ;;  %1816 = vmatprep.mubr.msk.bf16.mxu0 %vm1917_vm0, %v1916_v0 }
 0x227   : > { %v1897_v20 = vpop.eup %1896  ;;  %1826 = vmatprep.subr.bf16.mxu0 %v1916_v0 }
 0x228   : > { %v1899_v36 = vpop.eup %1898  ;;  %1811 = vmatmul.mubr.msk.bf16.vlgmr.msra.gmra.mxu1 %vm820_vm2, %v958_v35  ;;  %v948_v43 = vmul.f32 %v1897_v20, %v2134_v29 }
 0x229   : > { %1821 = vmatpush3.bf16.msra.mxu1 %v2181_v61  ;;  %v928_v19 = vpop.xlane.xlu1 %927  ;;  %v947_v37 = vmul.f32 %v1899_v36, %v2142_v30  ;;  %1822 = vmatprep.mubr.msk.bf16.mxu1 %vm1917_vm0, %v1916_v0 }
 0x22a   : > { %1904 = vrcp.f32 %v928_v19  ;;  %v925_v38 = vpop.xlane.xlu0 %924  ;;  %1832 = vmatprep.subr.bf16.mxu1 %v1916_v0  ;;  %v960_v45 = vpack.c.bf16 %v948_v43, %v948_v43 }
 0x22b   : > { %1906 = vrcp.f32 %v925_v38  ;;  %v959_v44 = vpack.c.bf16 %v947_v37, %v947_v37 }
 0x22d   : > { %1817 = vmatmul.mubr.msk.bf16.vlgmr.msra.gmra.mxu0 %vm820_vm2, %v959_v44 }
 0x22e   : > { %1827 = vmatpush3.bf16.msra.mxu0 %v2189_v3  ;;  %1828 = vmatprep.mubr.msk.bf16.mxu0 %vm1917_vm0, %v1916_v0 }
 0x22f   : > { %v1901_v30 = vpop.eup %1900  ;;  %1838 = vmatprep.subr.bf16.mxu0 %v1916_v0 }
 0x230   : > { %v1903_v46 = vpop.eup %1902  ;;  %1823 = vmatmul.mubr.msk.bf16.vlgmr.msra.gmra.mxu1 %vm820_vm2, %v960_v45  ;;  %v950_v47 = vmul.f32 %v1901_v30, %v2154_v41 }
 0x231   : > { %1833 = vmatpush3.bf16.msra.mxu1 %v2192_v40  ;;  %v949_v29 = vmul.f32 %v1903_v46, %v2156_v42  ;;  %1834 = vmatprep.mubr.msk.bf16.mxu1 %vm1917_vm0, %v1916_v0 }
 0x232   : > { %1844 = vmatprep.subr.bf16.mxu1 %v1916_v0  ;;  %v962_v53 = vpack.c.bf16 %v950_v47, %v950_v47 }
 0x233   : > { %v961_v48 = vpack.c.bf16 %v949_v29, %v949_v29 }
 0x235   : > { %1829 = vmatmul.mubr.msk.bf16.vlgmr.msra.gmra.mxu0 %vm820_vm2, %v961_v48 }
 0x236   : > { %1839 = vmatpush3.bf16.msra.mxu0 %v2197_v51  ;;  %1840 = vmatprep.mubr.msk.bf16.mxu0 %vm1917_vm0, %v1916_v0 }
 0x237   : > { %v1905_v54 = vpop.eup %1904 }
 0x238   : > { %v1907_v55 = vpop.eup %1906  ;;  %1835 = vmatmul.mubr.msk.bf16.vlgmr.msra.gmra.mxu1 %vm820_vm2, %v962_v53  ;;  %v952_v42 = vmul.f32 %v1905_v54, %v2166_v49 }
 0x239   : > { %1845 = vmatpush3.bf16.msra.mxu1 %v2200_v7  ;;  %v951_v41 = vmul.f32 %v1907_v55, %v2168_v50  ;;  %1846 = vmatprep.mubr.msk.bf16.mxu1 %vm1917_vm0, %v1916_v0 }
 0x23a   : > { %v964_v57 = vpack.c.bf16 %v952_v42, %v952_v42 }
 0x23b   : > { %v963_v56 = vpack.c.bf16 %v951_v41, %v951_v41 }
 0x23d   : > { %1841 = vmatmul.mubr.msk.bf16.vlgmr.msra.gmra.mxu0 %vm820_vm2, %v963_v56 }
 0x240   : > { %1847 = vmatmul.mubr.msk.bf16.vlgmr.msra.gmra.mxu1 %vm820_vm2, %v964_v57 }
 0x2d4   : > { %v1006_v58 = vpop.f32.mrf.mxu0 }
 0x2d5   : > { %v1518_v50 = vpack.c.bf16 %v1006_v58, %v1006_v58 }
 0x2d6   : > { %v1782_v0 = vpop.f32.mrf.mxu0 }
 0x2d7   : > { %1531 = vst.msk [vmem:[%s2264_s27] sm:$0xf] %vm1530_vm4, %v1518_v50 }
 0x2d8   : > { %v1009_v49 = vpop.f32.mrf.mxu0  ;;  %v1052_v59 = vpop.f32.mrf.mxu1 }
 0x2d9   : > { %v1519_v60 = vpack.c.bf16 %v1052_v59, %v1052_v59 }
 0x2da   : > { %v1783_v61 = vpop.f32.mrf.mxu0  ;;  %v1788_v62 = vpop.f32.mrf.mxu1 }
 0x2db   : > { %1532 = vst.msk [vmem:[%s2264_s27 + $0x4] sm:$0xf] %vm1530_vm4, %v1519_v60 }
 0x2dc   : > { %v1055_v2 = vpop.f32.mrf.mxu1  ;;  %v1098_v39 = vpop.f32.mrf.mxu0 }
 0x2dd   : > { %v1520_v3 = vpack.c.bf16 %v1098_v39, %v1098_v39 }
 0x2de   : > { %v1789_v40 = vpop.f32.mrf.mxu1  ;;  %v1794_v5 = vpop.f32.mrf.mxu0 }
 0x2df   : > { %1533 = vst.msk [vmem:[%s2264_s27 + $0x8] sm:$0xf] %vm1530_vm4, %v1520_v3 }
 0x2e0   : > { %v1101_v52 = vpop.f32.mrf.mxu0  ;;  %v1144_v51 = vpop.f32.mrf.mxu1 }
 0x2e1   : > { %v1521_v7 = vpack.c.bf16 %v1144_v51, %v1144_v51 }
 0x2e2   : > { %v1795_v63 = vpop.f32.mrf.mxu0  ;;  %v1800_v1 = vpop.f32.mrf.mxu1 }
 0x2e3   : > { %1534 = vst.msk [vmem:[%s2264_s27 + $0xc] sm:$0xf] %vm1530_vm4, %v1521_v7 }
 0x2e4   : > { %v1147_v8 = vpop.f32.mrf.mxu1 }
 0x2e5   : > { %v1190_v10 = vpop.f32.mrf.mxu0 }
 0x2e6   : > { %v1522_v11 = vpack.c.bf16 %v1190_v10, %v1190_v10  ;;  %v1801_v14 = vpop.f32.mrf.mxu1 }
 0x2e7   : > { %v1806_v16 = vpop.f32.mrf.mxu0 }
 0x2e8   : > { %1535 = vst.msk [vmem:[%s2264_s27 + $0x10] sm:$0xf] %vm1530_vm4, %v1522_v11  ;;  %v1236_v17 = vpop.f32.mrf.mxu1 }
 0x2e9   : > { %v1193_v13 = vpop.f32.mrf.mxu0  ;;  %v1523_v12 = vpack.c.bf16 %v1236_v17, %v1236_v17 }
 0x2ea   : > { %v1812_v18 = vpop.f32.mrf.mxu1 }
 0x2eb   : > { %1536 = vst.msk [vmem:[%s2264_s27 + $0x14] sm:$0xf] %vm1530_vm4, %v1523_v12  ;;  %v1807_v21 = vpop.f32.mrf.mxu0 }
 0x2ec   : > { %v1239_v22 = vpop.f32.mrf.mxu1 }
 0x2ed   : > { %v1282_v4 = vpop.f32.mrf.mxu0 }
 0x2ee   : > { %v1524_v23 = vpack.c.bf16 %v1282_v4, %v1282_v4  ;;  %v1813_v26 = vpop.f32.mrf.mxu1 }
 0x2ef   : > { %v1818_v6 = vpop.f32.mrf.mxu0 }
 0x2f0   : > { %1537 = vst.msk [vmem:[%s2264_s27 + $0x18] sm:$0xf] %vm1530_vm4, %v1524_v23  ;;  %v1328_v25 = vpop.f32.mrf.mxu1 }
 0x2f1   : > { %v1285_v27 = vpop.f32.mrf.mxu0  ;;  %v1525_v9 = vpack.c.bf16 %v1328_v25, %v1328_v25 }
 0x2f2   : > { %v1824_v24 = vpop.f32.mrf.mxu1 }
 0x2f3   : > { %1538 = vst.msk [vmem:[%s2264_s27 + $0x1c] sm:$0xf] %vm1530_vm4, %v1525_v9  ;;  %v1819_v28 = vpop.f32.mrf.mxu0 }
 0x2f4   : > { %v1331_v31 = vpop.f32.mrf.mxu1 }
 0x2f5   : > { %v1374_v32 = vpop.f32.mrf.mxu0 }
 0x2f6   : > { %v1526_v15 = vpack.c.bf16 %v1374_v32, %v1374_v32  ;;  %v1825_v33 = vpop.f32.mrf.mxu1 }
 0x2f7   : > { %v1830_v34 = vpop.f32.mrf.mxu0 }
 0x2f8   : > { %1539 = vst.msk [vmem:[%s2264_s27 + $0x20] sm:$0xf] %vm1530_vm4, %v1526_v15  ;;  %v1420_v35 = vpop.f32.mrf.mxu1 }
 0x2f9   : > { %v1377_v20 = vpop.f32.mrf.mxu0  ;;  %v1527_v36 = vpack.c.bf16 %v1420_v35, %v1420_v35 }
 0x2fa   : > { %v1836_v19 = vpop.f32.mrf.mxu1 }
 0x2fb   : > { %1540 = vst.msk [vmem:[%s2264_s27 + $0x24] sm:$0xf] %vm1530_vm4, %v1527_v36  ;;  %v1831_v37 = vpop.f32.mrf.mxu0 }
 0x2fc   : > { %v1423_v38 = vpop.f32.mrf.mxu1 }
 0x2fd   : > { %v1466_v43 = vpop.f32.mrf.mxu0 }
 0x2fe   : > { %v1528_v44 = vpack.c.bf16 %v1466_v43, %v1466_v43  ;;  %v1837_v45 = vpop.f32.mrf.mxu1 }
 0x2ff   : > { %v1842_v30 = vpop.f32.mrf.mxu0 }
 0x300   : > { %1541 = vst.msk [vmem:[%s2264_s27 + $0x28] sm:$0xf] %vm1530_vm4, %v1528_v44  ;;  %v1512_v46 = vpop.f32.mrf.mxu1 }
 0x301   : > { %v1469_v29 = vpop.f32.mrf.mxu0  ;;  %v1529_v47 = vpack.c.bf16 %v1512_v46, %v1512_v46 }
 0x302   : > { %v1848_v48 = vpop.f32.mrf.mxu1 }
 0x303   : > { %1542 = vst.msk [vmem:[%s2264_s27 + $0x2c] sm:$0xf] %vm1530_vm4, %v1529_v47  ;;  %v1843_v53 = vpop.f32.mrf.mxu0 }
 0x304   : > { %v1515_v54 = vpop.f32.mrf.mxu1 }
 0x306   : > { %v1849_v55 = vpop.f32.mrf.mxu1 }
 0x307 PF: > { %s13_s12 = sadd.s32 1, %s1914_s12  }
 0x308   : > { %p10_p4 = scmp.ge.s32.totalorder %s13_s12, 4  }
 0x30a   :  { %12 = sbr.rel (!%p10_p4) target bundleno = 1 (0x1), region = 68 }

// kernel: net_forward.19
= control target key start
LH: loop header
LB: loop body
LE: loop exit
PB: predicated region body
PF: predicated region fallthrough
CT: control target
= control target key end

     0   :  { %s855_s12 = smov 0   ;;  %s857_s13 = smov 0   ;;  %s956_s0 = inlined_call_operand.vmem [shape: bf16[24,8,64], index: 0, kind: input, shape index: {}]   ;;  %s957_s1 = inlined_call_operand.vmem [shape: bf16[12,64,768], index: 1, kind: input, shape index: {}]   ;;  %s958_s2 = inlined_call_operand.vmem [shape: f32[1,768], index: 2, kind: input, shape index: {}]   ;;  %s959_s3 = inlined_call_operand.vmem [shape: bf16[2,8,768], index: 3, kind: output, shape index: {}]  }
   0x1   :  { %s859_s14 = smov 0   ;;  %s861_s15 = smov 0  }
   0x2   :  { %s863_s16 = smov 0  }
   0x3 LB: > { %s22_s17 = sadd.s32 1, %s823_s14  ;;  %s25_s18 = sadd.s32 1, %s827_s15  ;;  %s831_s16 = sphi %s863_s16, %s13_s16   ;;  %s827_s15 = sphi %s861_s15, %s963_s15   ;;  %s823_s14 = sphi %s859_s14, %s962_s14   ;;  %s819_s13 = sphi %s857_s13, %s961_s13   ;;  %s815_s12 = sphi %s855_s12, %s960_s12  }
   0x4   : > { %p23_p0 = scmp.ge.s32.totalorder %s22_s17, 12  ;;  %p672_p1 = scmp.ge.s32.totalorder %s831_s16, 1 }
   0x5   : > { %p166_p2 = scmp.lt.s32.totalorder %s831_s16, 25 }
   0x6   : > { %s965_s17 = smov (%p23_p0, %s22_s17), 0  ;;  %s967_s18 = smov (!%p23_p0, %s25_s18), %s827_s15 }
   0x7   : > { %p167_p3 = pnand %p672_p1, %p166_p2  ;;  %p27_p4 = scmp.ge.s32.totalorder %s967_s18, 2 }
   0x8   : > { %s196_s19 = smul.u32 (!%p167_p3), 12, %s819_s13  ;;  %p204_p5 = scmp.lt.s32.totalorder (!%p167_p3), %s815_s12, 11 }
   0x9   : > { %s969_s18 = smov (%p27_p4, %s967_s18), 0  ;;  %170 = sbr.rel (%p167_p3) target bundleno = 274 (0x112), region = 32 }
   0xa   : > { %s197_s20 = sadd.s32 (!%p167_p3), %s815_s12, %s196_s19  ;;  %p209_p7 = scmp.lt.s32.totalorder (!%p167_p3), %s819_s13, 1 }
   0xb   : > { %p198_p6 = scmp.lt.s32.totalorder (!%p167_p3), %s197_s20, 23  ;;  %p676_p8 = scmp.ne.s32.totalorder (!%p167_p3), %s815_s12, 0 }
   0xe   : > { %s205_s21 = scalar_select %p204_p5, %s815_s12, 11 }
   0xf   : > { %s971_s20 = smov (!%p198_p6, %s197_s20), 23  ;;  %s973_s13 = smov (!%p209_p7, %s819_s13), 1 }
  0x10   : > { %s713_s22 = smul.u32 192, %s205_s21  ;;  %s673_s23 = sshll.u32 %s971_s20, 2 }
  0x11   : > { %s893_s26 = scalar_lea.vmem %s956_s0, %s673_s23  ;;  %s714_s30 = smul.u32 24, %s973_s13 }
  0x12   : > { %s898_s29 = scalar_lea.vmem %s957_s1, %s713_s22  ;;  %218 = sbr.rel (%p676_p8) target bundleno = 27 (0x1b), region = 36 }
  0x13   : > { %s903_s6 = scalar_lea.vmem %s959_s3, %s714_s30 }
  0x17   : > { %v833_v0 = vmov 0.0  }
  0x18   : > { %219 = vst [vmem:[#allocation2 + $0x28] sm:$0xff] %v833_v0  ;;  %220 = vst [vmem:[#allocation2 + $0x10] sm:$0xff] %v833_v0 }
  0x19   : > { %221 = vst [vmem:[#allocation2 + $0x8] sm:$0xff] %v833_v0  ;;  %222 = vst [vmem:[#allocation2] sm:$0xff] %v833_v0 }
  0x1a   : > { %223 = vst [vmem:[#allocation2 + $0x18] sm:$0xff] %v833_v0  ;;  %224 = vst [vmem:[#allocation2 + $0x20] sm:$0xff] %v833_v0 }
  0x1b PF: > { %v757_v1 = vld [vmem:[%s898_s29 + $0x94] ss:$24 sps:$4 sm:$0xff]   ;;  %v759_v2 = vld [vmem:[%s898_s29 + $0x90] ss:$24 sps:$4 sm:$0xff]   ;;  %v834_v3 = vmov 0   ;;  %vm376_vm0 = vcmask 523264  }
  0x1c   : > { %412 = vmatprep.mubr.bf16.mxu0 %v834_v3  ;;  %453 = vmatprep.mubr.bf16.mxu1 %v834_v3  ;;  %v760_v4 = vld [vmem:[%s898_s29 + $0x64] ss:$24 sps:$4 sm:$0xff]   ;;  %v762_v5 = vld [vmem:[%s898_s29 + $0x60] ss:$24 sps:$4 sm:$0xff]   ;;  %v763_v6 = vld [vmem:[%s898_s29 + $0x34] ss:$24 sps:$4 sm:$0xff]  }
  0x1d   : > { %388 = vmatprep.subr.bf16.mxu0 %v757_v1  ;;  %v766_v7 = vld [vmem:[%s898_s29 + $0x9c] ss:$24 sps:$4 sm:$0xff]   ;;  %v768_v8 = vld [vmem:[%s898_s29 + $0x98] ss:$24 sps:$4 sm:$0xff]   ;;  %v772_v10 = vld [vmem:[%s898_s29 + $0x6c] ss:$24 sps:$4 sm:$0xff]  }
  0x1e   : > { %389 = vmatpush1.bf16.msra.mxu0 %v759_v2  ;;  %v765_v9 = vld [vmem:[%s898_s29 + $0x30] ss:$24 sps:$4 sm:$0xff]   ;;  %429 = vmatprep.subr.bf16.mxu1 %v766_v7  ;;  %v769_v12 = vld [vmem:[%s898_s29 + $0x4] ss:$24 sps:$4 sm:$0xff]   ;;  %v771_v13 = vld [vmem:[%s898_s29] ss:$24 sps:$4 sm:$0xff]  }
  0x1f   : > { %390 = vmatprep.subr.bf16.mxu0 %v760_v4  ;;  %430 = vmatpush1.bf16.msra.mxu1 %v768_v8  ;;  %v774_v11 = vld [vmem:[%s898_s29 + $0x68] ss:$24 sps:$4 sm:$0xff]   ;;  %v778_v14 = vld [vmem:[%s898_s29 + $0x3c] ss:$24 sps:$4 sm:$0xff]   ;;  %v780_v15 = vld [vmem:[%s898_s29 + $0x38] ss:$24 sps:$4 sm:$0xff]  }
  0x20   : > { %431 = vmatprep.subr.bf16.mxu1 %v772_v10  ;;  %v777_v16 = vld [vmem:[%s898_s29 + $0xa4] ss:$24 sps:$4 sm:$0xff]   ;;  %v231_v18 = vld [vmem:[%s893_s26] sm:$0xf]  ;;  %v783_v21 = vld [vmem:[%s898_s29 + $0x74] ss:$24 sps:$4 sm:$0xff]  }
  0x21   : > { %v784_v17 = vld [vmem:[%s898_s29 + $0xc] ss:$24 sps:$4 sm:$0xff]   ;;  %v775_v19 = vld [vmem:[%s898_s29 + $0xa0] ss:$24 sps:$4 sm:$0xff]   ;;  %v781_v22 = vld [vmem:[%s898_s29 + $0x70] ss:$24 sps:$4 sm:$0xff]  }
  0x22   : > { %391 = vmatpush1.bf16.msra.mxu0 %v762_v5  ;;  %v786_v20 = vld [vmem:[%s898_s29 + $0x8] ss:$24 sps:$4 sm:$0xff]   ;;  %v789_v23 = vld [vmem:[%s898_s29 + $0x44] ss:$24 sps:$4 sm:$0xff]   ;;  %v792_v25 = vld [vmem:[%s898_s29 + $0x14] ss:$24 sps:$4 sm:$0xff]  }
  0x23   : > { %392 = vmatprep.subr.bf16.mxu0 %v763_v6  ;;  %432 = vmatpush1.bf16.msra.mxu1 %v774_v11  ;;  %v787_v24 = vld [vmem:[%s898_s29 + $0x40] ss:$24 sps:$4 sm:$0xff]   ;;  %v790_v26 = vld [vmem:[%s898_s29 + $0x10] ss:$24 sps:$4 sm:$0xff]   ;;  %p704_p9 = scmp.ne.s32.totalorder %s815_s12, 11 }
  0x24   : > { %433 = vmatprep.subr.bf16.mxu1 %v778_v14  ;;  %v225_v27 = vld [vmem:[#allocation2 + $0x28] sm:$0xff]  ;;  %v226_v29 = vld [vmem:[#allocation2 + $0x10] sm:$0xff]  ;;  %v228_v36 = vld [vmem:[#allocation2] sm:$0xff] }
  0x25   : > { %v227_v32 = vld [vmem:[#allocation2 + $0x8] sm:$0xff]  ;;  %v229_v43 = vld [vmem:[#allocation2 + $0x18] sm:$0xff]  ;;  %v230_v45 = vld [vmem:[#allocation2 + $0x20] sm:$0xff] }
  0x26   : > { %393 = vmatpush1.bf16.msra.mxu0 %v765_v9 }
  0x27   : > { %394 = vmatprep.subr.bf16.mxu0 %v769_v12  ;;  %434 = vmatpush1.bf16.msra.mxu1 %v780_v15 }
  0x28   : > { %435 = vmatprep.subr.bf16.mxu1 %v784_v17 }
  0x2a   : > { %395 = vmatpush1.bf16.msra.mxu0 %v771_v13 }
  0x2b   : > { %470 = vmatprep.subr.bf16.mxu0 %v777_v16  ;;  %436 = vmatpush1.bf16.msra.mxu1 %v786_v20 }
  0x2d   : > { %701 = vmatmul.mubr.msk.bf16.vlgmr.msra.gmra.mxu0 %vm376_vm0, %v231_v18 }
  0x2e   : > { %471 = vmatpush1.bf16.msra.mxu0 %v775_v19  ;;  %494 = vmatprep.mubr.bf16.mxu0 %v834_v3 }
  0x2f   : > { %472 = vmatprep.subr.bf16.mxu0 %v783_v21  ;;  %702 = vmatmul.mubr.msk.bf16.vlgmr.msra.gmra.mxu1 %vm376_vm0, %v231_v18 }
  0x32   : > { %473 = vmatpush1.bf16.msra.mxu0 %v781_v22 }
  0x33   : > { %474 = vmatprep.subr.bf16.mxu0 %v789_v23 }
  0x36   : > { %475 = vmatpush1.bf16.msra.mxu0 %v787_v24 }
  0x37   : > { %476 = vmatprep.subr.bf16.mxu0 %v792_v25 }
  0x3a   : > { %477 = vmatpush1.bf16.msra.mxu0 %v790_v26 }
  0x3d   : > { %703 = vmatmul.mubr.msk.bf16.vlgmr.msra.gmra.mxu0 %vm376_vm0, %v231_v18 }
  0xed   : > { %v414_v28 = vpop.f32.mrf.mxu0 }
  0xee   : > { %v503_v30 = vadd.f32 %v414_v28, %v225_v27 }
  0xef   : > { %v416_v31 = vpop.f32.mrf.mxu0  ;;  %v455_v35 = vpop.f32.mrf.mxu1 }
  0xf0   : > { %509 = vst [vmem:[#allocation2 + $0x28] sm:$0xff] %v503_v30  ;;  %v504_v33 = vadd.f32 %v416_v31, %v226_v29  ;;  %v505_v37 = vadd.f32 %v455_v35, %v227_v32 }
  0xf1   : > { %v418_v34 = vpop.f32.mrf.mxu0  ;;  %v457_v39 = vpop.f32.mrf.mxu1 }
  0xf2   : > { %510 = vst [vmem:[#allocation2 + $0x10] sm:$0xff] %v504_v33  ;;  %511 = vst [vmem:[#allocation2 + $0x8] sm:$0xff] %v505_v37  ;;  %v506_v40 = vadd.f32 %v457_v39, %v228_v36 }
  0xf3   : > { %v419_v38 = vpop.f32.mrf.mxu0  ;;  %v459_v41 = vpop.f32.mrf.mxu1 }
  0xf4   : > { %512 = vst [vmem:[#allocation2] sm:$0xff] %v506_v40 }
  0xf5   : > { %v460_v42 = vpop.f32.mrf.mxu1 }
  0xfd   : > { %v496_v44 = vpop.f32.mrf.mxu0 }
  0xfe   : > { %v507_v46 = vadd.f32 %v496_v44, %v229_v43 }
  0xff   : > { %v498_v47 = vpop.f32.mrf.mxu0  ;;  %518 = sbr.rel (%p704_p9) target bundleno = 274 (0x112), region = 40 }
 0x100   : > { %513 = vst [vmem:[#allocation2 + $0x18] sm:$0xff] %v507_v46  ;;  %v508_v48 = vadd.f32 %v498_v47, %v230_v45 }
 0x101   : > { %v500_v49 = vpop.f32.mrf.mxu0 }
 0x102   : > { %514 = vst [vmem:[#allocation2 + $0x20] sm:$0xff] %v508_v48 }
 0x103   : > { %v501_v50 = vpop.f32.mrf.mxu0 }
 0x104   : > { %v527_v51 = vlaneseq  ;;  %v525_v53 = vld [vmem:[%s958_s2] sm:$0x3f]  ;;  %v519_v54 = vld [vmem:[#allocation2 + $0x28] sm:$0xff]  ;;  %v520_v59 = vld [vmem:[#allocation2 + $0x10] sm:$0xff] }
 0x105   : > { %v521_v60 = vld [vmem:[#allocation2 + $0x8] sm:$0xff]  ;;  %v522_v61 = vld [vmem:[#allocation2] sm:$0xff] }
 0x106   : > { %v528_v52 = vshrl.u32 %v527_v51, 7 }
 0x107   : > { %v523_v4 = vld [vmem:[#allocation2 + $0x18] sm:$0xff] }
 0x108   : > { %v529_v55 = vsub.s32 0, %v528_v52  ;;  %v533_v56 = vsub.s32 1, %v528_v52  ;;  %v537_v57 = vsub.s32 2, %v528_v52  ;;  %v541_v58 = vsub.s32 3, %v528_v52 }
 0x109   : > { %v545_v62 = vsub.s32 4, %v528_v52  ;;  %v549_v63 = vsub.s32 5, %v528_v52  ;;  %v524_v5 = vld [vmem:[#allocation2 + $0x20] sm:$0xff] }
 0x10a   : > { %v530_v0 = vrot.slane %v525_v53, %v529_v55  ;;  %v534_v1 = vrot.slane %v525_v53, %v533_v56  ;;  %v538_v2 = vrot.slane %v525_v53, %v537_v57  ;;  %v542_v3 = vrot.slane %v525_v53, %v541_v58 }
 0x10b   : > { %v546_v6 = vrot.slane %v525_v53, %v545_v62  ;;  %v550_v7 = vrot.slane %v525_v53, %v549_v63 }
 0x10c   : > { %v557_v8 = vadd.f32 %v530_v0, %v519_v54  ;;  %v558_v9 = vadd.f32 %v534_v1, %v520_v59  ;;  %v559_v10 = vadd.f32 %v538_v2, %v521_v60  ;;  %v560_v11 = vadd.f32 %v542_v3, %v522_v61 }
 0x10d   : > { %v561_v12 = vadd.f32 %v546_v6, %v523_v4  ;;  %v562_v13 = vadd.f32 %v550_v7, %v524_v5 }
 0x10e   : > { %v710_v14 = vpack.c.bf16 %v558_v9, %v557_v8  ;;  %v711_v15 = vpack.c.bf16 %v560_v11, %v559_v10 }
 0x10f   : > { %v712_v16 = vpack.c.bf16 %v562_v13, %v561_v12 }
 0x110   : > { %587 = vst [vmem:[%s903_s6] sm:$0xff] %v710_v14  ;;  %588 = vst [vmem:[%s903_s6 + $0x8] sm:$0xff] %v711_v15 }
 0x111   : > { %589 = vst [vmem:[%s903_s6 + $0x10] sm:$0xff] %v712_v16 }
 0x112 PF: > { %s13_s16 = sadd.s32 1, %s831_s16   ;;  %s960_s12 = smov %s823_s14 }
 0x113   : > { %p10_p10 = scmp.ge.s32.totalorder %s13_s16, 26   ;;  %s961_s13 = smov %s827_s15 }
 0x114   : > { %s962_s14 = smov %s965_s17  ;;  %s963_s15 = smov %s969_s18 }
 0x115   :  { %12 = sbr.rel (!%p10_p10) target bundleno = 3 (0x3), region = 73 }

// kernel: net_forward.20
= control target key start
LH: loop header
LB: loop body
LE: loop exit
PB: predicated region body
PF: predicated region fallthrough
CT: control target
= control target key end

     0   :  { %s428_s0 = inlined_call_operand.vmem [shape: bf16[16,768], index: 0, kind: input, shape index: {}]   ;;  %s429_s1 = inlined_call_operand.vmem [shape: bf16[16,768], index: 1, kind: input, shape index: {}]   ;;  %s430_s2 = inlined_call_operand.vmem [shape: f32[1,768], index: 2, kind: input, shape index: {}]   ;;  %s431_s3 = inlined_call_operand.vmem [shape: f32[1,768], index: 3, kind: input, shape index: {}]   ;;  %s432_s4 = inlined_call_operand.vmem [shape: bf16[16,768], index: 4, kind: output, shape index: {}]  }
   0x1   :  { %v17_v0 = vld [vmem:[%s428_s0] sm:$0xff]  ;;  %v18_v1 = vld [vmem:[%s428_s0 + $0x8] sm:$0xff]  ;;  %v19_v2 = vld [vmem:[%s428_s0 + $0x10] sm:$0xff] }
   0x2   :  { %v23_v3 = vunpack.c.l.bf16 %v17_v0  ;;  %v24_v4 = vunpack.c.h.bf16 %v17_v0  ;;  %v25_v5 = vunpack.c.l.bf16 %v18_v1  ;;  %v35_v6 = vld [vmem:[%s429_s1] sm:$0xff]  ;;  %v36_v7 = vld [vmem:[%s429_s1 + $0x8] sm:$0xff]  ;;  %v37_v8 = vld [vmem:[%s429_s1 + $0x10] sm:$0xff]  ;;  %v26_v9 = vunpack.c.h.bf16 %v18_v1 }
   0x3   :  { %v41_v10 = vunpack.c.l.bf16 %v35_v6  ;;  %v42_v11 = vunpack.c.h.bf16 %v35_v6  ;;  %v20_v12 = vld [vmem:[%s428_s0 + $0x18] sm:$0xff]  ;;  %v43_v13 = vunpack.c.l.bf16 %v36_v7  ;;  %v44_v14 = vunpack.c.h.bf16 %v36_v7  ;;  %v21_v15 = vld [vmem:[%s428_s0 + $0x20] sm:$0xff]  ;;  %v22_v24 = vld [vmem:[%s428_s0 + $0x28] sm:$0xff] }
   0x4   :  { %v27_v16 = vunpack.c.l.bf16 %v19_v2  ;;  %v45_v17 = vunpack.c.l.bf16 %v37_v8  ;;  %v38_v20 = vld [vmem:[%s429_s1 + $0x18] sm:$0xff]  ;;  %v39_v21 = vld [vmem:[%s429_s1 + $0x20] sm:$0xff]  ;;  %v28_v22 = vunpack.c.h.bf16 %v19_v2  ;;  %v29_v25 = vunpack.c.l.bf16 %v20_v12  ;;  %v40_v31 = vld [vmem:[%s429_s1 + $0x28] sm:$0xff] }
   0x5   :  { %v53_v18 = vadd.f32 %v41_v10, %v23_v3  ;;  %v54_v19 = vadd.f32 %v42_v11, %v24_v4  ;;  %v55_v23 = vadd.f32 %v43_v13, %v25_v5  ;;  %v30_v26 = vunpack.c.h.bf16 %v20_v12 }
   0x6   :  { %v46_v27 = vunpack.c.h.bf16 %v37_v8  ;;  %v56_v28 = vadd.f32 %v44_v14, %v26_v9  ;;  %v31_v30 = vunpack.c.l.bf16 %v21_v15  ;;  %v32_v32 = vunpack.c.h.bf16 %v21_v15 }
   0x7   :  { %v65_v29 = vadd.f32 %v54_v19, %v53_v18  ;;  %v47_v33 = vunpack.c.l.bf16 %v38_v20  ;;  %v48_v34 = vunpack.c.h.bf16 %v38_v20  ;;  %v49_v35 = vunpack.c.l.bf16 %v39_v21 }
   0x8   :  { %v57_v36 = vadd.f32 %v45_v17, %v27_v16  ;;  %v33_v38 = vunpack.c.l.bf16 %v22_v24  ;;  %v50_v39 = vunpack.c.h.bf16 %v39_v21  ;;  %v51_v40 = vunpack.c.l.bf16 %v40_v31 }
   0x9   :  { %v66_v37 = vadd.f32 %v65_v29, %v55_v23  ;;  %v59_v41 = vadd.f32 %v47_v33, %v29_v25  ;;  %v60_v42 = vadd.f32 %v48_v34, %v30_v26  ;;  %v61_v43 = vadd.f32 %v49_v35, %v31_v30 }
   0xa   :  { %v58_v44 = vadd.f32 %v46_v27, %v28_v22  ;;  %v34_v46 = vunpack.c.h.bf16 %v22_v24  ;;  %v52_v47 = vunpack.c.h.bf16 %v40_v31  ;;  %v62_v48 = vadd.f32 %v50_v39, %v32_v32 }
   0xb   :  { %v67_v45 = vadd.f32 %v66_v37, %v56_v28  ;;  %v72_v49 = vadd.f32 %v60_v42, %v59_v41  ;;  %v63_v51 = vadd.f32 %v51_v40, %v33_v38  ;;  %v140_v35 = vlaneseq }
   0xc   :  { %v64_v54 = vadd.f32 %v52_v47, %v34_v46  ;;  %v182_v47 = vld [vmem:[%s431_s3] sm:$0x3f] }
   0xd   :  { %v68_v50 = vadd.f32 %v67_v45, %v57_v36  ;;  %v73_v52 = vadd.f32 %v72_v49, %v61_v43  ;;  %v141_v38 = vshrl.u32 %v140_v35, 7 }
   0xf   :  { %v69_v53 = vadd.f32 %v68_v50, %v58_v44  ;;  %v74_v55 = vadd.f32 %v73_v52, %v62_v48  ;;  %v142_v40 = vsub.s32 0, %v141_v38  ;;  %v158_v45 = vsub.s32 4, %v141_v38 }
  0x10   :  { %v162_v46 = vsub.s32 5, %v141_v38 }
  0x11   :  { %70 = vadd.xlane.f32.xlu0 %v69_v53  ;;  %v75_v56 = vadd.f32 %v74_v55, %v63_v51  ;;  %v187_v55 = vrot.slane %v182_v47, %v142_v40 }
  0x13   :  { %v76_v57 = vadd.f32 %v75_v56, %v64_v54 }
  0x15   :  { %77 = vadd.xlane.f32.xlu0 %v76_v57 }
  0x9a   :  { %v71_v58 = vpop.xlane.xlu0 %70 }
  0x9b   :  { %v80_v59 = vmul.f32 0.0013020834, %v71_v58 }
  0x9d   :  { %v349_v60 = vsub.f32 %v53_v18, %v80_v59  ;;  %v351_v61 = vsub.f32 %v54_v19, %v80_v59  ;;  %v353_v62 = vsub.f32 %v55_v23, %v80_v59  ;;  %v355_v0 = vsub.f32 %v56_v28, %v80_v59 }
  0x9e   :  { %v78_v63 = vpop.xlane.xlu0 %77  ;;  %v361_v4 = vsub.f32 %v57_v36, %v80_v59  ;;  %v87_v10 = vsub.f32 %v58_v44, %v80_v59  ;;  %v154_v44 = vsub.s32 3, %v141_v38 }
  0x9f   :  { %v94_v1 = vmul.f32 %v349_v60, %v349_v60  ;;  %v95_v2 = vmul.f32 %v351_v61, %v351_v61  ;;  %v81_v3 = vmul.f32 0.0013020834, %v78_v63  ;;  %v96_v5 = vmul.f32 %v353_v62, %v353_v62 }
  0xa0   :  { %v97_v11 = vmul.f32 %v355_v0, %v355_v0  ;;  %v98_v16 = vmul.f32 %v361_v4, %v361_v4  ;;  %v99_v21 = vmul.f32 %v87_v10, %v87_v10  ;;  %v199_v58 = vrot.slane %v182_v47, %v154_v44 }
  0xa1   :  { %v106_v6 = vadd.f32 %v95_v2, %v94_v1  ;;  %v365_v7 = vsub.f32 %v59_v41, %v81_v3  ;;  %v367_v8 = vsub.f32 %v60_v42, %v81_v3  ;;  %v369_v9 = vsub.f32 %v61_v43, %v81_v3  ;;  %v138_v42 = vld [vmem:[%s430_s2] sm:$0x3f] }
  0xa2   :  { %v373_v13 = vsub.f32 %v62_v48, %v81_v3  ;;  %v381_v18 = vsub.f32 %v63_v51, %v81_v3  ;;  %v385_v23 = vsub.f32 %v64_v54, %v81_v3  ;;  %v146_v41 = vsub.s32 1, %v141_v38 }
  0xa3   :  { %v107_v12 = vadd.f32 %v106_v6, %v96_v5  ;;  %v100_v14 = vmul.f32 %v365_v7, %v365_v7  ;;  %v101_v15 = vmul.f32 %v367_v8, %v367_v8  ;;  %v102_v19 = vmul.f32 %v369_v9, %v369_v9 }
  0xa4   :  { %v103_v24 = vmul.f32 %v373_v13, %v373_v13  ;;  %v104_v27 = vmul.f32 %v381_v18, %v381_v18  ;;  %v105_v29 = vmul.f32 %v385_v23, %v385_v23  ;;  %v150_v43 = vsub.s32 2, %v141_v38 }
  0xa5   :  { %v108_v17 = vadd.f32 %v107_v12, %v97_v11  ;;  %v113_v20 = vadd.f32 %v101_v15, %v100_v14  ;;  %v143_v48 = vrot.slane %v138_v42, %v142_v40  ;;  %v147_v49 = vrot.slane %v138_v42, %v146_v41 }
  0xa6   :  { %v151_v50 = vrot.slane %v138_v42, %v150_v43  ;;  %v155_v51 = vrot.slane %v138_v42, %v154_v44  ;;  %v159_v52 = vrot.slane %v138_v42, %v158_v45  ;;  %v163_v53 = vrot.slane %v138_v42, %v162_v46 }
  0xa7   :  { %v109_v22 = vadd.f32 %v108_v17, %v98_v16  ;;  %v114_v25 = vadd.f32 %v113_v20, %v102_v19  ;;  %v191_v56 = vrot.slane %v182_v47, %v146_v41  ;;  %v195_v57 = vrot.slane %v182_v47, %v150_v43 }
  0xa8   :  { %v203_v3 = vrot.slane %v182_v47, %v158_v45  ;;  %v207_v5 = vrot.slane %v182_v47, %v162_v46 }
  0xa9   :  { %v110_v26 = vadd.f32 %v109_v22, %v99_v21  ;;  %v115_v28 = vadd.f32 %v114_v25, %v103_v24 }
  0xab   :  { %111 = vadd.xlane.f32.xlu1 %v110_v26  ;;  %v116_v30 = vadd.f32 %v115_v28, %v104_v27 }
  0xad   :  { %v117_v31 = vadd.f32 %v116_v30, %v105_v29 }
  0xaf   :  { %118 = vadd.xlane.f32.xlu1 %v117_v31 }
 0x134   :  { %v112_v32 = vpop.xlane.xlu1 %111 }
 0x135   :  { %v120_v33 = vmul.f32 0.0013020834, %v112_v32 }
 0x137   :  { %v122_v34 = vadd.f32 1e-12, %v120_v33 }
 0x138   :  { %v119_v36 = vpop.xlane.xlu1 %118 }
 0x139   :  { %284 = vrsqrt.f32 %v122_v34  ;;  %v121_v37 = vmul.f32 0.0013020834, %v119_v36 }
 0x13b   :  { %v123_v39 = vadd.f32 1e-12, %v121_v37 }
 0x13d   :  { %286 = vrsqrt.f32 %v123_v39 }
 0x146   :  { %v285_v54 = vpop.eup %284 }
 0x147   :  { %v126_v59 = vmul.f32 %v285_v54, %v349_v60  ;;  %v127_v63 = vmul.f32 %v285_v54, %v351_v61  ;;  %v128_v1 = vmul.f32 %v285_v54, %v353_v62  ;;  %v129_v2 = vmul.f32 %v285_v54, %v355_v0 }
 0x148   :  { %v130_v6 = vmul.f32 %v285_v54, %v361_v4  ;;  %v131_v11 = vmul.f32 %v285_v54, %v87_v10 }
 0x149   :  { %v170_v12 = vmul.f32 %v143_v48, %v126_v59  ;;  %v171_v14 = vmul.f32 %v147_v49, %v127_v63  ;;  %v172_v15 = vmul.f32 %v151_v50, %v128_v1  ;;  %v173_v16 = vmul.f32 %v155_v51, %v129_v2 }
 0x14a   :  { %v174_v17 = vmul.f32 %v159_v52, %v130_v6  ;;  %v175_v19 = vmul.f32 %v163_v53, %v131_v11  ;;  %v287_v20 = vpop.eup %286 }
 0x14b   :  { %v214_v21 = vadd.f32 %v187_v55, %v170_v12  ;;  %v215_v60 = vadd.f32 %v191_v56, %v171_v14  ;;  %v216_v22 = vadd.f32 %v195_v57, %v172_v15  ;;  %v217_v61 = vadd.f32 %v199_v58, %v173_v16 }
 0x14c   :  { %v218_v24 = vadd.f32 %v203_v3, %v174_v17  ;;  %v219_v62 = vadd.f32 %v207_v5, %v175_v19  ;;  %v132_v0 = vmul.f32 %v287_v20, %v365_v7  ;;  %v133_v25 = vmul.f32 %v287_v20, %v367_v8 }
 0x14d   :  { %v278_v26 = vpack.c.bf16 %v215_v60, %v214_v21  ;;  %v279_v4 = vpack.c.bf16 %v217_v61, %v216_v22  ;;  %v134_v10 = vmul.f32 %v287_v20, %v369_v9  ;;  %v135_v27 = vmul.f32 %v287_v20, %v373_v13 }
 0x14e   :  { %v280_v28 = vpack.c.bf16 %v219_v62, %v218_v24  ;;  %v136_v29 = vmul.f32 %v287_v20, %v381_v18  ;;  %v137_v30 = vmul.f32 %v287_v20, %v385_v23  ;;  %v176_v31 = vmul.f32 %v143_v48, %v132_v0 }
 0x14f   :  { %262 = vst [vmem:[%s432_s4] sm:$0xff] %v278_v26  ;;  %263 = vst [vmem:[%s432_s4 + $0x8] sm:$0xff] %v279_v4  ;;  %v177_v7 = vmul.f32 %v147_v49, %v133_v25  ;;  %v178_v8 = vmul.f32 %v151_v50, %v134_v10  ;;  %v179_v32 = vmul.f32 %v155_v51, %v135_v27 }
 0x150   :  { %264 = vst [vmem:[%s432_s4 + $0x10] sm:$0xff] %v280_v28  ;;  %v180_v9 = vmul.f32 %v159_v52, %v136_v29  ;;  %v181_v13 = vmul.f32 %v163_v53, %v137_v30  ;;  %v220_v18 = vadd.f32 %v187_v55, %v176_v31 }
 0x151   :  { %v221_v23 = vadd.f32 %v191_v56, %v177_v7  ;;  %v222_v33 = vadd.f32 %v195_v57, %v178_v8  ;;  %v223_v34 = vadd.f32 %v199_v58, %v179_v32 }
 0x152   :  { %v224_v35 = vadd.f32 %v203_v3, %v180_v9  ;;  %v225_v36 = vadd.f32 %v207_v5, %v181_v13 }
 0x153   :  { %v281_v37 = vpack.c.bf16 %v221_v23, %v220_v18  ;;  %v282_v38 = vpack.c.bf16 %v223_v34, %v222_v33 }
 0x154   :  { %v283_v39 = vpack.c.bf16 %v225_v36, %v224_v35 }
 0x155   :  { %265 = vst [vmem:[%s432_s4 + $0x18] sm:$0xff] %v281_v37  ;;  %266 = vst [vmem:[%s432_s4 + $0x20] sm:$0xff] %v282_v38 }
 0x156   :  { %267 = vst [vmem:[%s432_s4 + $0x28] sm:$0xff] %v283_v39 }

// kernel: squeeze.1
= control target key start
LH: loop header
LB: loop body
LE: loop exit
PB: predicated region body
PF: predicated region fallthrough
CT: control target
= control target key end

     0   :  { %s77_s0 = inlined_call_operand.vmem [shape: s32[16], index: 0, kind: input, shape index: {}]   ;;  %s78_s1 = inlined_call_operand.hbm [shape: s32[2,8], index: 1, kind: output, shape index: {}]  }
   0x1   :  { %v6_v0 = vld [vmem:[%s77_s0] sm:$0x1] }
   0x2   :  { %2 = vsyncpa [#allocation1], 0  ;;  %7 = vst [vmem:[#allocation3] sm:$0x1] %v6_v0  ;;  %vm9_vm0 = vcmask 64512   ;;  %s59_s0 = smov 120  }
   0x3   :  { %s60_s8 = smov [#allocation0]  }
   0x4   :  { %s29_s9 = sshll.u32 %s60_s8, 4  ;;  %s30_s9 = int_to_ptr.vmem [resolvable:$true] %s29_s9 }
   0x5   :  { %s37_s10 = scalar_lea.vmem %s30_s9, 32  ;;  %p42_p1 = scmp.lt.s32.totalorder %s30_s9, %s30_s9 }
   0x6   :  { %p38_p0 = scmp.ne.s32.totalorder %s30_s9, %s37_s10  ;;  %p43_p2 = scmp.lt.s32.totalorder %s37_s10, %s37_s10 }
   0x8   :  { %p44_p3 = por %p43_p2, %p42_p1 }
   0x9   :  { %v11_v1 = vld [vmem:[#allocation3] sm:$0x1]  }
   0xa   :  { %v8_v2 = vld [vmem:[#allocation3] sm:$0x1]   ;;  %12 = vrot.lane.b32.xlu0 %v11_v1, %s59_s0  ;;  %p45_p4 = pnand %p44_p3, %p38_p0 }
   0xb   :  { %10 = vst.msk [vmem:[#allocation2] sm:$0x1] %vm9_vm0, %v8_v2  }
  0x7c   :  { %v13_v3 = vpop.permute.xlu0 %12  }
  0x7d   :  { %16 = vst.msk [vmem:[#allocation2 + $0x1] sm:$0x1] %vm9_vm0, %v13_v3  }
  0x84   :  { %v21_v4 = vld [vmem:[#allocation2] sm:$0x3] }
  0x85   :  { %24 = vst [vmem:[#allocation0] sm:$0x3] %v21_v4 }
  0x86   :  { %48 = shalt.err (!%p45_p4)
}
  0x87   :  { %32 = dma.vmem_to_hbm [thread:$0]  %s30_s9, 32, %s78_s1, [#allocation1]  }
  0x88   :  { %57 = dma.done.wait [#allocation1], 32  }
  0x89   :  { %58 = vsyncadd [#allocation1], 4294967264 }
  0x8a   :  { %34 = vsyncpa [#allocation1], 1 }

// kernel: net_forward.21
= control target key start
LH: loop header
LB: loop body
LE: loop exit
PB: predicated region body
PF: predicated region fallthrough
CT: control target
= control target key end

     0   :  { %s1973_s12 = smov 0   ;;  %s1975_s13 = smov 0   ;;  %s2365_s0 = inlined_call_operand.vmem [shape: bf16[16,768], index: 0, kind: input, shape index: {}]   ;;  %s2366_s1 = inlined_call_operand.vmem [shape: bf16[768,3072], index: 1, kind: input, shape index: {}]   ;;  %s2367_s2 = inlined_call_operand.vmem [shape: f32[1,3072], index: 2, kind: input, shape index: {}]   ;;  %s2368_s3 = inlined_call_operand.vmem [shape: bf16[16,3072], index: 3, kind: output, shape index: {}]  }
   0x1   :  { %s1977_s14 = smov 0   ;;  %s1979_s15 = smov 0  }
   0x2   :  { %s1981_s16 = smov 0  }
   0x3 LB: > { %s22_s17 = sadd.s32 1, %s1947_s15  ;;  %s1587_s18 = sadd.s32 4294967295, %s1951_s16   ;;  %s1951_s16 = sphi %s1981_s16, %s13_s16   ;;  %s1947_s15 = sphi %s1979_s15, %s2373_s15   ;;  %s1943_s14 = sphi %s1977_s14, %s2372_s14   ;;  %s1939_s13 = sphi %s1975_s13, %s2371_s13   ;;  %s1935_s12 = sphi %s1973_s12, %s2370_s12  }
   0x4   : > { %p23_p0 = scmp.ge.s32.totalorder %s22_s17, 12  ;;  %p65_p1 = scmp.ne.s32.totalorder %s1939_s13, %s1935_s12 }
   0x5   : > { %p66_p2 = scmp.eq.s32.totalorder %s1951_s16, 0  ;;  %p123_p4 = scmp.eq.s32.totalorder %s1587_s18, 11 }
   0x6   : > { %s2375_s17 = smov (%p23_p0, %s22_s17), 0  ;;  %s58_s20 = sadd.s32 1, %s1939_s13 }
   0x7   : > { %p67_p3 = por %p66_p2, %p65_p1  ;;  %s55_s19 = ssub.s32 %s1947_s15, %s2375_s17 }
   0x8   : > { %p56_p5 = scmp.eq.s32.totalorder %s55_s19, 0  ;;  %p2008_p6 = por %p123_p4, %p65_p1 }
   0x9   : > { %p1591_p7 = scmp.ge.s32.totalorder %s1951_s16, 12 }
   0xa   : > { %s2013_s22 = scalar_select %p56_p5, %s1939_s13, %s58_s20  }
   0xb   : > { %155 = sbr.rel (%p1591_p7) target bundleno = 116 (0x74), region = 20 }
  0x10   : > { %158 = sbr.rel (!%p67_p3) target bundleno = 116 (0x74), region = 24  ;;  %s160_s23 = sand.u32 (%p67_p3), 1, %s1939_s13  }
  0x11   : > { %s1706_s24 = sshll.u32 (%p67_p3), %s1947_s15, 3  ;;  %s1710_s25 = smul.u32 (%p67_p3), 768, %s160_s23 }
  0x12   : > { %s2021_s28 = scalar_lea.vmem (%p67_p3), %s2366_s1, %s1706_s24 }
  0x13   : > { %v384_v0 = vld [vmem:[%s2021_s28] sm:$0xff] (%p67_p3)  ;;  %s2029_s29 = scalar_lea.vmem (%p67_p3), [#allocation2], %s1710_s25 }
  0x14   : > { %v386_v1 = vld [vmem:[%s2021_s28 + $0x60] sm:$0xff] (%p67_p3)  ;;  %385 = vst [vmem:[%s2029_s29] sm:$0xff] (%p67_p3), %v384_v0 }
  0x15   : > { %v388_v2 = vld [vmem:[%s2021_s28 + $0xc0] sm:$0xff]  ;;  %387 = vst [vmem:[%s2029_s29 + $0x8] sm:$0xff] %v386_v1 }
  0x16   : > { %v390_v3 = vld [vmem:[%s2021_s28 + $0x120] sm:$0xff]  ;;  %389 = vst [vmem:[%s2029_s29 + $0x10] sm:$0xff] %v388_v2 }
  0x17   : > { %v392_v4 = vld [vmem:[%s2021_s28 + $0x180] sm:$0xff]  ;;  %391 = vst [vmem:[%s2029_s29 + $0x18] sm:$0xff] %v390_v3 }
  0x18   : > { %v394_v5 = vld [vmem:[%s2021_s28 + $0x1e0] sm:$0xff]  ;;  %393 = vst [vmem:[%s2029_s29 + $0x20] sm:$0xff] %v392_v4 }
  0x19   : > { %395 = vst [vmem:[%s2029_s29 + $0x28] sm:$0xff] %v394_v5  ;;  %v396_v6 = vld [vmem:[%s2021_s28 + $0x240] sm:$0xff] }
  0x1a   : > { %v398_v7 = vld [vmem:[%s2021_s28 + $0x2a0] sm:$0xff]  ;;  %397 = vst [vmem:[%s2029_s29 + $0x30] sm:$0xff] %v396_v6 }
  0x1b   : > { %v400_v8 = vld [vmem:[%s2021_s28 + $0x300] sm:$0xff]  ;;  %399 = vst [vmem:[%s2029_s29 + $0x38] sm:$0xff] %v398_v7 }
  0x1c   : > { %401 = vst [vmem:[%s2029_s29 + $0x40] sm:$0xff] %v400_v8  ;;  %v402_v9 = vld [vmem:[%s2021_s28 + $0x360] sm:$0xff] }
  0x1d   : > { %v404_v10 = vld [vmem:[%s2021_s28 + $0x3c0] sm:$0xff]  ;;  %403 = vst [vmem:[%s2029_s29 + $0x48] sm:$0xff] %v402_v9 }
  0x1e   : > { %v406_v11 = vld [vmem:[%s2021_s28 + $0x420] sm:$0xff]  ;;  %405 = vst [vmem:[%s2029_s29 + $0x50] sm:$0xff] %v404_v10 }
  0x1f   : > { %407 = vst [vmem:[%s2029_s29 + $0x58] sm:$0xff] %v406_v11  ;;  %v408_v12 = vld [vmem:[%s2021_s28 + $0x480] sm:$0xff] }
  0x20   : > { %v410_v13 = vld [vmem:[%s2021_s28 + $0x4e0] sm:$0xff]  ;;  %409 = vst [vmem:[%s2029_s29 + $0x60] sm:$0xff] %v408_v12 }
  0x21   : > { %v412_v14 = vld [vmem:[%s2021_s28 + $0x540] sm:$0xff]  ;;  %411 = vst [vmem:[%s2029_s29 + $0x68] sm:$0xff] %v410_v13 }
  0x22   : > { %413 = vst [vmem:[%s2029_s29 + $0x70] sm:$0xff] %v412_v14  ;;  %v414_v15 = vld [vmem:[%s2021_s28 + $0x5a0] sm:$0xff] }
  0x23   : > { %v416_v16 = vld [vmem:[%s2021_s28 + $0x600] sm:$0xff]  ;;  %415 = vst [vmem:[%s2029_s29 + $0x78] sm:$0xff] %v414_v15 }
  0x24   : > { %v418_v17 = vld [vmem:[%s2021_s28 + $0x660] sm:$0xff]  ;;  %417 = vst [vmem:[%s2029_s29 + $0x80] sm:$0xff] %v416_v16 }
  0x25   : > { %419 = vst [vmem:[%s2029_s29 + $0x88] sm:$0xff] %v418_v17  ;;  %v420_v18 = vld [vmem:[%s2021_s28 + $0x6c0] sm:$0xff] }
  0x26   : > { %v422_v19 = vld [vmem:[%s2021_s28 + $0x720] sm:$0xff]  ;;  %421 = vst [vmem:[%s2029_s29 + $0x90] sm:$0xff] %v420_v18 }
  0x27   : > { %v424_v20 = vld [vmem:[%s2021_s28 + $0x780] sm:$0xff]  ;;  %423 = vst [vmem:[%s2029_s29 + $0x98] sm:$0xff] %v422_v19 }
  0x28   : > { %425 = vst [vmem:[%s2029_s29 + $0xa0] sm:$0xff] %v424_v20  ;;  %v426_v21 = vld [vmem:[%s2021_s28 + $0x7e0] sm:$0xff] }
  0x29   : > { %v428_v22 = vld [vmem:[%s2021_s28 + $0x840] sm:$0xff]  ;;  %427 = vst [vmem:[%s2029_s29 + $0xa8] sm:$0xff] %v426_v21 }
  0x2a   : > { %v430_v23 = vld [vmem:[%s2021_s28 + $0x8a0] sm:$0xff]  ;;  %429 = vst [vmem:[%s2029_s29 + $0xb0] sm:$0xff] %v428_v22 }
  0x2b   : > { %431 = vst [vmem:[%s2029_s29 + $0xb8] sm:$0xff] %v430_v23  ;;  %v432_v24 = vld [vmem:[%s2021_s28 + $0x900] sm:$0xff] }
  0x2c   : > { %v434_v25 = vld [vmem:[%s2021_s28 + $0x960] sm:$0xff]  ;;  %433 = vst [vmem:[%s2029_s29 + $0xc0] sm:$0xff] %v432_v24 }
  0x2d   : > { %v436_v26 = vld [vmem:[%s2021_s28 + $0x9c0] sm:$0xff]  ;;  %435 = vst [vmem:[%s2029_s29 + $0xc8] sm:$0xff] %v434_v25 }
  0x2e   : > { %437 = vst [vmem:[%s2029_s29 + $0xd0] sm:$0xff] %v436_v26  ;;  %v438_v27 = vld [vmem:[%s2021_s28 + $0xa20] sm:$0xff] }
  0x2f   : > { %v440_v28 = vld [vmem:[%s2021_s28 + $0xa80] sm:$0xff]  ;;  %439 = vst [vmem:[%s2029_s29 + $0xd8] sm:$0xff] %v438_v27 }
  0x30   : > { %v442_v29 = vld [vmem:[%s2021_s28 + $0xae0] sm:$0xff]  ;;  %441 = vst [vmem:[%s2029_s29 + $0xe0] sm:$0xff] %v440_v28 }
  0x31   : > { %443 = vst [vmem:[%s2029_s29 + $0xe8] sm:$0xff] %v442_v29  ;;  %v444_v30 = vld [vmem:[%s2021_s28 + $0xb40] sm:$0xff] }
  0x32   : > { %v446_v31 = vld [vmem:[%s2021_s28 + $0xba0] sm:$0xff]  ;;  %445 = vst [vmem:[%s2029_s29 + $0xf0] sm:$0xff] %v444_v30 }
  0x33   : > { %v448_v32 = vld [vmem:[%s2021_s28 + $0xc00] sm:$0xff]  ;;  %447 = vst [vmem:[%s2029_s29 + $0xf8] sm:$0xff] %v446_v31 }
  0x34   : > { %449 = vst [vmem:[%s2029_s29 + $0x100] sm:$0xff] %v448_v32  ;;  %v450_v33 = vld [vmem:[%s2021_s28 + $0xc60] sm:$0xff] }
  0x35   : > { %v452_v34 = vld [vmem:[%s2021_s28 + $0xcc0] sm:$0xff]  ;;  %451 = vst [vmem:[%s2029_s29 + $0x108] sm:$0xff] %v450_v33 }
  0x36   : > { %v454_v35 = vld [vmem:[%s2021_s28 + $0xd20] sm:$0xff]  ;;  %453 = vst [vmem:[%s2029_s29 + $0x110] sm:$0xff] %v452_v34 }
  0x37   : > { %455 = vst [vmem:[%s2029_s29 + $0x118] sm:$0xff] %v454_v35  ;;  %v456_v36 = vld [vmem:[%s2021_s28 + $0xd80] sm:$0xff] }
  0x38   : > { %v458_v37 = vld [vmem:[%s2021_s28 + $0xde0] sm:$0xff]  ;;  %457 = vst [vmem:[%s2029_s29 + $0x120] sm:$0xff] %v456_v36 }
  0x39   : > { %v460_v38 = vld [vmem:[%s2021_s28 + $0xe40] sm:$0xff]  ;;  %459 = vst [vmem:[%s2029_s29 + $0x128] sm:$0xff] %v458_v37 }
  0x3a   : > { %461 = vst [vmem:[%s2029_s29 + $0x130] sm:$0xff] %v460_v38  ;;  %v462_v39 = vld [vmem:[%s2021_s28 + $0xea0] sm:$0xff] }
  0x3b   : > { %v464_v40 = vld [vmem:[%s2021_s28 + $0xf00] sm:$0xff]  ;;  %463 = vst [vmem:[%s2029_s29 + $0x138] sm:$0xff] %v462_v39 }
  0x3c   : > { %v466_v41 = vld [vmem:[%s2021_s28 + $0xf60] sm:$0xff]  ;;  %465 = vst [vmem:[%s2029_s29 + $0x140] sm:$0xff] %v464_v40 }
  0x3d   : > { %467 = vst [vmem:[%s2029_s29 + $0x148] sm:$0xff] %v466_v41  ;;  %v468_v42 = vld [vmem:[%s2021_s28 + $0xfc0] sm:$0xff] }
  0x3e   : > { %v470_v43 = vld [vmem:[%s2021_s28 + $0x1020] sm:$0xff]  ;;  %469 = vst [vmem:[%s2029_s29 + $0x150] sm:$0xff] %v468_v42 }
  0x3f   : > { %v472_v44 = vld [vmem:[%s2021_s28 + $0x1080] sm:$0xff]  ;;  %471 = vst [vmem:[%s2029_s29 + $0x158] sm:$0xff] %v470_v43 }
  0x40   : > { %473 = vst [vmem:[%s2029_s29 + $0x160] sm:$0xff] %v472_v44  ;;  %v474_v45 = vld [vmem:[%s2021_s28 + $0x10e0] sm:$0xff] }
  0x41   : > { %v476_v46 = vld [vmem:[%s2021_s28 + $0x1140] sm:$0xff]  ;;  %475 = vst [vmem:[%s2029_s29 + $0x168] sm:$0xff] %v474_v45 }
  0x42   : > { %v478_v47 = vld [vmem:[%s2021_s28 + $0x11a0] sm:$0xff]  ;;  %477 = vst [vmem:[%s2029_s29 + $0x170] sm:$0xff] %v476_v46 }
  0x43   : > { %479 = vst [vmem:[%s2029_s29 + $0x178] sm:$0xff] %v478_v47  ;;  %v480_v48 = vld [vmem:[%s2021_s28 + $0x1200] sm:$0xff] }
  0x44   : > { %v482_v49 = vld [vmem:[%s2021_s28 + $0x1260] sm:$0xff]  ;;  %481 = vst [vmem:[%s2029_s29 + $0x180] sm:$0xff] %v480_v48 }
  0x45   : > { %v484_v50 = vld [vmem:[%s2021_s28 + $0x12c0] sm:$0xff]  ;;  %483 = vst [vmem:[%s2029_s29 + $0x188] sm:$0xff] %v482_v49 }
  0x46   : > { %485 = vst [vmem:[%s2029_s29 + $0x190] sm:$0xff] %v484_v50  ;;  %v486_v51 = vld [vmem:[%s2021_s28 + $0x1320] sm:$0xff] }
  0x47   : > { %v488_v52 = vld [vmem:[%s2021_s28 + $0x1380] sm:$0xff]  ;;  %487 = vst [vmem:[%s2029_s29 + $0x198] sm:$0xff] %v486_v51 }
  0x48   : > { %v490_v53 = vld [vmem:[%s2021_s28 + $0x13e0] sm:$0xff]  ;;  %489 = vst [vmem:[%s2029_s29 + $0x1a0] sm:$0xff] %v488_v52 }
  0x49   : > { %491 = vst [vmem:[%s2029_s29 + $0x1a8] sm:$0xff] %v490_v53  ;;  %v492_v54 = vld [vmem:[%s2021_s28 + $0x1440] sm:$0xff] }
  0x4a   : > { %v494_v55 = vld [vmem:[%s2021_s28 + $0x14a0] sm:$0xff]  ;;  %493 = vst [vmem:[%s2029_s29 + $0x1b0] sm:$0xff] %v492_v54 }
  0x4b   : > { %v496_v56 = vld [vmem:[%s2021_s28 + $0x1500] sm:$0xff]  ;;  %495 = vst [vmem:[%s2029_s29 + $0x1b8] sm:$0xff] %v494_v55 }
  0x4c   : > { %497 = vst [vmem:[%s2029_s29 + $0x1c0] sm:$0xff] %v496_v56  ;;  %v498_v57 = vld [vmem:[%s2021_s28 + $0x1560] sm:$0xff] }
  0x4d   : > { %v500_v58 = vld [vmem:[%s2021_s28 + $0x15c0] sm:$0xff]  ;;  %499 = vst [vmem:[%s2029_s29 + $0x1c8] sm:$0xff] %v498_v57 }
  0x4e   : > { %v502_v59 = vld [vmem:[%s2021_s28 + $0x1620] sm:$0xff]  ;;  %501 = vst [vmem:[%s2029_s29 + $0x1d0] sm:$0xff] %v500_v58 }
  0x4f   : > { %503 = vst [vmem:[%s2029_s29 + $0x1d8] sm:$0xff] %v502_v59  ;;  %v504_v60 = vld [vmem:[%s2021_s28 + $0x1680] sm:$0xff] }
  0x50   : > { %v506_v61 = vld [vmem:[%s2021_s28 + $0x16e0] sm:$0xff]  ;;  %505 = vst [vmem:[%s2029_s29 + $0x1e0] sm:$0xff] %v504_v60 }
  0x51   : > { %v508_v62 = vld [vmem:[%s2021_s28 + $0x1740] sm:$0xff]  ;;  %507 = vst [vmem:[%s2029_s29 + $0x1e8] sm:$0xff] %v506_v61 }
  0x52   : > { %509 = vst [vmem:[%s2029_s29 + $0x1f0] sm:$0xff] %v508_v62  ;;  %v510_v63 = vld [vmem:[%s2021_s28 + $0x17a0] sm:$0xff] }
  0x53   : > { %v512_v0 = vld [vmem:[%s2021_s28 + $0x1800] sm:$0xff]  ;;  %511 = vst [vmem:[%s2029_s29 + $0x1f8] sm:$0xff] %v510_v63 }
  0x54   : > { %v514_v1 = vld [vmem:[%s2021_s28 + $0x1860] sm:$0xff]  ;;  %513 = vst [vmem:[%s2029_s29 + $0x200] sm:$0xff] %v512_v0 }
  0x55   : > { %515 = vst [vmem:[%s2029_s29 + $0x208] sm:$0xff] %v514_v1  ;;  %v516_v2 = vld [vmem:[%s2021_s28 + $0x18c0] sm:$0xff] }
  0x56   : > { %v518_v3 = vld [vmem:[%s2021_s28 + $0x1920] sm:$0xff]  ;;  %517 = vst [vmem:[%s2029_s29 + $0x210] sm:$0xff] %v516_v2 }
  0x57   : > { %v520_v4 = vld [vmem:[%s2021_s28 + $0x1980] sm:$0xff]  ;;  %519 = vst [vmem:[%s2029_s29 + $0x218] sm:$0xff] %v518_v3 }
  0x58   : > { %521 = vst [vmem:[%s2029_s29 + $0x220] sm:$0xff] %v520_v4  ;;  %v522_v5 = vld [vmem:[%s2021_s28 + $0x19e0] sm:$0xff] }
  0x59   : > { %v524_v6 = vld [vmem:[%s2021_s28 + $0x1a40] sm:$0xff]  ;;  %523 = vst [vmem:[%s2029_s29 + $0x228] sm:$0xff] %v522_v5 }
  0x5a   : > { %v526_v7 = vld [vmem:[%s2021_s28 + $0x1aa0] sm:$0xff]  ;;  %525 = vst [vmem:[%s2029_s29 + $0x230] sm:$0xff] %v524_v6 }
  0x5b   : > { %527 = vst [vmem:[%s2029_s29 + $0x238] sm:$0xff] %v526_v7  ;;  %v528_v8 = vld [vmem:[%s2021_s28 + $0x1b00] sm:$0xff] }
  0x5c   : > { %v530_v9 = vld [vmem:[%s2021_s28 + $0x1b60] sm:$0xff]  ;;  %529 = vst [vmem:[%s2029_s29 + $0x240] sm:$0xff] %v528_v8 }
  0x5d   : > { %v532_v10 = vld [vmem:[%s2021_s28 + $0x1bc0] sm:$0xff]  ;;  %531 = vst [vmem:[%s2029_s29 + $0x248] sm:$0xff] %v530_v9 }
  0x5e   : > { %533 = vst [vmem:[%s2029_s29 + $0x250] sm:$0xff] %v532_v10  ;;  %v534_v11 = vld [vmem:[%s2021_s28 + $0x1c20] sm:$0xff] }
  0x5f   : > { %v536_v12 = vld [vmem:[%s2021_s28 + $0x1c80] sm:$0xff]  ;;  %535 = vst [vmem:[%s2029_s29 + $0x258] sm:$0xff] %v534_v11 }
  0x60   : > { %v538_v13 = vld [vmem:[%s2021_s28 + $0x1ce0] sm:$0xff]  ;;  %537 = vst [vmem:[%s2029_s29 + $0x260] sm:$0xff] %v536_v12 }
  0x61   : > { %539 = vst [vmem:[%s2029_s29 + $0x268] sm:$0xff] %v538_v13  ;;  %v540_v14 = vld [vmem:[%s2021_s28 + $0x1d40] sm:$0xff] }
  0x62   : > { %v542_v15 = vld [vmem:[%s2021_s28 + $0x1da0] sm:$0xff]  ;;  %541 = vst [vmem:[%s2029_s29 + $0x270] sm:$0xff] %v540_v14 }
  0x63   : > { %v544_v16 = vld [vmem:[%s2021_s28 + $0x1e00] sm:$0xff]  ;;  %543 = vst [vmem:[%s2029_s29 + $0x278] sm:$0xff] %v542_v15 }
  0x64   : > { %545 = vst [vmem:[%s2029_s29 + $0x280] sm:$0xff] %v544_v16  ;;  %v546_v17 = vld [vmem:[%s2021_s28 + $0x1e60] sm:$0xff] }
  0x65   : > { %v548_v18 = vld [vmem:[%s2021_s28 + $0x1ec0] sm:$0xff]  ;;  %547 = vst [vmem:[%s2029_s29 + $0x288] sm:$0xff] %v546_v17 }
  0x66   : > { %v550_v19 = vld [vmem:[%s2021_s28 + $0x1f20] sm:$0xff]  ;;  %549 = vst [vmem:[%s2029_s29 + $0x290] sm:$0xff] %v548_v18 }
  0x67   : > { %551 = vst [vmem:[%s2029_s29 + $0x298] sm:$0xff] %v550_v19  ;;  %v552_v20 = vld [vmem:[%s2021_s28 + $0x1f80] sm:$0xff] }
  0x68   : > { %v554_v21 = vld [vmem:[%s2021_s28 + $0x1fe0] sm:$0xff]  ;;  %553 = vst [vmem:[%s2029_s29 + $0x2a0] sm:$0xff] %v552_v20 }
  0x69   : > { %v556_v22 = vld [vmem:[%s2021_s28 + $0x2040] sm:$0xff]  ;;  %555 = vst [vmem:[%s2029_s29 + $0x2a8] sm:$0xff] %v554_v21 }
  0x6a   : > { %557 = vst [vmem:[%s2029_s29 + $0x2b0] sm:$0xff] %v556_v22  ;;  %v558_v23 = vld [vmem:[%s2021_s28 + $0x20a0] sm:$0xff] }
  0x6b   : > { %v560_v24 = vld [vmem:[%s2021_s28 + $0x2100] sm:$0xff]  ;;  %559 = vst [vmem:[%s2029_s29 + $0x2b8] sm:$0xff] %v558_v23 }
  0x6c   : > { %v562_v25 = vld [vmem:[%s2021_s28 + $0x2160] sm:$0xff]  ;;  %561 = vst [vmem:[%s2029_s29 + $0x2c0] sm:$0xff] %v560_v24 }
  0x6d   : > { %563 = vst [vmem:[%s2029_s29 + $0x2c8] sm:$0xff] %v562_v25  ;;  %v564_v26 = vld [vmem:[%s2021_s28 + $0x21c0] sm:$0xff] }
  0x6e   : > { %v566_v27 = vld [vmem:[%s2021_s28 + $0x2220] sm:$0xff]  ;;  %565 = vst [vmem:[%s2029_s29 + $0x2d0] sm:$0xff] %v564_v26 }
  0x6f   : > { %v568_v28 = vld [vmem:[%s2021_s28 + $0x2280] sm:$0xff]  ;;  %567 = vst [vmem:[%s2029_s29 + $0x2d8] sm:$0xff] %v566_v27 }
  0x70   : > { %569 = vst [vmem:[%s2029_s29 + $0x2e0] sm:$0xff] %v568_v28  ;;  %v570_v29 = vld [vmem:[%s2021_s28 + $0x22e0] sm:$0xff] }
  0x71   : > { %v572_v30 = vld [vmem:[%s2021_s28 + $0x2340] sm:$0xff]  ;;  %571 = vst [vmem:[%s2029_s29 + $0x2e8] sm:$0xff] %v570_v29 }
  0x72   : > { %v574_v31 = vld [vmem:[%s2021_s28 + $0x23a0] sm:$0xff]  ;;  %573 = vst [vmem:[%s2029_s29 + $0x2f0] sm:$0xff] %v572_v30 }
  0x73   : > { %575 = vst [vmem:[%s2029_s29 + $0x2f8] sm:$0xff] %v574_v31 }
  0x74 PF: > { %p1594_p8 = scmp.ge.s32.totalorder %s1951_s16, 1  ;;  %p588_p9 = scmp.lt.s32.totalorder %s1951_s16, 13 }
  0x76   : > { %p589_p10 = pnand %p1594_p8, %p588_p9 }
  0x77   : > { %s595_s30 = sand.u32 (!%p589_p10), 1, %s1935_s12   ;;  %s1596_s26 = sshll.u32 (!%p589_p10), %s1943_s14, 1 }
  0x78   : > { %592 = sbr.rel (%p589_p10) target bundleno = 495 (0x1ef), region = 66  ;;  %p636_p11 = scmp.lt.s32.totalorder (!%p589_p10), %s1596_s26, 23 }
  0x79   : > { %s1711_s4 = smul.u32 (!%p589_p10), 768, %s595_s30 }
  0x7b   : > { %s2228_s9 = scalar_lea.vmem (!%p589_p10), [#allocation2], %s1711_s4  ;;  %s1595_s4 = sshll.u32 (!%p589_p10), %s595_s30, 4 }
  0x7c   : > { %s626_s5 = scalar_lea.vmem (!%p589_p10), [#allocation3], %s1595_s4 }
  0x7d   : > { %v1849_v32 = vld [vmem:[%s2365_s0 + $0x4] ss:$24 sps:$4 sm:$0xff]   ;;  %v1754_v35 = vld [vmem:[%s2228_s9 + $0x70] ss:$8 sps:$4 sm:$0xff]   ;;  %v1760_v39 = vld [vmem:[%s2228_s9 + $0x60] ss:$8 sps:$4 sm:$0xff]  }
  0x7e   : > { %v1856_v33 = vld [vmem:[%s2365_s0 + $0xc] ss:$24 sps:$4 sm:$0xff]   ;;  %1298 = vmatprep.mubr.bf16.mxu0 %v1849_v32  ;;  %v1752_v34 = vld [vmem:[%s2228_s9 + $0x74] ss:$8 sps:$4 sm:$0xff]   ;;  %v1757_v37 = vld [vmem:[%s2228_s9 + $0x170] ss:$8 sps:$4 sm:$0xff]  }
  0x7f   : > { %1341 = vmatprep.mubr.bf16.mxu1 %v1856_v33  ;;  %1266 = vmatprep.subr.bf16.mxu0 %v1752_v34  ;;  %v1755_v36 = vld [vmem:[%s2228_s9 + $0x174] ss:$8 sps:$4 sm:$0xff]   ;;  %v1758_v38 = vld [vmem:[%s2228_s9 + $0x64] ss:$8 sps:$4 sm:$0xff]   ;;  %v1763_v41 = vld [vmem:[%s2228_s9 + $0x160] ss:$8 sps:$4 sm:$0xff]  }
  0x80   : > { %1267 = vmatpush1.bf16.msra.mxu0 %v1754_v35  ;;  %1309 = vmatprep.subr.bf16.mxu1 %v1755_v36  ;;  %v1761_v40 = vld [vmem:[%s2228_s9 + $0x164] ss:$8 sps:$4 sm:$0xff]   ;;  %v1764_v42 = vld [vmem:[%s2228_s9 + $0x54] ss:$8 sps:$4 sm:$0xff]   ;;  %v1766_v43 = vld [vmem:[%s2228_s9 + $0x50] ss:$8 sps:$4 sm:$0xff]  }
  0x81   : > { %1310 = vmatpush1.bf16.msra.mxu1 %v1757_v37  ;;  %1268 = vmatprep.subr.bf16.mxu0 %v1758_v38  ;;  %v1767_v44 = vld [vmem:[%s2228_s9 + $0x154] ss:$8 sps:$4 sm:$0xff]   ;;  %v1770_v45 = vld [vmem:[%s2228_s9 + $0x44] ss:$8 sps:$4 sm:$0xff]   ;;  %v1769_v46 = vld [vmem:[%s2228_s9 + $0x150] ss:$8 sps:$4 sm:$0xff]  }
  0x82   : > { %1311 = vmatprep.subr.bf16.mxu1 %v1761_v40  ;;  %v1773_v47 = vld [vmem:[%s2228_s9 + $0x144] ss:$8 sps:$4 sm:$0xff]   ;;  %v1772_v48 = vld [vmem:[%s2228_s9 + $0x40] ss:$8 sps:$4 sm:$0xff]   ;;  %v1776_v49 = vld [vmem:[%s2228_s9 + $0x34] ss:$8 sps:$4 sm:$0xff]  }
  0x83   : > { %v1775_v50 = vld [vmem:[%s2228_s9 + $0x140] ss:$8 sps:$4 sm:$0xff]   ;;  %v1779_v51 = vld [vmem:[%s2228_s9 + $0x134] ss:$8 sps:$4 sm:$0xff]   ;;  %v1778_v52 = vld [vmem:[%s2228_s9 + $0x30] ss:$8 sps:$4 sm:$0xff]  }
  0x84   : > { %1269 = vmatpush1.bf16.msra.mxu0 %v1760_v39  ;;  %v1782_v53 = vld [vmem:[%s2228_s9 + $0x24] ss:$8 sps:$4 sm:$0xff]   ;;  %v1781_v54 = vld [vmem:[%s2228_s9 + $0x130] ss:$8 sps:$4 sm:$0xff]   ;;  %v1784_v56 = vld [vmem:[%s2228_s9 + $0x20] ss:$8 sps:$4 sm:$0xff]  }
  0x85   : > { %1270 = vmatprep.subr.bf16.mxu0 %v1764_v42  ;;  %1312 = vmatpush1.bf16.msra.mxu1 %v1763_v41  ;;  %v1785_v55 = vld [vmem:[%s2228_s9 + $0x124] ss:$8 sps:$4 sm:$0xff]   ;;  %v1788_v57 = vld [vmem:[%s2228_s9 + $0x14] ss:$8 sps:$4 sm:$0xff]   ;;  %v1787_v58 = vld [vmem:[%s2228_s9 + $0x120] ss:$8 sps:$4 sm:$0xff]  }
  0x86   : > { %1313 = vmatprep.subr.bf16.mxu1 %v1767_v44  ;;  %v1791_v59 = vld [vmem:[%s2228_s9 + $0x114] ss:$8 sps:$4 sm:$0xff]   ;;  %v1790_v60 = vld [vmem:[%s2228_s9 + $0x10] ss:$8 sps:$4 sm:$0xff]   ;;  %v1794_v61 = vld [vmem:[%s2228_s9 + $0x4] ss:$8 sps:$4 sm:$0xff]  }
  0x87   : > { %v1793_v62 = vld [vmem:[%s2228_s9 + $0x110] ss:$8 sps:$4 sm:$0xff]   ;;  %v1797_v63 = vld [vmem:[%s2228_s9 + $0x104] ss:$8 sps:$4 sm:$0xff]   ;;  %v1796_v0 = vld [vmem:[%s2228_s9] ss:$8 sps:$4 sm:$0xff]  }
  0x88   : > { %1271 = vmatpush1.bf16.msra.mxu0 %v1766_v43  ;;  %v1800_v1 = vld [vmem:[%s2228_s9 + $0xf4] ss:$8 sps:$4 sm:$0xff]   ;;  %v1799_v2 = vld [vmem:[%s2228_s9 + $0x100] ss:$8 sps:$4 sm:$0xff]   ;;  %v1802_v4 = vld [vmem:[%s2228_s9 + $0xf0] ss:$8 sps:$4 sm:$0xff]  }
  0x89   : > { %1272 = vmatprep.subr.bf16.mxu0 %v1770_v45  ;;  %1314 = vmatpush1.bf16.msra.mxu1 %v1769_v46  ;;  %v1803_v3 = vld [vmem:[%s2228_s9 + $0x1f4] ss:$8 sps:$4 sm:$0xff]   ;;  %v1806_v5 = vld [vmem:[%s2228_s9 + $0xe4] ss:$8 sps:$4 sm:$0xff]   ;;  %v1805_v6 = vld [vmem:[%s2228_s9 + $0x1f0] ss:$8 sps:$4 sm:$0xff]  }
  0x8a   : > { %1315 = vmatprep.subr.bf16.mxu1 %v1773_v47  ;;  %v1809_v7 = vld [vmem:[%s2228_s9 + $0x1e4] ss:$8 sps:$4 sm:$0xff]   ;;  %v1808_v8 = vld [vmem:[%s2228_s9 + $0xe0] ss:$8 sps:$4 sm:$0xff]   ;;  %v1812_v9 = vld [vmem:[%s2228_s9 + $0xd4] ss:$8 sps:$4 sm:$0xff]  }
  0x8b   : > { %v1811_v10 = vld [vmem:[%s2228_s9 + $0x1e0] ss:$8 sps:$4 sm:$0xff]   ;;  %v1815_v11 = vld [vmem:[%s2228_s9 + $0x1d4] ss:$8 sps:$4 sm:$0xff]   ;;  %v1814_v12 = vld [vmem:[%s2228_s9 + $0xd0] ss:$8 sps:$4 sm:$0xff]  }
  0x8c   : > { %1273 = vmatpush1.bf16.msra.mxu0 %v1772_v48  ;;  %v1818_v13 = vld [vmem:[%s2228_s9 + $0xc4] ss:$8 sps:$4 sm:$0xff]   ;;  %v1817_v14 = vld [vmem:[%s2228_s9 + $0x1d0] ss:$8 sps:$4 sm:$0xff]   ;;  %v1820_v16 = vld [vmem:[%s2228_s9 + $0xc0] ss:$8 sps:$4 sm:$0xff]  }
  0x8d   : > { %1274 = vmatprep.subr.bf16.mxu0 %v1776_v49  ;;  %1316 = vmatpush1.bf16.msra.mxu1 %v1775_v50  ;;  %v1821_v15 = vld [vmem:[%s2228_s9 + $0x1c4] ss:$8 sps:$4 sm:$0xff]   ;;  %v1824_v17 = vld [vmem:[%s2228_s9 + $0xb4] ss:$8 sps:$4 sm:$0xff]   ;;  %v1823_v18 = vld [vmem:[%s2228_s9 + $0x1c0] ss:$8 sps:$4 sm:$0xff]  }
  0x8e   : > { %1317 = vmatprep.subr.bf16.mxu1 %v1779_v51  ;;  %v1827_v19 = vld [vmem:[%s2228_s9 + $0x1b4] ss:$8 sps:$4 sm:$0xff]   ;;  %v1826_v20 = vld [vmem:[%s2228_s9 + $0xb0] ss:$8 sps:$4 sm:$0xff]   ;;  %v1830_v21 = vld [vmem:[%s2228_s9 + $0xa4] ss:$8 sps:$4 sm:$0xff]  }
  0x8f   : > { %v1829_v22 = vld [vmem:[%s2228_s9 + $0x1b0] ss:$8 sps:$4 sm:$0xff]   ;;  %v1833_v23 = vld [vmem:[%s2228_s9 + $0x1a4] ss:$8 sps:$4 sm:$0xff]   ;;  %v1832_v24 = vld [vmem:[%s2228_s9 + $0xa0] ss:$8 sps:$4 sm:$0xff]  }
  0x90   : > { %1275 = vmatpush1.bf16.msra.mxu0 %v1778_v52  ;;  %v1836_v25 = vld [vmem:[%s2228_s9 + $0x94] ss:$8 sps:$4 sm:$0xff]   ;;  %v1835_v26 = vld [vmem:[%s2228_s9 + $0x1a0] ss:$8 sps:$4 sm:$0xff]   ;;  %v1838_v28 = vld [vmem:[%s2228_s9 + $0x90] ss:$8 sps:$4 sm:$0xff]  }
  0x91   : > { %1276 = vmatprep.subr.bf16.mxu0 %v1782_v53  ;;  %1318 = vmatpush1.bf16.msra.mxu1 %v1781_v54  ;;  %v1839_v27 = vld [vmem:[%s2228_s9 + $0x194] ss:$8 sps:$4 sm:$0xff]   ;;  %v1842_v29 = vld [vmem:[%s2228_s9 + $0x84] ss:$8 sps:$4 sm:$0xff]   ;;  %v1841_v30 = vld [vmem:[%s2228_s9 + $0x190] ss:$8 sps:$4 sm:$0xff]  }
  0x92   : > { %1319 = vmatprep.subr.bf16.mxu1 %v1785_v55  ;;  %v1845_v31 = vld [vmem:[%s2228_s9 + $0x184] ss:$8 sps:$4 sm:$0xff]   ;;  %v1844_v32 = vld [vmem:[%s2228_s9 + $0x80] ss:$8 sps:$4 sm:$0xff]   ;;  %v1853_v33 = vld [vmem:[%s2228_s9 + $0x274] ss:$8 sps:$4 sm:$0xff]  }
  0x93   : > { %v1850_v34 = vld [vmem:[%s2228_s9 + $0x180] ss:$8 sps:$4 sm:$0xff]   ;;  %v1851_v36 = vld [vmem:[%s2228_s9 + $0x270] ss:$8 sps:$4 sm:$0xff]   ;;  %v1904_v37 = vld [vmem:[%s2365_s0 + $0x14] ss:$24 sps:$4 sm:$0xff]  }
  0x94   : > { %1277 = vmatpush1.bf16.msra.mxu0 %v1784_v56  ;;  %v1847_v35 = vld [vmem:[%s2365_s0] ss:$24 sps:$4 sm:$0xff]   ;;  %v1859_v39 = vld [vmem:[%s2228_s9 + $0x264] ss:$8 sps:$4 sm:$0xff]   ;;  %v1862_v41 = vld [vmem:[%s2228_s9 + $0x254] ss:$8 sps:$4 sm:$0xff]  }
  0x95   : > { %1278 = vmatprep.subr.bf16.mxu0 %v1788_v57  ;;  %1320 = vmatpush1.bf16.msra.mxu1 %v1787_v58  ;;  %v1854_v38 = vld [vmem:[%s2365_s0 + $0x8] ss:$24 sps:$4 sm:$0xff]   ;;  %v1860_v42 = vld [vmem:[%s2228_s9 + $0x250] ss:$8 sps:$4 sm:$0xff]   ;;  %v1865_v43 = vld [vmem:[%s2228_s9 + $0x244] ss:$8 sps:$4 sm:$0xff]  }
  0x96   : > { %1321 = vmatprep.subr.bf16.mxu1 %v1791_v59  ;;  %v1857_v40 = vld [vmem:[%s2228_s9 + $0x260] ss:$8 sps:$4 sm:$0xff]   ;;  %v1868_v45 = vld [vmem:[%s2228_s9 + $0x234] ss:$8 sps:$4 sm:$0xff]   ;;  %v1866_v46 = vld [vmem:[%s2228_s9 + $0x230] ss:$8 sps:$4 sm:$0xff]  }
  0x97   : > { %v1863_v44 = vld [vmem:[%s2228_s9 + $0x240] ss:$8 sps:$4 sm:$0xff]   ;;  %v1871_v47 = vld [vmem:[%s2228_s9 + $0x224] ss:$8 sps:$4 sm:$0xff]   ;;  %v1874_v49 = vld [vmem:[%s2228_s9 + $0x214] ss:$8 sps:$4 sm:$0xff]  }
  0x98   : > { %1279 = vmatpush1.bf16.msra.mxu0 %v1790_v60  ;;  %v1869_v48 = vld [vmem:[%s2228_s9 + $0x220] ss:$8 sps:$4 sm:$0xff]   ;;  %v1872_v50 = vld [vmem:[%s2228_s9 + $0x210] ss:$8 sps:$4 sm:$0xff]   ;;  %v1877_v51 = vld [vmem:[%s2228_s9 + $0x204] ss:$8 sps:$4 sm:$0xff]  }
  0x99   : > { %1280 = vmatprep.subr.bf16.mxu0 %v1794_v61  ;;  %1322 = vmatpush1.bf16.msra.mxu1 %v1793_v62  ;;  %v1875_v52 = vld [vmem:[%s2228_s9 + $0x200] ss:$8 sps:$4 sm:$0xff]   ;;  %v1880_v53 = vld [vmem:[%s2228_s9 + $0x2f4] ss:$8 sps:$4 sm:$0xff]   ;;  %v1878_v54 = vld [vmem:[%s2228_s9 + $0x2f0] ss:$8 sps:$4 sm:$0xff]  }
  0x9a   : > { %1323 = vmatprep.subr.bf16.mxu1 %v1797_v63  ;;  %v1883_v55 = vld [vmem:[%s2228_s9 + $0x2e4] ss:$8 sps:$4 sm:$0xff]   ;;  %v1881_v56 = vld [vmem:[%s2228_s9 + $0x2e0] ss:$8 sps:$4 sm:$0xff]   ;;  %v1886_v57 = vld [vmem:[%s2228_s9 + $0x2d4] ss:$8 sps:$4 sm:$0xff]  }
  0x9b   : > { %v1884_v58 = vld [vmem:[%s2228_s9 + $0x2d0] ss:$8 sps:$4 sm:$0xff]   ;;  %v1889_v59 = vld [vmem:[%s2228_s9 + $0x2c4] ss:$8 sps:$4 sm:$0xff]   ;;  %v1887_v60 = vld [vmem:[%s2228_s9 + $0x2c0] ss:$8 sps:$4 sm:$0xff]  }
  0x9c   : > { %1281 = vmatpush1.bf16.msra.mxu0 %v1796_v0  ;;  %v1892_v61 = vld [vmem:[%s2228_s9 + $0x2b4] ss:$8 sps:$4 sm:$0xff]   ;;  %v1890_v62 = vld [vmem:[%s2228_s9 + $0x2b0] ss:$8 sps:$4 sm:$0xff]   ;;  %v1895_v63 = vld [vmem:[%s2228_s9 + $0x2a4] ss:$8 sps:$4 sm:$0xff]  }
  0x9d   : > { %1282 = vmatprep.subr.bf16.mxu0 %v1800_v1  ;;  %1324 = vmatpush1.bf16.msra.mxu1 %v1799_v2  ;;  %v1893_v0 = vld [vmem:[%s2228_s9 + $0x2a0] ss:$8 sps:$4 sm:$0xff]   ;;  %v1898_v1 = vld [vmem:[%s2228_s9 + $0x294] ss:$8 sps:$4 sm:$0xff]   ;;  %v1896_v2 = vld [vmem:[%s2228_s9 + $0x290] ss:$8 sps:$4 sm:$0xff]  }
  0x9e   : > { %1325 = vmatprep.subr.bf16.mxu1 %v1803_v3  ;;  %v1901_v3 = vld [vmem:[%s2228_s9 + $0x284] ss:$8 sps:$4 sm:$0xff]   ;;  %s2377_s26 = smov (!%p636_p11, %s1596_s26), 23  ;;  %s1709_s12 = sshll.u32 (%p2008_p6), %s1943_s14, 3 }
  0x9f   : > { %s638_s29 = scalar_lea.vmem %s2367_s2, %s2377_s26  ;;  %s1457_s7 = scalar_lea.vmem (%p2008_p6), %s2368_s3, %s1709_s12 }
  0xa0   : > { %1283 = vmatpush2.bf16.msra.mxu0 %v1802_v4  ;;  %v1899_v4 = vld [vmem:[%s2228_s9 + $0x280] ss:$8 sps:$4 sm:$0xff]  }
  0xa1   : > { %1284 = vmatprep.subr.bf16.mxu0 %v1806_v5  ;;  %1326 = vmatpush2.bf16.msra.mxu1 %v1805_v6  ;;  %v1902_v5 = vld [vmem:[%s2365_s0 + $0x10] ss:$24 sps:$4 sm:$0xff]   ;;  %v746_v6 = vlaneseq }
  0xa2   : > { %1327 = vmatprep.subr.bf16.mxu1 %v1809_v7 }
  0xa3   : > { %v747_v7 = vshrl.u32 %v746_v6, 7 }
  0xa4   : > { %1285 = vmatpush2.bf16.msra.mxu0 %v1808_v8 }
  0xa5   : > { %1286 = vmatprep.subr.bf16.mxu0 %v1812_v9  ;;  %1328 = vmatpush2.bf16.msra.mxu1 %v1811_v10  ;;  %v748_v9 = vsub.s32 0, %v747_v7  ;;  %v744_v10 = vld [vmem:[%s638_s29] sm:$0x3] }
  0xa6   : > { %1329 = vmatprep.subr.bf16.mxu1 %v1815_v11  ;;  %v752_v11 = vsub.s32 1, %v747_v7 }
  0xa8   : > { %1287 = vmatpush2.bf16.msra.mxu0 %v1814_v12 }
  0xa9   : > { %1288 = vmatprep.subr.bf16.mxu0 %v1818_v13  ;;  %1330 = vmatpush2.bf16.msra.mxu1 %v1817_v14  ;;  %v749_v13 = vrot.slane %v744_v10, %v748_v9 }
  0xaa   : > { %1331 = vmatprep.subr.bf16.mxu1 %v1821_v15  ;;  %v753_v15 = vrot.slane %v744_v10, %v752_v11 }
  0xac   : > { %1289 = vmatpush2.bf16.msra.mxu0 %v1820_v16 }
  0xad   : > { %1290 = vmatprep.subr.bf16.mxu0 %v1824_v17  ;;  %1332 = vmatpush2.bf16.msra.mxu1 %v1823_v18 }
  0xae   : > { %1333 = vmatprep.subr.bf16.mxu1 %v1827_v19 }
  0xb0   : > { %1291 = vmatpush2.bf16.msra.mxu0 %v1826_v20 }
  0xb1   : > { %1292 = vmatprep.subr.bf16.mxu0 %v1830_v21  ;;  %1334 = vmatpush2.bf16.msra.mxu1 %v1829_v22 }
  0xb2   : > { %1335 = vmatprep.subr.bf16.mxu1 %v1833_v23 }
  0xb4   : > { %1293 = vmatpush2.bf16.msra.mxu0 %v1832_v24 }
  0xb5   : > { %1294 = vmatprep.subr.bf16.mxu0 %v1836_v25  ;;  %1336 = vmatpush2.bf16.msra.mxu1 %v1835_v26 }
  0xb6   : > { %1337 = vmatprep.subr.bf16.mxu1 %v1839_v27 }
  0xb8   : > { %1295 = vmatpush2.bf16.msra.mxu0 %v1838_v28 }
  0xb9   : > { %1296 = vmatprep.subr.bf16.mxu0 %v1842_v29  ;;  %1338 = vmatpush2.bf16.msra.mxu1 %v1841_v30 }
  0xba   : > { %1339 = vmatprep.subr.bf16.mxu1 %v1845_v31 }
  0xbc   : > { %1297 = vmatpush2.bf16.msra.mxu0 %v1844_v32 }
  0xbd   : > { %1352 = vmatprep.subr.bf16.mxu0 %v1853_v33  ;;  %1340 = vmatpush2.bf16.msra.mxu1 %v1850_v34 }
  0xbf   : > { %1299 = vmatmul.mubr.bf16.vlgmr.msra.gmra.mxu0 %v1847_v35 }
  0xc0   : > { %1353 = vmatpush1.bf16.msra.mxu0 %v1851_v36  ;;  %1384 = vmatprep.mubr.bf16.mxu0 %v1904_v37 }
  0xc1   : > { %1342 = vmatmul.mubr.bf16.vlgmr.msra.gmra.mxu1 %v1854_v38  ;;  %1354 = vmatprep.subr.bf16.mxu0 %v1859_v39 }
  0xc4   : > { %1355 = vmatpush1.bf16.msra.mxu0 %v1857_v40 }
  0xc5   : > { %1356 = vmatprep.subr.bf16.mxu0 %v1862_v41 }
  0xc8   : > { %1357 = vmatpush1.bf16.msra.mxu0 %v1860_v42 }
  0xc9   : > { %1358 = vmatprep.subr.bf16.mxu0 %v1865_v43 }
  0xcc   : > { %1359 = vmatpush1.bf16.msra.mxu0 %v1863_v44 }
  0xcd   : > { %1360 = vmatprep.subr.bf16.mxu0 %v1868_v45 }
  0xd0   : > { %1361 = vmatpush1.bf16.msra.mxu0 %v1866_v46 }
  0xd1   : > { %1362 = vmatprep.subr.bf16.mxu0 %v1871_v47 }
  0xd4   : > { %1363 = vmatpush1.bf16.msra.mxu0 %v1869_v48 }
  0xd5   : > { %1364 = vmatprep.subr.bf16.mxu0 %v1874_v49 }
  0xd8   : > { %1365 = vmatpush1.bf16.msra.mxu0 %v1872_v50 }
  0xd9   : > { %1366 = vmatprep.subr.bf16.mxu0 %v1877_v51 }
  0xdc   : > { %1367 = vmatpush1.bf16.msra.mxu0 %v1875_v52 }
  0xdd   : > { %1368 = vmatprep.subr.bf16.mxu0 %v1880_v53 }
  0xe0   : > { %1369 = vmatpush2.bf16.msra.mxu0 %v1878_v54 }
  0xe1   : > { %1370 = vmatprep.subr.bf16.mxu0 %v1883_v55 }
  0xe4   : > { %1371 = vmatpush2.bf16.msra.mxu0 %v1881_v56 }
  0xe5   : > { %1372 = vmatprep.subr.bf16.mxu0 %v1886_v57 }
  0xe8   : > { %1373 = vmatpush2.bf16.msra.mxu0 %v1884_v58 }
  0xe9   : > { %1374 = vmatprep.subr.bf16.mxu0 %v1889_v59 }
  0xec   : > { %1375 = vmatpush2.bf16.msra.mxu0 %v1887_v60 }
  0xed   : > { %1376 = vmatprep.subr.bf16.mxu0 %v1892_v61 }
  0xf0   : > { %1377 = vmatpush2.bf16.msra.mxu0 %v1890_v62 }
  0xf1   : > { %1378 = vmatprep.subr.bf16.mxu0 %v1895_v63 }
  0xf4   : > { %1379 = vmatpush2.bf16.msra.mxu0 %v1893_v0 }
  0xf5   : > { %1380 = vmatprep.subr.bf16.mxu0 %v1898_v1 }
  0xf8   : > { %1381 = vmatpush2.bf16.msra.mxu0 %v1896_v2 }
  0xf9   : > { %1382 = vmatprep.subr.bf16.mxu0 %v1901_v3 }
  0xfc   : > { %1383 = vmatpush2.bf16.msra.mxu0 %v1899_v4 }
  0xff   : > { %1385 = vmatmul.mubr.bf16.vlgmr.msra.gmra.mxu0 %v1902_v5 }
 0x17f   : > { %v1300_v8 = vpop.f32.mrf.mxu0 }
 0x180   : > { %v1301_v17 = vadd.f32 %v1300_v8, %v749_v13 }
 0x181   : > { %v1302_v12 = vpop.f32.mrf.mxu0  ;;  %v1343_v14 = vpop.f32.mrf.mxu1 }
 0x182   : > { %v1303_v19 = vadd.f32 %v1302_v12, %v753_v15  ;;  %v1344_v21 = vadd.f32 %v1343_v14, %v1301_v17 }
 0x183   : > { %v1304_v16 = vpop.f32.mrf.mxu0  ;;  %v1345_v18 = vpop.f32.mrf.mxu1 }
 0x184   : > { %v1305_v22 = vadd.f32 %v1304_v16, %v749_v13  ;;  %v1346_v25 = vadd.f32 %v1345_v18, %v1303_v19 }
 0x185   : > { %v1306_v20 = vpop.f32.mrf.mxu0  ;;  %v1347_v23 = vpop.f32.mrf.mxu1 }
 0x186   : > { %v1307_v27 = vadd.f32 %v1306_v20, %v753_v15  ;;  %v1348_v29 = vadd.f32 %v1347_v23, %v1305_v22 }
 0x187   : > { %v1349_v30 = vpop.f32.mrf.mxu1 }
 0x188   : > { %v1350_v37 = vadd.f32 %v1349_v30, %v1307_v27 }
 0x1bf   : > { %v1386_v24 = vpop.f32.mrf.mxu0 }
 0x1c0   : > { %v1387_v26 = vadd.f32 %v1386_v24, %v1344_v21 }
 0x1c1   : > { %v1388_v28 = vpop.f32.mrf.mxu0 }
 0x1c2   : > { %v1399_v31 = vmul.f32 0.044715, %v1387_v26  ;;  %v1389_v32 = vadd.f32 %v1388_v28, %v1346_v25  ;;  %v1395_v60 = vmul.f32 0.5, %v1387_v26 }
 0x1c3   : > { %v1390_v33 = vpop.f32.mrf.mxu0 }
 0x1c4   : > { %v1403_v34 = vmul.f32 %v1399_v31, %v1387_v26  ;;  %v1400_v35 = vmul.f32 0.044715, %v1389_v32  ;;  %v1391_v36 = vadd.f32 %v1390_v33, %v1348_v29  ;;  %v1396_v61 = vmul.f32 0.5, %v1389_v32 }
 0x1c5   : > { %v1392_v38 = vpop.f32.mrf.mxu0 }
 0x1c6   : > { %v1407_v39 = vmul.f32 %v1403_v34, %v1387_v26  ;;  %v1404_v40 = vmul.f32 %v1400_v35, %v1389_v32  ;;  %v1401_v41 = vmul.f32 0.044715, %v1391_v36  ;;  %v1393_v42 = vadd.f32 %v1392_v38, %v1350_v37 }
 0x1c7   : > { %v1397_v5 = vmul.f32 0.5, %v1391_v36 }
 0x1c8   : > { %v1411_v43 = vadd.f32 %v1407_v39, %v1387_v26  ;;  %v1408_v44 = vmul.f32 %v1404_v40, %v1389_v32  ;;  %v1405_v45 = vmul.f32 %v1401_v41, %v1391_v36  ;;  %v1402_v46 = vmul.f32 0.044715, %v1393_v42 }
 0x1c9   : > { %v1398_v6 = vmul.f32 0.5, %v1393_v42 }
 0x1ca   : > { %v1415_v47 = vmul.f32 0.7978846, %v1411_v43  ;;  %v1412_v48 = vadd.f32 %v1408_v44, %v1389_v32  ;;  %v1409_v49 = vmul.f32 %v1405_v45, %v1391_v36  ;;  %v1406_v50 = vmul.f32 %v1402_v46, %v1393_v42 }
 0x1cc   : > { %1905 = vtanh.f32 %v1415_v47  ;;  %v1416_v51 = vmul.f32 0.7978846, %v1412_v48  ;;  %v1413_v52 = vadd.f32 %v1409_v49, %v1391_v36  ;;  %v1410_v53 = vmul.f32 %v1406_v50, %v1393_v42 }
 0x1ce   : > { %1907 = vtanh.f32 %v1416_v51  ;;  %v1417_v54 = vmul.f32 0.7978846, %v1413_v52  ;;  %v1414_v55 = vadd.f32 %v1410_v53, %v1393_v42 }
 0x1d0   : > { %1909 = vtanh.f32 %v1417_v54  ;;  %v1418_v56 = vmul.f32 0.7978846, %v1414_v55 }
 0x1d2   : > { %1911 = vtanh.f32 %v1418_v56 }
 0x1d9   : > { %v1906_v57 = vpop.eup %1905 }
 0x1da   : > { %v1423_v58 = vadd.f32 1.0, %v1906_v57 }
 0x1db   : > { %v1908_v59 = vpop.eup %1907 }
 0x1dc   : > { %v1424_v62 = vadd.f32 1.0, %v1908_v59  ;;  %v1427_v0 = vmul.f32 %v1423_v58, %v1395_v60 }
 0x1dd   : > { %v1910_v63 = vpop.eup %1909 }
 0x1de   : > { %v1428_v1 = vmul.f32 %v1424_v62, %v1396_v61  ;;  %v1425_v2 = vadd.f32 1.0, %v1910_v63 }
 0x1df   : > { %v1912_v3 = vpop.eup %1911 }
 0x1e0   : > { %v1707_v4 = vpack.c.bf16 %v1428_v1, %v1427_v0  ;;  %v1426_v7 = vadd.f32 1.0, %v1912_v3  ;;  %v1429_v8 = vmul.f32 %v1425_v2, %v1397_v5 }
 0x1e2   : > { %1443 = vst [vmem:[%s626_s5] sm:$0xff] %v1707_v4  ;;  %v1430_v9 = vmul.f32 %v1426_v7, %v1398_v6  ;;  %1451 = sbr.rel (!%p2008_p6) target bundleno = 495 (0x1ef), region = 74 }
 0x1e4   : > { %v1708_v10 = vpack.c.bf16 %v1430_v9, %v1429_v8 }
 0x1e6   : > { %1444 = vst [vmem:[%s626_s5 + $0x8] sm:$0xff] %v1708_v10 }
 0x1e9   : > { %v1488_v11 = vld [vmem:[%s626_s5] sm:$0xff] }
 0x1ea   : > { %1489 = vst [vmem:[%s1457_s7] sm:$0xff] %v1488_v11 }
 0x1ed   : > { %v1490_v12 = vld [vmem:[%s626_s5 + $0x8] sm:$0xff] }
 0x1ee   : > { %1491 = vst [vmem:[%s1457_s7 + $0x60] sm:$0xff] %v1490_v12 }
 0x1ef PF: > { %s13_s16 = sadd.s32 1, %s1951_s16   ;;  %s2370_s12 = smov %s1939_s13 }
 0x1f0   : > { %p10_p12 = scmp.ge.s32.totalorder %s13_s16, 14   ;;  %s2371_s13 = smov %s2013_s22 }
 0x1f1   : > { %s2372_s14 = smov %s1947_s15  ;;  %s2373_s15 = smov %s2375_s17 }
 0x1f2   :  { %12 = sbr.rel (!%p10_p12) target bundleno = 3 (0x3), region = 149 }

// kernel: net_forward.31
= control target key start
LH: loop header
LB: loop body
LE: loop exit
PB: predicated region body
PF: predicated region fallthrough
CT: control target
= control target key end

     0   :  { %s2777_s0 = inlined_call_operand.vmem [shape: bf16[16,768], index: 0, kind: input, shape index: {}]   ;;  %s2778_s1 = inlined_call_operand.vmem [shape: bf16[768,512], index: 1, kind: input, shape index: {}]   ;;  %s2779_s2 = inlined_call_operand.vmem [shape: f32[1,512], index: 2, kind: input, shape index: {}]   ;;  %s2780_s3 = inlined_call_operand.hbm [shape: f32[16,512], index: 3, kind: output, shape index: {0}]   ;;  %s2781_s4 = inlined_call_operand.vmem [shape: s32[16,128], index: 4, kind: output, shape index: {1}]  }
   0x1   :  { %v1787_v0 = vld [vmem:[%s2778_s1 + $0xe4] ss:$16 sps:$4 sm:$0xff]   ;;  %v1791_v2 = vld [vmem:[%s2778_s1 + $0xe0] ss:$16 sps:$4 sm:$0xff]  }
   0x2   :  { %v1789_v1 = vld [vmem:[%s2778_s1 + $0x2e4] ss:$16 sps:$4 sm:$0xff]   ;;  %1227 = vmatprep.subr.bf16.mxu0 %v1787_v0  ;;  %v1792_v3 = vld [vmem:[%s2778_s1 + $0x2e0] ss:$16 sps:$4 sm:$0xff]  }
   0x3   :  { %1270 = vmatprep.subr.bf16.mxu1 %v1789_v1  ;;  %v1793_v4 = vld [vmem:[%s2778_s1 + $0xc4] ss:$16 sps:$4 sm:$0xff]   ;;  %1228 = vmatpush1.bf16.msra.mxu0 %v1791_v2  ;;  %v1797_v6 = vld [vmem:[%s2778_s1 + $0xc0] ss:$16 sps:$4 sm:$0xff]  }
   0x4   :  { %1271 = vmatpush1.bf16.msra.mxu1 %v1792_v3  ;;  %v1795_v5 = vld [vmem:[%s2778_s1 + $0x2c4] ss:$16 sps:$4 sm:$0xff]   ;;  %1229 = vmatprep.subr.bf16.mxu0 %v1793_v4  ;;  %v1798_v7 = vld [vmem:[%s2778_s1 + $0x2c0] ss:$16 sps:$4 sm:$0xff]   ;;  %v1894_v3 = vld [vmem:[%s2778_s1 + $0xec] ss:$16 sps:$4 sm:$0xff]  }
   0x5   :  { %1272 = vmatprep.subr.bf16.mxu1 %v1795_v5  ;;  %v1799_v8 = vld [vmem:[%s2778_s1 + $0xa4] ss:$16 sps:$4 sm:$0xff]   ;;  %v1803_v10 = vld [vmem:[%s2778_s1 + $0xa0] ss:$16 sps:$4 sm:$0xff]  }
   0x6   :  { %v1801_v9 = vld [vmem:[%s2778_s1 + $0x2a4] ss:$16 sps:$4 sm:$0xff]   ;;  %v1804_v11 = vld [vmem:[%s2778_s1 + $0x2a0] ss:$16 sps:$4 sm:$0xff]  }
   0x7   :  { %1230 = vmatpush1.bf16.msra.mxu0 %v1797_v6  ;;  %v1805_v12 = vld [vmem:[%s2778_s1 + $0x84] ss:$16 sps:$4 sm:$0xff]   ;;  %v1809_v14 = vld [vmem:[%s2778_s1 + $0x80] ss:$16 sps:$4 sm:$0xff]  }
   0x8   :  { %1273 = vmatpush1.bf16.msra.mxu1 %v1798_v7  ;;  %1231 = vmatprep.subr.bf16.mxu0 %v1799_v8  ;;  %v1807_v13 = vld [vmem:[%s2778_s1 + $0x284] ss:$16 sps:$4 sm:$0xff]   ;;  %v1810_v15 = vld [vmem:[%s2778_s1 + $0x280] ss:$16 sps:$4 sm:$0xff]   ;;  %v1892_v7 = vld [vmem:[%s2778_s1 + $0xe8] ss:$16 sps:$4 sm:$0xff]  }
   0x9   :  { %1274 = vmatprep.subr.bf16.mxu1 %v1801_v9  ;;  %v1811_v16 = vld [vmem:[%s2778_s1 + $0x64] ss:$16 sps:$4 sm:$0xff]   ;;  %v1815_v18 = vld [vmem:[%s2778_s1 + $0x60] ss:$16 sps:$4 sm:$0xff]   ;;  %v1900_v9 = vld [vmem:[%s2778_s1 + $0xcc] ss:$16 sps:$4 sm:$0xff]  }
   0xa   :  { %v1813_v17 = vld [vmem:[%s2778_s1 + $0x264] ss:$16 sps:$4 sm:$0xff]   ;;  %v1816_v19 = vld [vmem:[%s2778_s1 + $0x260] ss:$16 sps:$4 sm:$0xff]  }
   0xb   :  { %1232 = vmatpush1.bf16.msra.mxu0 %v1803_v10  ;;  %v1817_v20 = vld [vmem:[%s2778_s1 + $0x44] ss:$16 sps:$4 sm:$0xff]   ;;  %v1821_v22 = vld [vmem:[%s2778_s1 + $0x40] ss:$16 sps:$4 sm:$0xff]  }
   0xc   :  { %1275 = vmatpush1.bf16.msra.mxu1 %v1804_v11  ;;  %1233 = vmatprep.subr.bf16.mxu0 %v1805_v12  ;;  %v1819_v21 = vld [vmem:[%s2778_s1 + $0x244] ss:$16 sps:$4 sm:$0xff]   ;;  %v1822_v23 = vld [vmem:[%s2778_s1 + $0x240] ss:$16 sps:$4 sm:$0xff]   ;;  %v1898_v11 = vld [vmem:[%s2778_s1 + $0xc8] ss:$16 sps:$4 sm:$0xff]  }
   0xd   :  { %1276 = vmatprep.subr.bf16.mxu1 %v1807_v13  ;;  %v1823_v24 = vld [vmem:[%s2778_s1 + $0x24] ss:$16 sps:$4 sm:$0xff]   ;;  %v1827_v26 = vld [vmem:[%s2778_s1 + $0x20] ss:$16 sps:$4 sm:$0xff]   ;;  %v1906_v13 = vld [vmem:[%s2778_s1 + $0xac] ss:$16 sps:$4 sm:$0xff]  }
   0xe   :  { %v1825_v25 = vld [vmem:[%s2778_s1 + $0x224] ss:$16 sps:$4 sm:$0xff]   ;;  %v1828_v27 = vld [vmem:[%s2778_s1 + $0x220] ss:$16 sps:$4 sm:$0xff]  }
   0xf   :  { %1234 = vmatpush1.bf16.msra.mxu0 %v1809_v14  ;;  %v1829_v28 = vld [vmem:[%s2778_s1 + $0x4] ss:$16 sps:$4 sm:$0xff]   ;;  %v1833_v30 = vld [vmem:[%s2778_s1] ss:$16 sps:$4 sm:$0xff]  }
  0x10   :  { %1277 = vmatpush1.bf16.msra.mxu1 %v1810_v15  ;;  %1235 = vmatprep.subr.bf16.mxu0 %v1811_v16  ;;  %v1831_v29 = vld [vmem:[%s2778_s1 + $0x204] ss:$16 sps:$4 sm:$0xff]   ;;  %v1834_v31 = vld [vmem:[%s2778_s1 + $0x200] ss:$16 sps:$4 sm:$0xff]   ;;  %v1904_v15 = vld [vmem:[%s2778_s1 + $0xa8] ss:$16 sps:$4 sm:$0xff]  }
  0x11   :  { %1278 = vmatprep.subr.bf16.mxu1 %v1813_v17  ;;  %v1835_v32 = vld [vmem:[%s2778_s1 + $0x1e4] ss:$16 sps:$4 sm:$0xff]   ;;  %v1839_v34 = vld [vmem:[%s2778_s1 + $0x1e0] ss:$16 sps:$4 sm:$0xff]   ;;  %v1912_v17 = vld [vmem:[%s2778_s1 + $0x8c] ss:$16 sps:$4 sm:$0xff]  }
  0x12   :  { %v1837_v33 = vld [vmem:[%s2778_s1 + $0x3e4] ss:$16 sps:$4 sm:$0xff]   ;;  %v1840_v35 = vld [vmem:[%s2778_s1 + $0x3e0] ss:$16 sps:$4 sm:$0xff]  }
  0x13   :  { %1236 = vmatpush1.bf16.msra.mxu0 %v1815_v18  ;;  %v1841_v36 = vld [vmem:[%s2778_s1 + $0x1c4] ss:$16 sps:$4 sm:$0xff]   ;;  %v1845_v38 = vld [vmem:[%s2778_s1 + $0x1c0] ss:$16 sps:$4 sm:$0xff]  }
  0x14   :  { %1279 = vmatpush1.bf16.msra.mxu1 %v1816_v19  ;;  %1237 = vmatprep.subr.bf16.mxu0 %v1817_v20  ;;  %v1843_v37 = vld [vmem:[%s2778_s1 + $0x3c4] ss:$16 sps:$4 sm:$0xff]   ;;  %v1846_v39 = vld [vmem:[%s2778_s1 + $0x3c0] ss:$16 sps:$4 sm:$0xff]   ;;  %v1910_v19 = vld [vmem:[%s2778_s1 + $0x88] ss:$16 sps:$4 sm:$0xff]  }
  0x15   :  { %1280 = vmatprep.subr.bf16.mxu1 %v1819_v21  ;;  %v1847_v40 = vld [vmem:[%s2778_s1 + $0x1a4] ss:$16 sps:$4 sm:$0xff]   ;;  %v1851_v42 = vld [vmem:[%s2778_s1 + $0x1a0] ss:$16 sps:$4 sm:$0xff]   ;;  %v1918_v21 = vld [vmem:[%s2778_s1 + $0x6c] ss:$16 sps:$4 sm:$0xff]  }
  0x16   :  { %v1849_v41 = vld [vmem:[%s2778_s1 + $0x3a4] ss:$16 sps:$4 sm:$0xff]   ;;  %v1852_v43 = vld [vmem:[%s2778_s1 + $0x3a0] ss:$16 sps:$4 sm:$0xff]  }
  0x17   :  { %1238 = vmatpush1.bf16.msra.mxu0 %v1821_v22  ;;  %v1853_v44 = vld [vmem:[%s2778_s1 + $0x184] ss:$16 sps:$4 sm:$0xff]   ;;  %v1857_v46 = vld [vmem:[%s2778_s1 + $0x180] ss:$16 sps:$4 sm:$0xff]  }
  0x18   :  { %1281 = vmatpush1.bf16.msra.mxu1 %v1822_v23  ;;  %1239 = vmatprep.subr.bf16.mxu0 %v1823_v24  ;;  %v1855_v45 = vld [vmem:[%s2778_s1 + $0x384] ss:$16 sps:$4 sm:$0xff]   ;;  %v1858_v47 = vld [vmem:[%s2778_s1 + $0x380] ss:$16 sps:$4 sm:$0xff]   ;;  %v1916_v23 = vld [vmem:[%s2778_s1 + $0x68] ss:$16 sps:$4 sm:$0xff]  }
  0x19   :  { %1282 = vmatprep.subr.bf16.mxu1 %v1825_v25  ;;  %v1859_v48 = vld [vmem:[%s2778_s1 + $0x164] ss:$16 sps:$4 sm:$0xff]   ;;  %v1863_v52 = vld [vmem:[%s2778_s1 + $0x160] ss:$16 sps:$4 sm:$0xff]   ;;  %v1924_v25 = vld [vmem:[%s2778_s1 + $0x4c] ss:$16 sps:$4 sm:$0xff]  }
  0x1a   :  { %v1885_v49 = vld [vmem:[%s2777_s0 + $0x4] ss:$24 sps:$4 sm:$0xff]   ;;  %v1864_v53 = vld [vmem:[%s2778_s1 + $0x360] ss:$16 sps:$4 sm:$0xff]  }
  0x1b   :  { %1240 = vmatpush1.bf16.msra.mxu0 %v1827_v26  ;;  %v1861_v50 = vld [vmem:[%s2778_s1 + $0x364] ss:$16 sps:$4 sm:$0xff]   ;;  %1259 = vmatprep.mubr.bf16.mxu0 %v1885_v49  ;;  %v1869_v56 = vld [vmem:[%s2778_s1 + $0x140] ss:$16 sps:$4 sm:$0xff]  }
  0x1c   :  { %1283 = vmatpush1.bf16.msra.mxu1 %v1828_v27  ;;  %1241 = vmatprep.subr.bf16.mxu0 %v1829_v28  ;;  %v2290_v51 = vld [vmem:[%s2777_s0 + $0xc] ss:$24 sps:$4 sm:$0xff]   ;;  %v1870_v57 = vld [vmem:[%s2778_s1 + $0x340] ss:$16 sps:$4 sm:$0xff]   ;;  %v1922_v27 = vld [vmem:[%s2778_s1 + $0x48] ss:$16 sps:$4 sm:$0xff]  }
  0x1d   :  { %1284 = vmatprep.subr.bf16.mxu1 %v1831_v29  ;;  %1302 = vmatprep.mubr.bf16.mxu1 %v2290_v51  ;;  %v1865_v54 = vld [vmem:[%s2778_s1 + $0x144] ss:$16 sps:$4 sm:$0xff]   ;;  %v1875_v60 = vld [vmem:[%s2778_s1 + $0x120] ss:$16 sps:$4 sm:$0xff]   ;;  %v1930_v29 = vld [vmem:[%s2778_s1 + $0x2c] ss:$16 sps:$4 sm:$0xff]  }
  0x1e   :  { %v1867_v55 = vld [vmem:[%s2778_s1 + $0x344] ss:$16 sps:$4 sm:$0xff]   ;;  %v1876_v61 = vld [vmem:[%s2778_s1 + $0x320] ss:$16 sps:$4 sm:$0xff]  }
  0x1f   :  { %1242 = vmatpush1.bf16.msra.mxu0 %v1833_v30  ;;  %v1871_v58 = vld [vmem:[%s2778_s1 + $0x124] ss:$16 sps:$4 sm:$0xff]   ;;  %v1881_v0 = vld [vmem:[%s2778_s1 + $0x100] ss:$16 sps:$4 sm:$0xff]  }
  0x20   :  { %1285 = vmatpush1.bf16.msra.mxu1 %v1834_v31  ;;  %1243 = vmatprep.subr.bf16.mxu0 %v1835_v32  ;;  %v1873_v59 = vld [vmem:[%s2778_s1 + $0x324] ss:$16 sps:$4 sm:$0xff]   ;;  %v1882_v1 = vld [vmem:[%s2778_s1 + $0x300] ss:$16 sps:$4 sm:$0xff]   ;;  %v1928_v31 = vld [vmem:[%s2778_s1 + $0x28] ss:$16 sps:$4 sm:$0xff]  }
  0x21   :  { %1286 = vmatprep.subr.bf16.mxu1 %v1837_v33  ;;  %v1877_v62 = vld [vmem:[%s2778_s1 + $0x104] ss:$16 sps:$4 sm:$0xff]   ;;  %v2344_v4 = vld [vmem:[%s2777_s0] ss:$24 sps:$4 sm:$0xff]   ;;  %v1936_v33 = vld [vmem:[%s2778_s1 + $0xc] ss:$16 sps:$4 sm:$0xff]  }
  0x22   :  { %v1879_v63 = vld [vmem:[%s2778_s1 + $0x304] ss:$16 sps:$4 sm:$0xff]   ;;  %v2349_v5 = vld [vmem:[%s2777_s0 + $0x8] ss:$24 sps:$4 sm:$0xff]  }
  0x23   :  { %1244 = vmatpush2.bf16.msra.mxu0 %v1839_v34  ;;  %v1891_v2 = vld [vmem:[%s2778_s1 + $0x4e4] ss:$16 sps:$4 sm:$0xff]   ;;  %v1889_v6 = vld [vmem:[%s2778_s1 + $0x4e0] ss:$16 sps:$4 sm:$0xff]  }
  0x24   :  { %1287 = vmatpush2.bf16.msra.mxu1 %v1840_v35  ;;  %1245 = vmatprep.subr.bf16.mxu0 %v1841_v36  ;;  %v1897_v8 = vld [vmem:[%s2778_s1 + $0x4c4] ss:$16 sps:$4 sm:$0xff]   ;;  %v1895_v10 = vld [vmem:[%s2778_s1 + $0x4c0] ss:$16 sps:$4 sm:$0xff]   ;;  %v1934_v36 = vld [vmem:[%s2778_s1 + $0x8] ss:$16 sps:$4 sm:$0xff]  }
  0x25   :  { %1288 = vmatprep.subr.bf16.mxu1 %v1843_v37  ;;  %v1903_v12 = vld [vmem:[%s2778_s1 + $0x4a4] ss:$16 sps:$4 sm:$0xff]   ;;  %v1901_v14 = vld [vmem:[%s2778_s1 + $0x4a0] ss:$16 sps:$4 sm:$0xff]  }
  0x26   :  { %v1909_v16 = vld [vmem:[%s2778_s1 + $0x484] ss:$16 sps:$4 sm:$0xff]   ;;  %v1907_v18 = vld [vmem:[%s2778_s1 + $0x480] ss:$16 sps:$4 sm:$0xff]  }
  0x27   :  { %1246 = vmatpush2.bf16.msra.mxu0 %v1845_v38  ;;  %v1915_v20 = vld [vmem:[%s2778_s1 + $0x464] ss:$16 sps:$4 sm:$0xff]   ;;  %v1913_v22 = vld [vmem:[%s2778_s1 + $0x460] ss:$16 sps:$4 sm:$0xff]   ;;  %v1942_v38 = vld [vmem:[%s2778_s1 + $0x1ec] ss:$16 sps:$4 sm:$0xff]  }
  0x28   :  { %1289 = vmatpush2.bf16.msra.mxu1 %v1846_v39  ;;  %1247 = vmatprep.subr.bf16.mxu0 %v1847_v40  ;;  %v1921_v24 = vld [vmem:[%s2778_s1 + $0x444] ss:$16 sps:$4 sm:$0xff]   ;;  %v1919_v26 = vld [vmem:[%s2778_s1 + $0x440] ss:$16 sps:$4 sm:$0xff]   ;;  %v1940_v40 = vld [vmem:[%s2778_s1 + $0x1e8] ss:$16 sps:$4 sm:$0xff]  }
  0x29   :  { %1290 = vmatprep.subr.bf16.mxu1 %v1849_v41  ;;  %v1927_v28 = vld [vmem:[%s2778_s1 + $0x424] ss:$16 sps:$4 sm:$0xff]   ;;  %v1925_v30 = vld [vmem:[%s2778_s1 + $0x420] ss:$16 sps:$4 sm:$0xff]  }
  0x2a   :  { %v1933_v32 = vld [vmem:[%s2778_s1 + $0x404] ss:$16 sps:$4 sm:$0xff]   ;;  %v1931_v35 = vld [vmem:[%s2778_s1 + $0x400] ss:$16 sps:$4 sm:$0xff]  }
  0x2b   :  { %1248 = vmatpush2.bf16.msra.mxu0 %v1851_v42  ;;  %v2440_v34 = vld [vmem:[%s2777_s0 + $0x14] ss:$24 sps:$4 sm:$0xff]   ;;  %v1937_v39 = vld [vmem:[%s2778_s1 + $0x5e0] ss:$16 sps:$4 sm:$0xff]  }
  0x2c   :  { %1291 = vmatpush2.bf16.msra.mxu1 %v1852_v43  ;;  %1249 = vmatprep.subr.bf16.mxu0 %v1853_v44  ;;  %v1939_v37 = vld [vmem:[%s2778_s1 + $0x5e4] ss:$16 sps:$4 sm:$0xff]   ;;  %v1948_v42 = vld [vmem:[%s2778_s1 + $0x1cc] ss:$16 sps:$4 sm:$0xff]   ;;  %v1943_v43 = vld [vmem:[%s2778_s1 + $0x5c0] ss:$16 sps:$4 sm:$0xff]  }
  0x2d   :  { %1292 = vmatprep.subr.bf16.mxu1 %v1855_v45  ;;  %v1945_v41 = vld [vmem:[%s2778_s1 + $0x5c4] ss:$16 sps:$4 sm:$0xff]   ;;  %v1946_v44 = vld [vmem:[%s2778_s1 + $0x1c8] ss:$16 sps:$4 sm:$0xff]  }
  0x2e   :  { %v1951_v45 = vld [vmem:[%s2778_s1 + $0x5a4] ss:$16 sps:$4 sm:$0xff]  }
  0x2f   :  { %1250 = vmatpush2.bf16.msra.mxu0 %v1857_v46  ;;  %v1954_v46 = vld [vmem:[%s2778_s1 + $0x1ac] ss:$16 sps:$4 sm:$0xff]  }
  0x30   :  { %1293 = vmatpush2.bf16.msra.mxu1 %v1858_v47  ;;  %1251 = vmatprep.subr.bf16.mxu0 %v1859_v48  ;;  %v1949_v47 = vld [vmem:[%s2778_s1 + $0x5a0] ss:$16 sps:$4 sm:$0xff]   ;;  %v1952_v48 = vld [vmem:[%s2778_s1 + $0x1a8] ss:$16 sps:$4 sm:$0xff]  }
  0x31   :  { %1294 = vmatprep.subr.bf16.mxu1 %v1861_v50  ;;  %v1960_v50 = vld [vmem:[%s2778_s1 + $0x18c] ss:$16 sps:$4 sm:$0xff]  }
  0x33   :  { %1252 = vmatpush2.bf16.msra.mxu0 %v1863_v52  ;;  %v1955_v52 = vld [vmem:[%s2778_s1 + $0x580] ss:$16 sps:$4 sm:$0xff]  }
  0x34   :  { %1295 = vmatpush2.bf16.msra.mxu1 %v1864_v53  ;;  %1253 = vmatprep.subr.bf16.mxu0 %v1865_v54  ;;  %v1958_v53 = vld [vmem:[%s2778_s1 + $0x188] ss:$16 sps:$4 sm:$0xff]   ;;  %v1963_v54 = vld [vmem:[%s2778_s1 + $0x564] ss:$16 sps:$4 sm:$0xff]  }
  0x35   :  { %1296 = vmatprep.subr.bf16.mxu1 %v1867_v55  ;;  %v1966_v55 = vld [vmem:[%s2778_s1 + $0x16c] ss:$16 sps:$4 sm:$0xff]  }
  0x37   :  { %1254 = vmatpush2.bf16.msra.mxu0 %v1869_v56  ;;  %v1961_v56 = vld [vmem:[%s2778_s1 + $0x560] ss:$16 sps:$4 sm:$0xff]  }
  0x38   :  { %1297 = vmatpush2.bf16.msra.mxu1 %v1870_v57  ;;  %1255 = vmatprep.subr.bf16.mxu0 %v1871_v58  ;;  %v1964_v57 = vld [vmem:[%s2778_s1 + $0x168] ss:$16 sps:$4 sm:$0xff]   ;;  %v1969_v58 = vld [vmem:[%s2778_s1 + $0x544] ss:$16 sps:$4 sm:$0xff]  }
  0x39   :  { %1298 = vmatprep.subr.bf16.mxu1 %v1873_v59  ;;  %v1972_v59 = vld [vmem:[%s2778_s1 + $0x14c] ss:$16 sps:$4 sm:$0xff]  }
  0x3b   :  { %1256 = vmatpush2.bf16.msra.mxu0 %v1875_v60  ;;  %v1967_v60 = vld [vmem:[%s2778_s1 + $0x540] ss:$16 sps:$4 sm:$0xff]  }
  0x3c   :  { %1299 = vmatpush2.bf16.msra.mxu1 %v1876_v61  ;;  %1257 = vmatprep.subr.bf16.mxu0 %v1877_v62  ;;  %v1970_v61 = vld [vmem:[%s2778_s1 + $0x148] ss:$16 sps:$4 sm:$0xff]   ;;  %v1975_v62 = vld [vmem:[%s2778_s1 + $0x524] ss:$16 sps:$4 sm:$0xff]  }
  0x3d   :  { %1300 = vmatprep.subr.bf16.mxu1 %v1879_v63  ;;  %v1978_v63 = vld [vmem:[%s2778_s1 + $0x12c] ss:$16 sps:$4 sm:$0xff]  }
  0x3f   :  { %1258 = vmatpush2.bf16.msra.mxu0 %v1881_v0  ;;  %v1973_v0 = vld [vmem:[%s2778_s1 + $0x520] ss:$16 sps:$4 sm:$0xff]  }
  0x40   :  { %1301 = vmatpush2.bf16.msra.mxu1 %v1882_v1  ;;  %1313 = vmatprep.subr.bf16.mxu0 %v1891_v2  ;;  %v1976_v1 = vld [vmem:[%s2778_s1 + $0x128] ss:$16 sps:$4 sm:$0xff]   ;;  %v1981_v2 = vld [vmem:[%s2778_s1 + $0x504] ss:$16 sps:$4 sm:$0xff]  }
  0x41   :  { %1356 = vmatprep.subr.bf16.mxu1 %v1894_v3  ;;  %v1984_v3 = vld [vmem:[%s2778_s1 + $0x10c] ss:$16 sps:$4 sm:$0xff]  }
  0x42   :  { %1260 = vmatmul.mubr.bf16.vlgmr.msra.gmra.mxu0 %v2344_v4 }
  0x43   :  { %1303 = vmatmul.mubr.bf16.vlgmr.msra.gmra.mxu1 %v2349_v5  ;;  %1314 = vmatpush1.bf16.msra.mxu0 %v1889_v6  ;;  %v1979_v6 = vld [vmem:[%s2778_s1 + $0x500] ss:$16 sps:$4 sm:$0xff]  }
  0x44   :  { %1357 = vmatpush1.bf16.msra.mxu1 %v1892_v7  ;;  %1315 = vmatprep.subr.bf16.mxu0 %v1897_v8  ;;  %v1982_v7 = vld [vmem:[%s2778_s1 + $0x108] ss:$16 sps:$4 sm:$0xff]   ;;  %v1990_v8 = vld [vmem:[%s2778_s1 + $0x2ec] ss:$16 sps:$4 sm:$0xff]  }
  0x45   :  { %1358 = vmatprep.subr.bf16.mxu1 %v1900_v9  ;;  %1388 = vmatprep.mubr.bf16.mxu1 %v1885_v49  ;;  %v1957_v49 = vld [vmem:[%s2778_s1 + $0x584] ss:$16 sps:$4 sm:$0xff]   ;;  %v1993_v9 = vld [vmem:[%s2778_s1 + $0x4ec] ss:$16 sps:$4 sm:$0xff]  }
  0x46   :  { %1345 = vmatprep.mubr.bf16.mxu0 %v2440_v34 }
  0x47   :  { %1316 = vmatpush1.bf16.msra.mxu0 %v1895_v10  ;;  %v2554_v10 = vld [vmem:[%s2777_s0 + $0x10] ss:$24 sps:$4 sm:$0xff]  }
  0x48   :  { %1359 = vmatpush1.bf16.msra.mxu1 %v1898_v11  ;;  %1317 = vmatprep.subr.bf16.mxu0 %v1903_v12  ;;  %v1988_v11 = vld [vmem:[%s2778_s1 + $0x2e8] ss:$16 sps:$4 sm:$0xff]  }
  0x49   :  { %1360 = vmatprep.subr.bf16.mxu1 %v1906_v13  ;;  %v1991_v12 = vld [vmem:[%s2778_s1 + $0x4e8] ss:$16 sps:$4 sm:$0xff]   ;;  %v1996_v13 = vld [vmem:[%s2778_s1 + $0x2cc] ss:$16 sps:$4 sm:$0xff]  }
  0x4b   :  { %1318 = vmatpush1.bf16.msra.mxu0 %v1901_v14  ;;  %v1999_v14 = vld [vmem:[%s2778_s1 + $0x4cc] ss:$16 sps:$4 sm:$0xff]  }
  0x4c   :  { %1361 = vmatpush1.bf16.msra.mxu1 %v1904_v15  ;;  %1319 = vmatprep.subr.bf16.mxu0 %v1909_v16  ;;  %v1994_v15 = vld [vmem:[%s2778_s1 + $0x2c8] ss:$16 sps:$4 sm:$0xff]  }
  0x4d   :  { %1362 = vmatprep.subr.bf16.mxu1 %v1912_v17  ;;  %v1997_v16 = vld [vmem:[%s2778_s1 + $0x4c8] ss:$16 sps:$4 sm:$0xff]  }
  0x4f   :  { %1320 = vmatpush1.bf16.msra.mxu0 %v1907_v18 }
  0x50   :  { %1363 = vmatpush1.bf16.msra.mxu1 %v1910_v19  ;;  %1321 = vmatprep.subr.bf16.mxu0 %v1915_v20 }
  0x51   :  { %1364 = vmatprep.subr.bf16.mxu1 %v1918_v21 }
  0x53   :  { %1322 = vmatpush1.bf16.msra.mxu0 %v1913_v22 }
  0x54   :  { %1365 = vmatpush1.bf16.msra.mxu1 %v1916_v23  ;;  %1323 = vmatprep.subr.bf16.mxu0 %v1921_v24 }
  0x55   :  { %1366 = vmatprep.subr.bf16.mxu1 %v1924_v25 }
  0x57   :  { %1324 = vmatpush1.bf16.msra.mxu0 %v1919_v26 }
  0x58   :  { %1367 = vmatpush1.bf16.msra.mxu1 %v1922_v27  ;;  %1325 = vmatprep.subr.bf16.mxu0 %v1927_v28 }
  0x59   :  { %1368 = vmatprep.subr.bf16.mxu1 %v1930_v29 }
  0x5b   :  { %1326 = vmatpush1.bf16.msra.mxu0 %v1925_v30 }
  0x5c   :  { %1369 = vmatpush1.bf16.msra.mxu1 %v1928_v31  ;;  %1327 = vmatprep.subr.bf16.mxu0 %v1933_v32 }
  0x5d   :  { %1370 = vmatprep.subr.bf16.mxu1 %v1936_v33 }
  0x5f   :  { %1328 = vmatpush1.bf16.msra.mxu0 %v1931_v35 }
  0x60   :  { %1371 = vmatpush1.bf16.msra.mxu1 %v1934_v36  ;;  %1329 = vmatprep.subr.bf16.mxu0 %v1939_v37 }
  0x61   :  { %1372 = vmatprep.subr.bf16.mxu1 %v1942_v38 }
  0x63   :  { %1330 = vmatpush2.bf16.msra.mxu0 %v1937_v39 }
  0x64   :  { %1373 = vmatpush2.bf16.msra.mxu1 %v1940_v40  ;;  %1331 = vmatprep.subr.bf16.mxu0 %v1945_v41 }
  0x65   :  { %1374 = vmatprep.subr.bf16.mxu1 %v1948_v42 }
  0x67   :  { %1332 = vmatpush2.bf16.msra.mxu0 %v1943_v43 }
  0x68   :  { %1375 = vmatpush2.bf16.msra.mxu1 %v1946_v44  ;;  %1333 = vmatprep.subr.bf16.mxu0 %v1951_v45 }
  0x69   :  { %1376 = vmatprep.subr.bf16.mxu1 %v1954_v46 }
  0x6b   :  { %1334 = vmatpush2.bf16.msra.mxu0 %v1949_v47 }
  0x6c   :  { %1377 = vmatpush2.bf16.msra.mxu1 %v1952_v48  ;;  %1335 = vmatprep.subr.bf16.mxu0 %v1957_v49 }
  0x6d   :  { %1378 = vmatprep.subr.bf16.mxu1 %v1960_v50 }
  0x6f   :  { %1336 = vmatpush2.bf16.msra.mxu0 %v1955_v52 }
  0x70   :  { %1379 = vmatpush2.bf16.msra.mxu1 %v1958_v53  ;;  %1337 = vmatprep.subr.bf16.mxu0 %v1963_v54 }
  0x71   :  { %1380 = vmatprep.subr.bf16.mxu1 %v1966_v55 }
  0x73   :  { %1338 = vmatpush2.bf16.msra.mxu0 %v1961_v56 }
  0x74   :  { %1381 = vmatpush2.bf16.msra.mxu1 %v1964_v57  ;;  %1339 = vmatprep.subr.bf16.mxu0 %v1969_v58 }
  0x75   :  { %1382 = vmatprep.subr.bf16.mxu1 %v1972_v59 }
  0x77   :  { %1340 = vmatpush2.bf16.msra.mxu0 %v1967_v60 }
  0x78   :  { %1383 = vmatpush2.bf16.msra.mxu1 %v1970_v61  ;;  %1341 = vmatprep.subr.bf16.mxu0 %v1975_v62 }
  0x79   :  { %1384 = vmatprep.subr.bf16.mxu1 %v1978_v63 }
  0x7b   :  { %1342 = vmatpush2.bf16.msra.mxu0 %v1973_v0 }
  0x7c   :  { %1385 = vmatpush2.bf16.msra.mxu1 %v1976_v1  ;;  %1343 = vmatprep.subr.bf16.mxu0 %v1981_v2 }
  0x7d   :  { %1386 = vmatprep.subr.bf16.mxu1 %v1984_v3 }
  0x7f   :  { %1344 = vmatpush2.bf16.msra.mxu0 %v1979_v6 }
  0x80   :  { %1387 = vmatpush2.bf16.msra.mxu1 %v1982_v7  ;;  %1399 = vmatprep.subr.bf16.mxu0 %v1990_v8 }
  0x81   :  { %1442 = vmatprep.subr.bf16.mxu1 %v1993_v9 }
  0x82   :  { %1346 = vmatmul.mubr.bf16.vlgmr.msra.gmra.mxu0 %v2554_v10 }
  0x83   :  { %1389 = vmatmul.mubr.bf16.vlgmr.msra.gmra.mxu1 %v2344_v4  ;;  %1400 = vmatpush1.bf16.msra.mxu0 %v1988_v11 }
  0x84   :  { %1443 = vmatpush1.bf16.msra.mxu1 %v1991_v12 }
  0x85   :  { %10 = vsyncpa [#allocation3], 0  ;;  %1401 = vmatprep.subr.bf16.mxu0 %v1996_v13  ;;  %1444 = vmatprep.subr.bf16.mxu1 %v1999_v14  ;;  %v2002_v17 = vld [vmem:[%s2778_s1 + $0x2ac] ss:$16 sps:$4 sm:$0xff]   ;;  %v2000_v18 = vld [vmem:[%s2778_s1 + $0x2a8] ss:$16 sps:$4 sm:$0xff]   ;;  %v217_v11 = vlaneseq }
  0x86   :  { %v2005_v4 = vld [vmem:[%s2778_s1 + $0x4ac] ss:$16 sps:$4 sm:$0xff]   ;;  %1431 = vmatprep.mubr.bf16.mxu0 %v2290_v51  ;;  %1474 = vmatprep.mubr.bf16.mxu1 %v2440_v34  ;;  %v2003_v19 = vld [vmem:[%s2778_s1 + $0x4a8] ss:$16 sps:$4 sm:$0xff]  }
  0x87   :  { %1402 = vmatpush1.bf16.msra.mxu0 %v1994_v15  ;;  %v2008_v20 = vld [vmem:[%s2778_s1 + $0x28c] ss:$16 sps:$4 sm:$0xff]   ;;  %v2006_v21 = vld [vmem:[%s2778_s1 + $0x288] ss:$16 sps:$4 sm:$0xff]   ;;  %v218_v12 = vshrl.u32 %v217_v11, 7 }
  0x88   :  { %1445 = vmatpush1.bf16.msra.mxu1 %v1997_v16  ;;  %1403 = vmatprep.subr.bf16.mxu0 %v2002_v17  ;;  %v2011_v51 = vld [vmem:[%s2778_s1 + $0x48c] ss:$16 sps:$4 sm:$0xff]   ;;  %v2009_v22 = vld [vmem:[%s2778_s1 + $0x488] ss:$16 sps:$4 sm:$0xff]   ;;  %v215_v15 = vld [vmem:[%s2779_s2] sm:$0xf] }
  0x89   :  { %1446 = vmatprep.subr.bf16.mxu1 %v2005_v4  ;;  %v2014_v23 = vld [vmem:[%s2778_s1 + $0x26c] ss:$16 sps:$4 sm:$0xff]   ;;  %v2012_v25 = vld [vmem:[%s2778_s1 + $0x268] ss:$16 sps:$4 sm:$0xff]   ;;  %v219_v14 = vsub.s32 0, %v218_v12  ;;  %v223_v16 = vsub.s32 1, %v218_v12 }
  0x8a   :  { %v2017_v24 = vld [vmem:[%s2778_s1 + $0x46c] ss:$16 sps:$4 sm:$0xff]   ;;  %v2015_v26 = vld [vmem:[%s2778_s1 + $0x468] ss:$16 sps:$4 sm:$0xff]  }
  0x8b   :  { %1404 = vmatpush1.bf16.msra.mxu0 %v2000_v18  ;;  %v2020_v27 = vld [vmem:[%s2778_s1 + $0x24c] ss:$16 sps:$4 sm:$0xff]   ;;  %v2018_v29 = vld [vmem:[%s2778_s1 + $0x248] ss:$16 sps:$4 sm:$0xff]   ;;  %v220_v4 = vrot.slane %v215_v15, %v219_v14 }
  0x8c   :  { %1447 = vmatpush1.bf16.msra.mxu1 %v2003_v19  ;;  %1405 = vmatprep.subr.bf16.mxu0 %v2008_v20  ;;  %v2023_v28 = vld [vmem:[%s2778_s1 + $0x44c] ss:$16 sps:$4 sm:$0xff]   ;;  %v2021_v30 = vld [vmem:[%s2778_s1 + $0x448] ss:$16 sps:$4 sm:$0xff]   ;;  %v224_v19 = vrot.slane %v215_v15, %v223_v16 }
  0x8d   :  { %1448 = vmatprep.subr.bf16.mxu1 %v2011_v51  ;;  %v2026_v31 = vld [vmem:[%s2778_s1 + $0x22c] ss:$16 sps:$4 sm:$0xff]   ;;  %v2024_v33 = vld [vmem:[%s2778_s1 + $0x228] ss:$16 sps:$4 sm:$0xff]  }
  0x8e   :  { %v2029_v32 = vld [vmem:[%s2778_s1 + $0x42c] ss:$16 sps:$4 sm:$0xff]   ;;  %v2027_v34 = vld [vmem:[%s2778_s1 + $0x428] ss:$16 sps:$4 sm:$0xff]  }
  0x8f   :  { %1406 = vmatpush1.bf16.msra.mxu0 %v2006_v21  ;;  %v2032_v35 = vld [vmem:[%s2778_s1 + $0x20c] ss:$16 sps:$4 sm:$0xff]   ;;  %v2030_v37 = vld [vmem:[%s2778_s1 + $0x208] ss:$16 sps:$4 sm:$0xff]  }
  0x90   :  { %1449 = vmatpush1.bf16.msra.mxu1 %v2009_v22  ;;  %1407 = vmatprep.subr.bf16.mxu0 %v2014_v23  ;;  %v2035_v36 = vld [vmem:[%s2778_s1 + $0x40c] ss:$16 sps:$4 sm:$0xff]   ;;  %v2033_v38 = vld [vmem:[%s2778_s1 + $0x408] ss:$16 sps:$4 sm:$0xff]  }
  0x91   :  { %1450 = vmatprep.subr.bf16.mxu1 %v2017_v24  ;;  %v2038_v39 = vld [vmem:[%s2778_s1 + $0x3ec] ss:$16 sps:$4 sm:$0xff]   ;;  %v2036_v41 = vld [vmem:[%s2778_s1 + $0x3e8] ss:$16 sps:$4 sm:$0xff]  }
  0x92   :  { %v2041_v40 = vld [vmem:[%s2778_s1 + $0x5ec] ss:$16 sps:$4 sm:$0xff]   ;;  %v2039_v42 = vld [vmem:[%s2778_s1 + $0x5e8] ss:$16 sps:$4 sm:$0xff]  }
  0x93   :  { %1408 = vmatpush1.bf16.msra.mxu0 %v2012_v25  ;;  %v2044_v43 = vld [vmem:[%s2778_s1 + $0x3cc] ss:$16 sps:$4 sm:$0xff]   ;;  %v2042_v45 = vld [vmem:[%s2778_s1 + $0x3c8] ss:$16 sps:$4 sm:$0xff]  }
  0x94   :  { %1451 = vmatpush1.bf16.msra.mxu1 %v2015_v26  ;;  %1409 = vmatprep.subr.bf16.mxu0 %v2020_v27  ;;  %v2047_v44 = vld [vmem:[%s2778_s1 + $0x5cc] ss:$16 sps:$4 sm:$0xff]   ;;  %v2045_v46 = vld [vmem:[%s2778_s1 + $0x5c8] ss:$16 sps:$4 sm:$0xff]  }
  0x95   :  { %1452 = vmatprep.subr.bf16.mxu1 %v2023_v28  ;;  %v2050_v47 = vld [vmem:[%s2778_s1 + $0x3ac] ss:$16 sps:$4 sm:$0xff]   ;;  %v2048_v49 = vld [vmem:[%s2778_s1 + $0x3a8] ss:$16 sps:$4 sm:$0xff]  }
  0x96   :  { %v2053_v48 = vld [vmem:[%s2778_s1 + $0x5ac] ss:$16 sps:$4 sm:$0xff]   ;;  %v2051_v50 = vld [vmem:[%s2778_s1 + $0x5a8] ss:$16 sps:$4 sm:$0xff]  }
  0x97   :  { %1410 = vmatpush1.bf16.msra.mxu0 %v2018_v29  ;;  %v2056_v52 = vld [vmem:[%s2778_s1 + $0x38c] ss:$16 sps:$4 sm:$0xff]   ;;  %v2054_v54 = vld [vmem:[%s2778_s1 + $0x388] ss:$16 sps:$4 sm:$0xff]  }
  0x98   :  { %1453 = vmatpush1.bf16.msra.mxu1 %v2021_v30  ;;  %1411 = vmatprep.subr.bf16.mxu0 %v2026_v31  ;;  %v2059_v53 = vld [vmem:[%s2778_s1 + $0x58c] ss:$16 sps:$4 sm:$0xff]   ;;  %v2057_v55 = vld [vmem:[%s2778_s1 + $0x588] ss:$16 sps:$4 sm:$0xff]  }
  0x99   :  { %1454 = vmatprep.subr.bf16.mxu1 %v2029_v32  ;;  %v2062_v56 = vld [vmem:[%s2778_s1 + $0x36c] ss:$16 sps:$4 sm:$0xff]   ;;  %v2060_v58 = vld [vmem:[%s2778_s1 + $0x368] ss:$16 sps:$4 sm:$0xff]  }
  0x9a   :  { %v2065_v57 = vld [vmem:[%s2778_s1 + $0x56c] ss:$16 sps:$4 sm:$0xff]   ;;  %v2063_v59 = vld [vmem:[%s2778_s1 + $0x568] ss:$16 sps:$4 sm:$0xff]  }
  0x9b   :  { %1412 = vmatpush1.bf16.msra.mxu0 %v2024_v33  ;;  %v2068_v60 = vld [vmem:[%s2778_s1 + $0x34c] ss:$16 sps:$4 sm:$0xff]   ;;  %v2066_v62 = vld [vmem:[%s2778_s1 + $0x348] ss:$16 sps:$4 sm:$0xff]  }
  0x9c   :  { %1455 = vmatpush1.bf16.msra.mxu1 %v2027_v34  ;;  %1413 = vmatprep.subr.bf16.mxu0 %v2032_v35  ;;  %v2071_v61 = vld [vmem:[%s2778_s1 + $0x54c] ss:$16 sps:$4 sm:$0xff]   ;;  %v2069_v63 = vld [vmem:[%s2778_s1 + $0x548] ss:$16 sps:$4 sm:$0xff]  }
  0x9d   :  { %1456 = vmatprep.subr.bf16.mxu1 %v2035_v36  ;;  %v2074_v0 = vld [vmem:[%s2778_s1 + $0x32c] ss:$16 sps:$4 sm:$0xff]   ;;  %v2072_v2 = vld [vmem:[%s2778_s1 + $0x328] ss:$16 sps:$4 sm:$0xff]  }
  0x9e   :  { %v2077_v1 = vld [vmem:[%s2778_s1 + $0x52c] ss:$16 sps:$4 sm:$0xff]   ;;  %v2075_v3 = vld [vmem:[%s2778_s1 + $0x528] ss:$16 sps:$4 sm:$0xff]  }
  0x9f   :  { %1414 = vmatpush1.bf16.msra.mxu0 %v2030_v37  ;;  %v2080_v6 = vld [vmem:[%s2778_s1 + $0x30c] ss:$16 sps:$4 sm:$0xff]   ;;  %v2078_v8 = vld [vmem:[%s2778_s1 + $0x308] ss:$16 sps:$4 sm:$0xff]  }
  0xa0   :  { %1457 = vmatpush1.bf16.msra.mxu1 %v2033_v38  ;;  %1415 = vmatprep.subr.bf16.mxu0 %v2038_v39  ;;  %v2083_v7 = vld [vmem:[%s2778_s1 + $0x50c] ss:$16 sps:$4 sm:$0xff]   ;;  %v2081_v9 = vld [vmem:[%s2778_s1 + $0x508] ss:$16 sps:$4 sm:$0xff]   ;;  %s2106_s1 = smov [#allocation2]  }
  0xa1   :  { %1458 = vmatprep.subr.bf16.mxu1 %v2041_v40  ;;  %v227_v40 = vsub.s32 2, %v218_v12  ;;  %s1571_s2 = sshll.u32 %s2106_s1, 4  ;;  %s1572_s2 = int_to_ptr.vmem [resolvable:$true] %s1571_s2 }
  0xa2   :  { %s2084_s18 = scalar_lea.vmem %s1572_s2, 1024  ;;  %p2089_p1 = scmp.lt.s32.totalorder %s1572_s2, %s1572_s2 }
  0xa3   :  { %1416 = vmatpush2.bf16.msra.mxu0 %v2036_v41  ;;  %v231_v41 = vsub.s32 3, %v218_v12  ;;  %p2085_p0 = scmp.ne.s32.totalorder %s1572_s2, %s2084_s18  ;;  %p2090_p2 = scmp.lt.s32.totalorder %s2084_s18, %s2084_s18 }
  0xa4   :  { %1459 = vmatpush2.bf16.msra.mxu1 %v2039_v42  ;;  %1417 = vmatprep.subr.bf16.mxu0 %v2044_v43  ;;  %v228_v43 = vrot.slane %v215_v15, %v227_v40 }
  0xa5   :  { %1460 = vmatprep.subr.bf16.mxu1 %v2047_v44  ;;  %v232_v44 = vrot.slane %v215_v15, %v231_v41  ;;  %p2091_p3 = por %p2090_p2, %p2089_p1 }
  0xa7   :  { %1418 = vmatpush2.bf16.msra.mxu0 %v2042_v45  ;;  %p2092_p4 = pnand %p2091_p3, %p2085_p0 }
  0xa8   :  { %1461 = vmatpush2.bf16.msra.mxu1 %v2045_v46  ;;  %1419 = vmatprep.subr.bf16.mxu0 %v2050_v47 }
  0xa9   :  { %1462 = vmatprep.subr.bf16.mxu1 %v2053_v48 }
  0xab   :  { %1420 = vmatpush2.bf16.msra.mxu0 %v2048_v49 }
  0xac   :  { %1463 = vmatpush2.bf16.msra.mxu1 %v2051_v50  ;;  %1421 = vmatprep.subr.bf16.mxu0 %v2056_v52 }
  0xad   :  { %1464 = vmatprep.subr.bf16.mxu1 %v2059_v53 }
  0xaf   :  { %1422 = vmatpush2.bf16.msra.mxu0 %v2054_v54 }
  0xb0   :  { %1465 = vmatpush2.bf16.msra.mxu1 %v2057_v55  ;;  %1423 = vmatprep.subr.bf16.mxu0 %v2062_v56 }
  0xb1   :  { %1466 = vmatprep.subr.bf16.mxu1 %v2065_v57 }
  0xb3   :  { %1424 = vmatpush2.bf16.msra.mxu0 %v2060_v58 }
  0xb4   :  { %1467 = vmatpush2.bf16.msra.mxu1 %v2063_v59  ;;  %1425 = vmatprep.subr.bf16.mxu0 %v2068_v60 }
  0xb5   :  { %1468 = vmatprep.subr.bf16.mxu1 %v2071_v61 }
  0xb7   :  { %1426 = vmatpush2.bf16.msra.mxu0 %v2066_v62 }
  0xb8   :  { %1469 = vmatpush2.bf16.msra.mxu1 %v2069_v63  ;;  %1427 = vmatprep.subr.bf16.mxu0 %v2074_v0 }
  0xb9   :  { %1470 = vmatprep.subr.bf16.mxu1 %v2077_v1 }
  0xbb   :  { %1428 = vmatpush2.bf16.msra.mxu0 %v2072_v2 }
  0xbc   :  { %1471 = vmatpush2.bf16.msra.mxu1 %v2075_v3  ;;  %1429 = vmatprep.subr.bf16.mxu0 %v2080_v6 }
  0xbd   :  { %1472 = vmatprep.subr.bf16.mxu1 %v2083_v7 }
  0xbf   :  { %1430 = vmatpush2.bf16.msra.mxu0 %v2078_v8 }
  0xc0   :  { %1473 = vmatpush2.bf16.msra.mxu1 %v2081_v9 }
  0xc2   :  { %1432 = vmatmul.mubr.bf16.vlgmr.msra.gmra.mxu0 %v2349_v5 }
  0xc3   :  { %1475 = vmatmul.mubr.bf16.vlgmr.msra.gmra.mxu1 %v2554_v10 }
 0x102   :  { %v1261_v13 = vpop.f32.mrf.mxu0 }
 0x103   :  { %v1304_v18 = vpop.f32.mrf.mxu1  ;;  %v1262_v51 = vadd.f32 %v1261_v13, %v220_v4  ;;  %v1494_v13 = vand.u32 127, %v217_v11 }
 0x104   :  { %v1263_v17 = vpop.f32.mrf.mxu0 }
 0x105   :  { %v1306_v21 = vpop.f32.mrf.mxu1  ;;  %v1264_v5 = vadd.f32 %v1263_v17, %v224_v19  ;;  %v1305_v10 = vadd.f32 %v1304_v18, %v1262_v51  ;;  %v1495_v14 = vadd.s32 128, %v1494_v13  ;;  %v1496_v15 = vadd.s32 256, %v1494_v13 }
 0x106   :  { %v1265_v20 = vpop.f32.mrf.mxu0  ;;  %v1497_v16 = vadd.s32 384, %v1494_v13 }
 0x107   :  { %v1266_v23 = vadd.f32 %v1265_v20, %v220_v4  ;;  %v1308_v24 = vpop.f32.mrf.mxu1  ;;  %v1307_v26 = vadd.f32 %v1306_v21, %v1264_v5 }
 0x108   :  { %v1267_v22 = vpop.f32.mrf.mxu0 }
 0x109   :  { %v1268_v27 = vadd.f32 %v1267_v22, %v224_v19  ;;  %v1309_v30 = vadd.f32 %v1308_v24, %v1266_v23  ;;  %v1310_v32 = vpop.f32.mrf.mxu1 }
 0x10b   :  { %v1311_v34 = vadd.f32 %v1310_v32, %v1268_v27 }
 0x142   :  { %v1347_v25 = vpop.f32.mrf.mxu0 }
 0x143   :  { %v2752_v28 = vadd.f32 %v1347_v25, %v1305_v10  ;;  %v1390_v38 = vpop.f32.mrf.mxu1 }
 0x144   :  { %v1349_v29 = vpop.f32.mrf.mxu0  ;;  %v1391_v46 = vadd.f32 %v1390_v38, %v228_v43 }
 0x145   :  { %1485 = vst [vmem:[#allocation2] sm:$0xff] %v2752_v28  ;;  %v1350_v31 = vadd.f32 %v1349_v29, %v1307_v26  ;;  %v1392_v39 = vpop.f32.mrf.mxu1 }
 0x146   :  { %v1351_v33 = vpop.f32.mrf.mxu0  ;;  %v1393_v49 = vadd.f32 %v1392_v39, %v232_v44 }
 0x147   :  { %1486 = vst [vmem:[#allocation2 + $0x8] sm:$0xff] %v1350_v31  ;;  %v2755_v35 = vadd.f32 %v1351_v33, %v1309_v30  ;;  %v1394_v42 = vpop.f32.mrf.mxu1 }
 0x148   :  { %v1353_v36 = vpop.f32.mrf.mxu0  ;;  %v1395_v54 = vadd.f32 %v1394_v42, %v228_v43 }
 0x149   :  { %1489 = vst [vmem:[#allocation2 + $0x20] sm:$0xff] %v2755_v35  ;;  %v2758_v37 = vadd.f32 %v1353_v36, %v1311_v34  ;;  %v1396_v45 = vpop.f32.mrf.mxu1 }
 0x14a   :  { %v1397_v59 = vadd.f32 %v1396_v45, %v232_v44 }
 0x14b   :  { %1490 = vst [vmem:[#allocation2 + $0x28] sm:$0xff] %v2758_v37 }
 0x182   :  { %v1433_v47 = vpop.f32.mrf.mxu0 }
 0x183   :  { %v1476_v48 = vpop.f32.mrf.mxu1  ;;  %v1434_v50 = vadd.f32 %v1433_v47, %v1391_v46 }
 0x184   :  { %v1435_v52 = vpop.f32.mrf.mxu0 }
 0x185   :  { %v1478_v53 = vpop.f32.mrf.mxu1  ;;  %v1477_v55 = vadd.f32 %v1476_v48, %v1434_v50  ;;  %v1436_v56 = vadd.f32 %v1435_v52, %v1393_v49 }
 0x186   :  { %v1437_v57 = vpop.f32.mrf.mxu0 }
 0x187   :  { %v1480_v58 = vpop.f32.mrf.mxu1  ;;  %1487 = vst [vmem:[#allocation2 + $0x10] sm:$0xff] %v1477_v55  ;;  %v1479_v60 = vadd.f32 %v1478_v53, %v1436_v56  ;;  %v1438_v61 = vadd.f32 %v1437_v57, %v1395_v54  ;;  %v1498_v1 = vmax.f32 %v2752_v28, %v1477_v55 }
 0x188   :  { %v1439_v62 = vpop.f32.mrf.mxu0 }
 0x189   :  { %1488 = vst [vmem:[#allocation2 + $0x18] sm:$0xff] %v1479_v60  ;;  %v1481_v63 = vadd.f32 %v1480_v58, %v1438_v61  ;;  %v1440_v0 = vadd.f32 %v1439_v62, %v1397_v59  ;;  %v1499_v2 = vmax.f32 %v1350_v31, %v1479_v60  ;;  %v1482_v3 = vpop.f32.mrf.mxu1 }
 0x18b   :  { %1491 = vst [vmem:[#allocation2 + $0x30] sm:$0xff] %v1481_v63  ;;  %v1483_v6 = vadd.f32 %v1482_v3, %v1440_v0  ;;  %v1500_v7 = vmax.f32 %v1498_v1, %v1499_v2  ;;  %v1503_v8 = vmax.f32 %v2755_v35, %v1481_v63 }
 0x18d   :  { %1492 = vst [vmem:[#allocation2 + $0x38] sm:$0xff] %v1483_v6  ;;  %1501 = vmax.xlane.f32.xlu0 %v1500_v7  ;;  %v1504_v9 = vmax.f32 %v2758_v37, %v1483_v6 }
 0x18f   :  { %v1505_v12 = vmax.f32 %v1503_v8, %v1504_v9 }
 0x191   :  { %1506 = vmax.xlane.f32.xlu0 %v1505_v12 }
 0x216   :  { %v1502_v17 = vpop.xlane.xlu0 %1501 }
 0x217   :  { %vm1508_vm0 = vcmp.eq.f32.partialorder %v2752_v28, %v1502_v17  ;;  %vm1509_vm1 = vcmp.eq.f32.partialorder %v1350_v31, %v1502_v17  ;;  %vm1510_vm2 = vcmp.eq.f32.partialorder %v1477_v55, %v1502_v17  ;;  %vm1511_vm3 = vcmp.eq.f32.partialorder %v1479_v60, %v1502_v17 }
 0x218   :  { %v1516_v4 = vsel %vm1508_vm0, %v1494_v13, 512  ;;  %v1517_v18 = vsel %vm1509_vm1, %v1495_v14, 512  ;;  %v1518_v19 = vsel %vm1510_vm2, %v1496_v15, 512  ;;  %v1519_v20 = vsel %vm1511_vm3, %v1497_v16, 512 }
 0x219   :  { %vm1524_vm4 = vcmp.lt.s32.totalorder %v1516_v4, %v1518_v19  ;;  %vm1526_vm5 = vcmp.lt.s32.totalorder %v1517_v18, %v1519_v20 }
 0x21a   :  { %v1507_v51 = vpop.xlane.xlu0 %1506  ;;  %v1525_v21 = vsel %vm1524_vm4, %v1516_v4, %v1518_v19  ;;  %v1527_v5 = vsel %vm1526_vm5, %v1517_v18, %v1519_v20 }
 0x21b   :  { %vm1512_vm6 = vcmp.eq.f32.partialorder %v2755_v35, %v1507_v51  ;;  %vm1513_vm7 = vcmp.eq.f32.partialorder %v2758_v37, %v1507_v51  ;;  %vm1514_vm8 = vcmp.eq.f32.partialorder %v1481_v63, %v1507_v51  ;;  %vm1515_vm9 = vcmp.eq.f32.partialorder %v1483_v6, %v1507_v51 }
 0x21c   :  { %v1520_v11 = vsel %vm1512_vm6, %v1494_v13, 512  ;;  %v1521_v22 = vsel %vm1513_vm7, %v1495_v14, 512  ;;  %v1522_v10 = vsel %vm1514_vm8, %v1496_v15, 512  ;;  %v1523_v23 = vsel %vm1515_vm9, %v1497_v16, 512 }
 0x21d   :  { %vm1528_vm10 = vcmp.lt.s32.totalorder %v1525_v21, %v1527_v5  ;;  %vm1544_vm11 = vcmp.lt.s32.totalorder %v1520_v11, %v1522_v10  ;;  %vm1546_vm12 = vcmp.lt.s32.totalorder %v1521_v22, %v1523_v23 }
 0x21e   :  { %v1529_v24 = vsel %vm1528_vm10, %v1525_v21, %v1527_v5  ;;  %v1545_v25 = vsel %vm1544_vm11, %v1520_v11, %v1522_v10  ;;  %v1547_v26 = vsel %vm1546_vm12, %v1521_v22, %v1523_v23 }
 0x21f   :  { %v1531_v27 = vshra.s32 %v1529_v24, 16  ;;  %vm1548_vm13 = vcmp.lt.s32.totalorder %v1545_v25, %v1547_v26  ;;  %v1530_v32 = vand.u32 65535, %v1529_v24 }
 0x220   :  { %v1549_v28 = vsel %vm1548_vm13, %v1545_v25, %v1547_v26 }
 0x221   :  { %v1533_v29 = vcvt.s32.f32 %v1531_v27  ;;  %v1551_v30 = vshra.s32 %v1549_v28, 16  ;;  %v1532_v34 = vcvt.s32.f32 %v1530_v32  ;;  %v1550_v35 = vand.u32 65535, %v1549_v28 }
 0x223   :  { %1534 = vmin.xlane.f32.xlu1 %v1533_v29  ;;  %v1553_v31 = vcvt.s32.f32 %v1551_v30  ;;  %v1552_v38 = vcvt.s32.f32 %v1550_v35 }
 0x227   :  { %1554 = vmin.xlane.f32.xlu1 %v1553_v31 }
 0x2ac   :  { %v1535_v33 = vpop.xlane.xlu1 %1534 }
 0x2ad   :  { %vm1536_vm14 = vcmp.eq.f32.partialorder %v1533_v29, %v1535_v33 }
 0x2ae   :  { %v1537_v36 = vsel %vm1536_vm14, %v1532_v34, inf }
 0x2af   :  { %1538 = vmin.xlane.f32.xlu0 %v1537_v36 }
 0x2b0   :  { %v1555_v37 = vpop.xlane.xlu1 %1554 }
 0x2b1   :  { %vm1556_vm15 = vcmp.eq.f32.partialorder %v1553_v31, %v1555_v37 }
 0x2b2   :  { %v1557_v39 = vsel %vm1556_vm15, %v1552_v38, inf }
 0x2b3   :  { %1558 = vmin.xlane.f32.xlu1 %v1557_v39 }
 0x2b4   :  { %2095 = shalt.err (!%p2092_p4)
}
 0x2b5   :  { %s2107_s19 = smov 512   ;;  %s2108_s20 = smov 32   ;;  %v1541_v40 = vcvt.f32.s32 %v1535_v33  ;;  %v1561_v43 = vcvt.f32.s32 %v1555_v37 }
 0x2b6   :  { %1577 = dma.vmem_to_hbm [thread:$0]  %s1572_s2, 1024, %s2780_s3, [#allocation3], %s2107_s19, %s2107_s19, %s2108_s20  }
 0x2b7   :  { %v1542_v42 = vshll.u32 %v1541_v40, 16  ;;  %v1562_v47 = vshll.u32 %v1561_v43, 16 }
 0x338   :  { %v1539_v41 = vpop.xlane.xlu0 %1538 }
 0x339   :  { %v1540_v44 = vcvt.f32.s32 %v1539_v41 }
 0x33b   :  { %v1543_v45 = vadd.s32 %v1542_v42, %v1540_v44 }
 0x33c   :  { %v1559_v46 = vpop.xlane.xlu1 %1558 }
 0x33d   :  { %1564 = vst [vmem:[%s2781_s4] sm:$0xff] %v1543_v45  ;;  %v1560_v48 = vcvt.f32.s32 %v1559_v46 }
 0x33f   :  { %v1563_v49 = vadd.s32 %v1562_v47, %v1560_v48 }
 0x341   :  { %1565 = vst [vmem:[%s2781_s4 + $0x8] sm:$0xff] %v1563_v49 }
 0x342   :  { %2104 = dma.done.wait [#allocation3], 1024  }
 0x343   :  { %2105 = vsyncadd [#allocation3], 4294966272 }
 0x344   :  { %1585 = vsyncpa [#allocation3], 1 }

// kernel: net_forward.22
= control target key start
LH: loop header
LB: loop body
LE: loop exit
PB: predicated region body
PF: predicated region fallthrough
CT: control target
= control target key end

     0   :  { %s6033_s12 = smov 0   ;;  %s6035_s13 = smov 0   ;;  %s7445_s0 = inlined_call_operand.vmem [shape: bf16[16,3072], index: 0, kind: input, shape index: {}]   ;;  %s7446_s1 = inlined_call_operand.vmem [shape: bf16[3072,768], index: 1, kind: input, shape index: {}]   ;;  %s7447_s2 = inlined_call_operand.vmem [shape: f32[1,768], index: 2, kind: input, shape index: {}]   ;;  %s7448_s3 = inlined_call_operand.vmem [shape: bf16[16,768], index: 3, kind: output, shape index: {}]  }
   0x1   :  { %s6037_s14 = smov 0   ;;  %s6039_s15 = smov 0  }
   0x2   :  { %s6041_s16 = smov 0  }
   0x3 LB: > { %s22_s17 = sadd.s32 1, %s6007_s15  ;;  %s4926_s18 = sadd.s32 4294967295, %s6011_s16   ;;  %s6011_s16 = sphi %s6041_s16, %s13_s16   ;;  %s6007_s15 = sphi %s6039_s15, %s7453_s15   ;;  %s6003_s14 = sphi %s6037_s14, %s7452_s14   ;;  %s5999_s13 = sphi %s6035_s13, %s7451_s13   ;;  %s5995_s12 = sphi %s6033_s12, %s7450_s12  }
   0x4   : > { %p23_p0 = scmp.ge.s32.totalorder %s22_s17, 3  ;;  %p65_p1 = scmp.ne.s32.totalorder %s5999_s13, %s5995_s12 }
   0x5   : > { %p66_p2 = scmp.eq.s32.totalorder %s6011_s16, 0  ;;  %p123_p4 = scmp.eq.s32.totalorder %s4926_s18, 2 }
   0x6   : > { %s7455_s17 = smov (%p23_p0, %s22_s17), 0  ;;  %s58_s20 = sadd.s32 1, %s5999_s13 }
   0x7   : > { %p67_p3 = por %p66_p2, %p65_p1  ;;  %s55_s19 = ssub.s32 %s6007_s15, %s7455_s17 }
   0x8   : > { %p56_p5 = scmp.eq.s32.totalorder %s55_s19, 0  ;;  %p6068_p6 = por %p123_p4, %p65_p1 }
   0x9   : > { %p4930_p7 = scmp.ge.s32.totalorder %s6011_s16, 3 }
   0xa   : > { %s6073_s22 = scalar_select %p56_p5, %s5999_s13, %s58_s20  }
   0xb   : > { %155 = sbr.rel (%p4930_p7) target bundleno = 213 (0xd5), region = 20 }
  0x10   : > { %158 = sbr.rel (!%p67_p3) target bundleno = 213 (0xd5), region = 24  ;;  %s160_s23 = sand.u32 (%p67_p3), 1, %s5999_s13  }
  0x11   : > { %s5351_s24 = sshll.u32 (%p67_p3), %s6007_s15, 3  ;;  %s5355_s25 = smul.u32 (%p67_p3), 3072, %s160_s23 }
  0x12   : > { %s6081_s28 = scalar_lea.vmem (%p67_p3), %s7446_s1, %s5351_s24 }
  0x13   : > { %v960_v0 = vld [vmem:[%s6081_s28] sm:$0xff] (%p67_p3)  ;;  %v962_v1 = vld [vmem:[%s6081_s28 + $0x18] sm:$0xff] (%p67_p3)  ;;  %v964_v2 = vld [vmem:[%s6081_s28 + $0x30] sm:$0xff] (%p67_p3)  ;;  %s6089_s29 = scalar_lea.vmem (%p67_p3), [#allocation2], %s5355_s25 }
  0x14   : > { %v966_v3 = vld [vmem:[%s6081_s28 + $0x48] sm:$0xff] (%p67_p3)  ;;  %v968_v4 = vld [vmem:[%s6081_s28 + $0x60] sm:$0xff] (%p67_p3)  ;;  %v970_v5 = vld [vmem:[%s6081_s28 + $0x78] sm:$0xff] (%p67_p3)  ;;  %961 = vst [vmem:[%s6089_s29] sm:$0xff] (%p67_p3), %v960_v0 }
  0x15   : > { %963 = vst [vmem:[%s6089_s29 + $0x8] sm:$0xff] %v962_v1  ;;  %965 = vst [vmem:[%s6089_s29 + $0x10] sm:$0xff] %v964_v2  ;;  %v972_v6 = vld [vmem:[%s6081_s28 + $0x90] sm:$0xff]  ;;  %v974_v7 = vld [vmem:[%s6081_s28 + $0xa8] sm:$0xff] }
  0x16   : > { %967 = vst [vmem:[%s6089_s29 + $0x18] sm:$0xff] %v966_v3  ;;  %969 = vst [vmem:[%s6089_s29 + $0x20] sm:$0xff] %v968_v4  ;;  %v976_v8 = vld [vmem:[%s6081_s28 + $0xc0] sm:$0xff]  ;;  %v978_v9 = vld [vmem:[%s6081_s28 + $0xd8] sm:$0xff] }
  0x17   : > { %971 = vst [vmem:[%s6089_s29 + $0x28] sm:$0xff] %v970_v5  ;;  %973 = vst [vmem:[%s6089_s29 + $0x30] sm:$0xff] %v972_v6  ;;  %v980_v10 = vld [vmem:[%s6081_s28 + $0xf0] sm:$0xff]  ;;  %v982_v11 = vld [vmem:[%s6081_s28 + $0x108] sm:$0xff] }
  0x18   : > { %975 = vst [vmem:[%s6089_s29 + $0x38] sm:$0xff] %v974_v7  ;;  %977 = vst [vmem:[%s6089_s29 + $0x40] sm:$0xff] %v976_v8  ;;  %v984_v12 = vld [vmem:[%s6081_s28 + $0x120] sm:$0xff]  ;;  %v986_v13 = vld [vmem:[%s6081_s28 + $0x138] sm:$0xff] }
  0x19   : > { %979 = vst [vmem:[%s6089_s29 + $0x48] sm:$0xff] %v978_v9  ;;  %981 = vst [vmem:[%s6089_s29 + $0x50] sm:$0xff] %v980_v10  ;;  %v988_v14 = vld [vmem:[%s6081_s28 + $0x150] sm:$0xff]  ;;  %v990_v15 = vld [vmem:[%s6081_s28 + $0x168] sm:$0xff] }
  0x1a   : > { %983 = vst [vmem:[%s6089_s29 + $0x58] sm:$0xff] %v982_v11  ;;  %985 = vst [vmem:[%s6089_s29 + $0x60] sm:$0xff] %v984_v12  ;;  %v992_v16 = vld [vmem:[%s6081_s28 + $0x180] sm:$0xff]  ;;  %v994_v17 = vld [vmem:[%s6081_s28 + $0x198] sm:$0xff] }
  0x1b   : > { %987 = vst [vmem:[%s6089_s29 + $0x68] sm:$0xff] %v986_v13  ;;  %989 = vst [vmem:[%s6089_s29 + $0x70] sm:$0xff] %v988_v14  ;;  %v996_v18 = vld [vmem:[%s6081_s28 + $0x1b0] sm:$0xff]  ;;  %v998_v19 = vld [vmem:[%s6081_s28 + $0x1c8] sm:$0xff] }
  0x1c   : > { %991 = vst [vmem:[%s6089_s29 + $0x78] sm:$0xff] %v990_v15  ;;  %993 = vst [vmem:[%s6089_s29 + $0x80] sm:$0xff] %v992_v16  ;;  %v1000_v20 = vld [vmem:[%s6081_s28 + $0x1e0] sm:$0xff]  ;;  %v1002_v21 = vld [vmem:[%s6081_s28 + $0x1f8] sm:$0xff] }
  0x1d   : > { %995 = vst [vmem:[%s6089_s29 + $0x88] sm:$0xff] %v994_v17  ;;  %997 = vst [vmem:[%s6089_s29 + $0x90] sm:$0xff] %v996_v18  ;;  %v1004_v22 = vld [vmem:[%s6081_s28 + $0x210] sm:$0xff]  ;;  %v1006_v23 = vld [vmem:[%s6081_s28 + $0x228] sm:$0xff] }
  0x1e   : > { %999 = vst [vmem:[%s6089_s29 + $0x98] sm:$0xff] %v998_v19  ;;  %1001 = vst [vmem:[%s6089_s29 + $0xa0] sm:$0xff] %v1000_v20  ;;  %v1008_v24 = vld [vmem:[%s6081_s28 + $0x240] sm:$0xff]  ;;  %v1010_v25 = vld [vmem:[%s6081_s28 + $0x258] sm:$0xff] }
  0x1f   : > { %1003 = vst [vmem:[%s6089_s29 + $0xa8] sm:$0xff] %v1002_v21  ;;  %1005 = vst [vmem:[%s6089_s29 + $0xb0] sm:$0xff] %v1004_v22  ;;  %v1012_v26 = vld [vmem:[%s6081_s28 + $0x270] sm:$0xff]  ;;  %v1014_v27 = vld [vmem:[%s6081_s28 + $0x288] sm:$0xff] }
  0x20   : > { %1007 = vst [vmem:[%s6089_s29 + $0xb8] sm:$0xff] %v1006_v23  ;;  %1009 = vst [vmem:[%s6089_s29 + $0xc0] sm:$0xff] %v1008_v24  ;;  %v1016_v28 = vld [vmem:[%s6081_s28 + $0x2a0] sm:$0xff]  ;;  %v1018_v29 = vld [vmem:[%s6081_s28 + $0x2b8] sm:$0xff] }
  0x21   : > { %1011 = vst [vmem:[%s6089_s29 + $0xc8] sm:$0xff] %v1010_v25  ;;  %1013 = vst [vmem:[%s6089_s29 + $0xd0] sm:$0xff] %v1012_v26  ;;  %v1020_v30 = vld [vmem:[%s6081_s28 + $0x2d0] sm:$0xff]  ;;  %v1022_v31 = vld [vmem:[%s6081_s28 + $0x2e8] sm:$0xff] }
  0x22   : > { %1015 = vst [vmem:[%s6089_s29 + $0xd8] sm:$0xff] %v1014_v27  ;;  %1017 = vst [vmem:[%s6089_s29 + $0xe0] sm:$0xff] %v1016_v28  ;;  %v1024_v32 = vld [vmem:[%s6081_s28 + $0x300] sm:$0xff]  ;;  %v1026_v33 = vld [vmem:[%s6081_s28 + $0x318] sm:$0xff] }
  0x23   : > { %1019 = vst [vmem:[%s6089_s29 + $0xe8] sm:$0xff] %v1018_v29  ;;  %1021 = vst [vmem:[%s6089_s29 + $0xf0] sm:$0xff] %v1020_v30  ;;  %v1028_v34 = vld [vmem:[%s6081_s28 + $0x330] sm:$0xff]  ;;  %v1030_v35 = vld [vmem:[%s6081_s28 + $0x348] sm:$0xff] }
  0x24   : > { %1023 = vst [vmem:[%s6089_s29 + $0xf8] sm:$0xff] %v1022_v31  ;;  %1025 = vst [vmem:[%s6089_s29 + $0x100] sm:$0xff] %v1024_v32  ;;  %v1032_v36 = vld [vmem:[%s6081_s28 + $0x360] sm:$0xff]  ;;  %v1034_v37 = vld [vmem:[%s6081_s28 + $0x378] sm:$0xff] }
  0x25   : > { %1027 = vst [vmem:[%s6089_s29 + $0x108] sm:$0xff] %v1026_v33  ;;  %1029 = vst [vmem:[%s6089_s29 + $0x110] sm:$0xff] %v1028_v34  ;;  %v1036_v38 = vld [vmem:[%s6081_s28 + $0x390] sm:$0xff]  ;;  %v1038_v39 = vld [vmem:[%s6081_s28 + $0x3a8] sm:$0xff] }
  0x26   : > { %1031 = vst [vmem:[%s6089_s29 + $0x118] sm:$0xff] %v1030_v35  ;;  %1033 = vst [vmem:[%s6089_s29 + $0x120] sm:$0xff] %v1032_v36  ;;  %v1040_v40 = vld [vmem:[%s6081_s28 + $0x3c0] sm:$0xff]  ;;  %v1042_v41 = vld [vmem:[%s6081_s28 + $0x3d8] sm:$0xff] }
  0x27   : > { %1035 = vst [vmem:[%s6089_s29 + $0x128] sm:$0xff] %v1034_v37  ;;  %1037 = vst [vmem:[%s6089_s29 + $0x130] sm:$0xff] %v1036_v38  ;;  %v1044_v42 = vld [vmem:[%s6081_s28 + $0x3f0] sm:$0xff]  ;;  %v1046_v43 = vld [vmem:[%s6081_s28 + $0x408] sm:$0xff] }
  0x28   : > { %1039 = vst [vmem:[%s6089_s29 + $0x138] sm:$0xff] %v1038_v39  ;;  %1041 = vst [vmem:[%s6089_s29 + $0x140] sm:$0xff] %v1040_v40  ;;  %v1048_v44 = vld [vmem:[%s6081_s28 + $0x420] sm:$0xff]  ;;  %v1050_v45 = vld [vmem:[%s6081_s28 + $0x438] sm:$0xff] }
  0x29   : > { %1043 = vst [vmem:[%s6089_s29 + $0x148] sm:$0xff] %v1042_v41  ;;  %1045 = vst [vmem:[%s6089_s29 + $0x150] sm:$0xff] %v1044_v42  ;;  %v1052_v46 = vld [vmem:[%s6081_s28 + $0x450] sm:$0xff]  ;;  %v1054_v47 = vld [vmem:[%s6081_s28 + $0x468] sm:$0xff] }
  0x2a   : > { %1047 = vst [vmem:[%s6089_s29 + $0x158] sm:$0xff] %v1046_v43  ;;  %1049 = vst [vmem:[%s6089_s29 + $0x160] sm:$0xff] %v1048_v44  ;;  %v1056_v48 = vld [vmem:[%s6081_s28 + $0x480] sm:$0xff]  ;;  %v1058_v49 = vld [vmem:[%s6081_s28 + $0x498] sm:$0xff] }
  0x2b   : > { %1051 = vst [vmem:[%s6089_s29 + $0x168] sm:$0xff] %v1050_v45  ;;  %1053 = vst [vmem:[%s6089_s29 + $0x170] sm:$0xff] %v1052_v46  ;;  %v1060_v50 = vld [vmem:[%s6081_s28 + $0x4b0] sm:$0xff]  ;;  %v1062_v51 = vld [vmem:[%s6081_s28 + $0x4c8] sm:$0xff] }
  0x2c   : > { %1055 = vst [vmem:[%s6089_s29 + $0x178] sm:$0xff] %v1054_v47  ;;  %1057 = vst [vmem:[%s6089_s29 + $0x180] sm:$0xff] %v1056_v48  ;;  %v1064_v52 = vld [vmem:[%s6081_s28 + $0x4e0] sm:$0xff]  ;;  %v1066_v53 = vld [vmem:[%s6081_s28 + $0x4f8] sm:$0xff] }
  0x2d   : > { %1059 = vst [vmem:[%s6089_s29 + $0x188] sm:$0xff] %v1058_v49  ;;  %1061 = vst [vmem:[%s6089_s29 + $0x190] sm:$0xff] %v1060_v50  ;;  %v1068_v54 = vld [vmem:[%s6081_s28 + $0x510] sm:$0xff]  ;;  %v1070_v55 = vld [vmem:[%s6081_s28 + $0x528] sm:$0xff] }
  0x2e   : > { %1063 = vst [vmem:[%s6089_s29 + $0x198] sm:$0xff] %v1062_v51  ;;  %1065 = vst [vmem:[%s6089_s29 + $0x1a0] sm:$0xff] %v1064_v52  ;;  %v1072_v56 = vld [vmem:[%s6081_s28 + $0x540] sm:$0xff]  ;;  %v1074_v57 = vld [vmem:[%s6081_s28 + $0x558] sm:$0xff] }
  0x2f   : > { %1067 = vst [vmem:[%s6089_s29 + $0x1a8] sm:$0xff] %v1066_v53  ;;  %1069 = vst [vmem:[%s6089_s29 + $0x1b0] sm:$0xff] %v1068_v54  ;;  %v1076_v58 = vld [vmem:[%s6081_s28 + $0x570] sm:$0xff]  ;;  %v1078_v59 = vld [vmem:[%s6081_s28 + $0x588] sm:$0xff] }
  0x30   : > { %1071 = vst [vmem:[%s6089_s29 + $0x1b8] sm:$0xff] %v1070_v55  ;;  %1073 = vst [vmem:[%s6089_s29 + $0x1c0] sm:$0xff] %v1072_v56  ;;  %v1080_v60 = vld [vmem:[%s6081_s28 + $0x5a0] sm:$0xff]  ;;  %v1082_v61 = vld [vmem:[%s6081_s28 + $0x5b8] sm:$0xff] }
  0x31   : > { %1075 = vst [vmem:[%s6089_s29 + $0x1c8] sm:$0xff] %v1074_v57  ;;  %1077 = vst [vmem:[%s6089_s29 + $0x1d0] sm:$0xff] %v1076_v58  ;;  %v1084_v62 = vld [vmem:[%s6081_s28 + $0x5d0] sm:$0xff]  ;;  %v1086_v63 = vld [vmem:[%s6081_s28 + $0x5e8] sm:$0xff] }
  0x32   : > { %1079 = vst [vmem:[%s6089_s29 + $0x1d8] sm:$0xff] %v1078_v59  ;;  %1081 = vst [vmem:[%s6089_s29 + $0x1e0] sm:$0xff] %v1080_v60  ;;  %v1088_v0 = vld [vmem:[%s6081_s28 + $0x600] sm:$0xff]  ;;  %v1090_v1 = vld [vmem:[%s6081_s28 + $0x618] sm:$0xff] }
  0x33   : > { %1083 = vst [vmem:[%s6089_s29 + $0x1e8] sm:$0xff] %v1082_v61  ;;  %1085 = vst [vmem:[%s6089_s29 + $0x1f0] sm:$0xff] %v1084_v62  ;;  %v1092_v2 = vld [vmem:[%s6081_s28 + $0x630] sm:$0xff]  ;;  %v1094_v3 = vld [vmem:[%s6081_s28 + $0x648] sm:$0xff] }
  0x34   : > { %1087 = vst [vmem:[%s6089_s29 + $0x1f8] sm:$0xff] %v1086_v63  ;;  %1089 = vst [vmem:[%s6089_s29 + $0x200] sm:$0xff] %v1088_v0  ;;  %v1096_v4 = vld [vmem:[%s6081_s28 + $0x660] sm:$0xff]  ;;  %v1098_v5 = vld [vmem:[%s6081_s28 + $0x678] sm:$0xff] }
  0x35   : > { %1091 = vst [vmem:[%s6089_s29 + $0x208] sm:$0xff] %v1090_v1  ;;  %1093 = vst [vmem:[%s6089_s29 + $0x210] sm:$0xff] %v1092_v2  ;;  %v1100_v6 = vld [vmem:[%s6081_s28 + $0x690] sm:$0xff]  ;;  %v1102_v7 = vld [vmem:[%s6081_s28 + $0x6a8] sm:$0xff] }
  0x36   : > { %1095 = vst [vmem:[%s6089_s29 + $0x218] sm:$0xff] %v1094_v3  ;;  %1097 = vst [vmem:[%s6089_s29 + $0x220] sm:$0xff] %v1096_v4  ;;  %v1104_v8 = vld [vmem:[%s6081_s28 + $0x6c0] sm:$0xff]  ;;  %v1106_v9 = vld [vmem:[%s6081_s28 + $0x6d8] sm:$0xff] }
  0x37   : > { %1099 = vst [vmem:[%s6089_s29 + $0x228] sm:$0xff] %v1098_v5  ;;  %1101 = vst [vmem:[%s6089_s29 + $0x230] sm:$0xff] %v1100_v6  ;;  %v1108_v10 = vld [vmem:[%s6081_s28 + $0x6f0] sm:$0xff]  ;;  %v1110_v11 = vld [vmem:[%s6081_s28 + $0x708] sm:$0xff] }
  0x38   : > { %1103 = vst [vmem:[%s6089_s29 + $0x238] sm:$0xff] %v1102_v7  ;;  %1105 = vst [vmem:[%s6089_s29 + $0x240] sm:$0xff] %v1104_v8  ;;  %v1112_v12 = vld [vmem:[%s6081_s28 + $0x720] sm:$0xff]  ;;  %v1114_v13 = vld [vmem:[%s6081_s28 + $0x738] sm:$0xff] }
  0x39   : > { %1107 = vst [vmem:[%s6089_s29 + $0x248] sm:$0xff] %v1106_v9  ;;  %1109 = vst [vmem:[%s6089_s29 + $0x250] sm:$0xff] %v1108_v10  ;;  %v1116_v14 = vld [vmem:[%s6081_s28 + $0x750] sm:$0xff]  ;;  %v1118_v15 = vld [vmem:[%s6081_s28 + $0x768] sm:$0xff] }
  0x3a   : > { %1111 = vst [vmem:[%s6089_s29 + $0x258] sm:$0xff] %v1110_v11  ;;  %1113 = vst [vmem:[%s6089_s29 + $0x260] sm:$0xff] %v1112_v12  ;;  %v1120_v16 = vld [vmem:[%s6081_s28 + $0x780] sm:$0xff]  ;;  %v1122_v17 = vld [vmem:[%s6081_s28 + $0x798] sm:$0xff] }
  0x3b   : > { %1115 = vst [vmem:[%s6089_s29 + $0x268] sm:$0xff] %v1114_v13  ;;  %1117 = vst [vmem:[%s6089_s29 + $0x270] sm:$0xff] %v1116_v14  ;;  %v1124_v18 = vld [vmem:[%s6081_s28 + $0x7b0] sm:$0xff]  ;;  %v1126_v19 = vld [vmem:[%s6081_s28 + $0x7c8] sm:$0xff] }
  0x3c   : > { %1119 = vst [vmem:[%s6089_s29 + $0x278] sm:$0xff] %v1118_v15  ;;  %1121 = vst [vmem:[%s6089_s29 + $0x280] sm:$0xff] %v1120_v16  ;;  %v1128_v20 = vld [vmem:[%s6081_s28 + $0x7e0] sm:$0xff]  ;;  %v1130_v21 = vld [vmem:[%s6081_s28 + $0x7f8] sm:$0xff] }
  0x3d   : > { %1123 = vst [vmem:[%s6089_s29 + $0x288] sm:$0xff] %v1122_v17  ;;  %1125 = vst [vmem:[%s6089_s29 + $0x290] sm:$0xff] %v1124_v18  ;;  %v1132_v22 = vld [vmem:[%s6081_s28 + $0x810] sm:$0xff]  ;;  %v1134_v23 = vld [vmem:[%s6081_s28 + $0x828] sm:$0xff] }
  0x3e   : > { %1127 = vst [vmem:[%s6089_s29 + $0x298] sm:$0xff] %v1126_v19  ;;  %1129 = vst [vmem:[%s6089_s29 + $0x2a0] sm:$0xff] %v1128_v20  ;;  %v1136_v24 = vld [vmem:[%s6081_s28 + $0x840] sm:$0xff]  ;;  %v1138_v25 = vld [vmem:[%s6081_s28 + $0x858] sm:$0xff] }
  0x3f   : > { %1131 = vst [vmem:[%s6089_s29 + $0x2a8] sm:$0xff] %v1130_v21  ;;  %1133 = vst [vmem:[%s6089_s29 + $0x2b0] sm:$0xff] %v1132_v22  ;;  %v1140_v26 = vld [vmem:[%s6081_s28 + $0x870] sm:$0xff]  ;;  %v1142_v27 = vld [vmem:[%s6081_s28 + $0x888] sm:$0xff] }
  0x40   : > { %1135 = vst [vmem:[%s6089_s29 + $0x2b8] sm:$0xff] %v1134_v23  ;;  %1137 = vst [vmem:[%s6089_s29 + $0x2c0] sm:$0xff] %v1136_v24  ;;  %v1144_v28 = vld [vmem:[%s6081_s28 + $0x8a0] sm:$0xff]  ;;  %v1146_v29 = vld [vmem:[%s6081_s28 + $0x8b8] sm:$0xff] }
  0x41   : > { %1139 = vst [vmem:[%s6089_s29 + $0x2c8] sm:$0xff] %v1138_v25  ;;  %1141 = vst [vmem:[%s6089_s29 + $0x2d0] sm:$0xff] %v1140_v26  ;;  %v1148_v30 = vld [vmem:[%s6081_s28 + $0x8d0] sm:$0xff]  ;;  %v1150_v31 = vld [vmem:[%s6081_s28 + $0x8e8] sm:$0xff] }
  0x42   : > { %1143 = vst [vmem:[%s6089_s29 + $0x2d8] sm:$0xff] %v1142_v27  ;;  %1145 = vst [vmem:[%s6089_s29 + $0x2e0] sm:$0xff] %v1144_v28  ;;  %v1152_v32 = vld [vmem:[%s6081_s28 + $0x900] sm:$0xff]  ;;  %v1154_v33 = vld [vmem:[%s6081_s28 + $0x918] sm:$0xff] }
  0x43   : > { %1147 = vst [vmem:[%s6089_s29 + $0x2e8] sm:$0xff] %v1146_v29  ;;  %1149 = vst [vmem:[%s6089_s29 + $0x2f0] sm:$0xff] %v1148_v30  ;;  %v1156_v34 = vld [vmem:[%s6081_s28 + $0x930] sm:$0xff]  ;;  %v1158_v35 = vld [vmem:[%s6081_s28 + $0x948] sm:$0xff] }
  0x44   : > { %1151 = vst [vmem:[%s6089_s29 + $0x2f8] sm:$0xff] %v1150_v31  ;;  %1153 = vst [vmem:[%s6089_s29 + $0x300] sm:$0xff] %v1152_v32  ;;  %v1160_v36 = vld [vmem:[%s6081_s28 + $0x960] sm:$0xff]  ;;  %v1162_v37 = vld [vmem:[%s6081_s28 + $0x978] sm:$0xff] }
  0x45   : > { %1155 = vst [vmem:[%s6089_s29 + $0x308] sm:$0xff] %v1154_v33  ;;  %1157 = vst [vmem:[%s6089_s29 + $0x310] sm:$0xff] %v1156_v34  ;;  %v1164_v38 = vld [vmem:[%s6081_s28 + $0x990] sm:$0xff]  ;;  %v1166_v39 = vld [vmem:[%s6081_s28 + $0x9a8] sm:$0xff] }
  0x46   : > { %1159 = vst [vmem:[%s6089_s29 + $0x318] sm:$0xff] %v1158_v35  ;;  %1161 = vst [vmem:[%s6089_s29 + $0x320] sm:$0xff] %v1160_v36  ;;  %v1168_v40 = vld [vmem:[%s6081_s28 + $0x9c0] sm:$0xff]  ;;  %v1170_v41 = vld [vmem:[%s6081_s28 + $0x9d8] sm:$0xff] }
  0x47   : > { %1163 = vst [vmem:[%s6089_s29 + $0x328] sm:$0xff] %v1162_v37  ;;  %1165 = vst [vmem:[%s6089_s29 + $0x330] sm:$0xff] %v1164_v38  ;;  %v1172_v42 = vld [vmem:[%s6081_s28 + $0x9f0] sm:$0xff]  ;;  %v1174_v43 = vld [vmem:[%s6081_s28 + $0xa08] sm:$0xff] }
  0x48   : > { %1167 = vst [vmem:[%s6089_s29 + $0x338] sm:$0xff] %v1166_v39  ;;  %1169 = vst [vmem:[%s6089_s29 + $0x340] sm:$0xff] %v1168_v40  ;;  %v1176_v44 = vld [vmem:[%s6081_s28 + $0xa20] sm:$0xff]  ;;  %v1178_v45 = vld [vmem:[%s6081_s28 + $0xa38] sm:$0xff] }
  0x49   : > { %1171 = vst [vmem:[%s6089_s29 + $0x348] sm:$0xff] %v1170_v41  ;;  %1173 = vst [vmem:[%s6089_s29 + $0x350] sm:$0xff] %v1172_v42  ;;  %v1180_v46 = vld [vmem:[%s6081_s28 + $0xa50] sm:$0xff]  ;;  %v1182_v47 = vld [vmem:[%s6081_s28 + $0xa68] sm:$0xff] }
  0x4a   : > { %1175 = vst [vmem:[%s6089_s29 + $0x358] sm:$0xff] %v1174_v43  ;;  %1177 = vst [vmem:[%s6089_s29 + $0x360] sm:$0xff] %v1176_v44  ;;  %v1184_v48 = vld [vmem:[%s6081_s28 + $0xa80] sm:$0xff]  ;;  %v1186_v49 = vld [vmem:[%s6081_s28 + $0xa98] sm:$0xff] }
  0x4b   : > { %1179 = vst [vmem:[%s6089_s29 + $0x368] sm:$0xff] %v1178_v45  ;;  %1181 = vst [vmem:[%s6089_s29 + $0x370] sm:$0xff] %v1180_v46  ;;  %v1188_v50 = vld [vmem:[%s6081_s28 + $0xab0] sm:$0xff]  ;;  %v1190_v51 = vld [vmem:[%s6081_s28 + $0xac8] sm:$0xff] }
  0x4c   : > { %1183 = vst [vmem:[%s6089_s29 + $0x378] sm:$0xff] %v1182_v47  ;;  %1185 = vst [vmem:[%s6089_s29 + $0x380] sm:$0xff] %v1184_v48  ;;  %v1192_v52 = vld [vmem:[%s6081_s28 + $0xae0] sm:$0xff]  ;;  %v1194_v53 = vld [vmem:[%s6081_s28 + $0xaf8] sm:$0xff] }
  0x4d   : > { %1187 = vst [vmem:[%s6089_s29 + $0x388] sm:$0xff] %v1186_v49  ;;  %1189 = vst [vmem:[%s6089_s29 + $0x390] sm:$0xff] %v1188_v50  ;;  %v1196_v54 = vld [vmem:[%s6081_s28 + $0xb10] sm:$0xff]  ;;  %v1198_v55 = vld [vmem:[%s6081_s28 + $0xb28] sm:$0xff] }
  0x4e   : > { %1191 = vst [vmem:[%s6089_s29 + $0x398] sm:$0xff] %v1190_v51  ;;  %1193 = vst [vmem:[%s6089_s29 + $0x3a0] sm:$0xff] %v1192_v52  ;;  %v1200_v56 = vld [vmem:[%s6081_s28 + $0xb40] sm:$0xff]  ;;  %v1202_v57 = vld [vmem:[%s6081_s28 + $0xb58] sm:$0xff] }
  0x4f   : > { %1195 = vst [vmem:[%s6089_s29 + $0x3a8] sm:$0xff] %v1194_v53  ;;  %1197 = vst [vmem:[%s6089_s29 + $0x3b0] sm:$0xff] %v1196_v54  ;;  %v1204_v58 = vld [vmem:[%s6081_s28 + $0xb70] sm:$0xff]  ;;  %v1206_v59 = vld [vmem:[%s6081_s28 + $0xb88] sm:$0xff] }
  0x50   : > { %1199 = vst [vmem:[%s6089_s29 + $0x3b8] sm:$0xff] %v1198_v55  ;;  %1201 = vst [vmem:[%s6089_s29 + $0x3c0] sm:$0xff] %v1200_v56  ;;  %v1208_v60 = vld [vmem:[%s6081_s28 + $0xba0] sm:$0xff]  ;;  %v1210_v61 = vld [vmem:[%s6081_s28 + $0xbb8] sm:$0xff] }
  0x51   : > { %1203 = vst [vmem:[%s6089_s29 + $0x3c8] sm:$0xff] %v1202_v57  ;;  %1205 = vst [vmem:[%s6089_s29 + $0x3d0] sm:$0xff] %v1204_v58  ;;  %v1212_v62 = vld [vmem:[%s6081_s28 + $0xbd0] sm:$0xff]  ;;  %v1214_v63 = vld [vmem:[%s6081_s28 + $0xbe8] sm:$0xff] }
  0x52   : > { %1207 = vst [vmem:[%s6089_s29 + $0x3d8] sm:$0xff] %v1206_v59  ;;  %1209 = vst [vmem:[%s6089_s29 + $0x3e0] sm:$0xff] %v1208_v60  ;;  %v1216_v0 = vld [vmem:[%s6081_s28 + $0xc00] sm:$0xff]  ;;  %v1218_v1 = vld [vmem:[%s6081_s28 + $0xc18] sm:$0xff] }
  0x53   : > { %1211 = vst [vmem:[%s6089_s29 + $0x3e8] sm:$0xff] %v1210_v61  ;;  %1213 = vst [vmem:[%s6089_s29 + $0x3f0] sm:$0xff] %v1212_v62  ;;  %v1220_v2 = vld [vmem:[%s6081_s28 + $0xc30] sm:$0xff]  ;;  %v1222_v3 = vld [vmem:[%s6081_s28 + $0xc48] sm:$0xff] }
  0x54   : > { %1215 = vst [vmem:[%s6089_s29 + $0x3f8] sm:$0xff] %v1214_v63  ;;  %1217 = vst [vmem:[%s6089_s29 + $0x400] sm:$0xff] %v1216_v0  ;;  %v1224_v4 = vld [vmem:[%s6081_s28 + $0xc60] sm:$0xff]  ;;  %v1226_v5 = vld [vmem:[%s6081_s28 + $0xc78] sm:$0xff] }
  0x55   : > { %1219 = vst [vmem:[%s6089_s29 + $0x408] sm:$0xff] %v1218_v1  ;;  %1221 = vst [vmem:[%s6089_s29 + $0x410] sm:$0xff] %v1220_v2  ;;  %v1228_v6 = vld [vmem:[%s6081_s28 + $0xc90] sm:$0xff]  ;;  %v1230_v7 = vld [vmem:[%s6081_s28 + $0xca8] sm:$0xff] }
  0x56   : > { %1223 = vst [vmem:[%s6089_s29 + $0x418] sm:$0xff] %v1222_v3  ;;  %1225 = vst [vmem:[%s6089_s29 + $0x420] sm:$0xff] %v1224_v4  ;;  %v1232_v8 = vld [vmem:[%s6081_s28 + $0xcc0] sm:$0xff]  ;;  %v1234_v9 = vld [vmem:[%s6081_s28 + $0xcd8] sm:$0xff] }
  0x57   : > { %1227 = vst [vmem:[%s6089_s29 + $0x428] sm:$0xff] %v1226_v5  ;;  %1229 = vst [vmem:[%s6089_s29 + $0x430] sm:$0xff] %v1228_v6  ;;  %v1236_v10 = vld [vmem:[%s6081_s28 + $0xcf0] sm:$0xff]  ;;  %v1238_v11 = vld [vmem:[%s6081_s28 + $0xd08] sm:$0xff] }
  0x58   : > { %1231 = vst [vmem:[%s6089_s29 + $0x438] sm:$0xff] %v1230_v7  ;;  %1233 = vst [vmem:[%s6089_s29 + $0x440] sm:$0xff] %v1232_v8  ;;  %v1240_v12 = vld [vmem:[%s6081_s28 + $0xd20] sm:$0xff]  ;;  %v1242_v13 = vld [vmem:[%s6081_s28 + $0xd38] sm:$0xff] }
  0x59   : > { %1235 = vst [vmem:[%s6089_s29 + $0x448] sm:$0xff] %v1234_v9  ;;  %1237 = vst [vmem:[%s6089_s29 + $0x450] sm:$0xff] %v1236_v10  ;;  %v1244_v14 = vld [vmem:[%s6081_s28 + $0xd50] sm:$0xff]  ;;  %v1246_v15 = vld [vmem:[%s6081_s28 + $0xd68] sm:$0xff] }
  0x5a   : > { %1239 = vst [vmem:[%s6089_s29 + $0x458] sm:$0xff] %v1238_v11  ;;  %1241 = vst [vmem:[%s6089_s29 + $0x460] sm:$0xff] %v1240_v12  ;;  %v1248_v16 = vld [vmem:[%s6081_s28 + $0xd80] sm:$0xff]  ;;  %v1250_v17 = vld [vmem:[%s6081_s28 + $0xd98] sm:$0xff] }
  0x5b   : > { %1243 = vst [vmem:[%s6089_s29 + $0x468] sm:$0xff] %v1242_v13  ;;  %1245 = vst [vmem:[%s6089_s29 + $0x470] sm:$0xff] %v1244_v14  ;;  %v1252_v18 = vld [vmem:[%s6081_s28 + $0xdb0] sm:$0xff]  ;;  %v1254_v19 = vld [vmem:[%s6081_s28 + $0xdc8] sm:$0xff] }
  0x5c   : > { %1247 = vst [vmem:[%s6089_s29 + $0x478] sm:$0xff] %v1246_v15  ;;  %1249 = vst [vmem:[%s6089_s29 + $0x480] sm:$0xff] %v1248_v16  ;;  %v1256_v20 = vld [vmem:[%s6081_s28 + $0xde0] sm:$0xff]  ;;  %v1258_v21 = vld [vmem:[%s6081_s28 + $0xdf8] sm:$0xff] }
  0x5d   : > { %1251 = vst [vmem:[%s6089_s29 + $0x488] sm:$0xff] %v1250_v17  ;;  %1253 = vst [vmem:[%s6089_s29 + $0x490] sm:$0xff] %v1252_v18  ;;  %v1260_v22 = vld [vmem:[%s6081_s28 + $0xe10] sm:$0xff]  ;;  %v1262_v23 = vld [vmem:[%s6081_s28 + $0xe28] sm:$0xff] }
  0x5e   : > { %1255 = vst [vmem:[%s6089_s29 + $0x498] sm:$0xff] %v1254_v19  ;;  %1257 = vst [vmem:[%s6089_s29 + $0x4a0] sm:$0xff] %v1256_v20  ;;  %v1264_v24 = vld [vmem:[%s6081_s28 + $0xe40] sm:$0xff]  ;;  %v1266_v25 = vld [vmem:[%s6081_s28 + $0xe58] sm:$0xff] }
  0x5f   : > { %1259 = vst [vmem:[%s6089_s29 + $0x4a8] sm:$0xff] %v1258_v21  ;;  %1261 = vst [vmem:[%s6089_s29 + $0x4b0] sm:$0xff] %v1260_v22  ;;  %v1268_v26 = vld [vmem:[%s6081_s28 + $0xe70] sm:$0xff]  ;;  %v1270_v27 = vld [vmem:[%s6081_s28 + $0xe88] sm:$0xff] }
  0x60   : > { %1263 = vst [vmem:[%s6089_s29 + $0x4b8] sm:$0xff] %v1262_v23  ;;  %1265 = vst [vmem:[%s6089_s29 + $0x4c0] sm:$0xff] %v1264_v24  ;;  %v1272_v28 = vld [vmem:[%s6081_s28 + $0xea0] sm:$0xff]  ;;  %v1274_v29 = vld [vmem:[%s6081_s28 + $0xeb8] sm:$0xff] }
  0x61   : > { %1267 = vst [vmem:[%s6089_s29 + $0x4c8] sm:$0xff] %v1266_v25  ;;  %1269 = vst [vmem:[%s6089_s29 + $0x4d0] sm:$0xff] %v1268_v26  ;;  %v1276_v30 = vld [vmem:[%s6081_s28 + $0xed0] sm:$0xff]  ;;  %v1278_v31 = vld [vmem:[%s6081_s28 + $0xee8] sm:$0xff] }
  0x62   : > { %1271 = vst [vmem:[%s6089_s29 + $0x4d8] sm:$0xff] %v1270_v27  ;;  %1273 = vst [vmem:[%s6089_s29 + $0x4e0] sm:$0xff] %v1272_v28  ;;  %v1280_v32 = vld [vmem:[%s6081_s28 + $0xf00] sm:$0xff]  ;;  %v1282_v33 = vld [vmem:[%s6081_s28 + $0xf18] sm:$0xff] }
  0x63   : > { %1275 = vst [vmem:[%s6089_s29 + $0x4e8] sm:$0xff] %v1274_v29  ;;  %1277 = vst [vmem:[%s6089_s29 + $0x4f0] sm:$0xff] %v1276_v30  ;;  %v1284_v34 = vld [vmem:[%s6081_s28 + $0xf30] sm:$0xff]  ;;  %v1286_v35 = vld [vmem:[%s6081_s28 + $0xf48] sm:$0xff] }
  0x64   : > { %1279 = vst [vmem:[%s6089_s29 + $0x4f8] sm:$0xff] %v1278_v31  ;;  %1281 = vst [vmem:[%s6089_s29 + $0x500] sm:$0xff] %v1280_v32  ;;  %v1288_v36 = vld [vmem:[%s6081_s28 + $0xf60] sm:$0xff]  ;;  %v1290_v37 = vld [vmem:[%s6081_s28 + $0xf78] sm:$0xff] }
  0x65   : > { %1283 = vst [vmem:[%s6089_s29 + $0x508] sm:$0xff] %v1282_v33  ;;  %1285 = vst [vmem:[%s6089_s29 + $0x510] sm:$0xff] %v1284_v34  ;;  %v1292_v38 = vld [vmem:[%s6081_s28 + $0xf90] sm:$0xff]  ;;  %v1294_v39 = vld [vmem:[%s6081_s28 + $0xfa8] sm:$0xff] }
  0x66   : > { %1287 = vst [vmem:[%s6089_s29 + $0x518] sm:$0xff] %v1286_v35  ;;  %1289 = vst [vmem:[%s6089_s29 + $0x520] sm:$0xff] %v1288_v36  ;;  %v1296_v40 = vld [vmem:[%s6081_s28 + $0xfc0] sm:$0xff]  ;;  %v1298_v41 = vld [vmem:[%s6081_s28 + $0xfd8] sm:$0xff] }
  0x67   : > { %1291 = vst [vmem:[%s6089_s29 + $0x528] sm:$0xff] %v1290_v37  ;;  %1293 = vst [vmem:[%s6089_s29 + $0x530] sm:$0xff] %v1292_v38  ;;  %v1300_v42 = vld [vmem:[%s6081_s28 + $0xff0] sm:$0xff]  ;;  %v1302_v43 = vld [vmem:[%s6081_s28 + $0x1008] sm:$0xff] }
  0x68   : > { %1295 = vst [vmem:[%s6089_s29 + $0x538] sm:$0xff] %v1294_v39  ;;  %1297 = vst [vmem:[%s6089_s29 + $0x540] sm:$0xff] %v1296_v40  ;;  %v1304_v44 = vld [vmem:[%s6081_s28 + $0x1020] sm:$0xff]  ;;  %v1306_v45 = vld [vmem:[%s6081_s28 + $0x1038] sm:$0xff] }
  0x69   : > { %1299 = vst [vmem:[%s6089_s29 + $0x548] sm:$0xff] %v1298_v41  ;;  %1301 = vst [vmem:[%s6089_s29 + $0x550] sm:$0xff] %v1300_v42  ;;  %v1308_v46 = vld [vmem:[%s6081_s28 + $0x1050] sm:$0xff]  ;;  %v1310_v47 = vld [vmem:[%s6081_s28 + $0x1068] sm:$0xff] }
  0x6a   : > { %1303 = vst [vmem:[%s6089_s29 + $0x558] sm:$0xff] %v1302_v43  ;;  %1305 = vst [vmem:[%s6089_s29 + $0x560] sm:$0xff] %v1304_v44  ;;  %v1312_v48 = vld [vmem:[%s6081_s28 + $0x1080] sm:$0xff]  ;;  %v1314_v49 = vld [vmem:[%s6081_s28 + $0x1098] sm:$0xff] }
  0x6b   : > { %1307 = vst [vmem:[%s6089_s29 + $0x568] sm:$0xff] %v1306_v45  ;;  %1309 = vst [vmem:[%s6089_s29 + $0x570] sm:$0xff] %v1308_v46  ;;  %v1316_v50 = vld [vmem:[%s6081_s28 + $0x10b0] sm:$0xff]  ;;  %v1318_v51 = vld [vmem:[%s6081_s28 + $0x10c8] sm:$0xff] }
  0x6c   : > { %1311 = vst [vmem:[%s6089_s29 + $0x578] sm:$0xff] %v1310_v47  ;;  %1313 = vst [vmem:[%s6089_s29 + $0x580] sm:$0xff] %v1312_v48  ;;  %v1320_v52 = vld [vmem:[%s6081_s28 + $0x10e0] sm:$0xff]  ;;  %v1322_v53 = vld [vmem:[%s6081_s28 + $0x10f8] sm:$0xff] }
  0x6d   : > { %1315 = vst [vmem:[%s6089_s29 + $0x588] sm:$0xff] %v1314_v49  ;;  %1317 = vst [vmem:[%s6089_s29 + $0x590] sm:$0xff] %v1316_v50  ;;  %v1324_v54 = vld [vmem:[%s6081_s28 + $0x1110] sm:$0xff]  ;;  %v1326_v55 = vld [vmem:[%s6081_s28 + $0x1128] sm:$0xff] }
  0x6e   : > { %1319 = vst [vmem:[%s6089_s29 + $0x598] sm:$0xff] %v1318_v51  ;;  %1321 = vst [vmem:[%s6089_s29 + $0x5a0] sm:$0xff] %v1320_v52  ;;  %v1328_v56 = vld [vmem:[%s6081_s28 + $0x1140] sm:$0xff]  ;;  %v1330_v57 = vld [vmem:[%s6081_s28 + $0x1158] sm:$0xff] }
  0x6f   : > { %1323 = vst [vmem:[%s6089_s29 + $0x5a8] sm:$0xff] %v1322_v53  ;;  %1325 = vst [vmem:[%s6089_s29 + $0x5b0] sm:$0xff] %v1324_v54  ;;  %v1332_v58 = vld [vmem:[%s6081_s28 + $0x1170] sm:$0xff]  ;;  %v1334_v59 = vld [vmem:[%s6081_s28 + $0x1188] sm:$0xff] }
  0x70   : > { %1327 = vst [vmem:[%s6089_s29 + $0x5b8] sm:$0xff] %v1326_v55  ;;  %1329 = vst [vmem:[%s6089_s29 + $0x5c0] sm:$0xff] %v1328_v56  ;;  %v1336_v60 = vld [vmem:[%s6081_s28 + $0x11a0] sm:$0xff]  ;;  %v1338_v61 = vld [vmem:[%s6081_s28 + $0x11b8] sm:$0xff] }
  0x71   : > { %1331 = vst [vmem:[%s6089_s29 + $0x5c8] sm:$0xff] %v1330_v57  ;;  %1333 = vst [vmem:[%s6089_s29 + $0x5d0] sm:$0xff] %v1332_v58  ;;  %v1340_v62 = vld [vmem:[%s6081_s28 + $0x11d0] sm:$0xff]  ;;  %v1342_v63 = vld [vmem:[%s6081_s28 + $0x11e8] sm:$0xff] }
  0x72   : > { %1335 = vst [vmem:[%s6089_s29 + $0x5d8] sm:$0xff] %v1334_v59  ;;  %1337 = vst [vmem:[%s6089_s29 + $0x5e0] sm:$0xff] %v1336_v60  ;;  %v1344_v0 = vld [vmem:[%s6081_s28 + $0x1200] sm:$0xff]  ;;  %v1346_v1 = vld [vmem:[%s6081_s28 + $0x1218] sm:$0xff] }
  0x73   : > { %1339 = vst [vmem:[%s6089_s29 + $0x5e8] sm:$0xff] %v1338_v61  ;;  %1341 = vst [vmem:[%s6089_s29 + $0x5f0] sm:$0xff] %v1340_v62  ;;  %v1348_v2 = vld [vmem:[%s6081_s28 + $0x1230] sm:$0xff]  ;;  %v1350_v3 = vld [vmem:[%s6081_s28 + $0x1248] sm:$0xff] }
  0x74   : > { %1343 = vst [vmem:[%s6089_s29 + $0x5f8] sm:$0xff] %v1342_v63  ;;  %1345 = vst [vmem:[%s6089_s29 + $0x600] sm:$0xff] %v1344_v0  ;;  %v1352_v4 = vld [vmem:[%s6081_s28 + $0x1260] sm:$0xff]  ;;  %v1354_v5 = vld [vmem:[%s6081_s28 + $0x1278] sm:$0xff] }
  0x75   : > { %1347 = vst [vmem:[%s6089_s29 + $0x608] sm:$0xff] %v1346_v1  ;;  %1349 = vst [vmem:[%s6089_s29 + $0x610] sm:$0xff] %v1348_v2  ;;  %v1356_v6 = vld [vmem:[%s6081_s28 + $0x1290] sm:$0xff]  ;;  %v1358_v7 = vld [vmem:[%s6081_s28 + $0x12a8] sm:$0xff] }
  0x76   : > { %1351 = vst [vmem:[%s6089_s29 + $0x618] sm:$0xff] %v1350_v3  ;;  %1353 = vst [vmem:[%s6089_s29 + $0x620] sm:$0xff] %v1352_v4  ;;  %v1360_v8 = vld [vmem:[%s6081_s28 + $0x12c0] sm:$0xff]  ;;  %v1362_v9 = vld [vmem:[%s6081_s28 + $0x12d8] sm:$0xff] }
  0x77   : > { %1355 = vst [vmem:[%s6089_s29 + $0x628] sm:$0xff] %v1354_v5  ;;  %1357 = vst [vmem:[%s6089_s29 + $0x630] sm:$0xff] %v1356_v6  ;;  %v1364_v10 = vld [vmem:[%s6081_s28 + $0x12f0] sm:$0xff]  ;;  %v1366_v11 = vld [vmem:[%s6081_s28 + $0x1308] sm:$0xff] }
  0x78   : > { %1359 = vst [vmem:[%s6089_s29 + $0x638] sm:$0xff] %v1358_v7  ;;  %1361 = vst [vmem:[%s6089_s29 + $0x640] sm:$0xff] %v1360_v8  ;;  %v1368_v12 = vld [vmem:[%s6081_s28 + $0x1320] sm:$0xff]  ;;  %v1370_v13 = vld [vmem:[%s6081_s28 + $0x1338] sm:$0xff] }
  0x79   : > { %1363 = vst [vmem:[%s6089_s29 + $0x648] sm:$0xff] %v1362_v9  ;;  %1365 = vst [vmem:[%s6089_s29 + $0x650] sm:$0xff] %v1364_v10  ;;  %v1372_v14 = vld [vmem:[%s6081_s28 + $0x1350] sm:$0xff]  ;;  %v1374_v15 = vld [vmem:[%s6081_s28 + $0x1368] sm:$0xff] }
  0x7a   : > { %1367 = vst [vmem:[%s6089_s29 + $0x658] sm:$0xff] %v1366_v11  ;;  %1369 = vst [vmem:[%s6089_s29 + $0x660] sm:$0xff] %v1368_v12  ;;  %v1376_v16 = vld [vmem:[%s6081_s28 + $0x1380] sm:$0xff]  ;;  %v1378_v17 = vld [vmem:[%s6081_s28 + $0x1398] sm:$0xff] }
  0x7b   : > { %1371 = vst [vmem:[%s6089_s29 + $0x668] sm:$0xff] %v1370_v13  ;;  %1373 = vst [vmem:[%s6089_s29 + $0x670] sm:$0xff] %v1372_v14  ;;  %v1380_v18 = vld [vmem:[%s6081_s28 + $0x13b0] sm:$0xff]  ;;  %v1382_v19 = vld [vmem:[%s6081_s28 + $0x13c8] sm:$0xff] }
  0x7c   : > { %1375 = vst [vmem:[%s6089_s29 + $0x678] sm:$0xff] %v1374_v15  ;;  %1377 = vst [vmem:[%s6089_s29 + $0x680] sm:$0xff] %v1376_v16  ;;  %v1384_v20 = vld [vmem:[%s6081_s28 + $0x13e0] sm:$0xff]  ;;  %v1386_v21 = vld [vmem:[%s6081_s28 + $0x13f8] sm:$0xff] }
  0x7d   : > { %1379 = vst [vmem:[%s6089_s29 + $0x688] sm:$0xff] %v1378_v17  ;;  %1381 = vst [vmem:[%s6089_s29 + $0x690] sm:$0xff] %v1380_v18  ;;  %v1388_v22 = vld [vmem:[%s6081_s28 + $0x1410] sm:$0xff]  ;;  %v1390_v23 = vld [vmem:[%s6081_s28 + $0x1428] sm:$0xff] }
  0x7e   : > { %1383 = vst [vmem:[%s6089_s29 + $0x698] sm:$0xff] %v1382_v19  ;;  %1385 = vst [vmem:[%s6089_s29 + $0x6a0] sm:$0xff] %v1384_v20  ;;  %v1392_v24 = vld [vmem:[%s6081_s28 + $0x1440] sm:$0xff]  ;;  %v1394_v25 = vld [vmem:[%s6081_s28 + $0x1458] sm:$0xff] }
  0x7f   : > { %1387 = vst [vmem:[%s6089_s29 + $0x6a8] sm:$0xff] %v1386_v21  ;;  %1389 = vst [vmem:[%s6089_s29 + $0x6b0] sm:$0xff] %v1388_v22  ;;  %v1396_v26 = vld [vmem:[%s6081_s28 + $0x1470] sm:$0xff]  ;;  %v1398_v27 = vld [vmem:[%s6081_s28 + $0x1488] sm:$0xff] }
  0x80   : > { %1391 = vst [vmem:[%s6089_s29 + $0x6b8] sm:$0xff] %v1390_v23  ;;  %1393 = vst [vmem:[%s6089_s29 + $0x6c0] sm:$0xff] %v1392_v24  ;;  %v1400_v28 = vld [vmem:[%s6081_s28 + $0x14a0] sm:$0xff]  ;;  %v1402_v29 = vld [vmem:[%s6081_s28 + $0x14b8] sm:$0xff] }
  0x81   : > { %1395 = vst [vmem:[%s6089_s29 + $0x6c8] sm:$0xff] %v1394_v25  ;;  %1397 = vst [vmem:[%s6089_s29 + $0x6d0] sm:$0xff] %v1396_v26  ;;  %v1404_v30 = vld [vmem:[%s6081_s28 + $0x14d0] sm:$0xff]  ;;  %v1406_v31 = vld [vmem:[%s6081_s28 + $0x14e8] sm:$0xff] }
  0x82   : > { %1399 = vst [vmem:[%s6089_s29 + $0x6d8] sm:$0xff] %v1398_v27  ;;  %1401 = vst [vmem:[%s6089_s29 + $0x6e0] sm:$0xff] %v1400_v28  ;;  %v1408_v32 = vld [vmem:[%s6081_s28 + $0x1500] sm:$0xff]  ;;  %v1410_v33 = vld [vmem:[%s6081_s28 + $0x1518] sm:$0xff] }
  0x83   : > { %1403 = vst [vmem:[%s6089_s29 + $0x6e8] sm:$0xff] %v1402_v29  ;;  %1405 = vst [vmem:[%s6089_s29 + $0x6f0] sm:$0xff] %v1404_v30  ;;  %v1412_v34 = vld [vmem:[%s6081_s28 + $0x1530] sm:$0xff]  ;;  %v1414_v35 = vld [vmem:[%s6081_s28 + $0x1548] sm:$0xff] }
  0x84   : > { %1407 = vst [vmem:[%s6089_s29 + $0x6f8] sm:$0xff] %v1406_v31  ;;  %1409 = vst [vmem:[%s6089_s29 + $0x700] sm:$0xff] %v1408_v32  ;;  %v1416_v36 = vld [vmem:[%s6081_s28 + $0x1560] sm:$0xff]  ;;  %v1418_v37 = vld [vmem:[%s6081_s28 + $0x1578] sm:$0xff] }
  0x85   : > { %1411 = vst [vmem:[%s6089_s29 + $0x708] sm:$0xff] %v1410_v33  ;;  %1413 = vst [vmem:[%s6089_s29 + $0x710] sm:$0xff] %v1412_v34  ;;  %v1420_v38 = vld [vmem:[%s6081_s28 + $0x1590] sm:$0xff]  ;;  %v1422_v39 = vld [vmem:[%s6081_s28 + $0x15a8] sm:$0xff] }
  0x86   : > { %1415 = vst [vmem:[%s6089_s29 + $0x718] sm:$0xff] %v1414_v35  ;;  %1417 = vst [vmem:[%s6089_s29 + $0x720] sm:$0xff] %v1416_v36  ;;  %v1424_v40 = vld [vmem:[%s6081_s28 + $0x15c0] sm:$0xff]  ;;  %v1426_v41 = vld [vmem:[%s6081_s28 + $0x15d8] sm:$0xff] }
  0x87   : > { %1419 = vst [vmem:[%s6089_s29 + $0x728] sm:$0xff] %v1418_v37  ;;  %1421 = vst [vmem:[%s6089_s29 + $0x730] sm:$0xff] %v1420_v38  ;;  %v1428_v42 = vld [vmem:[%s6081_s28 + $0x15f0] sm:$0xff]  ;;  %v1430_v43 = vld [vmem:[%s6081_s28 + $0x1608] sm:$0xff] }
  0x88   : > { %1423 = vst [vmem:[%s6089_s29 + $0x738] sm:$0xff] %v1422_v39  ;;  %1425 = vst [vmem:[%s6089_s29 + $0x740] sm:$0xff] %v1424_v40  ;;  %v1432_v44 = vld [vmem:[%s6081_s28 + $0x1620] sm:$0xff]  ;;  %v1434_v45 = vld [vmem:[%s6081_s28 + $0x1638] sm:$0xff] }
  0x89   : > { %1427 = vst [vmem:[%s6089_s29 + $0x748] sm:$0xff] %v1426_v41  ;;  %1429 = vst [vmem:[%s6089_s29 + $0x750] sm:$0xff] %v1428_v42  ;;  %v1436_v46 = vld [vmem:[%s6081_s28 + $0x1650] sm:$0xff]  ;;  %v1438_v47 = vld [vmem:[%s6081_s28 + $0x1668] sm:$0xff] }
  0x8a   : > { %1431 = vst [vmem:[%s6089_s29 + $0x758] sm:$0xff] %v1430_v43  ;;  %1433 = vst [vmem:[%s6089_s29 + $0x760] sm:$0xff] %v1432_v44  ;;  %v1440_v48 = vld [vmem:[%s6081_s28 + $0x1680] sm:$0xff]  ;;  %v1442_v49 = vld [vmem:[%s6081_s28 + $0x1698] sm:$0xff] }
  0x8b   : > { %1435 = vst [vmem:[%s6089_s29 + $0x768] sm:$0xff] %v1434_v45  ;;  %1437 = vst [vmem:[%s6089_s29 + $0x770] sm:$0xff] %v1436_v46  ;;  %v1444_v50 = vld [vmem:[%s6081_s28 + $0x16b0] sm:$0xff]  ;;  %v1446_v51 = vld [vmem:[%s6081_s28 + $0x16c8] sm:$0xff] }
  0x8c   : > { %1439 = vst [vmem:[%s6089_s29 + $0x778] sm:$0xff] %v1438_v47  ;;  %1441 = vst [vmem:[%s6089_s29 + $0x780] sm:$0xff] %v1440_v48  ;;  %v1448_v52 = vld [vmem:[%s6081_s28 + $0x16e0] sm:$0xff]  ;;  %v1450_v53 = vld [vmem:[%s6081_s28 + $0x16f8] sm:$0xff] }
  0x8d   : > { %1443 = vst [vmem:[%s6089_s29 + $0x788] sm:$0xff] %v1442_v49  ;;  %1445 = vst [vmem:[%s6089_s29 + $0x790] sm:$0xff] %v1444_v50  ;;  %v1452_v54 = vld [vmem:[%s6081_s28 + $0x1710] sm:$0xff]  ;;  %v1454_v55 = vld [vmem:[%s6081_s28 + $0x1728] sm:$0xff] }
  0x8e   : > { %1447 = vst [vmem:[%s6089_s29 + $0x798] sm:$0xff] %v1446_v51  ;;  %1449 = vst [vmem:[%s6089_s29 + $0x7a0] sm:$0xff] %v1448_v52  ;;  %v1456_v56 = vld [vmem:[%s6081_s28 + $0x1740] sm:$0xff]  ;;  %v1458_v57 = vld [vmem:[%s6081_s28 + $0x1758] sm:$0xff] }
  0x8f   : > { %1451 = vst [vmem:[%s6089_s29 + $0x7a8] sm:$0xff] %v1450_v53  ;;  %1453 = vst [vmem:[%s6089_s29 + $0x7b0] sm:$0xff] %v1452_v54  ;;  %v1460_v58 = vld [vmem:[%s6081_s28 + $0x1770] sm:$0xff]  ;;  %v1462_v59 = vld [vmem:[%s6081_s28 + $0x1788] sm:$0xff] }
  0x90   : > { %1455 = vst [vmem:[%s6089_s29 + $0x7b8] sm:$0xff] %v1454_v55  ;;  %1457 = vst [vmem:[%s6089_s29 + $0x7c0] sm:$0xff] %v1456_v56  ;;  %v1464_v60 = vld [vmem:[%s6081_s28 + $0x17a0] sm:$0xff]  ;;  %v1466_v61 = vld [vmem:[%s6081_s28 + $0x17b8] sm:$0xff] }
  0x91   : > { %1459 = vst [vmem:[%s6089_s29 + $0x7c8] sm:$0xff] %v1458_v57  ;;  %1461 = vst [vmem:[%s6089_s29 + $0x7d0] sm:$0xff] %v1460_v58  ;;  %v1468_v62 = vld [vmem:[%s6081_s28 + $0x17d0] sm:$0xff]  ;;  %v1470_v63 = vld [vmem:[%s6081_s28 + $0x17e8] sm:$0xff] }
  0x92   : > { %1463 = vst [vmem:[%s6089_s29 + $0x7d8] sm:$0xff] %v1462_v59  ;;  %1465 = vst [vmem:[%s6089_s29 + $0x7e0] sm:$0xff] %v1464_v60  ;;  %v1472_v0 = vld [vmem:[%s6081_s28 + $0x1800] sm:$0xff]  ;;  %v1474_v1 = vld [vmem:[%s6081_s28 + $0x1818] sm:$0xff] }
  0x93   : > { %1467 = vst [vmem:[%s6089_s29 + $0x7e8] sm:$0xff] %v1466_v61  ;;  %1469 = vst [vmem:[%s6089_s29 + $0x7f0] sm:$0xff] %v1468_v62  ;;  %v1476_v2 = vld [vmem:[%s6081_s28 + $0x1830] sm:$0xff]  ;;  %v1478_v3 = vld [vmem:[%s6081_s28 + $0x1848] sm:$0xff] }
  0x94   : > { %1471 = vst [vmem:[%s6089_s29 + $0x7f8] sm:$0xff] %v1470_v63  ;;  %1473 = vst [vmem:[%s6089_s29 + $0x800] sm:$0xff] %v1472_v0  ;;  %v1480_v4 = vld [vmem:[%s6081_s28 + $0x1860] sm:$0xff]  ;;  %v1482_v5 = vld [vmem:[%s6081_s28 + $0x1878] sm:$0xff] }
  0x95   : > { %1475 = vst [vmem:[%s6089_s29 + $0x808] sm:$0xff] %v1474_v1  ;;  %1477 = vst [vmem:[%s6089_s29 + $0x810] sm:$0xff] %v1476_v2  ;;  %v1484_v6 = vld [vmem:[%s6081_s28 + $0x1890] sm:$0xff]  ;;  %v1486_v7 = vld [vmem:[%s6081_s28 + $0x18a8] sm:$0xff] }
  0x96   : > { %1479 = vst [vmem:[%s6089_s29 + $0x818] sm:$0xff] %v1478_v3  ;;  %1481 = vst [vmem:[%s6089_s29 + $0x820] sm:$0xff] %v1480_v4  ;;  %v1488_v8 = vld [vmem:[%s6081_s28 + $0x18c0] sm:$0xff]  ;;  %v1490_v9 = vld [vmem:[%s6081_s28 + $0x18d8] sm:$0xff] }
  0x97   : > { %1483 = vst [vmem:[%s6089_s29 + $0x828] sm:$0xff] %v1482_v5  ;;  %1485 = vst [vmem:[%s6089_s29 + $0x830] sm:$0xff] %v1484_v6  ;;  %v1492_v10 = vld [vmem:[%s6081_s28 + $0x18f0] sm:$0xff]  ;;  %v1494_v11 = vld [vmem:[%s6081_s28 + $0x1908] sm:$0xff] }
  0x98   : > { %1487 = vst [vmem:[%s6089_s29 + $0x838] sm:$0xff] %v1486_v7  ;;  %1489 = vst [vmem:[%s6089_s29 + $0x840] sm:$0xff] %v1488_v8  ;;  %v1496_v12 = vld [vmem:[%s6081_s28 + $0x1920] sm:$0xff]  ;;  %v1498_v13 = vld [vmem:[%s6081_s28 + $0x1938] sm:$0xff] }
  0x99   : > { %1491 = vst [vmem:[%s6089_s29 + $0x848] sm:$0xff] %v1490_v9  ;;  %1493 = vst [vmem:[%s6089_s29 + $0x850] sm:$0xff] %v1492_v10  ;;  %v1500_v14 = vld [vmem:[%s6081_s28 + $0x1950] sm:$0xff]  ;;  %v1502_v15 = vld [vmem:[%s6081_s28 + $0x1968] sm:$0xff] }
  0x9a   : > { %1495 = vst [vmem:[%s6089_s29 + $0x858] sm:$0xff] %v1494_v11  ;;  %1497 = vst [vmem:[%s6089_s29 + $0x860] sm:$0xff] %v1496_v12  ;;  %v1504_v16 = vld [vmem:[%s6081_s28 + $0x1980] sm:$0xff]  ;;  %v1506_v17 = vld [vmem:[%s6081_s28 + $0x1998] sm:$0xff] }
  0x9b   : > { %1499 = vst [vmem:[%s6089_s29 + $0x868] sm:$0xff] %v1498_v13  ;;  %1501 = vst [vmem:[%s6089_s29 + $0x870] sm:$0xff] %v1500_v14  ;;  %v1508_v18 = vld [vmem:[%s6081_s28 + $0x19b0] sm:$0xff]  ;;  %v1510_v19 = vld [vmem:[%s6081_s28 + $0x19c8] sm:$0xff] }
  0x9c   : > { %1503 = vst [vmem:[%s6089_s29 + $0x878] sm:$0xff] %v1502_v15  ;;  %1505 = vst [vmem:[%s6089_s29 + $0x880] sm:$0xff] %v1504_v16  ;;  %v1512_v20 = vld [vmem:[%s6081_s28 + $0x19e0] sm:$0xff]  ;;  %v1514_v21 = vld [vmem:[%s6081_s28 + $0x19f8] sm:$0xff] }
  0x9d   : > { %1507 = vst [vmem:[%s6089_s29 + $0x888] sm:$0xff] %v1506_v17  ;;  %1509 = vst [vmem:[%s6089_s29 + $0x890] sm:$0xff] %v1508_v18  ;;  %v1516_v22 = vld [vmem:[%s6081_s28 + $0x1a10] sm:$0xff]  ;;  %v1518_v23 = vld [vmem:[%s6081_s28 + $0x1a28] sm:$0xff] }
  0x9e   : > { %1511 = vst [vmem:[%s6089_s29 + $0x898] sm:$0xff] %v1510_v19  ;;  %1513 = vst [vmem:[%s6089_s29 + $0x8a0] sm:$0xff] %v1512_v20  ;;  %v1520_v24 = vld [vmem:[%s6081_s28 + $0x1a40] sm:$0xff]  ;;  %v1522_v25 = vld [vmem:[%s6081_s28 + $0x1a58] sm:$0xff] }
  0x9f   : > { %1515 = vst [vmem:[%s6089_s29 + $0x8a8] sm:$0xff] %v1514_v21  ;;  %1517 = vst [vmem:[%s6089_s29 + $0x8b0] sm:$0xff] %v1516_v22  ;;  %v1524_v26 = vld [vmem:[%s6081_s28 + $0x1a70] sm:$0xff]  ;;  %v1526_v27 = vld [vmem:[%s6081_s28 + $0x1a88] sm:$0xff] }
  0xa0   : > { %1519 = vst [vmem:[%s6089_s29 + $0x8b8] sm:$0xff] %v1518_v23  ;;  %1521 = vst [vmem:[%s6089_s29 + $0x8c0] sm:$0xff] %v1520_v24  ;;  %v1528_v28 = vld [vmem:[%s6081_s28 + $0x1aa0] sm:$0xff]  ;;  %v1530_v29 = vld [vmem:[%s6081_s28 + $0x1ab8] sm:$0xff] }
  0xa1   : > { %1523 = vst [vmem:[%s6089_s29 + $0x8c8] sm:$0xff] %v1522_v25  ;;  %1525 = vst [vmem:[%s6089_s29 + $0x8d0] sm:$0xff] %v1524_v26  ;;  %v1532_v30 = vld [vmem:[%s6081_s28 + $0x1ad0] sm:$0xff]  ;;  %v1534_v31 = vld [vmem:[%s6081_s28 + $0x1ae8] sm:$0xff] }
  0xa2   : > { %1527 = vst [vmem:[%s6089_s29 + $0x8d8] sm:$0xff] %v1526_v27  ;;  %1529 = vst [vmem:[%s6089_s29 + $0x8e0] sm:$0xff] %v1528_v28  ;;  %v1536_v32 = vld [vmem:[%s6081_s28 + $0x1b00] sm:$0xff]  ;;  %v1538_v33 = vld [vmem:[%s6081_s28 + $0x1b18] sm:$0xff] }
  0xa3   : > { %1531 = vst [vmem:[%s6089_s29 + $0x8e8] sm:$0xff] %v1530_v29  ;;  %1533 = vst [vmem:[%s6089_s29 + $0x8f0] sm:$0xff] %v1532_v30  ;;  %v1540_v34 = vld [vmem:[%s6081_s28 + $0x1b30] sm:$0xff]  ;;  %v1542_v35 = vld [vmem:[%s6081_s28 + $0x1b48] sm:$0xff] }
  0xa4   : > { %1535 = vst [vmem:[%s6089_s29 + $0x8f8] sm:$0xff] %v1534_v31  ;;  %1537 = vst [vmem:[%s6089_s29 + $0x900] sm:$0xff] %v1536_v32  ;;  %v1544_v36 = vld [vmem:[%s6081_s28 + $0x1b60] sm:$0xff]  ;;  %v1546_v37 = vld [vmem:[%s6081_s28 + $0x1b78] sm:$0xff] }
  0xa5   : > { %1539 = vst [vmem:[%s6089_s29 + $0x908] sm:$0xff] %v1538_v33  ;;  %1541 = vst [vmem:[%s6089_s29 + $0x910] sm:$0xff] %v1540_v34  ;;  %v1548_v38 = vld [vmem:[%s6081_s28 + $0x1b90] sm:$0xff]  ;;  %v1550_v39 = vld [vmem:[%s6081_s28 + $0x1ba8] sm:$0xff] }
  0xa6   : > { %1543 = vst [vmem:[%s6089_s29 + $0x918] sm:$0xff] %v1542_v35  ;;  %1545 = vst [vmem:[%s6089_s29 + $0x920] sm:$0xff] %v1544_v36  ;;  %v1552_v40 = vld [vmem:[%s6081_s28 + $0x1bc0] sm:$0xff]  ;;  %v1554_v41 = vld [vmem:[%s6081_s28 + $0x1bd8] sm:$0xff] }
  0xa7   : > { %1547 = vst [vmem:[%s6089_s29 + $0x928] sm:$0xff] %v1546_v37  ;;  %1549 = vst [vmem:[%s6089_s29 + $0x930] sm:$0xff] %v1548_v38  ;;  %v1556_v42 = vld [vmem:[%s6081_s28 + $0x1bf0] sm:$0xff]  ;;  %v1558_v43 = vld [vmem:[%s6081_s28 + $0x1c08] sm:$0xff] }
  0xa8   : > { %1551 = vst [vmem:[%s6089_s29 + $0x938] sm:$0xff] %v1550_v39  ;;  %1553 = vst [vmem:[%s6089_s29 + $0x940] sm:$0xff] %v1552_v40  ;;  %v1560_v44 = vld [vmem:[%s6081_s28 + $0x1c20] sm:$0xff]  ;;  %v1562_v45 = vld [vmem:[%s6081_s28 + $0x1c38] sm:$0xff] }
  0xa9   : > { %1555 = vst [vmem:[%s6089_s29 + $0x948] sm:$0xff] %v1554_v41  ;;  %1557 = vst [vmem:[%s6089_s29 + $0x950] sm:$0xff] %v1556_v42  ;;  %v1564_v46 = vld [vmem:[%s6081_s28 + $0x1c50] sm:$0xff]  ;;  %v1566_v47 = vld [vmem:[%s6081_s28 + $0x1c68] sm:$0xff] }
  0xaa   : > { %1559 = vst [vmem:[%s6089_s29 + $0x958] sm:$0xff] %v1558_v43  ;;  %1561 = vst [vmem:[%s6089_s29 + $0x960] sm:$0xff] %v1560_v44  ;;  %v1568_v48 = vld [vmem:[%s6081_s28 + $0x1c80] sm:$0xff]  ;;  %v1570_v49 = vld [vmem:[%s6081_s28 + $0x1c98] sm:$0xff] }
  0xab   : > { %1563 = vst [vmem:[%s6089_s29 + $0x968] sm:$0xff] %v1562_v45  ;;  %1565 = vst [vmem:[%s6089_s29 + $0x970] sm:$0xff] %v1564_v46  ;;  %v1572_v50 = vld [vmem:[%s6081_s28 + $0x1cb0] sm:$0xff]  ;;  %v1574_v51 = vld [vmem:[%s6081_s28 + $0x1cc8] sm:$0xff] }
  0xac   : > { %1567 = vst [vmem:[%s6089_s29 + $0x978] sm:$0xff] %v1566_v47  ;;  %1569 = vst [vmem:[%s6089_s29 + $0x980] sm:$0xff] %v1568_v48  ;;  %v1576_v52 = vld [vmem:[%s6081_s28 + $0x1ce0] sm:$0xff]  ;;  %v1578_v53 = vld [vmem:[%s6081_s28 + $0x1cf8] sm:$0xff] }
  0xad   : > { %1571 = vst [vmem:[%s6089_s29 + $0x988] sm:$0xff] %v1570_v49  ;;  %1573 = vst [vmem:[%s6089_s29 + $0x990] sm:$0xff] %v1572_v50  ;;  %v1580_v54 = vld [vmem:[%s6081_s28 + $0x1d10] sm:$0xff]  ;;  %v1582_v55 = vld [vmem:[%s6081_s28 + $0x1d28] sm:$0xff] }
  0xae   : > { %1575 = vst [vmem:[%s6089_s29 + $0x998] sm:$0xff] %v1574_v51  ;;  %1577 = vst [vmem:[%s6089_s29 + $0x9a0] sm:$0xff] %v1576_v52  ;;  %v1584_v56 = vld [vmem:[%s6081_s28 + $0x1d40] sm:$0xff]  ;;  %v1586_v57 = vld [vmem:[%s6081_s28 + $0x1d58] sm:$0xff] }
  0xaf   : > { %1579 = vst [vmem:[%s6089_s29 + $0x9a8] sm:$0xff] %v1578_v53  ;;  %1581 = vst [vmem:[%s6089_s29 + $0x9b0] sm:$0xff] %v1580_v54  ;;  %v1588_v58 = vld [vmem:[%s6081_s28 + $0x1d70] sm:$0xff]  ;;  %v1590_v59 = vld [vmem:[%s6081_s28 + $0x1d88] sm:$0xff] }
  0xb0   : > { %1583 = vst [vmem:[%s6089_s29 + $0x9b8] sm:$0xff] %v1582_v55  ;;  %1585 = vst [vmem:[%s6089_s29 + $0x9c0] sm:$0xff] %v1584_v56  ;;  %v1592_v60 = vld [vmem:[%s6081_s28 + $0x1da0] sm:$0xff]  ;;  %v1594_v61 = vld [vmem:[%s6081_s28 + $0x1db8] sm:$0xff] }
  0xb1   : > { %1587 = vst [vmem:[%s6089_s29 + $0x9c8] sm:$0xff] %v1586_v57  ;;  %1589 = vst [vmem:[%s6089_s29 + $0x9d0] sm:$0xff] %v1588_v58  ;;  %v1596_v62 = vld [vmem:[%s6081_s28 + $0x1dd0] sm:$0xff]  ;;  %v1598_v63 = vld [vmem:[%s6081_s28 + $0x1de8] sm:$0xff] }
  0xb2   : > { %1591 = vst [vmem:[%s6089_s29 + $0x9d8] sm:$0xff] %v1590_v59  ;;  %1593 = vst [vmem:[%s6089_s29 + $0x9e0] sm:$0xff] %v1592_v60  ;;  %v1600_v0 = vld [vmem:[%s6081_s28 + $0x1e00] sm:$0xff]  ;;  %v1602_v1 = vld [vmem:[%s6081_s28 + $0x1e18] sm:$0xff] }
  0xb3   : > { %1595 = vst [vmem:[%s6089_s29 + $0x9e8] sm:$0xff] %v1594_v61  ;;  %1597 = vst [vmem:[%s6089_s29 + $0x9f0] sm:$0xff] %v1596_v62  ;;  %v1604_v2 = vld [vmem:[%s6081_s28 + $0x1e30] sm:$0xff]  ;;  %v1606_v3 = vld [vmem:[%s6081_s28 + $0x1e48] sm:$0xff] }
  0xb4   : > { %1599 = vst [vmem:[%s6089_s29 + $0x9f8] sm:$0xff] %v1598_v63  ;;  %1601 = vst [vmem:[%s6089_s29 + $0xa00] sm:$0xff] %v1600_v0  ;;  %v1608_v4 = vld [vmem:[%s6081_s28 + $0x1e60] sm:$0xff]  ;;  %v1610_v5 = vld [vmem:[%s6081_s28 + $0x1e78] sm:$0xff] }
  0xb5   : > { %1603 = vst [vmem:[%s6089_s29 + $0xa08] sm:$0xff] %v1602_v1  ;;  %1605 = vst [vmem:[%s6089_s29 + $0xa10] sm:$0xff] %v1604_v2  ;;  %v1612_v6 = vld [vmem:[%s6081_s28 + $0x1e90] sm:$0xff]  ;;  %v1614_v7 = vld [vmem:[%s6081_s28 + $0x1ea8] sm:$0xff] }
  0xb6   : > { %1607 = vst [vmem:[%s6089_s29 + $0xa18] sm:$0xff] %v1606_v3  ;;  %1609 = vst [vmem:[%s6089_s29 + $0xa20] sm:$0xff] %v1608_v4  ;;  %v1616_v8 = vld [vmem:[%s6081_s28 + $0x1ec0] sm:$0xff]  ;;  %v1618_v9 = vld [vmem:[%s6081_s28 + $0x1ed8] sm:$0xff] }
  0xb7   : > { %1611 = vst [vmem:[%s6089_s29 + $0xa28] sm:$0xff] %v1610_v5  ;;  %1613 = vst [vmem:[%s6089_s29 + $0xa30] sm:$0xff] %v1612_v6  ;;  %v1620_v10 = vld [vmem:[%s6081_s28 + $0x1ef0] sm:$0xff]  ;;  %v1622_v11 = vld [vmem:[%s6081_s28 + $0x1f08] sm:$0xff] }
  0xb8   : > { %1615 = vst [vmem:[%s6089_s29 + $0xa38] sm:$0xff] %v1614_v7  ;;  %1617 = vst [vmem:[%s6089_s29 + $0xa40] sm:$0xff] %v1616_v8  ;;  %v1624_v12 = vld [vmem:[%s6081_s28 + $0x1f20] sm:$0xff]  ;;  %v1626_v13 = vld [vmem:[%s6081_s28 + $0x1f38] sm:$0xff] }
  0xb9   : > { %1619 = vst [vmem:[%s6089_s29 + $0xa48] sm:$0xff] %v1618_v9  ;;  %1621 = vst [vmem:[%s6089_s29 + $0xa50] sm:$0xff] %v1620_v10  ;;  %v1628_v14 = vld [vmem:[%s6081_s28 + $0x1f50] sm:$0xff]  ;;  %v1630_v15 = vld [vmem:[%s6081_s28 + $0x1f68] sm:$0xff] }
  0xba   : > { %1623 = vst [vmem:[%s6089_s29 + $0xa58] sm:$0xff] %v1622_v11  ;;  %1625 = vst [vmem:[%s6089_s29 + $0xa60] sm:$0xff] %v1624_v12  ;;  %v1632_v16 = vld [vmem:[%s6081_s28 + $0x1f80] sm:$0xff]  ;;  %v1634_v17 = vld [vmem:[%s6081_s28 + $0x1f98] sm:$0xff] }
  0xbb   : > { %1627 = vst [vmem:[%s6089_s29 + $0xa68] sm:$0xff] %v1626_v13  ;;  %1629 = vst [vmem:[%s6089_s29 + $0xa70] sm:$0xff] %v1628_v14  ;;  %v1636_v18 = vld [vmem:[%s6081_s28 + $0x1fb0] sm:$0xff]  ;;  %v1638_v19 = vld [vmem:[%s6081_s28 + $0x1fc8] sm:$0xff] }
  0xbc   : > { %1631 = vst [vmem:[%s6089_s29 + $0xa78] sm:$0xff] %v1630_v15  ;;  %1633 = vst [vmem:[%s6089_s29 + $0xa80] sm:$0xff] %v1632_v16  ;;  %v1640_v20 = vld [vmem:[%s6081_s28 + $0x1fe0] sm:$0xff]  ;;  %v1642_v21 = vld [vmem:[%s6081_s28 + $0x1ff8] sm:$0xff] }
  0xbd   : > { %1635 = vst [vmem:[%s6089_s29 + $0xa88] sm:$0xff] %v1634_v17  ;;  %1637 = vst [vmem:[%s6089_s29 + $0xa90] sm:$0xff] %v1636_v18  ;;  %v1644_v22 = vld [vmem:[%s6081_s28 + $0x2010] sm:$0xff]  ;;  %v1646_v23 = vld [vmem:[%s6081_s28 + $0x2028] sm:$0xff] }
  0xbe   : > { %1639 = vst [vmem:[%s6089_s29 + $0xa98] sm:$0xff] %v1638_v19  ;;  %1641 = vst [vmem:[%s6089_s29 + $0xaa0] sm:$0xff] %v1640_v20  ;;  %v1648_v24 = vld [vmem:[%s6081_s28 + $0x2040] sm:$0xff]  ;;  %v1650_v25 = vld [vmem:[%s6081_s28 + $0x2058] sm:$0xff] }
  0xbf   : > { %1643 = vst [vmem:[%s6089_s29 + $0xaa8] sm:$0xff] %v1642_v21  ;;  %1645 = vst [vmem:[%s6089_s29 + $0xab0] sm:$0xff] %v1644_v22  ;;  %v1652_v26 = vld [vmem:[%s6081_s28 + $0x2070] sm:$0xff]  ;;  %v1654_v27 = vld [vmem:[%s6081_s28 + $0x2088] sm:$0xff] }
  0xc0   : > { %1647 = vst [vmem:[%s6089_s29 + $0xab8] sm:$0xff] %v1646_v23  ;;  %1649 = vst [vmem:[%s6089_s29 + $0xac0] sm:$0xff] %v1648_v24  ;;  %v1656_v28 = vld [vmem:[%s6081_s28 + $0x20a0] sm:$0xff]  ;;  %v1658_v29 = vld [vmem:[%s6081_s28 + $0x20b8] sm:$0xff] }
  0xc1   : > { %1651 = vst [vmem:[%s6089_s29 + $0xac8] sm:$0xff] %v1650_v25  ;;  %1653 = vst [vmem:[%s6089_s29 + $0xad0] sm:$0xff] %v1652_v26  ;;  %v1660_v30 = vld [vmem:[%s6081_s28 + $0x20d0] sm:$0xff]  ;;  %v1662_v31 = vld [vmem:[%s6081_s28 + $0x20e8] sm:$0xff] }
  0xc2   : > { %1655 = vst [vmem:[%s6089_s29 + $0xad8] sm:$0xff] %v1654_v27  ;;  %1657 = vst [vmem:[%s6089_s29 + $0xae0] sm:$0xff] %v1656_v28  ;;  %v1664_v32 = vld [vmem:[%s6081_s28 + $0x2100] sm:$0xff]  ;;  %v1666_v33 = vld [vmem:[%s6081_s28 + $0x2118] sm:$0xff] }
  0xc3   : > { %1659 = vst [vmem:[%s6089_s29 + $0xae8] sm:$0xff] %v1658_v29  ;;  %1661 = vst [vmem:[%s6089_s29 + $0xaf0] sm:$0xff] %v1660_v30  ;;  %v1668_v34 = vld [vmem:[%s6081_s28 + $0x2130] sm:$0xff]  ;;  %v1670_v35 = vld [vmem:[%s6081_s28 + $0x2148] sm:$0xff] }
  0xc4   : > { %1663 = vst [vmem:[%s6089_s29 + $0xaf8] sm:$0xff] %v1662_v31  ;;  %1665 = vst [vmem:[%s6089_s29 + $0xb00] sm:$0xff] %v1664_v32  ;;  %v1672_v36 = vld [vmem:[%s6081_s28 + $0x2160] sm:$0xff]  ;;  %v1674_v37 = vld [vmem:[%s6081_s28 + $0x2178] sm:$0xff] }
  0xc5   : > { %1667 = vst [vmem:[%s6089_s29 + $0xb08] sm:$0xff] %v1666_v33  ;;  %1669 = vst [vmem:[%s6089_s29 + $0xb10] sm:$0xff] %v1668_v34  ;;  %v1676_v38 = vld [vmem:[%s6081_s28 + $0x2190] sm:$0xff]  ;;  %v1678_v39 = vld [vmem:[%s6081_s28 + $0x21a8] sm:$0xff] }
  0xc6   : > { %1671 = vst [vmem:[%s6089_s29 + $0xb18] sm:$0xff] %v1670_v35  ;;  %1673 = vst [vmem:[%s6089_s29 + $0xb20] sm:$0xff] %v1672_v36  ;;  %v1680_v40 = vld [vmem:[%s6081_s28 + $0x21c0] sm:$0xff]  ;;  %v1682_v41 = vld [vmem:[%s6081_s28 + $0x21d8] sm:$0xff] }
  0xc7   : > { %1675 = vst [vmem:[%s6089_s29 + $0xb28] sm:$0xff] %v1674_v37  ;;  %1677 = vst [vmem:[%s6089_s29 + $0xb30] sm:$0xff] %v1676_v38  ;;  %v1684_v42 = vld [vmem:[%s6081_s28 + $0x21f0] sm:$0xff]  ;;  %v1686_v43 = vld [vmem:[%s6081_s28 + $0x2208] sm:$0xff] }
  0xc8   : > { %1679 = vst [vmem:[%s6089_s29 + $0xb38] sm:$0xff] %v1678_v39  ;;  %1681 = vst [vmem:[%s6089_s29 + $0xb40] sm:$0xff] %v1680_v40  ;;  %v1688_v44 = vld [vmem:[%s6081_s28 + $0x2220] sm:$0xff]  ;;  %v1690_v45 = vld [vmem:[%s6081_s28 + $0x2238] sm:$0xff] }
  0xc9   : > { %1683 = vst [vmem:[%s6089_s29 + $0xb48] sm:$0xff] %v1682_v41  ;;  %1685 = vst [vmem:[%s6089_s29 + $0xb50] sm:$0xff] %v1684_v42  ;;  %v1692_v46 = vld [vmem:[%s6081_s28 + $0x2250] sm:$0xff]  ;;  %v1694_v47 = vld [vmem:[%s6081_s28 + $0x2268] sm:$0xff] }
  0xca   : > { %1687 = vst [vmem:[%s6089_s29 + $0xb58] sm:$0xff] %v1686_v43  ;;  %1689 = vst [vmem:[%s6089_s29 + $0xb60] sm:$0xff] %v1688_v44  ;;  %v1696_v48 = vld [vmem:[%s6081_s28 + $0x2280] sm:$0xff]  ;;  %v1698_v49 = vld [vmem:[%s6081_s28 + $0x2298] sm:$0xff] }
  0xcb   : > { %1691 = vst [vmem:[%s6089_s29 + $0xb68] sm:$0xff] %v1690_v45  ;;  %1693 = vst [vmem:[%s6089_s29 + $0xb70] sm:$0xff] %v1692_v46  ;;  %v1700_v50 = vld [vmem:[%s6081_s28 + $0x22b0] sm:$0xff]  ;;  %v1702_v51 = vld [vmem:[%s6081_s28 + $0x22c8] sm:$0xff] }
  0xcc   : > { %1695 = vst [vmem:[%s6089_s29 + $0xb78] sm:$0xff] %v1694_v47  ;;  %1697 = vst [vmem:[%s6089_s29 + $0xb80] sm:$0xff] %v1696_v48  ;;  %v1704_v52 = vld [vmem:[%s6081_s28 + $0x22e0] sm:$0xff]  ;;  %v1706_v53 = vld [vmem:[%s6081_s28 + $0x22f8] sm:$0xff] }
  0xcd   : > { %1699 = vst [vmem:[%s6089_s29 + $0xb88] sm:$0xff] %v1698_v49  ;;  %1701 = vst [vmem:[%s6089_s29 + $0xb90] sm:$0xff] %v1700_v50  ;;  %v1708_v54 = vld [vmem:[%s6081_s28 + $0x2310] sm:$0xff]  ;;  %v1710_v55 = vld [vmem:[%s6081_s28 + $0x2328] sm:$0xff] }
  0xce   : > { %1703 = vst [vmem:[%s6089_s29 + $0xb98] sm:$0xff] %v1702_v51  ;;  %1705 = vst [vmem:[%s6089_s29 + $0xba0] sm:$0xff] %v1704_v52  ;;  %v1712_v56 = vld [vmem:[%s6081_s28 + $0x2340] sm:$0xff]  ;;  %v1714_v57 = vld [vmem:[%s6081_s28 + $0x2358] sm:$0xff] }
  0xcf   : > { %1707 = vst [vmem:[%s6089_s29 + $0xba8] sm:$0xff] %v1706_v53  ;;  %1709 = vst [vmem:[%s6089_s29 + $0xbb0] sm:$0xff] %v1708_v54  ;;  %v1716_v58 = vld [vmem:[%s6081_s28 + $0x2370] sm:$0xff]  ;;  %v1718_v59 = vld [vmem:[%s6081_s28 + $0x2388] sm:$0xff] }
  0xd0   : > { %1711 = vst [vmem:[%s6089_s29 + $0xbb8] sm:$0xff] %v1710_v55  ;;  %1713 = vst [vmem:[%s6089_s29 + $0xbc0] sm:$0xff] %v1712_v56  ;;  %v1720_v60 = vld [vmem:[%s6081_s28 + $0x23a0] sm:$0xff]  ;;  %v1722_v61 = vld [vmem:[%s6081_s28 + $0x23b8] sm:$0xff] }
  0xd1   : > { %1715 = vst [vmem:[%s6089_s29 + $0xbc8] sm:$0xff] %v1714_v57  ;;  %1717 = vst [vmem:[%s6089_s29 + $0xbd0] sm:$0xff] %v1716_v58  ;;  %v1724_v62 = vld [vmem:[%s6081_s28 + $0x23d0] sm:$0xff]  ;;  %v1726_v63 = vld [vmem:[%s6081_s28 + $0x23e8] sm:$0xff] }
  0xd2   : > { %1719 = vst [vmem:[%s6089_s29 + $0xbd8] sm:$0xff] %v1718_v59  ;;  %1721 = vst [vmem:[%s6089_s29 + $0xbe0] sm:$0xff] %v1720_v60 }
  0xd3   : > { %1723 = vst [vmem:[%s6089_s29 + $0xbe8] sm:$0xff] %v1722_v61  ;;  %1725 = vst [vmem:[%s6089_s29 + $0xbf0] sm:$0xff] %v1724_v62 }
  0xd4   : > { %1727 = vst [vmem:[%s6089_s29 + $0xbf8] sm:$0xff] %v1726_v63 }
  0xd5 PF: > { %p4933_p8 = scmp.ge.s32.totalorder %s6011_s16, 1  ;;  %p1740_p9 = scmp.lt.s32.totalorder %s6011_s16, 4 }
  0xd7   : > { %p1741_p10 = pnand %p4933_p8, %p1740_p9 }
  0xd8   : > { %s1747_s30 = sand.u32 (!%p1741_p10), 1, %s5995_s12  }
  0xd9   : > { %1744 = sbr.rel (%p1741_p10) target bundleno = 822 (0x336), region = 66  ;;  %s4934_s5 = sshll.u32 (!%p1741_p10), %s1747_s30, 4 }
  0xda   : > { %s5356_s10 = smul.u32 (!%p1741_p10), 3072, %s1747_s30  ;;  %s1778_s6 = scalar_lea.vmem (!%p1741_p10), [#allocation3], %s4934_s5 }
  0xdc   : > { %s6886_s19 = scalar_lea.vmem (!%p1741_p10), [#allocation2], %s5356_s10 }
  0xde   : > { %v6859_v0 = vld [vmem:[%s7445_s0] sm:$0xff]  ;;  %v6869_v2 = vld [vmem:[%s7445_s0 + $0x8] sm:$0xff]  ;;  %v5397_v8 = vld [vmem:[%s6886_s19 + $0x74] ss:$8 sps:$4 sm:$0xff]   ;;  %s5354_s12 = sshll.u32 (%p6068_p6), %s6003_s14, 3 }
  0xdf   : > { %v6864_v1 = vld [vmem:[%s7445_s0 + $0x60] sm:$0xff]  ;;  %v6880_v5 = vld [vmem:[%s7445_s0 + $0x68] sm:$0xff]  ;;  %v5399_v9 = vld [vmem:[%s6886_s19 + $0x174] ss:$8 sps:$4 sm:$0xff]   ;;  %4254 = vmatprep.subr.bf16.mxu0 %v5397_v8  ;;  %s4796_s8 = scalar_lea.vmem (%p6068_p6), %s7448_s3, %s5354_s12 }
  0xe0   : > { %v4936_v3 = vcombine.low %v6859_v0, %v6864_v1  ;;  %v4937_v4 = vcombine.high %v6859_v0, %v6864_v1  ;;  %v4938_v6 = vcombine.low %v6869_v2, %v6880_v5  ;;  %v4939_v7 = vcombine.high %v6869_v2, %v6880_v5  ;;  %v5401_v10 = vld [vmem:[%s6886_s19 + $0x70] ss:$8 sps:$4 sm:$0xff]   ;;  %4297 = vmatprep.subr.bf16.mxu1 %v5399_v9  ;;  %v5403_v12 = vld [vmem:[%s6886_s19 + $0x64] ss:$8 sps:$4 sm:$0xff]   ;;  %v5407_v14 = vld [vmem:[%s6886_s19 + $0x60] ss:$8 sps:$4 sm:$0xff]  }
  0xe1   : > { %v5402_v11 = vld [vmem:[%s6886_s19 + $0x170] ss:$8 sps:$4 sm:$0xff]   ;;  %4255 = vmatpush1.bf16.msra.mxu0 %v5401_v10  ;;  %v5405_v13 = vld [vmem:[%s6886_s19 + $0x164] ss:$8 sps:$4 sm:$0xff]   ;;  %v5408_v15 = vld [vmem:[%s6886_s19 + $0x160] ss:$8 sps:$4 sm:$0xff]  }
  0xe2   : > { %4286 = vmatprep.mubr.bf16.mxu0 %v4937_v4  ;;  %4329 = vmatprep.mubr.bf16.mxu1 %v4939_v7  ;;  %v5409_v16 = vld [vmem:[%s6886_s19 + $0x54] ss:$8 sps:$4 sm:$0xff]   ;;  %v5413_v18 = vld [vmem:[%s6886_s19 + $0x50] ss:$8 sps:$4 sm:$0xff]   ;;  %v5415_v20 = vld [vmem:[%s6886_s19 + $0x44] ss:$8 sps:$4 sm:$0xff]  }
  0xe3   : > { %4298 = vmatpush1.bf16.msra.mxu1 %v5402_v11  ;;  %4256 = vmatprep.subr.bf16.mxu0 %v5403_v12  ;;  %v5411_v17 = vld [vmem:[%s6886_s19 + $0x154] ss:$8 sps:$4 sm:$0xff]   ;;  %v5414_v19 = vld [vmem:[%s6886_s19 + $0x150] ss:$8 sps:$4 sm:$0xff]   ;;  %v5417_v21 = vld [vmem:[%s6886_s19 + $0x144] ss:$8 sps:$4 sm:$0xff]  }
  0xe4   : > { %4299 = vmatprep.subr.bf16.mxu1 %v5405_v13  ;;  %v5419_v22 = vld [vmem:[%s6886_s19 + $0x40] ss:$8 sps:$4 sm:$0xff]   ;;  %v5421_v24 = vld [vmem:[%s6886_s19 + $0x34] ss:$8 sps:$4 sm:$0xff]   ;;  %v5425_v26 = vld [vmem:[%s6886_s19 + $0x30] ss:$8 sps:$4 sm:$0xff]  }
  0xe5   : > { %4257 = vmatpush1.bf16.msra.mxu0 %v5407_v14  ;;  %v5420_v23 = vld [vmem:[%s6886_s19 + $0x140] ss:$8 sps:$4 sm:$0xff]   ;;  %v5423_v25 = vld [vmem:[%s6886_s19 + $0x134] ss:$8 sps:$4 sm:$0xff]   ;;  %v5426_v27 = vld [vmem:[%s6886_s19 + $0x130] ss:$8 sps:$4 sm:$0xff]  }
  0xe6   : > { %4258 = vmatprep.subr.bf16.mxu0 %v5409_v16  ;;  %v5427_v28 = vld [vmem:[%s6886_s19 + $0x24] ss:$8 sps:$4 sm:$0xff]   ;;  %v5431_v30 = vld [vmem:[%s6886_s19 + $0x20] ss:$8 sps:$4 sm:$0xff]   ;;  %v5433_v32 = vld [vmem:[%s6886_s19 + $0x14] ss:$8 sps:$4 sm:$0xff]  }
  0xe7   : > { %4300 = vmatpush1.bf16.msra.mxu1 %v5408_v15  ;;  %v5429_v29 = vld [vmem:[%s6886_s19 + $0x124] ss:$8 sps:$4 sm:$0xff]   ;;  %v5432_v31 = vld [vmem:[%s6886_s19 + $0x120] ss:$8 sps:$4 sm:$0xff]   ;;  %v5435_v33 = vld [vmem:[%s6886_s19 + $0x114] ss:$8 sps:$4 sm:$0xff]  }
  0xe8   : > { %4301 = vmatprep.subr.bf16.mxu1 %v5411_v17  ;;  %v5437_v34 = vld [vmem:[%s6886_s19 + $0x10] ss:$8 sps:$4 sm:$0xff]   ;;  %v5439_v36 = vld [vmem:[%s6886_s19 + $0x4] ss:$8 sps:$4 sm:$0xff]   ;;  %v5443_v38 = vld [vmem:[%s6886_s19] ss:$8 sps:$4 sm:$0xff]  }
  0xe9   : > { %4259 = vmatpush1.bf16.msra.mxu0 %v5413_v18  ;;  %v5438_v35 = vld [vmem:[%s6886_s19 + $0x110] ss:$8 sps:$4 sm:$0xff]   ;;  %v5441_v37 = vld [vmem:[%s6886_s19 + $0x104] ss:$8 sps:$4 sm:$0xff]   ;;  %v5444_v39 = vld [vmem:[%s6886_s19 + $0x100] ss:$8 sps:$4 sm:$0xff]  }
  0xea   : > { %4260 = vmatprep.subr.bf16.mxu0 %v5415_v20  ;;  %v5445_v40 = vld [vmem:[%s6886_s19 + $0xf4] ss:$8 sps:$4 sm:$0xff]   ;;  %v5449_v42 = vld [vmem:[%s6886_s19 + $0xf0] ss:$8 sps:$4 sm:$0xff]   ;;  %v5451_v44 = vld [vmem:[%s6886_s19 + $0xe4] ss:$8 sps:$4 sm:$0xff]  }
  0xeb   : > { %4302 = vmatpush1.bf16.msra.mxu1 %v5414_v19  ;;  %v5447_v41 = vld [vmem:[%s6886_s19 + $0x1f4] ss:$8 sps:$4 sm:$0xff]   ;;  %v5450_v43 = vld [vmem:[%s6886_s19 + $0x1f0] ss:$8 sps:$4 sm:$0xff]   ;;  %v5453_v45 = vld [vmem:[%s6886_s19 + $0x1e4] ss:$8 sps:$4 sm:$0xff]  }
  0xec   : > { %4303 = vmatprep.subr.bf16.mxu1 %v5417_v21  ;;  %v5455_v46 = vld [vmem:[%s6886_s19 + $0xe0] ss:$8 sps:$4 sm:$0xff]   ;;  %v5457_v48 = vld [vmem:[%s6886_s19 + $0xd4] ss:$8 sps:$4 sm:$0xff]   ;;  %v5461_v50 = vld [vmem:[%s6886_s19 + $0xd0] ss:$8 sps:$4 sm:$0xff]  }
  0xed   : > { %4261 = vmatpush1.bf16.msra.mxu0 %v5419_v22  ;;  %v5456_v47 = vld [vmem:[%s6886_s19 + $0x1e0] ss:$8 sps:$4 sm:$0xff]   ;;  %v5459_v49 = vld [vmem:[%s6886_s19 + $0x1d4] ss:$8 sps:$4 sm:$0xff]   ;;  %v5462_v51 = vld [vmem:[%s6886_s19 + $0x1d0] ss:$8 sps:$4 sm:$0xff]  }
  0xee   : > { %4262 = vmatprep.subr.bf16.mxu0 %v5421_v24  ;;  %v5463_v52 = vld [vmem:[%s6886_s19 + $0xc4] ss:$8 sps:$4 sm:$0xff]   ;;  %v5467_v54 = vld [vmem:[%s6886_s19 + $0xc0] ss:$8 sps:$4 sm:$0xff]   ;;  %v5469_v56 = vld [vmem:[%s6886_s19 + $0xb4] ss:$8 sps:$4 sm:$0xff]  }
  0xef   : > { %4304 = vmatpush1.bf16.msra.mxu1 %v5420_v23  ;;  %v5465_v53 = vld [vmem:[%s6886_s19 + $0x1c4] ss:$8 sps:$4 sm:$0xff]   ;;  %v5468_v55 = vld [vmem:[%s6886_s19 + $0x1c0] ss:$8 sps:$4 sm:$0xff]   ;;  %v5471_v57 = vld [vmem:[%s6886_s19 + $0x1b4] ss:$8 sps:$4 sm:$0xff]  }
  0xf0   : > { %4305 = vmatprep.subr.bf16.mxu1 %v5423_v25  ;;  %v5473_v58 = vld [vmem:[%s6886_s19 + $0xb0] ss:$8 sps:$4 sm:$0xff]   ;;  %v5475_v60 = vld [vmem:[%s6886_s19 + $0xa4] ss:$8 sps:$4 sm:$0xff]   ;;  %v5479_v62 = vld [vmem:[%s6886_s19 + $0xa0] ss:$8 sps:$4 sm:$0xff]  }
  0xf1   : > { %4263 = vmatpush1.bf16.msra.mxu0 %v5425_v26  ;;  %v5474_v59 = vld [vmem:[%s6886_s19 + $0x1b0] ss:$8 sps:$4 sm:$0xff]   ;;  %v5477_v61 = vld [vmem:[%s6886_s19 + $0x1a4] ss:$8 sps:$4 sm:$0xff]   ;;  %v5480_v63 = vld [vmem:[%s6886_s19 + $0x1a0] ss:$8 sps:$4 sm:$0xff]  }
  0xf2   : > { %4264 = vmatprep.subr.bf16.mxu0 %v5427_v28  ;;  %v5481_v4 = vld [vmem:[%s6886_s19 + $0x94] ss:$8 sps:$4 sm:$0xff]   ;;  %v5485_v8 = vld [vmem:[%s6886_s19 + $0x90] ss:$8 sps:$4 sm:$0xff]   ;;  %v5487_v10 = vld [vmem:[%s6886_s19 + $0x84] ss:$8 sps:$4 sm:$0xff]  }
  0xf3   : > { %4306 = vmatpush1.bf16.msra.mxu1 %v5426_v27  ;;  %v5483_v7 = vld [vmem:[%s6886_s19 + $0x194] ss:$8 sps:$4 sm:$0xff]   ;;  %v5486_v9 = vld [vmem:[%s6886_s19 + $0x190] ss:$8 sps:$4 sm:$0xff]   ;;  %v5489_v11 = vld [vmem:[%s6886_s19 + $0x184] ss:$8 sps:$4 sm:$0xff]  }
  0xf4   : > { %4307 = vmatprep.subr.bf16.mxu1 %v5429_v29  ;;  %v5491_v12 = vld [vmem:[%s6886_s19 + $0x80] ss:$8 sps:$4 sm:$0xff]   ;;  %v5495_v14 = vld [vmem:[%s6886_s19 + $0x274] ss:$8 sps:$4 sm:$0xff]   ;;  %v5493_v18 = vld [vmem:[%s6886_s19 + $0x270] ss:$8 sps:$4 sm:$0xff]  }
  0xf5   : > { %4265 = vmatpush1.bf16.msra.mxu0 %v5431_v30  ;;  %v5492_v13 = vld [vmem:[%s6886_s19 + $0x180] ss:$8 sps:$4 sm:$0xff]   ;;  %v5498_v15 = vld [vmem:[%s6886_s19 + $0x374] ss:$8 sps:$4 sm:$0xff]   ;;  %v5496_v19 = vld [vmem:[%s6886_s19 + $0x370] ss:$8 sps:$4 sm:$0xff]  }
  0xf6   : > { %4266 = vmatprep.subr.bf16.mxu0 %v5433_v32  ;;  %v6957_v16 = vld [vmem:[%s7445_s0 + $0x10] sm:$0xff]  ;;  %v5501_v20 = vld [vmem:[%s6886_s19 + $0x264] ss:$8 sps:$4 sm:$0xff]   ;;  %v5499_v23 = vld [vmem:[%s6886_s19 + $0x260] ss:$8 sps:$4 sm:$0xff]  }
  0xf7   : > { %4308 = vmatpush1.bf16.msra.mxu1 %v5432_v31  ;;  %v6962_v17 = vld [vmem:[%s7445_s0 + $0x70] sm:$0xff]  ;;  %v5504_v21 = vld [vmem:[%s6886_s19 + $0x364] ss:$8 sps:$4 sm:$0xff]   ;;  %v5502_v24 = vld [vmem:[%s6886_s19 + $0x360] ss:$8 sps:$4 sm:$0xff]  }
  0xf8   : > { %4309 = vmatprep.subr.bf16.mxu1 %v5435_v33  ;;  %v4941_v22 = vcombine.high %v6957_v16, %v6962_v17  ;;  %v5507_v25 = vld [vmem:[%s6886_s19 + $0x254] ss:$8 sps:$4 sm:$0xff]   ;;  %v5505_v0 = vld [vmem:[%s6886_s19 + $0x250] ss:$8 sps:$4 sm:$0xff]   ;;  %v5513_v2 = vld [vmem:[%s6886_s19 + $0x244] ss:$8 sps:$4 sm:$0xff]  }
  0xf9   : > { %4267 = vmatpush1.bf16.msra.mxu0 %v5437_v34  ;;  %v5510_v26 = vld [vmem:[%s6886_s19 + $0x354] ss:$8 sps:$4 sm:$0xff]   ;;  %v5508_v1 = vld [vmem:[%s6886_s19 + $0x350] ss:$8 sps:$4 sm:$0xff]   ;;  %v5511_v5 = vld [vmem:[%s6886_s19 + $0x240] ss:$8 sps:$4 sm:$0xff]  }
  0xfa   : > { %4268 = vmatprep.subr.bf16.mxu0 %v5439_v36  ;;  %v5519_v27 = vld [vmem:[%s6886_s19 + $0x234] ss:$8 sps:$4 sm:$0xff]   ;;  %v5517_v29 = vld [vmem:[%s6886_s19 + $0x230] ss:$8 sps:$4 sm:$0xff]   ;;  %v5525_v31 = vld [vmem:[%s6886_s19 + $0x224] ss:$8 sps:$4 sm:$0xff]  }
  0xfb   : > { %4310 = vmatpush1.bf16.msra.mxu1 %v5438_v35  ;;  %v5522_v28 = vld [vmem:[%s6886_s19 + $0x334] ss:$8 sps:$4 sm:$0xff]   ;;  %v5520_v30 = vld [vmem:[%s6886_s19 + $0x330] ss:$8 sps:$4 sm:$0xff]   ;;  %v5528_v32 = vld [vmem:[%s6886_s19 + $0x324] ss:$8 sps:$4 sm:$0xff]  }
  0xfc   : > { %4311 = vmatprep.subr.bf16.mxu1 %v5441_v37  ;;  %v6995_v33 = vld [vmem:[%s7445_s0 + $0x18] sm:$0xff]  ;;  %v5523_v34 = vld [vmem:[%s6886_s19 + $0x220] ss:$8 sps:$4 sm:$0xff]  }
  0xfd   : > { %4269 = vmatpush1.bf16.msra.mxu0 %v5443_v38  ;;  %v5526_v35 = vld [vmem:[%s6886_s19 + $0x320] ss:$8 sps:$4 sm:$0xff]   ;;  %v5531_v36 = vld [vmem:[%s6886_s19 + $0x214] ss:$8 sps:$4 sm:$0xff]  }
  0xfe   : > { %4270 = vmatprep.subr.bf16.mxu0 %v5445_v40  ;;  %v5534_v37 = vld [vmem:[%s6886_s19 + $0x314] ss:$8 sps:$4 sm:$0xff]   ;;  %v5529_v40 = vld [vmem:[%s6886_s19 + $0x210] ss:$8 sps:$4 sm:$0xff]  }
  0xff   : > { %4312 = vmatpush1.bf16.msra.mxu1 %v5444_v39  ;;  %v7004_v38 = vld [vmem:[%s7445_s0 + $0x78] sm:$0xff] }
 0x100   : > { %4313 = vmatprep.subr.bf16.mxu1 %v5447_v41  ;;  %v4943_v39 = vcombine.high %v6995_v33, %v7004_v38  ;;  %v5532_v41 = vld [vmem:[%s6886_s19 + $0x310] ss:$8 sps:$4 sm:$0xff]  }
 0x101   : > { %4271 = vmatpush2.bf16.msra.mxu0 %v5449_v42  ;;  %v5537_v42 = vld [vmem:[%s6886_s19 + $0x204] ss:$8 sps:$4 sm:$0xff]  }
 0x102   : > { %4272 = vmatprep.subr.bf16.mxu0 %v5451_v44  ;;  %v5535_v44 = vld [vmem:[%s6886_s19 + $0x200] ss:$8 sps:$4 sm:$0xff]  }
 0x103   : > { %4314 = vmatpush2.bf16.msra.mxu1 %v5450_v43  ;;  %v5540_v43 = vld [vmem:[%s6886_s19 + $0x304] ss:$8 sps:$4 sm:$0xff]  }
 0x104   : > { %4315 = vmatprep.subr.bf16.mxu1 %v5453_v45  ;;  %v5538_v45 = vld [vmem:[%s6886_s19 + $0x300] ss:$8 sps:$4 sm:$0xff]  }
 0x105   : > { %4273 = vmatpush2.bf16.msra.mxu0 %v5455_v46  ;;  %v5543_v46 = vld [vmem:[%s6886_s19 + $0x2f4] ss:$8 sps:$4 sm:$0xff]  }
 0x106   : > { %4274 = vmatprep.subr.bf16.mxu0 %v5457_v48  ;;  %v5541_v48 = vld [vmem:[%s6886_s19 + $0x2f0] ss:$8 sps:$4 sm:$0xff]  }
 0x107   : > { %4316 = vmatpush2.bf16.msra.mxu1 %v5456_v47  ;;  %v5546_v47 = vld [vmem:[%s6886_s19 + $0x3f4] ss:$8 sps:$4 sm:$0xff]  }
 0x108   : > { %4317 = vmatprep.subr.bf16.mxu1 %v5459_v49  ;;  %v5544_v49 = vld [vmem:[%s6886_s19 + $0x3f0] ss:$8 sps:$4 sm:$0xff]  }
 0x109   : > { %4275 = vmatpush2.bf16.msra.mxu0 %v5461_v50  ;;  %v5549_v50 = vld [vmem:[%s6886_s19 + $0x2e4] ss:$8 sps:$4 sm:$0xff]  }
 0x10a   : > { %4276 = vmatprep.subr.bf16.mxu0 %v5463_v52  ;;  %v5547_v52 = vld [vmem:[%s6886_s19 + $0x2e0] ss:$8 sps:$4 sm:$0xff]  }
 0x10b   : > { %4318 = vmatpush2.bf16.msra.mxu1 %v5462_v51  ;;  %v5552_v51 = vld [vmem:[%s6886_s19 + $0x3e4] ss:$8 sps:$4 sm:$0xff]  }
 0x10c   : > { %4319 = vmatprep.subr.bf16.mxu1 %v5465_v53  ;;  %v5550_v53 = vld [vmem:[%s6886_s19 + $0x3e0] ss:$8 sps:$4 sm:$0xff]  }
 0x10d   : > { %4277 = vmatpush2.bf16.msra.mxu0 %v5467_v54  ;;  %v5555_v54 = vld [vmem:[%s6886_s19 + $0x2d4] ss:$8 sps:$4 sm:$0xff]  }
 0x10e   : > { %4278 = vmatprep.subr.bf16.mxu0 %v5469_v56  ;;  %v5553_v56 = vld [vmem:[%s6886_s19 + $0x2d0] ss:$8 sps:$4 sm:$0xff]  }
 0x10f   : > { %4320 = vmatpush2.bf16.msra.mxu1 %v5468_v55  ;;  %v5558_v55 = vld [vmem:[%s6886_s19 + $0x3d4] ss:$8 sps:$4 sm:$0xff]  }
 0x110   : > { %4321 = vmatprep.subr.bf16.mxu1 %v5471_v57  ;;  %v5556_v57 = vld [vmem:[%s6886_s19 + $0x3d0] ss:$8 sps:$4 sm:$0xff]  }
 0x111   : > { %4279 = vmatpush2.bf16.msra.mxu0 %v5473_v58  ;;  %v5561_v58 = vld [vmem:[%s6886_s19 + $0x2c4] ss:$8 sps:$4 sm:$0xff]  }
 0x112   : > { %4280 = vmatprep.subr.bf16.mxu0 %v5475_v60  ;;  %v5559_v60 = vld [vmem:[%s6886_s19 + $0x2c0] ss:$8 sps:$4 sm:$0xff]  }
 0x113   : > { %4322 = vmatpush2.bf16.msra.mxu1 %v5474_v59  ;;  %v5564_v59 = vld [vmem:[%s6886_s19 + $0x3c4] ss:$8 sps:$4 sm:$0xff]  }
 0x114   : > { %4323 = vmatprep.subr.bf16.mxu1 %v5477_v61  ;;  %v5562_v61 = vld [vmem:[%s6886_s19 + $0x3c0] ss:$8 sps:$4 sm:$0xff]  }
 0x115   : > { %4281 = vmatpush2.bf16.msra.mxu0 %v5479_v62  ;;  %v5567_v62 = vld [vmem:[%s6886_s19 + $0x2b4] ss:$8 sps:$4 sm:$0xff]  }
 0x116   : > { %4282 = vmatprep.subr.bf16.mxu0 %v5481_v4  ;;  %v5565_v4 = vld [vmem:[%s6886_s19 + $0x2b0] ss:$8 sps:$4 sm:$0xff]  }
 0x117   : > { %4324 = vmatpush2.bf16.msra.mxu1 %v5480_v63  ;;  %v5570_v63 = vld [vmem:[%s6886_s19 + $0x3b4] ss:$8 sps:$4 sm:$0xff]  }
 0x118   : > { %4325 = vmatprep.subr.bf16.mxu1 %v5483_v7  ;;  %v5568_v7 = vld [vmem:[%s6886_s19 + $0x3b0] ss:$8 sps:$4 sm:$0xff]  }
 0x119   : > { %4283 = vmatpush2.bf16.msra.mxu0 %v5485_v8  ;;  %v5573_v8 = vld [vmem:[%s6886_s19 + $0x2a4] ss:$8 sps:$4 sm:$0xff]  }
 0x11a   : > { %4284 = vmatprep.subr.bf16.mxu0 %v5487_v10  ;;  %v5571_v10 = vld [vmem:[%s6886_s19 + $0x2a0] ss:$8 sps:$4 sm:$0xff]  }
 0x11b   : > { %4326 = vmatpush2.bf16.msra.mxu1 %v5486_v9  ;;  %v5576_v9 = vld [vmem:[%s6886_s19 + $0x3a4] ss:$8 sps:$4 sm:$0xff]  }
 0x11c   : > { %4327 = vmatprep.subr.bf16.mxu1 %v5489_v11  ;;  %v5574_v11 = vld [vmem:[%s6886_s19 + $0x3a0] ss:$8 sps:$4 sm:$0xff]  }
 0x11d   : > { %4285 = vmatpush2.bf16.msra.mxu0 %v5491_v12  ;;  %v5579_v12 = vld [vmem:[%s6886_s19 + $0x294] ss:$8 sps:$4 sm:$0xff]  }
 0x11e   : > { %4340 = vmatprep.subr.bf16.mxu0 %v5495_v14  ;;  %v5577_v14 = vld [vmem:[%s6886_s19 + $0x290] ss:$8 sps:$4 sm:$0xff]  }
 0x11f   : > { %4328 = vmatpush2.bf16.msra.mxu1 %v5492_v13  ;;  %v5582_v13 = vld [vmem:[%s6886_s19 + $0x394] ss:$8 sps:$4 sm:$0xff]  }
 0x120   : > { %4383 = vmatprep.subr.bf16.mxu1 %v5498_v15  ;;  %4287 = vmatmul.mubr.bf16.vlgmr.msra.gmra.mxu0 %v4936_v3  ;;  %v5516_v3 = vld [vmem:[%s6886_s19 + $0x344] ss:$8 sps:$4 sm:$0xff]   ;;  %v5580_v15 = vld [vmem:[%s6886_s19 + $0x390] ss:$8 sps:$4 sm:$0xff]  }
 0x121   : > { %4341 = vmatpush1.bf16.msra.mxu0 %v5493_v18  ;;  %4372 = vmatprep.mubr.bf16.mxu0 %v4941_v22  ;;  %v5585_v18 = vld [vmem:[%s6886_s19 + $0x284] ss:$8 sps:$4 sm:$0xff]   ;;  %v5591_v22 = vld [vmem:[%s6886_s19 + $0x474] ss:$8 sps:$4 sm:$0xff]  }
 0x122   : > { %4330 = vmatmul.mubr.bf16.vlgmr.msra.gmra.mxu1 %v4938_v6  ;;  %4342 = vmatprep.subr.bf16.mxu0 %v5501_v20  ;;  %v5514_v6 = vld [vmem:[%s6886_s19 + $0x340] ss:$8 sps:$4 sm:$0xff]  }
 0x123   : > { %4384 = vmatpush1.bf16.msra.mxu1 %v5496_v19  ;;  %4415 = vmatprep.mubr.bf16.mxu1 %v4943_v39  ;;  %v5588_v19 = vld [vmem:[%s6886_s19 + $0x384] ss:$8 sps:$4 sm:$0xff]   ;;  %v5583_v20 = vld [vmem:[%s6886_s19 + $0x280] ss:$8 sps:$4 sm:$0xff]   ;;  %v5618_v39 = vld [vmem:[%s6886_s19 + $0x534] ss:$8 sps:$4 sm:$0xff]  }
 0x124   : > { %4385 = vmatprep.subr.bf16.mxu1 %v5504_v21  ;;  %v5586_v21 = vld [vmem:[%s6886_s19 + $0x380] ss:$8 sps:$4 sm:$0xff]  }
 0x125   : > { %4343 = vmatpush1.bf16.msra.mxu0 %v5499_v23  ;;  %v5594_v23 = vld [vmem:[%s6886_s19 + $0x574] ss:$8 sps:$4 sm:$0xff]  }
 0x126   : > { %4344 = vmatprep.subr.bf16.mxu0 %v5507_v25  ;;  %v5592_v25 = vld [vmem:[%s6886_s19 + $0x570] ss:$8 sps:$4 sm:$0xff]  }
 0x127   : > { %4386 = vmatpush1.bf16.msra.mxu1 %v5502_v24  ;;  %v5589_v24 = vld [vmem:[%s6886_s19 + $0x470] ss:$8 sps:$4 sm:$0xff]  }
 0x128   : > { %4387 = vmatprep.subr.bf16.mxu1 %v5510_v26  ;;  %v4940_v26 = vcombine.low %v6957_v16, %v6962_v17  ;;  %v7069_v16 = vld [vmem:[%s7445_s0 + $0x28] sm:$0xff] }
 0x129   : > { %4345 = vmatpush1.bf16.msra.mxu0 %v5505_v0  ;;  %v4942_v0 = vcombine.low %v6995_v33, %v7004_v38  ;;  %v7074_v17 = vld [vmem:[%s7445_s0 + $0x88] sm:$0xff]  ;;  %v5604_v33 = vld [vmem:[%s6886_s19 + $0x550] ss:$8 sps:$4 sm:$0xff]   ;;  %v5615_v38 = vld [vmem:[%s6886_s19 + $0x434] ss:$8 sps:$4 sm:$0xff]  }
 0x12a   : > { %4346 = vmatprep.subr.bf16.mxu0 %v5513_v2  ;;  %v5600_v2 = vld [vmem:[%s6886_s19 + $0x564] ss:$8 sps:$4 sm:$0xff]  }
 0x12b   : > { %4388 = vmatpush1.bf16.msra.mxu1 %v5508_v1  ;;  %v5597_v1 = vld [vmem:[%s6886_s19 + $0x464] ss:$8 sps:$4 sm:$0xff]  }
 0x12c   : > { %4389 = vmatprep.subr.bf16.mxu1 %v5516_v3  ;;  %v7059_v3 = vld [vmem:[%s7445_s0 + $0x20] sm:$0xff] }
 0x12d   : > { %4347 = vmatpush1.bf16.msra.mxu0 %v5511_v5  ;;  %v7064_v5 = vld [vmem:[%s7445_s0 + $0x80] sm:$0xff] }
 0x12e   : > { %4348 = vmatprep.subr.bf16.mxu0 %v5519_v27  ;;  %v4947_v27 = vcombine.high %v7069_v16, %v7074_v17 }
 0x12f   : > { %4390 = vmatpush1.bf16.msra.mxu1 %v5514_v6  ;;  %v4945_v6 = vcombine.high %v7059_v3, %v7064_v5 }
 0x130   : > { %4391 = vmatprep.subr.bf16.mxu1 %v5522_v28  ;;  %v5595_v28 = vld [vmem:[%s6886_s19 + $0x460] ss:$8 sps:$4 sm:$0xff]  }
 0x131   : > { %4349 = vmatpush1.bf16.msra.mxu0 %v5517_v29  ;;  %v5598_v29 = vld [vmem:[%s6886_s19 + $0x560] ss:$8 sps:$4 sm:$0xff]  }
 0x132   : > { %4350 = vmatprep.subr.bf16.mxu0 %v5525_v31  ;;  %v5606_v31 = vld [vmem:[%s6886_s19 + $0x554] ss:$8 sps:$4 sm:$0xff]  }
 0x133   : > { %4392 = vmatpush1.bf16.msra.mxu1 %v5520_v30  ;;  %v5603_v30 = vld [vmem:[%s6886_s19 + $0x454] ss:$8 sps:$4 sm:$0xff]  }
 0x134   : > { %4393 = vmatprep.subr.bf16.mxu1 %v5528_v32  ;;  %v5601_v32 = vld [vmem:[%s6886_s19 + $0x450] ss:$8 sps:$4 sm:$0xff]  }
 0x135   : > { %4351 = vmatpush1.bf16.msra.mxu0 %v5523_v34  ;;  %v5609_v34 = vld [vmem:[%s6886_s19 + $0x444] ss:$8 sps:$4 sm:$0xff]  }
 0x136   : > { %4352 = vmatprep.subr.bf16.mxu0 %v5531_v36  ;;  %v5607_v36 = vld [vmem:[%s6886_s19 + $0x440] ss:$8 sps:$4 sm:$0xff]  }
 0x137   : > { %4394 = vmatpush1.bf16.msra.mxu1 %v5526_v35  ;;  %v5612_v35 = vld [vmem:[%s6886_s19 + $0x544] ss:$8 sps:$4 sm:$0xff]  }
 0x138   : > { %4395 = vmatprep.subr.bf16.mxu1 %v5534_v37  ;;  %v5610_v37 = vld [vmem:[%s6886_s19 + $0x540] ss:$8 sps:$4 sm:$0xff]  }
 0x139   : > { %4353 = vmatpush1.bf16.msra.mxu0 %v5529_v40  ;;  %v5613_v40 = vld [vmem:[%s6886_s19 + $0x430] ss:$8 sps:$4 sm:$0xff]  }
 0x13a   : > { %4354 = vmatprep.subr.bf16.mxu0 %v5537_v42  ;;  %v5621_v42 = vld [vmem:[%s6886_s19 + $0x424] ss:$8 sps:$4 sm:$0xff]  }
 0x13b   : > { %4396 = vmatpush1.bf16.msra.mxu1 %v5532_v41  ;;  %v5616_v41 = vld [vmem:[%s6886_s19 + $0x530] ss:$8 sps:$4 sm:$0xff]  }
 0x13c   : > { %4397 = vmatprep.subr.bf16.mxu1 %v5540_v43  ;;  %v5624_v43 = vld [vmem:[%s6886_s19 + $0x524] ss:$8 sps:$4 sm:$0xff]  }
 0x13d   : > { %4355 = vmatpush1.bf16.msra.mxu0 %v5535_v44  ;;  %v5619_v44 = vld [vmem:[%s6886_s19 + $0x420] ss:$8 sps:$4 sm:$0xff]  }
 0x13e   : > { %4356 = vmatprep.subr.bf16.mxu0 %v5543_v46  ;;  %v5627_v46 = vld [vmem:[%s6886_s19 + $0x414] ss:$8 sps:$4 sm:$0xff]  }
 0x13f   : > { %4398 = vmatpush1.bf16.msra.mxu1 %v5538_v45  ;;  %v5622_v45 = vld [vmem:[%s6886_s19 + $0x520] ss:$8 sps:$4 sm:$0xff]  }
 0x140   : > { %4399 = vmatprep.subr.bf16.mxu1 %v5546_v47  ;;  %v5630_v47 = vld [vmem:[%s6886_s19 + $0x514] ss:$8 sps:$4 sm:$0xff]  }
 0x141   : > { %4357 = vmatpush2.bf16.msra.mxu0 %v5541_v48  ;;  %v5625_v48 = vld [vmem:[%s6886_s19 + $0x410] ss:$8 sps:$4 sm:$0xff]  }
 0x142   : > { %4358 = vmatprep.subr.bf16.mxu0 %v5549_v50  ;;  %v5633_v50 = vld [vmem:[%s6886_s19 + $0x404] ss:$8 sps:$4 sm:$0xff]  }
 0x143   : > { %4400 = vmatpush2.bf16.msra.mxu1 %v5544_v49  ;;  %v5628_v49 = vld [vmem:[%s6886_s19 + $0x510] ss:$8 sps:$4 sm:$0xff]  }
 0x144   : > { %4401 = vmatprep.subr.bf16.mxu1 %v5552_v51  ;;  %v5636_v51 = vld [vmem:[%s6886_s19 + $0x504] ss:$8 sps:$4 sm:$0xff]  }
 0x145   : > { %4359 = vmatpush2.bf16.msra.mxu0 %v5547_v52  ;;  %v5631_v52 = vld [vmem:[%s6886_s19 + $0x400] ss:$8 sps:$4 sm:$0xff]  }
 0x146   : > { %4360 = vmatprep.subr.bf16.mxu0 %v5555_v54  ;;  %v5639_v54 = vld [vmem:[%s6886_s19 + $0x4f4] ss:$8 sps:$4 sm:$0xff]  }
 0x147   : > { %4402 = vmatpush2.bf16.msra.mxu1 %v5550_v53  ;;  %v5634_v53 = vld [vmem:[%s6886_s19 + $0x500] ss:$8 sps:$4 sm:$0xff]  }
 0x148   : > { %4403 = vmatprep.subr.bf16.mxu1 %v5558_v55  ;;  %v5642_v55 = vld [vmem:[%s6886_s19 + $0x5f4] ss:$8 sps:$4 sm:$0xff]  }
 0x149   : > { %4361 = vmatpush2.bf16.msra.mxu0 %v5553_v56  ;;  %v5637_v56 = vld [vmem:[%s6886_s19 + $0x4f0] ss:$8 sps:$4 sm:$0xff]  }
 0x14a   : > { %4362 = vmatprep.subr.bf16.mxu0 %v5561_v58  ;;  %v5645_v58 = vld [vmem:[%s6886_s19 + $0x4e4] ss:$8 sps:$4 sm:$0xff]  }
 0x14b   : > { %4404 = vmatpush2.bf16.msra.mxu1 %v5556_v57  ;;  %v5640_v57 = vld [vmem:[%s6886_s19 + $0x5f0] ss:$8 sps:$4 sm:$0xff]  }
 0x14c   : > { %4405 = vmatprep.subr.bf16.mxu1 %v5564_v59  ;;  %v5648_v59 = vld [vmem:[%s6886_s19 + $0x5e4] ss:$8 sps:$4 sm:$0xff]  }
 0x14d   : > { %4363 = vmatpush2.bf16.msra.mxu0 %v5559_v60  ;;  %v5643_v60 = vld [vmem:[%s6886_s19 + $0x4e0] ss:$8 sps:$4 sm:$0xff]  }
 0x14e   : > { %4364 = vmatprep.subr.bf16.mxu0 %v5567_v62  ;;  %v5651_v62 = vld [vmem:[%s6886_s19 + $0x4d4] ss:$8 sps:$4 sm:$0xff]  }
 0x14f   : > { %4406 = vmatpush2.bf16.msra.mxu1 %v5562_v61  ;;  %v5646_v61 = vld [vmem:[%s6886_s19 + $0x5e0] ss:$8 sps:$4 sm:$0xff]  }
 0x150   : > { %4407 = vmatprep.subr.bf16.mxu1 %v5570_v63  ;;  %v5654_v63 = vld [vmem:[%s6886_s19 + $0x5d4] ss:$8 sps:$4 sm:$0xff]  }
 0x151   : > { %4365 = vmatpush2.bf16.msra.mxu0 %v5565_v4  ;;  %v5649_v4 = vld [vmem:[%s6886_s19 + $0x4d0] ss:$8 sps:$4 sm:$0xff]  }
 0x152   : > { %4366 = vmatprep.subr.bf16.mxu0 %v5573_v8  ;;  %v5657_v8 = vld [vmem:[%s6886_s19 + $0x4c4] ss:$8 sps:$4 sm:$0xff]  }
 0x153   : > { %4408 = vmatpush2.bf16.msra.mxu1 %v5568_v7  ;;  %v5652_v7 = vld [vmem:[%s6886_s19 + $0x5d0] ss:$8 sps:$4 sm:$0xff]  }
 0x154   : > { %4409 = vmatprep.subr.bf16.mxu1 %v5576_v9  ;;  %v5660_v9 = vld [vmem:[%s6886_s19 + $0x5c4] ss:$8 sps:$4 sm:$0xff]  }
 0x155   : > { %4367 = vmatpush2.bf16.msra.mxu0 %v5571_v10  ;;  %v5655_v10 = vld [vmem:[%s6886_s19 + $0x4c0] ss:$8 sps:$4 sm:$0xff]  }
 0x156   : > { %4368 = vmatprep.subr.bf16.mxu0 %v5579_v12  ;;  %v5663_v12 = vld [vmem:[%s6886_s19 + $0x4b4] ss:$8 sps:$4 sm:$0xff]  }
 0x157   : > { %4410 = vmatpush2.bf16.msra.mxu1 %v5574_v11  ;;  %v5658_v11 = vld [vmem:[%s6886_s19 + $0x5c0] ss:$8 sps:$4 sm:$0xff]  }
 0x158   : > { %4411 = vmatprep.subr.bf16.mxu1 %v5582_v13  ;;  %v5666_v13 = vld [vmem:[%s6886_s19 + $0x5b4] ss:$8 sps:$4 sm:$0xff]  }
 0x159   : > { %4369 = vmatpush2.bf16.msra.mxu0 %v5577_v14  ;;  %v5661_v14 = vld [vmem:[%s6886_s19 + $0x4b0] ss:$8 sps:$4 sm:$0xff]  }
 0x15a   : > { %4370 = vmatprep.subr.bf16.mxu0 %v5585_v18  ;;  %v5669_v18 = vld [vmem:[%s6886_s19 + $0x4a4] ss:$8 sps:$4 sm:$0xff]  }
 0x15b   : > { %4412 = vmatpush2.bf16.msra.mxu1 %v5580_v15  ;;  %v5664_v15 = vld [vmem:[%s6886_s19 + $0x5b0] ss:$8 sps:$4 sm:$0xff]  }
 0x15c   : > { %4413 = vmatprep.subr.bf16.mxu1 %v5588_v19  ;;  %v5672_v19 = vld [vmem:[%s6886_s19 + $0x5a4] ss:$8 sps:$4 sm:$0xff]  }
 0x15d   : > { %4371 = vmatpush2.bf16.msra.mxu0 %v5583_v20  ;;  %v5667_v20 = vld [vmem:[%s6886_s19 + $0x4a0] ss:$8 sps:$4 sm:$0xff]  }
 0x15e   : > { %4426 = vmatprep.subr.bf16.mxu0 %v5591_v22  ;;  %v5675_v22 = vld [vmem:[%s6886_s19 + $0x494] ss:$8 sps:$4 sm:$0xff]  }
 0x15f   : > { %4414 = vmatpush2.bf16.msra.mxu1 %v5586_v21  ;;  %v5670_v21 = vld [vmem:[%s6886_s19 + $0x5a0] ss:$8 sps:$4 sm:$0xff]  }
 0x160   : > { %4469 = vmatprep.subr.bf16.mxu1 %v5594_v23  ;;  %4373 = vmatmul.mubr.bf16.vlgmr.msra.gmra.mxu0 %v4940_v26  ;;  %v5678_v23 = vld [vmem:[%s6886_s19 + $0x594] ss:$8 sps:$4 sm:$0xff]   ;;  %v5681_v26 = vld [vmem:[%s6886_s19 + $0x484] ss:$8 sps:$4 sm:$0xff]  }
 0x161   : > { %4427 = vmatpush1.bf16.msra.mxu0 %v5589_v24  ;;  %4458 = vmatprep.mubr.bf16.mxu0 %v4945_v6  ;;  %v5673_v24 = vld [vmem:[%s6886_s19 + $0x490] ss:$8 sps:$4 sm:$0xff]   ;;  %v5687_v6 = vld [vmem:[%s6886_s19 + $0x674] ss:$8 sps:$4 sm:$0xff]  }
 0x162   : > { %4416 = vmatmul.mubr.bf16.vlgmr.msra.gmra.mxu1 %v4942_v0  ;;  %4428 = vmatprep.subr.bf16.mxu0 %v5597_v1  ;;  %v5684_v0 = vld [vmem:[%s6886_s19 + $0x584] ss:$8 sps:$4 sm:$0xff]   ;;  %v5679_v1 = vld [vmem:[%s6886_s19 + $0x480] ss:$8 sps:$4 sm:$0xff]  }
 0x163   : > { %4470 = vmatpush1.bf16.msra.mxu1 %v5592_v25  ;;  %4501 = vmatprep.mubr.bf16.mxu1 %v4947_v27  ;;  %v5676_v25 = vld [vmem:[%s6886_s19 + $0x590] ss:$8 sps:$4 sm:$0xff]   ;;  %v5690_v27 = vld [vmem:[%s6886_s19 + $0x774] ss:$8 sps:$4 sm:$0xff]  }
 0x164   : > { %4471 = vmatprep.subr.bf16.mxu1 %v5600_v2  ;;  %v5682_v2 = vld [vmem:[%s6886_s19 + $0x580] ss:$8 sps:$4 sm:$0xff]  }
 0x165   : > { %4429 = vmatpush1.bf16.msra.mxu0 %v5595_v28  ;;  %v7143_v28 = vld [vmem:[%s7445_s0 + $0x30] sm:$0xff] }
 0x166   : > { %4430 = vmatprep.subr.bf16.mxu0 %v5603_v30  ;;  %v7153_v30 = vld [vmem:[%s7445_s0 + $0x38] sm:$0xff] }
 0x167   : > { %4472 = vmatpush1.bf16.msra.mxu1 %v5598_v29  ;;  %v7148_v29 = vld [vmem:[%s7445_s0 + $0x90] sm:$0xff] }
 0x168   : > { %4473 = vmatprep.subr.bf16.mxu1 %v5606_v31  ;;  %v4944_v31 = vcombine.low %v7059_v3, %v7064_v5  ;;  %v5696_v3 = vld [vmem:[%s6886_s19 + $0x764] ss:$8 sps:$4 sm:$0xff]   ;;  %v4949_v5 = vcombine.high %v7143_v28, %v7148_v29 }
 0x169   : > { %4431 = vmatpush1.bf16.msra.mxu0 %v5601_v32  ;;  %v4946_v32 = vcombine.low %v7069_v16, %v7074_v17  ;;  %v5691_v17 = vld [vmem:[%s6886_s19 + $0x660] ss:$8 sps:$4 sm:$0xff]  }
 0x16a   : > { %4432 = vmatprep.subr.bf16.mxu0 %v5609_v34  ;;  %v5685_v34 = vld [vmem:[%s6886_s19 + $0x670] ss:$8 sps:$4 sm:$0xff]  }
 0x16b   : > { %4474 = vmatpush1.bf16.msra.mxu1 %v5604_v33  ;;  %v7162_v33 = vld [vmem:[%s7445_s0 + $0x98] sm:$0xff] }
 0x16c   : > { %4475 = vmatprep.subr.bf16.mxu1 %v5612_v35  ;;  %v5688_v35 = vld [vmem:[%s6886_s19 + $0x770] ss:$8 sps:$4 sm:$0xff]   ;;  %v4951_v16 = vcombine.high %v7153_v30, %v7162_v33 }
 0x16d   : > { %4433 = vmatpush1.bf16.msra.mxu0 %v5607_v36  ;;  %v5693_v36 = vld [vmem:[%s6886_s19 + $0x664] ss:$8 sps:$4 sm:$0xff]  }
 0x16e   : > { %4434 = vmatprep.subr.bf16.mxu0 %v5615_v38  ;;  %v5699_v38 = vld [vmem:[%s6886_s19 + $0x654] ss:$8 sps:$4 sm:$0xff]  }
 0x16f   : > { %4476 = vmatpush1.bf16.msra.mxu1 %v5610_v37  ;;  %v5694_v37 = vld [vmem:[%s6886_s19 + $0x760] ss:$8 sps:$4 sm:$0xff]  }
 0x170   : > { %4477 = vmatprep.subr.bf16.mxu1 %v5618_v39  ;;  %v5702_v39 = vld [vmem:[%s6886_s19 + $0x754] ss:$8 sps:$4 sm:$0xff]  }
 0x171   : > { %4435 = vmatpush1.bf16.msra.mxu0 %v5613_v40  ;;  %v5697_v40 = vld [vmem:[%s6886_s19 + $0x650] ss:$8 sps:$4 sm:$0xff]  }
 0x172   : > { %4436 = vmatprep.subr.bf16.mxu0 %v5621_v42  ;;  %v5705_v42 = vld [vmem:[%s6886_s19 + $0x644] ss:$8 sps:$4 sm:$0xff]  }
 0x173   : > { %4478 = vmatpush1.bf16.msra.mxu1 %v5616_v41  ;;  %v5700_v41 = vld [vmem:[%s6886_s19 + $0x750] ss:$8 sps:$4 sm:$0xff]  }
 0x174   : > { %4479 = vmatprep.subr.bf16.mxu1 %v5624_v43  ;;  %v5708_v43 = vld [vmem:[%s6886_s19 + $0x744] ss:$8 sps:$4 sm:$0xff]  }
 0x175   : > { %4437 = vmatpush1.bf16.msra.mxu0 %v5619_v44  ;;  %v5703_v44 = vld [vmem:[%s6886_s19 + $0x640] ss:$8 sps:$4 sm:$0xff]  }
 0x176   : > { %4438 = vmatprep.subr.bf16.mxu0 %v5627_v46  ;;  %v5711_v46 = vld [vmem:[%s6886_s19 + $0x634] ss:$8 sps:$4 sm:$0xff]  }
 0x177   : > { %4480 = vmatpush1.bf16.msra.mxu1 %v5622_v45  ;;  %v5706_v45 = vld [vmem:[%s6886_s19 + $0x740] ss:$8 sps:$4 sm:$0xff]  }
 0x178   : > { %4481 = vmatprep.subr.bf16.mxu1 %v5630_v47  ;;  %v5714_v47 = vld [vmem:[%s6886_s19 + $0x734] ss:$8 sps:$4 sm:$0xff]  }
 0x179   : > { %4439 = vmatpush1.bf16.msra.mxu0 %v5625_v48  ;;  %v5709_v48 = vld [vmem:[%s6886_s19 + $0x630] ss:$8 sps:$4 sm:$0xff]  }
 0x17a   : > { %4440 = vmatprep.subr.bf16.mxu0 %v5633_v50  ;;  %v5717_v50 = vld [vmem:[%s6886_s19 + $0x624] ss:$8 sps:$4 sm:$0xff]  }
 0x17b   : > { %4482 = vmatpush1.bf16.msra.mxu1 %v5628_v49  ;;  %v5712_v49 = vld [vmem:[%s6886_s19 + $0x730] ss:$8 sps:$4 sm:$0xff]  }
 0x17c   : > { %4483 = vmatprep.subr.bf16.mxu1 %v5636_v51  ;;  %v5720_v51 = vld [vmem:[%s6886_s19 + $0x724] ss:$8 sps:$4 sm:$0xff]  }
 0x17d   : > { %4441 = vmatpush1.bf16.msra.mxu0 %v5631_v52  ;;  %v5715_v52 = vld [vmem:[%s6886_s19 + $0x620] ss:$8 sps:$4 sm:$0xff]  }
 0x17e   : > { %4442 = vmatprep.subr.bf16.mxu0 %v5639_v54  ;;  %v5723_v54 = vld [vmem:[%s6886_s19 + $0x614] ss:$8 sps:$4 sm:$0xff]  }
 0x17f   : > { %4484 = vmatpush1.bf16.msra.mxu1 %v5634_v53  ;;  %v5718_v53 = vld [vmem:[%s6886_s19 + $0x720] ss:$8 sps:$4 sm:$0xff]  }
 0x180   : > { %4485 = vmatprep.subr.bf16.mxu1 %v5642_v55  ;;  %v5726_v55 = vld [vmem:[%s6886_s19 + $0x714] ss:$8 sps:$4 sm:$0xff]  }
 0x181   : > { %4443 = vmatpush2.bf16.msra.mxu0 %v5637_v56  ;;  %v5721_v56 = vld [vmem:[%s6886_s19 + $0x610] ss:$8 sps:$4 sm:$0xff]  }
 0x182   : > { %4444 = vmatprep.subr.bf16.mxu0 %v5645_v58  ;;  %v5729_v58 = vld [vmem:[%s6886_s19 + $0x604] ss:$8 sps:$4 sm:$0xff]  }
 0x183   : > { %4486 = vmatpush2.bf16.msra.mxu1 %v5640_v57  ;;  %v5724_v57 = vld [vmem:[%s6886_s19 + $0x710] ss:$8 sps:$4 sm:$0xff]  }
 0x184   : > { %4487 = vmatprep.subr.bf16.mxu1 %v5648_v59  ;;  %v5732_v59 = vld [vmem:[%s6886_s19 + $0x704] ss:$8 sps:$4 sm:$0xff]  }
 0x185   : > { %4445 = vmatpush2.bf16.msra.mxu0 %v5643_v60  ;;  %v5727_v60 = vld [vmem:[%s6886_s19 + $0x600] ss:$8 sps:$4 sm:$0xff]  }
 0x186   : > { %4446 = vmatprep.subr.bf16.mxu0 %v5651_v62  ;;  %v5735_v62 = vld [vmem:[%s6886_s19 + $0x6f4] ss:$8 sps:$4 sm:$0xff]  }
 0x187   : > { %4488 = vmatpush2.bf16.msra.mxu1 %v5646_v61  ;;  %v5730_v61 = vld [vmem:[%s6886_s19 + $0x700] ss:$8 sps:$4 sm:$0xff]  }
 0x188   : > { %4489 = vmatprep.subr.bf16.mxu1 %v5654_v63  ;;  %v5738_v63 = vld [vmem:[%s6886_s19 + $0x7f4] ss:$8 sps:$4 sm:$0xff]  }
 0x189   : > { %4447 = vmatpush2.bf16.msra.mxu0 %v5649_v4  ;;  %v5733_v4 = vld [vmem:[%s6886_s19 + $0x6f0] ss:$8 sps:$4 sm:$0xff]  }
 0x18a   : > { %4448 = vmatprep.subr.bf16.mxu0 %v5657_v8  ;;  %v5741_v8 = vld [vmem:[%s6886_s19 + $0x6e4] ss:$8 sps:$4 sm:$0xff]  }
 0x18b   : > { %4490 = vmatpush2.bf16.msra.mxu1 %v5652_v7  ;;  %v5736_v7 = vld [vmem:[%s6886_s19 + $0x7f0] ss:$8 sps:$4 sm:$0xff]  }
 0x18c   : > { %4491 = vmatprep.subr.bf16.mxu1 %v5660_v9  ;;  %v5744_v9 = vld [vmem:[%s6886_s19 + $0x7e4] ss:$8 sps:$4 sm:$0xff]  }
 0x18d   : > { %4449 = vmatpush2.bf16.msra.mxu0 %v5655_v10  ;;  %v5739_v10 = vld [vmem:[%s6886_s19 + $0x6e0] ss:$8 sps:$4 sm:$0xff]  }
 0x18e   : > { %4450 = vmatprep.subr.bf16.mxu0 %v5663_v12  ;;  %v5747_v12 = vld [vmem:[%s6886_s19 + $0x6d4] ss:$8 sps:$4 sm:$0xff]  }
 0x18f   : > { %4492 = vmatpush2.bf16.msra.mxu1 %v5658_v11  ;;  %v5742_v11 = vld [vmem:[%s6886_s19 + $0x7e0] ss:$8 sps:$4 sm:$0xff]  }
 0x190   : > { %4493 = vmatprep.subr.bf16.mxu1 %v5666_v13  ;;  %v5750_v13 = vld [vmem:[%s6886_s19 + $0x7d4] ss:$8 sps:$4 sm:$0xff]  }
 0x191   : > { %4451 = vmatpush2.bf16.msra.mxu0 %v5661_v14  ;;  %v5745_v14 = vld [vmem:[%s6886_s19 + $0x6d0] ss:$8 sps:$4 sm:$0xff]  }
 0x192   : > { %4452 = vmatprep.subr.bf16.mxu0 %v5669_v18  ;;  %v5753_v18 = vld [vmem:[%s6886_s19 + $0x6c4] ss:$8 sps:$4 sm:$0xff]  }
 0x193   : > { %4494 = vmatpush2.bf16.msra.mxu1 %v5664_v15  ;;  %v5748_v15 = vld [vmem:[%s6886_s19 + $0x7d0] ss:$8 sps:$4 sm:$0xff]  }
 0x194   : > { %4495 = vmatprep.subr.bf16.mxu1 %v5672_v19  ;;  %v5756_v19 = vld [vmem:[%s6886_s19 + $0x7c4] ss:$8 sps:$4 sm:$0xff]  }
 0x195   : > { %4453 = vmatpush2.bf16.msra.mxu0 %v5667_v20  ;;  %v5751_v20 = vld [vmem:[%s6886_s19 + $0x6c0] ss:$8 sps:$4 sm:$0xff]  }
 0x196   : > { %4454 = vmatprep.subr.bf16.mxu0 %v5675_v22  ;;  %v5759_v22 = vld [vmem:[%s6886_s19 + $0x6b4] ss:$8 sps:$4 sm:$0xff]  }
 0x197   : > { %4496 = vmatpush2.bf16.msra.mxu1 %v5670_v21  ;;  %v5754_v21 = vld [vmem:[%s6886_s19 + $0x7c0] ss:$8 sps:$4 sm:$0xff]  }
 0x198   : > { %4497 = vmatprep.subr.bf16.mxu1 %v5678_v23  ;;  %v5762_v23 = vld [vmem:[%s6886_s19 + $0x7b4] ss:$8 sps:$4 sm:$0xff]  }
 0x199   : > { %4455 = vmatpush2.bf16.msra.mxu0 %v5673_v24  ;;  %v5757_v24 = vld [vmem:[%s6886_s19 + $0x6b0] ss:$8 sps:$4 sm:$0xff]  }
 0x19a   : > { %4456 = vmatprep.subr.bf16.mxu0 %v5681_v26  ;;  %v5765_v26 = vld [vmem:[%s6886_s19 + $0x6a4] ss:$8 sps:$4 sm:$0xff]  }
 0x19b   : > { %4498 = vmatpush2.bf16.msra.mxu1 %v5676_v25  ;;  %v5760_v25 = vld [vmem:[%s6886_s19 + $0x7b0] ss:$8 sps:$4 sm:$0xff]  }
 0x19c   : > { %4499 = vmatprep.subr.bf16.mxu1 %v5684_v0  ;;  %v5768_v0 = vld [vmem:[%s6886_s19 + $0x7a4] ss:$8 sps:$4 sm:$0xff]  }
 0x19d   : > { %4457 = vmatpush2.bf16.msra.mxu0 %v5679_v1  ;;  %v5763_v1 = vld [vmem:[%s6886_s19 + $0x6a0] ss:$8 sps:$4 sm:$0xff]  }
 0x19e   : > { %4512 = vmatprep.subr.bf16.mxu0 %v5687_v6  ;;  %v5771_v6 = vld [vmem:[%s6886_s19 + $0x694] ss:$8 sps:$4 sm:$0xff]  }
 0x19f   : > { %4500 = vmatpush2.bf16.msra.mxu1 %v5682_v2  ;;  %v5766_v2 = vld [vmem:[%s6886_s19 + $0x7a0] ss:$8 sps:$4 sm:$0xff]  }
 0x1a0   : > { %4555 = vmatprep.subr.bf16.mxu1 %v5690_v27  ;;  %4459 = vmatmul.mubr.bf16.vlgmr.msra.gmra.mxu0 %v4944_v31  ;;  %v5774_v27 = vld [vmem:[%s6886_s19 + $0x794] ss:$8 sps:$4 sm:$0xff]   ;;  %v5769_v31 = vld [vmem:[%s6886_s19 + $0x690] ss:$8 sps:$4 sm:$0xff]  }
 0x1a1   : > { %4513 = vmatpush1.bf16.msra.mxu0 %v5685_v34  ;;  %4544 = vmatprep.mubr.bf16.mxu0 %v4949_v5  ;;  %v5777_v34 = vld [vmem:[%s6886_s19 + $0x684] ss:$8 sps:$4 sm:$0xff]   ;;  %v5783_v5 = vld [vmem:[%s6886_s19 + $0x874] ss:$8 sps:$4 sm:$0xff]  }
 0x1a2   : > { %4502 = vmatmul.mubr.bf16.vlgmr.msra.gmra.mxu1 %v4946_v32  ;;  %4514 = vmatprep.subr.bf16.mxu0 %v5693_v36  ;;  %v5772_v32 = vld [vmem:[%s6886_s19 + $0x790] ss:$8 sps:$4 sm:$0xff]   ;;  %v5775_v36 = vld [vmem:[%s6886_s19 + $0x680] ss:$8 sps:$4 sm:$0xff]  }
 0x1a3   : > { %4556 = vmatpush1.bf16.msra.mxu1 %v5688_v35  ;;  %4587 = vmatprep.mubr.bf16.mxu1 %v4951_v16  ;;  %v5780_v35 = vld [vmem:[%s6886_s19 + $0x784] ss:$8 sps:$4 sm:$0xff]   ;;  %v5786_v16 = vld [vmem:[%s6886_s19 + $0x974] ss:$8 sps:$4 sm:$0xff]  }
 0x1a4   : > { %4557 = vmatprep.subr.bf16.mxu1 %v5696_v3  ;;  %v5778_v3 = vld [vmem:[%s6886_s19 + $0x780] ss:$8 sps:$4 sm:$0xff]  }
 0x1a5   : > { %4515 = vmatpush1.bf16.msra.mxu0 %v5691_v17  ;;  %v7235_v17 = vld [vmem:[%s7445_s0 + $0x40] sm:$0xff] }
 0x1a6   : > { %4516 = vmatprep.subr.bf16.mxu0 %v5699_v38  ;;  %v7245_v38 = vld [vmem:[%s7445_s0 + $0x48] sm:$0xff] }
 0x1a7   : > { %4558 = vmatpush1.bf16.msra.mxu1 %v5694_v37  ;;  %v7240_v37 = vld [vmem:[%s7445_s0 + $0xa0] sm:$0xff] }
 0x1a8   : > { %4559 = vmatprep.subr.bf16.mxu1 %v5702_v39  ;;  %v4948_v39 = vcombine.low %v7143_v28, %v7148_v29  ;;  %v5792_v28 = vld [vmem:[%s6886_s19 + $0x964] ss:$8 sps:$4 sm:$0xff]   ;;  %v4953_v29 = vcombine.high %v7235_v17, %v7240_v37 }
 0x1a9   : > { %4517 = vmatpush1.bf16.msra.mxu0 %v5697_v40  ;;  %v4950_v40 = vcombine.low %v7153_v30, %v7162_v33  ;;  %v5787_v33 = vld [vmem:[%s6886_s19 + $0x860] ss:$8 sps:$4 sm:$0xff]  }
 0x1aa   : > { %4518 = vmatprep.subr.bf16.mxu0 %v5705_v42  ;;  %v5781_v42 = vld [vmem:[%s6886_s19 + $0x870] ss:$8 sps:$4 sm:$0xff]  }
 0x1ab   : > { %4560 = vmatpush1.bf16.msra.mxu1 %v5700_v41  ;;  %v7254_v41 = vld [vmem:[%s7445_s0 + $0xa8] sm:$0xff] }
 0x1ac   : > { %4561 = vmatprep.subr.bf16.mxu1 %v5708_v43  ;;  %v5784_v43 = vld [vmem:[%s6886_s19 + $0x970] ss:$8 sps:$4 sm:$0xff]   ;;  %v4955_v30 = vcombine.high %v7245_v38, %v7254_v41 }
 0x1ad   : > { %4519 = vmatpush1.bf16.msra.mxu0 %v5703_v44  ;;  %v5789_v44 = vld [vmem:[%s6886_s19 + $0x864] ss:$8 sps:$4 sm:$0xff]  }
 0x1ae   : > { %4520 = vmatprep.subr.bf16.mxu0 %v5711_v46  ;;  %v5795_v46 = vld [vmem:[%s6886_s19 + $0x854] ss:$8 sps:$4 sm:$0xff]  }
 0x1af   : > { %4562 = vmatpush1.bf16.msra.mxu1 %v5706_v45  ;;  %v5790_v45 = vld [vmem:[%s6886_s19 + $0x960] ss:$8 sps:$4 sm:$0xff]  }
 0x1b0   : > { %4563 = vmatprep.subr.bf16.mxu1 %v5714_v47  ;;  %v5798_v47 = vld [vmem:[%s6886_s19 + $0x954] ss:$8 sps:$4 sm:$0xff]  }
 0x1b1   : > { %4521 = vmatpush1.bf16.msra.mxu0 %v5709_v48  ;;  %v5793_v48 = vld [vmem:[%s6886_s19 + $0x850] ss:$8 sps:$4 sm:$0xff]  }
 0x1b2   : > { %4522 = vmatprep.subr.bf16.mxu0 %v5717_v50  ;;  %v5801_v50 = vld [vmem:[%s6886_s19 + $0x844] ss:$8 sps:$4 sm:$0xff]  }
 0x1b3   : > { %4564 = vmatpush1.bf16.msra.mxu1 %v5712_v49  ;;  %v5796_v49 = vld [vmem:[%s6886_s19 + $0x950] ss:$8 sps:$4 sm:$0xff]  }
 0x1b4   : > { %4565 = vmatprep.subr.bf16.mxu1 %v5720_v51  ;;  %v5804_v51 = vld [vmem:[%s6886_s19 + $0x944] ss:$8 sps:$4 sm:$0xff]  }
 0x1b5   : > { %4523 = vmatpush1.bf16.msra.mxu0 %v5715_v52  ;;  %v5799_v52 = vld [vmem:[%s6886_s19 + $0x840] ss:$8 sps:$4 sm:$0xff]  }
 0x1b6   : > { %4524 = vmatprep.subr.bf16.mxu0 %v5723_v54  ;;  %v5807_v54 = vld [vmem:[%s6886_s19 + $0x834] ss:$8 sps:$4 sm:$0xff]  }
 0x1b7   : > { %4566 = vmatpush1.bf16.msra.mxu1 %v5718_v53  ;;  %v5802_v53 = vld [vmem:[%s6886_s19 + $0x940] ss:$8 sps:$4 sm:$0xff]  }
 0x1b8   : > { %4567 = vmatprep.subr.bf16.mxu1 %v5726_v55  ;;  %v5810_v55 = vld [vmem:[%s6886_s19 + $0x934] ss:$8 sps:$4 sm:$0xff]  }
 0x1b9   : > { %4525 = vmatpush1.bf16.msra.mxu0 %v5721_v56  ;;  %v5805_v56 = vld [vmem:[%s6886_s19 + $0x830] ss:$8 sps:$4 sm:$0xff]  }
 0x1ba   : > { %4526 = vmatprep.subr.bf16.mxu0 %v5729_v58  ;;  %v5813_v58 = vld [vmem:[%s6886_s19 + $0x824] ss:$8 sps:$4 sm:$0xff]  }
 0x1bb   : > { %4568 = vmatpush1.bf16.msra.mxu1 %v5724_v57  ;;  %v5808_v57 = vld [vmem:[%s6886_s19 + $0x930] ss:$8 sps:$4 sm:$0xff]  }
 0x1bc   : > { %4569 = vmatprep.subr.bf16.mxu1 %v5732_v59  ;;  %v5816_v59 = vld [vmem:[%s6886_s19 + $0x924] ss:$8 sps:$4 sm:$0xff]  }
 0x1bd   : > { %4527 = vmatpush1.bf16.msra.mxu0 %v5727_v60  ;;  %v5811_v60 = vld [vmem:[%s6886_s19 + $0x820] ss:$8 sps:$4 sm:$0xff]  }
 0x1be   : > { %4528 = vmatprep.subr.bf16.mxu0 %v5735_v62  ;;  %v5819_v62 = vld [vmem:[%s6886_s19 + $0x814] ss:$8 sps:$4 sm:$0xff]  }
 0x1bf   : > { %4570 = vmatpush1.bf16.msra.mxu1 %v5730_v61  ;;  %v5814_v61 = vld [vmem:[%s6886_s19 + $0x920] ss:$8 sps:$4 sm:$0xff]  }
 0x1c0   : > { %4571 = vmatprep.subr.bf16.mxu1 %v5738_v63  ;;  %v5822_v63 = vld [vmem:[%s6886_s19 + $0x914] ss:$8 sps:$4 sm:$0xff]  }
 0x1c1   : > { %4529 = vmatpush2.bf16.msra.mxu0 %v5733_v4  ;;  %v5817_v4 = vld [vmem:[%s6886_s19 + $0x810] ss:$8 sps:$4 sm:$0xff]  }
 0x1c2   : > { %4530 = vmatprep.subr.bf16.mxu0 %v5741_v8  ;;  %v5825_v8 = vld [vmem:[%s6886_s19 + $0x804] ss:$8 sps:$4 sm:$0xff]  }
 0x1c3   : > { %4572 = vmatpush2.bf16.msra.mxu1 %v5736_v7  ;;  %v5820_v7 = vld [vmem:[%s6886_s19 + $0x910] ss:$8 sps:$4 sm:$0xff]  }
 0x1c4   : > { %4573 = vmatprep.subr.bf16.mxu1 %v5744_v9  ;;  %v5828_v9 = vld [vmem:[%s6886_s19 + $0x904] ss:$8 sps:$4 sm:$0xff]  }
 0x1c5   : > { %4531 = vmatpush2.bf16.msra.mxu0 %v5739_v10  ;;  %v5823_v10 = vld [vmem:[%s6886_s19 + $0x800] ss:$8 sps:$4 sm:$0xff]  }
 0x1c6   : > { %4532 = vmatprep.subr.bf16.mxu0 %v5747_v12  ;;  %v5831_v12 = vld [vmem:[%s6886_s19 + $0x8f4] ss:$8 sps:$4 sm:$0xff]  }
 0x1c7   : > { %4574 = vmatpush2.bf16.msra.mxu1 %v5742_v11  ;;  %v5826_v11 = vld [vmem:[%s6886_s19 + $0x900] ss:$8 sps:$4 sm:$0xff]  }
 0x1c8   : > { %4575 = vmatprep.subr.bf16.mxu1 %v5750_v13  ;;  %v5834_v13 = vld [vmem:[%s6886_s19 + $0x9f4] ss:$8 sps:$4 sm:$0xff]  }
 0x1c9   : > { %4533 = vmatpush2.bf16.msra.mxu0 %v5745_v14  ;;  %v5829_v14 = vld [vmem:[%s6886_s19 + $0x8f0] ss:$8 sps:$4 sm:$0xff]  }
 0x1ca   : > { %4534 = vmatprep.subr.bf16.mxu0 %v5753_v18  ;;  %v5837_v18 = vld [vmem:[%s6886_s19 + $0x8e4] ss:$8 sps:$4 sm:$0xff]  }
 0x1cb   : > { %4576 = vmatpush2.bf16.msra.mxu1 %v5748_v15  ;;  %v5832_v15 = vld [vmem:[%s6886_s19 + $0x9f0] ss:$8 sps:$4 sm:$0xff]  }
 0x1cc   : > { %4577 = vmatprep.subr.bf16.mxu1 %v5756_v19  ;;  %v5840_v19 = vld [vmem:[%s6886_s19 + $0x9e4] ss:$8 sps:$4 sm:$0xff]  }
 0x1cd   : > { %4535 = vmatpush2.bf16.msra.mxu0 %v5751_v20  ;;  %v5835_v20 = vld [vmem:[%s6886_s19 + $0x8e0] ss:$8 sps:$4 sm:$0xff]  }
 0x1ce   : > { %4536 = vmatprep.subr.bf16.mxu0 %v5759_v22  ;;  %v5843_v22 = vld [vmem:[%s6886_s19 + $0x8d4] ss:$8 sps:$4 sm:$0xff]  }
 0x1cf   : > { %4578 = vmatpush2.bf16.msra.mxu1 %v5754_v21  ;;  %v5838_v21 = vld [vmem:[%s6886_s19 + $0x9e0] ss:$8 sps:$4 sm:$0xff]  }
 0x1d0   : > { %4579 = vmatprep.subr.bf16.mxu1 %v5762_v23  ;;  %v5846_v23 = vld [vmem:[%s6886_s19 + $0x9d4] ss:$8 sps:$4 sm:$0xff]  }
 0x1d1   : > { %4537 = vmatpush2.bf16.msra.mxu0 %v5757_v24  ;;  %v5841_v24 = vld [vmem:[%s6886_s19 + $0x8d0] ss:$8 sps:$4 sm:$0xff]  }
 0x1d2   : > { %4538 = vmatprep.subr.bf16.mxu0 %v5765_v26  ;;  %v5849_v26 = vld [vmem:[%s6886_s19 + $0x8c4] ss:$8 sps:$4 sm:$0xff]  }
 0x1d3   : > { %4580 = vmatpush2.bf16.msra.mxu1 %v5760_v25  ;;  %v5844_v25 = vld [vmem:[%s6886_s19 + $0x9d0] ss:$8 sps:$4 sm:$0xff]  }
 0x1d4   : > { %4581 = vmatprep.subr.bf16.mxu1 %v5768_v0  ;;  %v5852_v0 = vld [vmem:[%s6886_s19 + $0x9c4] ss:$8 sps:$4 sm:$0xff]  }
 0x1d5   : > { %4539 = vmatpush2.bf16.msra.mxu0 %v5763_v1  ;;  %v5847_v1 = vld [vmem:[%s6886_s19 + $0x8c0] ss:$8 sps:$4 sm:$0xff]  }
 0x1d6   : > { %4540 = vmatprep.subr.bf16.mxu0 %v5771_v6  ;;  %v5855_v6 = vld [vmem:[%s6886_s19 + $0x8b4] ss:$8 sps:$4 sm:$0xff]  }
 0x1d7   : > { %4582 = vmatpush2.bf16.msra.mxu1 %v5766_v2  ;;  %v5850_v2 = vld [vmem:[%s6886_s19 + $0x9c0] ss:$8 sps:$4 sm:$0xff]  }
 0x1d8   : > { %4583 = vmatprep.subr.bf16.mxu1 %v5774_v27  ;;  %v5858_v27 = vld [vmem:[%s6886_s19 + $0x9b4] ss:$8 sps:$4 sm:$0xff]  }
 0x1d9   : > { %4541 = vmatpush2.bf16.msra.mxu0 %v5769_v31  ;;  %v5853_v31 = vld [vmem:[%s6886_s19 + $0x8b0] ss:$8 sps:$4 sm:$0xff]  }
 0x1da   : > { %4542 = vmatprep.subr.bf16.mxu0 %v5777_v34  ;;  %v5861_v34 = vld [vmem:[%s6886_s19 + $0x8a4] ss:$8 sps:$4 sm:$0xff]  }
 0x1db   : > { %4584 = vmatpush2.bf16.msra.mxu1 %v5772_v32  ;;  %v5856_v32 = vld [vmem:[%s6886_s19 + $0x9b0] ss:$8 sps:$4 sm:$0xff]  }
 0x1dc   : > { %4585 = vmatprep.subr.bf16.mxu1 %v5780_v35  ;;  %v5864_v35 = vld [vmem:[%s6886_s19 + $0x9a4] ss:$8 sps:$4 sm:$0xff]  }
 0x1dd   : > { %4543 = vmatpush2.bf16.msra.mxu0 %v5775_v36  ;;  %v5859_v36 = vld [vmem:[%s6886_s19 + $0x8a0] ss:$8 sps:$4 sm:$0xff]  }
 0x1de   : > { %4598 = vmatprep.subr.bf16.mxu0 %v5783_v5  ;;  %v5867_v5 = vld [vmem:[%s6886_s19 + $0x894] ss:$8 sps:$4 sm:$0xff]  }
 0x1df   : > { %4586 = vmatpush2.bf16.msra.mxu1 %v5778_v3  ;;  %v5862_v3 = vld [vmem:[%s6886_s19 + $0x9a0] ss:$8 sps:$4 sm:$0xff]  }
 0x1e0   : > { %4641 = vmatprep.subr.bf16.mxu1 %v5786_v16  ;;  %4545 = vmatmul.mubr.bf16.vlgmr.msra.gmra.mxu0 %v4948_v39  ;;  %v5870_v16 = vld [vmem:[%s6886_s19 + $0x994] ss:$8 sps:$4 sm:$0xff]   ;;  %v5865_v39 = vld [vmem:[%s6886_s19 + $0x890] ss:$8 sps:$4 sm:$0xff]  }
 0x1e1   : > { %4599 = vmatpush1.bf16.msra.mxu0 %v5781_v42  ;;  %4630 = vmatprep.mubr.bf16.mxu0 %v4953_v29  ;;  %v5873_v42 = vld [vmem:[%s6886_s19 + $0x884] ss:$8 sps:$4 sm:$0xff]   ;;  %v5879_v29 = vld [vmem:[%s6886_s19 + $0xa74] ss:$8 sps:$4 sm:$0xff]  }
 0x1e2   : > { %4588 = vmatmul.mubr.bf16.vlgmr.msra.gmra.mxu1 %v4950_v40  ;;  %4600 = vmatprep.subr.bf16.mxu0 %v5789_v44  ;;  %v5868_v40 = vld [vmem:[%s6886_s19 + $0x990] ss:$8 sps:$4 sm:$0xff]   ;;  %v5871_v44 = vld [vmem:[%s6886_s19 + $0x880] ss:$8 sps:$4 sm:$0xff]  }
 0x1e3   : > { %4642 = vmatpush1.bf16.msra.mxu1 %v5784_v43  ;;  %4673 = vmatprep.mubr.bf16.mxu1 %v4955_v30  ;;  %v5876_v43 = vld [vmem:[%s6886_s19 + $0x984] ss:$8 sps:$4 sm:$0xff]   ;;  %v5882_v30 = vld [vmem:[%s6886_s19 + $0xb74] ss:$8 sps:$4 sm:$0xff]  }
 0x1e4   : > { %4643 = vmatprep.subr.bf16.mxu1 %v5792_v28  ;;  %v5874_v28 = vld [vmem:[%s6886_s19 + $0x980] ss:$8 sps:$4 sm:$0xff]  }
 0x1e5   : > { %4601 = vmatpush1.bf16.msra.mxu0 %v5787_v33  ;;  %v7327_v33 = vld [vmem:[%s7445_s0 + $0x50] sm:$0xff] }
 0x1e6   : > { %4602 = vmatprep.subr.bf16.mxu0 %v5795_v46  ;;  %v4954_v46 = vcombine.low %v7245_v38, %v7254_v41  ;;  %v5885_v38 = vld [vmem:[%s6886_s19 + $0xa64] ss:$8 sps:$4 sm:$0xff]  }
 0x1e7   : > { %4644 = vmatpush1.bf16.msra.mxu1 %v5790_v45  ;;  %v4952_v45 = vcombine.low %v7235_v17, %v7240_v37  ;;  %v5877_v17 = vld [vmem:[%s6886_s19 + $0xa70] ss:$8 sps:$4 sm:$0xff]   ;;  %v5888_v41 = vld [vmem:[%s6886_s19 + $0xb64] ss:$8 sps:$4 sm:$0xff]  }
 0x1e8   : > { %4645 = vmatprep.subr.bf16.mxu1 %v5798_v47  ;;  %v7336_v47 = vld [vmem:[%s7445_s0 + $0xb0] sm:$0xff] }
 0x1e9   : > { %4603 = vmatpush1.bf16.msra.mxu0 %v5793_v48  ;;  %v7341_v48 = vld [vmem:[%s7445_s0 + $0x58] sm:$0xff] }
 0x1ea   : > { %4604 = vmatprep.subr.bf16.mxu0 %v5801_v50  ;;  %v5880_v37 = vld [vmem:[%s6886_s19 + $0xb70] ss:$8 sps:$4 sm:$0xff]   ;;  %v4957_v50 = vcombine.high %v7327_v33, %v7336_v47 }
 0x1eb   : > { %4646 = vmatpush1.bf16.msra.mxu1 %v5796_v49  ;;  %v7346_v49 = vld [vmem:[%s7445_s0 + $0xb8] sm:$0xff] }
 0x1ec   : > { %4647 = vmatprep.subr.bf16.mxu1 %v5804_v51  ;;  %v4959_v51 = vcombine.high %v7341_v48, %v7346_v49 }
 0x1ed   : > { %4605 = vmatpush1.bf16.msra.mxu0 %v5799_v52  ;;  %v5883_v52 = vld [vmem:[%s6886_s19 + $0xa60] ss:$8 sps:$4 sm:$0xff]  }
 0x1ee   : > { %4606 = vmatprep.subr.bf16.mxu0 %v5807_v54  ;;  %v5891_v54 = vld [vmem:[%s6886_s19 + $0xa54] ss:$8 sps:$4 sm:$0xff]  }
 0x1ef   : > { %4648 = vmatpush1.bf16.msra.mxu1 %v5802_v53  ;;  %v5886_v53 = vld [vmem:[%s6886_s19 + $0xb60] ss:$8 sps:$4 sm:$0xff]  }
 0x1f0   : > { %4649 = vmatprep.subr.bf16.mxu1 %v5810_v55  ;;  %v5894_v55 = vld [vmem:[%s6886_s19 + $0xb54] ss:$8 sps:$4 sm:$0xff]  }
 0x1f1   : > { %4607 = vmatpush1.bf16.msra.mxu0 %v5805_v56  ;;  %v5889_v56 = vld [vmem:[%s6886_s19 + $0xa50] ss:$8 sps:$4 sm:$0xff]  }
 0x1f2   : > { %4608 = vmatprep.subr.bf16.mxu0 %v5813_v58  ;;  %v5897_v58 = vld [vmem:[%s6886_s19 + $0xa44] ss:$8 sps:$4 sm:$0xff]  }
 0x1f3   : > { %4650 = vmatpush1.bf16.msra.mxu1 %v5808_v57  ;;  %v5892_v57 = vld [vmem:[%s6886_s19 + $0xb50] ss:$8 sps:$4 sm:$0xff]  }
 0x1f4   : > { %4651 = vmatprep.subr.bf16.mxu1 %v5816_v59  ;;  %v5900_v59 = vld [vmem:[%s6886_s19 + $0xb44] ss:$8 sps:$4 sm:$0xff]  }
 0x1f5   : > { %4609 = vmatpush1.bf16.msra.mxu0 %v5811_v60  ;;  %v5895_v60 = vld [vmem:[%s6886_s19 + $0xa40] ss:$8 sps:$4 sm:$0xff]  }
 0x1f6   : > { %4610 = vmatprep.subr.bf16.mxu0 %v5819_v62  ;;  %v5903_v62 = vld [vmem:[%s6886_s19 + $0xa34] ss:$8 sps:$4 sm:$0xff]  }
 0x1f7   : > { %4652 = vmatpush1.bf16.msra.mxu1 %v5814_v61  ;;  %v5898_v61 = vld [vmem:[%s6886_s19 + $0xb40] ss:$8 sps:$4 sm:$0xff]  }
 0x1f8   : > { %4653 = vmatprep.subr.bf16.mxu1 %v5822_v63  ;;  %v5906_v63 = vld [vmem:[%s6886_s19 + $0xb34] ss:$8 sps:$4 sm:$0xff]  }
 0x1f9   : > { %4611 = vmatpush1.bf16.msra.mxu0 %v5817_v4  ;;  %v5901_v4 = vld [vmem:[%s6886_s19 + $0xa30] ss:$8 sps:$4 sm:$0xff]  }
 0x1fa   : > { %4612 = vmatprep.subr.bf16.mxu0 %v5825_v8  ;;  %v5909_v8 = vld [vmem:[%s6886_s19 + $0xa24] ss:$8 sps:$4 sm:$0xff]  }
 0x1fb   : > { %4654 = vmatpush1.bf16.msra.mxu1 %v5820_v7  ;;  %v5904_v7 = vld [vmem:[%s6886_s19 + $0xb30] ss:$8 sps:$4 sm:$0xff]  }
 0x1fc   : > { %4655 = vmatprep.subr.bf16.mxu1 %v5828_v9  ;;  %v5912_v9 = vld [vmem:[%s6886_s19 + $0xb24] ss:$8 sps:$4 sm:$0xff]  }
 0x1fd   : > { %4613 = vmatpush1.bf16.msra.mxu0 %v5823_v10  ;;  %v5907_v10 = vld [vmem:[%s6886_s19 + $0xa20] ss:$8 sps:$4 sm:$0xff]  }
 0x1fe   : > { %4614 = vmatprep.subr.bf16.mxu0 %v5831_v12  ;;  %v5915_v12 = vld [vmem:[%s6886_s19 + $0xa14] ss:$8 sps:$4 sm:$0xff]  }
 0x1ff   : > { %4656 = vmatpush1.bf16.msra.mxu1 %v5826_v11  ;;  %v5910_v11 = vld [vmem:[%s6886_s19 + $0xb20] ss:$8 sps:$4 sm:$0xff]  }
 0x200   : > { %4657 = vmatprep.subr.bf16.mxu1 %v5834_v13  ;;  %v5918_v13 = vld [vmem:[%s6886_s19 + $0xb14] ss:$8 sps:$4 sm:$0xff]  }
 0x201   : > { %4615 = vmatpush2.bf16.msra.mxu0 %v5829_v14  ;;  %v5913_v14 = vld [vmem:[%s6886_s19 + $0xa10] ss:$8 sps:$4 sm:$0xff]  }
 0x202   : > { %4616 = vmatprep.subr.bf16.mxu0 %v5837_v18  ;;  %v5921_v18 = vld [vmem:[%s6886_s19 + $0xa04] ss:$8 sps:$4 sm:$0xff]  }
 0x203   : > { %4658 = vmatpush2.bf16.msra.mxu1 %v5832_v15  ;;  %v5916_v15 = vld [vmem:[%s6886_s19 + $0xb10] ss:$8 sps:$4 sm:$0xff]  }
 0x204   : > { %4659 = vmatprep.subr.bf16.mxu1 %v5840_v19  ;;  %v5924_v19 = vld [vmem:[%s6886_s19 + $0xb04] ss:$8 sps:$4 sm:$0xff]  }
 0x205   : > { %4617 = vmatpush2.bf16.msra.mxu0 %v5835_v20  ;;  %v5919_v20 = vld [vmem:[%s6886_s19 + $0xa00] ss:$8 sps:$4 sm:$0xff]  }
 0x206   : > { %4618 = vmatprep.subr.bf16.mxu0 %v5843_v22  ;;  %v5927_v22 = vld [vmem:[%s6886_s19 + $0xaf4] ss:$8 sps:$4 sm:$0xff]  }
 0x207   : > { %4660 = vmatpush2.bf16.msra.mxu1 %v5838_v21  ;;  %v5922_v21 = vld [vmem:[%s6886_s19 + $0xb00] ss:$8 sps:$4 sm:$0xff]  }
 0x208   : > { %4661 = vmatprep.subr.bf16.mxu1 %v5846_v23  ;;  %v5930_v23 = vld [vmem:[%s6886_s19 + $0xbf4] ss:$8 sps:$4 sm:$0xff]  }
 0x209   : > { %4619 = vmatpush2.bf16.msra.mxu0 %v5841_v24  ;;  %v5925_v24 = vld [vmem:[%s6886_s19 + $0xaf0] ss:$8 sps:$4 sm:$0xff]  }
 0x20a   : > { %4620 = vmatprep.subr.bf16.mxu0 %v5849_v26  ;;  %v5933_v26 = vld [vmem:[%s6886_s19 + $0xae4] ss:$8 sps:$4 sm:$0xff]  }
 0x20b   : > { %4662 = vmatpush2.bf16.msra.mxu1 %v5844_v25  ;;  %v5928_v25 = vld [vmem:[%s6886_s19 + $0xbf0] ss:$8 sps:$4 sm:$0xff]  }
 0x20c   : > { %4663 = vmatprep.subr.bf16.mxu1 %v5852_v0  ;;  %v5936_v0 = vld [vmem:[%s6886_s19 + $0xbe4] ss:$8 sps:$4 sm:$0xff]  }
 0x20d   : > { %4621 = vmatpush2.bf16.msra.mxu0 %v5847_v1  ;;  %v5931_v1 = vld [vmem:[%s6886_s19 + $0xae0] ss:$8 sps:$4 sm:$0xff]  }
 0x20e   : > { %4622 = vmatprep.subr.bf16.mxu0 %v5855_v6  ;;  %v5939_v6 = vld [vmem:[%s6886_s19 + $0xad4] ss:$8 sps:$4 sm:$0xff]  }
 0x20f   : > { %4664 = vmatpush2.bf16.msra.mxu1 %v5850_v2  ;;  %v5934_v2 = vld [vmem:[%s6886_s19 + $0xbe0] ss:$8 sps:$4 sm:$0xff]  }
 0x210   : > { %4665 = vmatprep.subr.bf16.mxu1 %v5858_v27  ;;  %v5942_v27 = vld [vmem:[%s6886_s19 + $0xbd4] ss:$8 sps:$4 sm:$0xff]  }
 0x211   : > { %4623 = vmatpush2.bf16.msra.mxu0 %v5853_v31  ;;  %v5937_v31 = vld [vmem:[%s6886_s19 + $0xad0] ss:$8 sps:$4 sm:$0xff]  }
 0x212   : > { %4624 = vmatprep.subr.bf16.mxu0 %v5861_v34  ;;  %v5945_v34 = vld [vmem:[%s6886_s19 + $0xac4] ss:$8 sps:$4 sm:$0xff]  }
 0x213   : > { %4666 = vmatpush2.bf16.msra.mxu1 %v5856_v32  ;;  %v5940_v32 = vld [vmem:[%s6886_s19 + $0xbd0] ss:$8 sps:$4 sm:$0xff]  }
 0x214   : > { %4667 = vmatprep.subr.bf16.mxu1 %v5864_v35  ;;  %v5948_v35 = vld [vmem:[%s6886_s19 + $0xbc4] ss:$8 sps:$4 sm:$0xff]  }
 0x215   : > { %4625 = vmatpush2.bf16.msra.mxu0 %v5859_v36  ;;  %v5943_v36 = vld [vmem:[%s6886_s19 + $0xac0] ss:$8 sps:$4 sm:$0xff]  }
 0x216   : > { %4626 = vmatprep.subr.bf16.mxu0 %v5867_v5  ;;  %v5951_v5 = vld [vmem:[%s6886_s19 + $0xab4] ss:$8 sps:$4 sm:$0xff]  }
 0x217   : > { %4668 = vmatpush2.bf16.msra.mxu1 %v5862_v3  ;;  %v5946_v3 = vld [vmem:[%s6886_s19 + $0xbc0] ss:$8 sps:$4 sm:$0xff]  }
 0x218   : > { %4669 = vmatprep.subr.bf16.mxu1 %v5870_v16  ;;  %v5954_v16 = vld [vmem:[%s6886_s19 + $0xbb4] ss:$8 sps:$4 sm:$0xff]  }
 0x219   : > { %4627 = vmatpush2.bf16.msra.mxu0 %v5865_v39  ;;  %v5949_v39 = vld [vmem:[%s6886_s19 + $0xab0] ss:$8 sps:$4 sm:$0xff]  }
 0x21a   : > { %4628 = vmatprep.subr.bf16.mxu0 %v5873_v42  ;;  %v5957_v42 = vld [vmem:[%s6886_s19 + $0xaa4] ss:$8 sps:$4 sm:$0xff]  }
 0x21b   : > { %4670 = vmatpush2.bf16.msra.mxu1 %v5868_v40  ;;  %v5952_v40 = vld [vmem:[%s6886_s19 + $0xbb0] ss:$8 sps:$4 sm:$0xff]  }
 0x21c   : > { %4671 = vmatprep.subr.bf16.mxu1 %v5876_v43  ;;  %v5960_v43 = vld [vmem:[%s6886_s19 + $0xba4] ss:$8 sps:$4 sm:$0xff]  }
 0x21d   : > { %4629 = vmatpush2.bf16.msra.mxu0 %v5871_v44  ;;  %v5955_v44 = vld [vmem:[%s6886_s19 + $0xaa0] ss:$8 sps:$4 sm:$0xff]  }
 0x21e   : > { %4684 = vmatprep.subr.bf16.mxu0 %v5879_v29  ;;  %v5963_v29 = vld [vmem:[%s6886_s19 + $0xa94] ss:$8 sps:$4 sm:$0xff]  }
 0x21f   : > { %4672 = vmatpush2.bf16.msra.mxu1 %v5874_v28  ;;  %v5958_v28 = vld [vmem:[%s6886_s19 + $0xba0] ss:$8 sps:$4 sm:$0xff]  }
 0x220   : > { %4727 = vmatprep.subr.bf16.mxu1 %v5882_v30  ;;  %4631 = vmatmul.mubr.bf16.vlgmr.msra.gmra.mxu0 %v4952_v45  ;;  %v5966_v30 = vld [vmem:[%s6886_s19 + $0xb94] ss:$8 sps:$4 sm:$0xff]   ;;  %v5961_v45 = vld [vmem:[%s6886_s19 + $0xa90] ss:$8 sps:$4 sm:$0xff]  }
 0x221   : > { %4685 = vmatpush1.bf16.msra.mxu0 %v5877_v17  ;;  %4716 = vmatprep.mubr.bf16.mxu0 %v4957_v50  ;;  %v5969_v17 = vld [vmem:[%s6886_s19 + $0xa84] ss:$8 sps:$4 sm:$0xff]   ;;  %v4956_v50 = vcombine.low %v7327_v33, %v7336_v47 }
 0x222   : > { %4674 = vmatmul.mubr.bf16.vlgmr.msra.gmra.mxu1 %v4954_v46  ;;  %4686 = vmatprep.subr.bf16.mxu0 %v5885_v38  ;;  %v5964_v46 = vld [vmem:[%s6886_s19 + $0xb90] ss:$8 sps:$4 sm:$0xff]   ;;  %v5967_v38 = vld [vmem:[%s6886_s19 + $0xa80] ss:$8 sps:$4 sm:$0xff]  }
 0x223   : > { %4728 = vmatpush1.bf16.msra.mxu1 %v5880_v37  ;;  %4759 = vmatprep.mubr.bf16.mxu1 %v4959_v51  ;;  %v5972_v37 = vld [vmem:[%s6886_s19 + $0xb84] ss:$8 sps:$4 sm:$0xff]   ;;  %v4958_v51 = vcombine.low %v7341_v48, %v7346_v49  ;;  %v2204_v49 = vlaneseq }
 0x224   : > { %4729 = vmatprep.subr.bf16.mxu1 %v5888_v41  ;;  %v5970_v41 = vld [vmem:[%s6886_s19 + $0xb80] ss:$8 sps:$4 sm:$0xff]   ;;  %s4935_s19 = sshll.u32 %s6003_s14, 1 }
 0x225   : > { %4687 = vmatpush1.bf16.msra.mxu0 %v5883_v52  ;;  %v4288_v52 = vpop.f32.mrf.mxu0  ;;  %p1788_p11 = scmp.lt.s32.totalorder %s4935_s19, 5 }
 0x226   : > { %4688 = vmatprep.subr.bf16.mxu0 %v5891_v54 }
 0x227   : > { %4730 = vmatpush1.bf16.msra.mxu1 %v5886_v53  ;;  %v4331_v53 = vpop.f32.mrf.mxu1  ;;  %v4290_v54 = vpop.f32.mrf.mxu0  ;;  %s7457_s19 = smov (!%p1788_p11, %s4935_s19), 5 }
 0x228   : > { %4731 = vmatprep.subr.bf16.mxu1 %v5894_v55  ;;  %s1790_s4 = scalar_lea.vmem %s7447_s2, %s7457_s19 }
 0x229   : > { %4689 = vmatpush1.bf16.msra.mxu0 %v5889_v56  ;;  %v4333_v55 = vpop.f32.mrf.mxu1  ;;  %v4292_v56 = vpop.f32.mrf.mxu0 }
 0x22a   : > { %4690 = vmatprep.subr.bf16.mxu0 %v5897_v58 }
 0x22b   : > { %4732 = vmatpush1.bf16.msra.mxu1 %v5892_v57  ;;  %v4335_v57 = vpop.f32.mrf.mxu1  ;;  %v4294_v58 = vpop.f32.mrf.mxu0 }
 0x22c   : > { %4733 = vmatprep.subr.bf16.mxu1 %v5900_v59 }
 0x22d   : > { %4691 = vmatpush1.bf16.msra.mxu0 %v5895_v60  ;;  %v4337_v59 = vpop.f32.mrf.mxu1  ;;  %v4374_v60 = vpop.f32.mrf.mxu0 }
 0x22e   : > { %4692 = vmatprep.subr.bf16.mxu0 %v5903_v62 }
 0x22f   : > { %4734 = vmatpush1.bf16.msra.mxu1 %v5898_v61  ;;  %v4417_v61 = vpop.f32.mrf.mxu1  ;;  %v4376_v62 = vpop.f32.mrf.mxu0 }
 0x230   : > { %4735 = vmatprep.subr.bf16.mxu1 %v5906_v63 }
 0x231   : > { %4693 = vmatpush1.bf16.msra.mxu0 %v5901_v4  ;;  %v4419_v33 = vpop.f32.mrf.mxu1  ;;  %v4378_v47 = vpop.f32.mrf.mxu0 }
 0x232   : > { %4694 = vmatprep.subr.bf16.mxu0 %v5909_v8 }
 0x233   : > { %4736 = vmatpush1.bf16.msra.mxu1 %v5904_v7  ;;  %v4421_v48 = vpop.f32.mrf.mxu1  ;;  %v4380_v63 = vpop.f32.mrf.mxu0 }
 0x234   : > { %4737 = vmatprep.subr.bf16.mxu1 %v5912_v9  ;;  %v2205_v9 = vshrl.u32 %v2204_v49, 7 }
 0x235   : > { %4695 = vmatpush1.bf16.msra.mxu0 %v5907_v10  ;;  %v4423_v4 = vpop.f32.mrf.mxu1 }
 0x236   : > { %4696 = vmatprep.subr.bf16.mxu0 %v5915_v12  ;;  %v2206_v12 = vsub.s32 0, %v2205_v9 }
 0x237   : > { %4738 = vmatpush1.bf16.msra.mxu1 %v5910_v11 }
 0x238   : > { %4739 = vmatprep.subr.bf16.mxu1 %v5918_v13  ;;  %v2202_v13 = vld [vmem:[%s1790_s4] sm:$0x3] }
 0x239   : > { %4697 = vmatpush1.bf16.msra.mxu0 %v5913_v14  ;;  %v2210_v14 = vsub.s32 1, %v2205_v9 }
 0x23a   : > { %4698 = vmatprep.subr.bf16.mxu0 %v5921_v18 }
 0x23b   : > { %4740 = vmatpush1.bf16.msra.mxu1 %v5916_v15 }
 0x23c   : > { %4741 = vmatprep.subr.bf16.mxu1 %v5924_v19  ;;  %v2207_v19 = vrot.slane %v2202_v13, %v2206_v12 }
 0x23d   : > { %4699 = vmatpush1.bf16.msra.mxu0 %v5919_v20  ;;  %v2211_v20 = vrot.slane %v2202_v13, %v2210_v14 }
 0x23e   : > { %4700 = vmatprep.subr.bf16.mxu0 %v5927_v22 }
 0x23f   : > { %4742 = vmatpush1.bf16.msra.mxu1 %v5922_v21 }
 0x240   : > { %4743 = vmatprep.subr.bf16.mxu1 %v5930_v23  ;;  %v4289_v23 = vadd.f32 %v4288_v52, %v2207_v19 }
 0x241   : > { %4701 = vmatpush2.bf16.msra.mxu0 %v5925_v24 }
 0x242   : > { %4702 = vmatprep.subr.bf16.mxu0 %v5933_v26  ;;  %v4291_v26 = vadd.f32 %v4290_v54, %v2211_v20 }
 0x243   : > { %4744 = vmatpush2.bf16.msra.mxu1 %v5928_v25 }
 0x244   : > { %4745 = vmatprep.subr.bf16.mxu1 %v5936_v0  ;;  %v4332_v0 = vadd.f32 %v4331_v53, %v4289_v23 }
 0x245   : > { %4703 = vmatpush2.bf16.msra.mxu0 %v5931_v1  ;;  %v4293_v1 = vadd.f32 %v4292_v56, %v2207_v19 }
 0x246   : > { %4704 = vmatprep.subr.bf16.mxu0 %v5939_v6 }
 0x247   : > { %4746 = vmatpush2.bf16.msra.mxu1 %v5934_v2 }
 0x248   : > { %4747 = vmatprep.subr.bf16.mxu1 %v5942_v27  ;;  %v4334_v27 = vadd.f32 %v4333_v55, %v4291_v26 }
 0x249   : > { %4705 = vmatpush2.bf16.msra.mxu0 %v5937_v31  ;;  %v4295_v31 = vadd.f32 %v4294_v58, %v2211_v20 }
 0x24a   : > { %4706 = vmatprep.subr.bf16.mxu0 %v5945_v34  ;;  %v4336_v34 = vadd.f32 %v4335_v57, %v4293_v1 }
 0x24b   : > { %4748 = vmatpush2.bf16.msra.mxu1 %v5940_v32  ;;  %v4375_v32 = vadd.f32 %v4374_v60, %v4332_v0 }
 0x24c   : > { %4749 = vmatprep.subr.bf16.mxu1 %v5948_v35  ;;  %v4377_v35 = vadd.f32 %v4376_v62, %v4334_v27 }
 0x24d   : > { %4707 = vmatpush2.bf16.msra.mxu0 %v5943_v36 }
 0x24e   : > { %4708 = vmatprep.subr.bf16.mxu0 %v5951_v5  ;;  %v4338_v5 = vadd.f32 %v4337_v59, %v4295_v31 }
 0x24f   : > { %4750 = vmatpush2.bf16.msra.mxu1 %v5946_v3 }
 0x250   : > { %4751 = vmatprep.subr.bf16.mxu1 %v5954_v16  ;;  %v4418_v16 = vadd.f32 %v4417_v61, %v4375_v32 }
 0x251   : > { %4709 = vmatpush2.bf16.msra.mxu0 %v5949_v39  ;;  %v4379_v39 = vadd.f32 %v4378_v47, %v4336_v34 }
 0x252   : > { %4710 = vmatprep.subr.bf16.mxu0 %v5957_v42  ;;  %v4381_v42 = vadd.f32 %v4380_v63, %v4338_v5 }
 0x253   : > { %4752 = vmatpush2.bf16.msra.mxu1 %v5952_v40  ;;  %v4420_v40 = vadd.f32 %v4419_v33, %v4377_v35 }
 0x254   : > { %4753 = vmatprep.subr.bf16.mxu1 %v5960_v43 }
 0x255   : > { %4711 = vmatpush2.bf16.msra.mxu0 %v5955_v44 }
 0x256   : > { %4712 = vmatprep.subr.bf16.mxu0 %v5963_v29  ;;  %v4422_v29 = vadd.f32 %v4421_v48, %v4379_v39 }
 0x257   : > { %4754 = vmatpush2.bf16.msra.mxu1 %v5958_v28 }
 0x258   : > { %4755 = vmatprep.subr.bf16.mxu1 %v5966_v30 }
 0x259   : > { %4713 = vmatpush2.bf16.msra.mxu0 %v5961_v45 }
 0x25a   : > { %4714 = vmatprep.subr.bf16.mxu0 %v5969_v17  ;;  %v4424_v17 = vadd.f32 %v4423_v4, %v4381_v42 }
 0x25b   : > { %4756 = vmatpush2.bf16.msra.mxu1 %v5964_v46 }
 0x25c   : > { %4757 = vmatprep.subr.bf16.mxu1 %v5972_v37 }
 0x25d   : > { %4715 = vmatpush2.bf16.msra.mxu0 %v5967_v38 }
 0x25f   : > { %4758 = vmatpush2.bf16.msra.mxu1 %v5970_v41 }
 0x260   : > { %4717 = vmatmul.mubr.bf16.vlgmr.msra.gmra.mxu0 %v4956_v50  ;;  %v4460_v7 = vpop.f32.mrf.mxu0 }
 0x261   : > { %v4461_v43 = vadd.f32 %v4460_v7, %v4418_v16 }
 0x262   : > { %4760 = vmatmul.mubr.bf16.vlgmr.msra.gmra.mxu1 %v4958_v51  ;;  %v4503_v8 = vpop.f32.mrf.mxu1  ;;  %v4462_v10 = vpop.f32.mrf.mxu0 }
 0x263   : > { %v4463_v30 = vadd.f32 %v4462_v10, %v4420_v40  ;;  %v4504_v37 = vadd.f32 %v4503_v8, %v4461_v43 }
 0x264   : > { %v4505_v11 = vpop.f32.mrf.mxu1  ;;  %v4464_v15 = vpop.f32.mrf.mxu0 }
 0x265   : > { %v4465_v38 = vadd.f32 %v4464_v15, %v4422_v29  ;;  %v4506_v41 = vadd.f32 %v4505_v11, %v4463_v30 }
 0x266   : > { %v4507_v18 = vpop.f32.mrf.mxu1  ;;  %v4466_v21 = vpop.f32.mrf.mxu0 }
 0x267   : > { %v4467_v50 = vadd.f32 %v4466_v21, %v4424_v17  ;;  %v4508_v54 = vadd.f32 %v4507_v18, %v4465_v38 }
 0x268   : > { %v4509_v22 = vpop.f32.mrf.mxu1 }
 0x269   : > { %v4510_v56 = vadd.f32 %v4509_v22, %v4467_v50 }
 0x2a0   : > { %v4546_v24 = vpop.f32.mrf.mxu0 }
 0x2a1   : > { %v4547_v51 = vadd.f32 %v4546_v24, %v4504_v37 }
 0x2a2   : > { %v4589_v25 = vpop.f32.mrf.mxu1  ;;  %v4548_v2 = vpop.f32.mrf.mxu0 }
 0x2a3   : > { %v4549_v55 = vadd.f32 %v4548_v2, %v4506_v41  ;;  %v4590_v57 = vadd.f32 %v4589_v25, %v4547_v51 }
 0x2a4   : > { %v4591_v6 = vpop.f32.mrf.mxu1  ;;  %v4550_v36 = vpop.f32.mrf.mxu0 }
 0x2a5   : > { %v4551_v58 = vadd.f32 %v4550_v36, %v4508_v54  ;;  %v4592_v61 = vadd.f32 %v4591_v6, %v4549_v55 }
 0x2a6   : > { %v4593_v3 = vpop.f32.mrf.mxu1  ;;  %v4552_v44 = vpop.f32.mrf.mxu0 }
 0x2a7   : > { %v4553_v62 = vadd.f32 %v4552_v44, %v4510_v56  ;;  %v4594_v47 = vadd.f32 %v4593_v3, %v4551_v58 }
 0x2a8   : > { %v4595_v28 = vpop.f32.mrf.mxu1 }
 0x2a9   : > { %v4596_v4 = vadd.f32 %v4595_v28, %v4553_v62 }
 0x2e0   : > { %v4632_v45 = vpop.f32.mrf.mxu0 }
 0x2e1   : > { %v4633_v33 = vadd.f32 %v4632_v45, %v4590_v57 }
 0x2e2   : > { %v4675_v46 = vpop.f32.mrf.mxu1  ;;  %v4634_v52 = vpop.f32.mrf.mxu0 }
 0x2e3   : > { %v4635_v48 = vadd.f32 %v4634_v52, %v4592_v61  ;;  %v4676_v7 = vadd.f32 %v4675_v46, %v4633_v33 }
 0x2e4   : > { %v4677_v53 = vpop.f32.mrf.mxu1  ;;  %v4636_v59 = vpop.f32.mrf.mxu0 }
 0x2e5   : > { %v4637_v8 = vadd.f32 %v4636_v59, %v4594_v47  ;;  %v4678_v11 = vadd.f32 %v4677_v53, %v4635_v48 }
 0x2e6   : > { %v4679_v60 = vpop.f32.mrf.mxu1  ;;  %v4638_v49 = vpop.f32.mrf.mxu0 }
 0x2e7   : > { %v4639_v12 = vadd.f32 %v4638_v49, %v4596_v4  ;;  %v4680_v18 = vadd.f32 %v4679_v60, %v4637_v8 }
 0x2e8   : > { %v4681_v63 = vpop.f32.mrf.mxu1 }
 0x2e9   : > { %v4682_v22 = vadd.f32 %v4681_v63, %v4639_v12 }
 0x320   : > { %v4718_v9 = vpop.f32.mrf.mxu0 }
 0x321   : > { %v4719_v13 = vadd.f32 %v4718_v9, %v4676_v7 }
 0x322   : > { %v4761_v10 = vpop.f32.mrf.mxu1  ;;  %v4720_v14 = vpop.f32.mrf.mxu0 }
 0x323   : > { %v4721_v19 = vadd.f32 %v4720_v14, %v4678_v11  ;;  %v4762_v23 = vadd.f32 %v4761_v10, %v4719_v13 }
 0x324   : > { %v4763_v15 = vpop.f32.mrf.mxu1  ;;  %v4722_v20 = vpop.f32.mrf.mxu0 }
 0x325   : > { %v4764_v24 = vadd.f32 %v4763_v15, %v4721_v19  ;;  %v4723_v25 = vadd.f32 %v4722_v20, %v4680_v18 }
 0x326   : > { %v4765_v21 = vpop.f32.mrf.mxu1  ;;  %v4724_v26 = vpop.f32.mrf.mxu0 }
 0x327   : > { %v5352_v0 = vpack.c.bf16 %v4764_v24, %v4762_v23  ;;  %v4725_v1 = vadd.f32 %v4724_v26, %v4682_v22  ;;  %v4766_v6 = vadd.f32 %v4765_v21, %v4723_v25 }
 0x328   : > { %v4767_v2 = vpop.f32.mrf.mxu1 }
 0x329   : > { %4782 = vst [vmem:[%s1778_s6] sm:$0xff] %v5352_v0  ;;  %v4768_v27 = vadd.f32 %v4767_v2, %v4725_v1  ;;  %4790 = sbr.rel (!%p6068_p6) target bundleno = 822 (0x336), region = 74 }
 0x32b   : > { %v5353_v31 = vpack.c.bf16 %v4768_v27, %v4766_v6 }
 0x32d   : > { %4783 = vst [vmem:[%s1778_s6 + $0x8] sm:$0xff] %v5353_v31 }
 0x330   : > { %v4827_v32 = vld [vmem:[%s1778_s6] sm:$0xff] }
 0x331   : > { %4828 = vst [vmem:[%s4796_s8] sm:$0xff] %v4827_v32 }
 0x334   : > { %v4829_v34 = vld [vmem:[%s1778_s6 + $0x8] sm:$0xff] }
 0x335   : > { %4830 = vst [vmem:[%s4796_s8 + $0x18] sm:$0xff] %v4829_v34 }
 0x336 PF: > { %s13_s16 = sadd.s32 1, %s6011_s16   ;;  %s7450_s12 = smov %s5999_s13 }
 0x337   : > { %p10_p12 = scmp.ge.s32.totalorder %s13_s16, 5   ;;  %s7451_s13 = smov %s6073_s22 }
 0x338   : > { %s7452_s14 = smov %s6007_s15  ;;  %s7453_s15 = smov %s7455_s17 }
 0x339   :  { %12 = sbr.rel (!%p10_p12) target bundleno = 3 (0x3), region = 149 }

</bundles_post_ra>
